<compile_context>
chip_gen: v6e
topology: v6e:2x2x1
jax: 0.10.0
libtpu: 0.0.40
codegen_flags: <defaults>
</compile_context>

<pallas_src>
import functools

import jax
import jax.numpy as jnp
from jax import lax
from jax.experimental import pallas as pl
from jax.experimental.pallas import tpu as pltpu


# --------------------------------------------------------------------------
# Helpers (traced inside the kernel).
# --------------------------------------------------------------------------
def _zero_border(pad_ref, H, W):
    """Zero only the 1-pixel halo of a (H+2, W+2, C) pad scratch."""
    Hp, Wp, C = pad_ref.shape
    dt = pad_ref.dtype
    row = jnp.zeros((1, Wp, C), dt)
    col = jnp.zeros((Hp, 1, C), dt)
    pad_ref[0:1, :, :] = row
    pad_ref[H + 1:H + 2, :, :] = row
    pad_ref[:, 0:1, :] = col
    pad_ref[:, W + 1:W + 2, :] = col


def _conv3x3_relu(x, pad_ref, get_w, b, H, W):
    """'same' 3x3 conv + ReLU as 9 accumulating per-tap matmuls.

    x: (H, W, Cin) f32.  pad_ref: (H+2, W+2, Cin) f32 scratch whose border is
    already zero.  get_w(t) -> (Cin, Cout) bf16 tap weight (t = 3*dy + dx).
    b: (1, Cout) f32.  Returns (H*W, Cout) f32.
    """
    cin = x.shape[-1]
    cout = b.shape[-1]
    pad_ref[1:H + 1, 1:W + 1, :] = x
    acc = jnp.zeros((H * W, cout), jnp.float32)
    t = 0
    for dy in range(3):
        for dx in range(3):
            tap = pad_ref[dy:dy + H, dx:dx + W, :].reshape(H * W, cin)
            acc = acc + jnp.dot(tap.astype(jnp.bfloat16), get_w(t),
                                preferred_element_type=jnp.float32)
            t += 1
    return jnp.maximum(acc + b, 0.0)


def _layer_norm(x, w, b, eps=1e-5):
    mu = jnp.mean(x, axis=-1, keepdims=True)
    var = jnp.mean(jnp.square(x - mu), axis=-1, keepdims=True)
    return (x - mu) * lax.rsqrt(var + eps) * w + b


def _flash_head(qh, kh, vh, scale, kv_block):
    """Single-head attention with online softmax over kv blocks.

    qh/kh/vh: (S, dh) f32.  Returns (S, dh) f32.  Bounds the score working
    set to (S, kv_block) so large BEV grids fit v7x's 64 MiB VMEM.
    """
    S, dh = qh.shape
    nkv = S // kv_block
    qb = qh.astype(jnp.bfloat16)
    m = jnp.full((S, 1), -jnp.inf, jnp.float32)
    denom = jnp.zeros((S, 1), jnp.float32)
    acc = jnp.zeros((S, dh), jnp.float32)
    for j in range(nkv):
        kj = kh[j * kv_block:(j + 1) * kv_block, :].astype(jnp.bfloat16)
        vj = vh[j * kv_block:(j + 1) * kv_block, :].astype(jnp.bfloat16)
        # Contract last dims of both operands: no transposed f32 copy of k.
        s = lax.dot_general(qb, kj, (((1,), (1,)), ((), ())),
                            preferred_element_type=jnp.float32) * scale
        m_new = jnp.maximum(m, jnp.max(s, axis=-1, keepdims=True))
        alpha = jnp.exp(m - m_new)
        p = jnp.exp(s - m_new)
        denom = alpha * denom + jnp.sum(p, axis=-1, keepdims=True)
        acc = alpha * acc + jnp.dot(p.astype(jnp.bfloat16), vj,
                                    preferred_element_type=jnp.float32)
        m = m_new
    return acc * pl.reciprocal(denom, approx=True)


# --------------------------------------------------------------------------
# Fully fused BEVModel kernel.  grid = (B, NCAM): the camera axis is an
# "arbitrary" reduction into a VMEM-resident fused latent; the transformer
# stack and decoder run on the last camera step with everything in VMEM.
# --------------------------------------------------------------------------
def _bev_kernel(x_ref, ew1_ref, eb1_ref, ew2_ref, eb2_ref, ew3_ref, eb3_ref,
                wqkv_ref, bqkv_ref, wo_ref, fw1_ref, fb1_ref, fw2_ref, vec_ref,
                dw1_ref, db1_ref, dw2t_ref, db2_ref,
                o_ref,
                pad0, pad1, pad2, padd, facc,
                *, H, W, nheads):
    cam = pl.program_id(1)
    last_cam = pl.num_programs(1) - 1
    S = H * W

    # One-time (per batch element) border zeroing of the pad scratches.
    @pl.when(cam == 0)
    def _():
        for pad in (pad0, pad1, pad2, padd):
            _zero_border(pad, H, W)

    # ---- per-camera encoder: 3x (conv3x3 + ReLU) ---------------------------
    # TODO(synk): for production H*W add spatial row-strip tiling (strip
    # height a multiple of 8, 1-row halo) and pad D/channel widths to 128 for
    # lane-dense residual traffic; CIN=3 on the lane axis of pad0 is also a
    # candidate for a roll+mask channel-major formulation.
    x = x_ref[0]                                             # (H, W, CIN) f32
    h = _conv3x3_relu(x, pad0, lambda t: ew1_ref[0, t], eb1_ref[0], H, W)
    h = _conv3x3_relu(h.reshape(H, W, -1), pad1, lambda t: ew2_ref[0, t],
                      eb2_ref[0], H, W)
    h = _conv3x3_relu(h.reshape(H, W, -1), pad2, lambda t: ew3_ref[0, t],
                      eb3_ref[0], H, W)                      # (S, D) f32

    # ---- camera-sum fusion into the resident VMEM accumulator --------------
    @pl.when(cam == 0)
    def _():
        facc[...] = h

    @pl.when(cam > 0)
    def _():
        facc[...] = facc[...] + h

    # ---- last camera: transformer stack + decoder, fully VMEM-resident -----
    @pl.when(cam == last_cam)
    def _():
        D = facc.shape[-1]
        L = wqkv_ref.shape[0]
        dh = D // nheads
        scale = 1.0 / float(dh) ** 0.5
        kv_block = S if S <= 512 else 512
        # TODO(synk): mask/handle a ragged last kv block when S % 512 != 0.

        seq = facc[...]                                      # (S, D) f32
        for l in range(L):
            vecs = vec_ref[l]                # (6, D): bo,b2,ln1w,ln1b,ln2w,ln2b
            bo, b2 = vecs[0:1, :], vecs[1:2, :]
            ln1w, ln1b = vecs[2:3, :], vecs[3:4, :]
            ln2w, ln2b = vecs[4:5, :], vecs[5:6, :]

            # Fused QKV projection: one (S,D) x (D,3D) bf16 MXU matmul.
            qkv = jnp.dot(seq.astype(jnp.bfloat16), wqkv_ref[l],
                          preferred_element_type=jnp.float32) + bqkv_ref[l]
            wo = wo_ref[l]                                   # (D, D) bf16

            attn = jnp.zeros((S, D), jnp.float32)
            for hd in range(nheads):         # nheads == 2: static unroll
                qh = qkv[:, hd * dh:(hd + 1) * dh]
                kh = qkv[:, D + hd * dh:D + (hd + 1) * dh]
                vh = qkv[:, 2 * D + hd * dh:2 * D + (hd + 1) * dh]
                ctx = _flash_head(qh, kh, vh, scale, kv_block)
                # Accumulate each head through its W_O row-slice (== concat+proj).
                attn = attn + jnp.dot(ctx.astype(jnp.bfloat16),
                                      wo[hd * dh:(hd + 1) * dh, :],
                                      preferred_element_type=jnp.float32)
            attn = attn + bo

            h1 = _layer_norm(seq + attn, ln1w, ln1b)         # post-LN
            ff = jnp.dot(h1.astype(jnp.bfloat16), fw1_ref[l],
                         preferred_element_type=jnp.float32) + fb1_ref[l]
            ff = jnp.maximum(ff, 0.0)
            ff = jnp.dot(ff.astype(jnp.bfloat16), fw2_ref[l],
                         preferred_element_type=jnp.float32) + b2
            seq = _layer_norm(h1 + ff, ln2w, ln2b)

        # Decoder: conv3x3(D->64)+ReLU, then 1x1 conv emitted transposed so
        # H*W lands on the lane axis of the (1, 3, S) output block.
        hdec = _conv3x3_relu(seq.reshape(H, W, D), padd, lambda t: dw1_ref[t],
                             db1_ref[...], H, W)             # (S, 64) f32
        y = lax.dot_general(dw2t_ref[...], hdec.astype(jnp.bfloat16),
                            (((1,), (1,)), ((), ())),
                            preferred_element_type=jnp.float32) + db2_ref[...]
        o_ref[...] = y.reshape(1, 3, S)


# --------------------------------------------------------------------------
# Full BEVModel forward:  x (B, num_cameras, Cin, H, W) -> (B, 3, H, W)
# --------------------------------------------------------------------------
def bev_forward(x, params):
    B, NCAM, CIN, H, W = x.shape
    enc, tfm, dec = params["enc"], params["tfm"], params["dec"]
    D = enc["w3"].shape[-1]
    L = tfm["wqkv"].shape[0]
    F = tfm["w1"].shape[-1]
    S = H * W

    # NCHW -> NHWC per camera, flattened to (B*NCAM, H, W, Cin).
    xc = jnp.transpose(x, (0, 1, 3, 4, 2)).reshape(B * NCAM, H, W, CIN)

    kernel = functools.partial(_bev_kernel, H=H, W=W, nheads=params["nheads"])

    out = pl.pallas_call(
        kernel,
        out_shape=jax.ShapeDtypeStruct((B, 3, S), jnp.float32),
        grid=(B, NCAM),
        in_specs=[
            # per-camera image
            pl.BlockSpec((1, H, W, CIN), lambda b, c: (b * NCAM + c, 0, 0, 0)),
            # per-camera encoder conv weights / biases (streamed per cam step)
            pl.BlockSpec((1, 9, CIN, 32), lambda b, c: (c, 0, 0, 0)),
            pl.BlockSpec((1, 1, 32), lambda b, c: (c, 0, 0)),
            pl.BlockSpec((1, 9, 32, 64), lambda b, c: (c, 0, 0, 0)),
            pl.BlockSpec((1, 1, 64), lambda b, c: (c, 0, 0)),
            pl.BlockSpec((1, 9, 64, D), lambda b, c: (c, 0, 0, 0)),
            pl.BlockSpec((1, 1, D), lambda b, c: (c, 0, 0)),
            # transformer weights (constant block index -> DMA'd once, resident)
            pl.BlockSpec((L, D, 3 * D), lambda b, c: (0, 0, 0)),
            pl.BlockSpec((L, 1, 3 * D), lambda b, c: (0, 0, 0)),
            pl.BlockSpec((L, D, D), lambda b, c: (0, 0, 0)),
            pl.BlockSpec((L, D, F), lambda b, c: (0, 0, 0)),
            pl.BlockSpec((L, 1, F), lambda b, c: (0, 0, 0)),
            pl.BlockSpec((L, F, D), lambda b, c: (0, 0, 0)),
            pl.BlockSpec((L, 6, D), lambda b, c: (0, 0, 0)),
            # decoder weights
            pl.BlockSpec((9, D, 64), lambda b, c: (0, 0, 0)),
            pl.BlockSpec((1, 64), lambda b, c: (0, 0)),
            pl.BlockSpec((3, 64), lambda b, c: (0, 0)),
            pl.BlockSpec((3, 1), lambda b, c: (0, 0)),
        ],
        out_specs=pl.BlockSpec((1, 3, S), lambda b, c: (b, 0, 0)),
        scratch_shapes=[
            pltpu.VMEM((H + 2, W + 2, CIN), jnp.float32),    # conv1 pad
            pltpu.VMEM((H + 2, W + 2, 32), jnp.float32),     # conv2 pad
            pltpu.VMEM((H + 2, W + 2, 64), jnp.float32),     # conv3 pad
            pltpu.VMEM((H + 2, W + 2, D), jnp.float32),      # decoder pad
            pltpu.VMEM((S, D), jnp.float32),                 # fused latent
        ],
        compiler_params=pltpu.CompilerParams(
            dimension_semantics=("parallel", "arbitrary"),
            vmem_limit_bytes=32 * 1024 * 1024),
    )(xc, enc["w1"], enc["b1"], enc["w2"], enc["b2"], enc["w3"], enc["b3"],
      tfm["wqkv"], tfm["bqkv"], tfm["wo"], tfm["w1"], tfm["b1"], tfm["w2"],
      tfm["vecs"], dec["w1"], dec["b1"], dec["w2t"], dec["b2"])

    # Output is already channel-major; this reshape is free (row-major).
    return out.reshape(B, 3, H, W)


# --------------------------------------------------------------------------
# Deterministic synthetic parameters, packed kernel-ready (scaled-down:
# latent_dim=32, dim_feedforward=64, num_layers=2, nhead=2).
# Conv weights are per-tap (9, Cin, Cout); a PyTorch (Cout, Cin, KH, KW)
# tensor maps here via w.transpose(2, 3, 1, 0).reshape(9, Cin, Cout).
# QKV/FFN/out-proj weights are the transposes of PyTorch's Linear weights.
# Matmul weights are bf16; biases, LayerNorm params and accumulators are f32.
# --------------------------------------------------------------------------
def init_params(key, num_cameras, cin, d, nheads, nlayers, ffn):
    keys = iter(jax.random.split(key, 1024))

    def nrm(shape, scale=0.1):
        return scale * jax.random.normal(next(keys), shape, jnp.float32)

    def conv_stack(cin_, cout_):
        w = jnp.stack([nrm((3, 3, cin_, cout_)) for _ in range(num_cameras)], 0)
        w = w.reshape(num_cameras, 9, cin_, cout_).astype(jnp.bfloat16)
        b = jnp.stack([nrm((cout_,), 0.01) for _ in range(num_cameras)], 0)
        return w, b.reshape(num_cameras, 1, cout_)

    e_w1, e_b1 = conv_stack(cin, 32)
    e_w2, e_b2 = conv_stack(32, 64)
    e_w3, e_b3 = conv_stack(64, d)
    enc = dict(w1=e_w1, b1=e_b1, w2=e_w2, b2=e_b2, w3=e_w3, b3=e_b3)

    wqkv, bqkv, wo, w1, b1, w2, vecs = [], [], [], [], [], [], []
    for _ in range(nlayers):
        wqkv.append(jnp.concatenate([nrm((d, d)) for _ in range(3)], axis=1))
        bqkv.append(jnp.concatenate([nrm((1, d), 0.01) for _ in range(3)], 1))
        wo.append(nrm((d, d)))
        w1.append(nrm((d, ffn)))
        b1.append(nrm((1, ffn), 0.01))
        w2.append(nrm((ffn, d)))
        bo_, b2_ = nrm((1, d), 0.01), nrm((1, d), 0.01)
        ones, zeros = jnp.ones((1, d), jnp.float32), jnp.zeros((1, d), jnp.float32)
        vecs.append(jnp.concatenate([bo_, b2_, ones, zeros, ones, zeros], 0))
    tfm = dict(
        wqkv=jnp.stack(wqkv, 0).astype(jnp.bfloat16),   # (L, D, 3D)
        bqkv=jnp.stack(bqkv, 0),                        # (L, 1, 3D)
        wo=jnp.stack(wo, 0).astype(jnp.bfloat16),       # (L, D, D)
        w1=jnp.stack(w1, 0).astype(jnp.bfloat16),       # (L, D, F)
        b1=jnp.stack(b1, 0),                            # (L, 1, F)
        w2=jnp.stack(w2, 0).astype(jnp.bfloat16),       # (L, F, D)
        vecs=jnp.stack(vecs, 0),                        # (L, 6, D)
    )

    dec = dict(
        w1=nrm((3, 3, d, 64)).reshape(9, d, 64).astype(jnp.bfloat16),
        b1=nrm((64,), 0.01).reshape(1, 64),
        w2t=nrm((64, 3)).T.astype(jnp.bfloat16),        # (3, 64)
        b2=nrm((3,), 0.01).reshape(3, 1),
    )
    return dict(nheads=nheads, enc=enc, tfm=tfm, dec=dec)


if __name__ == "__main__":
    B, NCAM, CIN, H, W = 2, 2, 3, 8, 8
    D, NHEADS, NLAYERS, FFN = 32, 2, 2, 64

    key = jax.random.PRNGKey(0)
    kx, kp = jax.random.split(key)
    x = jax.random.normal(kx, (B, NCAM, CIN, H, W), jnp.float32)
    params = init_params(kp, NCAM, CIN, D, NHEADS, NLAYERS, FFN)

    fwd = jax.jit(lambda inp: bev_forward(inp, params))
    out = jax.block_until_ready(fwd(x))
    assert out.shape == (B, 3, H, W), out.shape
    assert bool(jnp.all(jnp.isfinite(out)))
    print("KERNEL_OK")
</pallas_src>

<mosaic_0001>
module attributes {stable_mosaic.version = 11 : i64} {
  func.func @_bev_kernel(%arg0: i32, %arg1: i32, %arg2: memref<1x8x8x3xf32, #tpu.memory_space<vmem>>, %arg3: memref<1x9x3x32xbf16, #tpu.memory_space<vmem>>, %arg4: memref<1x1x32xf32, #tpu.memory_space<vmem>>, %arg5: memref<1x9x32x64xbf16, #tpu.memory_space<vmem>>, %arg6: memref<1x1x64xf32, #tpu.memory_space<vmem>>, %arg7: memref<1x9x64x32xbf16, #tpu.memory_space<vmem>>, %arg8: memref<1x1x32xf32, #tpu.memory_space<vmem>>, %arg9: memref<2x32x96xbf16, #tpu.memory_space<vmem>>, %arg10: memref<2x1x96xf32, #tpu.memory_space<vmem>>, %arg11: memref<2x32x32xbf16, #tpu.memory_space<vmem>>, %arg12: memref<2x32x64xbf16, #tpu.memory_space<vmem>>, %arg13: memref<2x1x64xf32, #tpu.memory_space<vmem>>, %arg14: memref<2x64x32xbf16, #tpu.memory_space<vmem>>, %arg15: memref<2x6x32xf32, #tpu.memory_space<vmem>>, %arg16: memref<9x32x64xbf16, #tpu.memory_space<vmem>>, %arg17: memref<1x64xf32, #tpu.memory_space<vmem>>, %arg18: memref<3x64xbf16, #tpu.memory_space<vmem>>, %arg19: memref<3x1xf32, #tpu.memory_space<vmem>>, %arg20: memref<1x3x64xf32, #tpu.memory_space<vmem>>, %arg21: memref<10x10x3xf32, #tpu.memory_space<vmem>>, %arg22: memref<10x10x32xf32, #tpu.memory_space<vmem>>, %arg23: memref<10x10x64xf32, #tpu.memory_space<vmem>>, %arg24: memref<10x10x32xf32, #tpu.memory_space<vmem>>, %arg25: memref<64x32xf32, #tpu.memory_space<vmem>>) attributes {dimension_semantics = [#tpu.dimension_semantics<parallel>, #tpu.dimension_semantics<arbitrary>], iteration_bounds = array<i64: 2, 2>, scalar_prefetch = 0 : i64, scratch_operands = 5 : i64, tpu.core_type = #tpu.core_type<tc>, window_params = [{transform_indices = @transform_0, window_bounds = array<i64: 1, 8, 8, 3>}, {transform_indices = @transform_1, window_bounds = array<i64: 1, 9, 3, 32>}, {transform_indices = @transform_2, window_bounds = array<i64: 1, 1, 32>}, {transform_indices = @transform_3, window_bounds = array<i64: 1, 9, 32, 64>}, {transform_indices = @transform_4, window_bounds = array<i64: 1, 1, 64>}, {transform_indices = @transform_5, window_bounds = array<i64: 1, 9, 64, 32>}, {transform_indices = @transform_6, window_bounds = array<i64: 1, 1, 32>}, {pipeline_mode = #tpu.pipeline_mode<synchronous>, transform_indices = @transform_7, window_bounds = array<i64: 2, 32, 96>}, {pipeline_mode = #tpu.pipeline_mode<synchronous>, transform_indices = @transform_8, window_bounds = array<i64: 2, 1, 96>}, {pipeline_mode = #tpu.pipeline_mode<synchronous>, transform_indices = @transform_9, window_bounds = array<i64: 2, 32, 32>}, {pipeline_mode = #tpu.pipeline_mode<synchronous>, transform_indices = @transform_10, window_bounds = array<i64: 2, 32, 64>}, {pipeline_mode = #tpu.pipeline_mode<synchronous>, transform_indices = @transform_11, window_bounds = array<i64: 2, 1, 64>}, {pipeline_mode = #tpu.pipeline_mode<synchronous>, transform_indices = @transform_12, window_bounds = array<i64: 2, 64, 32>}, {pipeline_mode = #tpu.pipeline_mode<synchronous>, transform_indices = @transform_13, window_bounds = array<i64: 2, 6, 32>}, {pipeline_mode = #tpu.pipeline_mode<synchronous>, transform_indices = @transform_14, window_bounds = array<i64: 9, 32, 64>}, {pipeline_mode = #tpu.pipeline_mode<synchronous>, transform_indices = @transform_15, window_bounds = array<i64: 1, 64>}, {pipeline_mode = #tpu.pipeline_mode<synchronous>, transform_indices = @transform_16, window_bounds = array<i64: 3, 64>}, {pipeline_mode = #tpu.pipeline_mode<synchronous>, transform_indices = @transform_17, window_bounds = array<i64: 3, 1>}, {transform_indices = @transform_18, window_bounds = array<i64: 1, 3, 64>}]} {
    %c0_i32 = arith.constant 0 : i32
    %0 = arith.cmpi eq, %arg1, %c0_i32 : i32
    %1 = arith.extui %0 : i1 to i32
    %c0_i32_0 = arith.constant 0 : i32
    %2 = arith.cmpi ne, %1, %c0_i32_0 : i32
    scf.if %2 {
      %cst_240 = arith.constant 0.000000e+00 : f32
      %229 = vector.broadcast %cst_240 : f32 to vector<1x10x3xf32>
      %cst_241 = arith.constant 0.000000e+00 : f32
      %230 = vector.broadcast %cst_241 : f32 to vector<10x1x3xf32>
      %c0_242 = arith.constant 0 : index
      %c0_243 = arith.constant 0 : index
      %c0_244 = arith.constant 0 : index
      %231 = vector.load %arg21[%c0_242, %c0_243, %c0_244] : memref<10x10x3xf32, #tpu.memory_space<vmem>>, vector<1x10x3xf32>
      tpu.vector_store %arg21[%c0_242, %c0_243, %c0_244], %229 {strides = array<i32>} : memref<10x10x3xf32, #tpu.memory_space<vmem>>, vector<1x10x3xf32>,
      %c9 = arith.constant 9 : index
      %c0_245 = arith.constant 0 : index
      %c0_246 = arith.constant 0 : index
      %232 = vector.load %arg21[%c9, %c0_245, %c0_246] : memref<10x10x3xf32, #tpu.memory_space<vmem>>, vector<1x10x3xf32>
      tpu.vector_store %arg21[%c9, %c0_245, %c0_246], %229 {strides = array<i32>} : memref<10x10x3xf32, #tpu.memory_space<vmem>>, vector<1x10x3xf32>,
      %c0_247 = arith.constant 0 : index
      %c0_248 = arith.constant 0 : index
      %c0_249 = arith.constant 0 : index
      %233 = vector.load %arg21[%c0_247, %c0_248, %c0_249] : memref<10x10x3xf32, #tpu.memory_space<vmem>>, vector<10x1x3xf32>
      tpu.vector_store %arg21[%c0_247, %c0_248, %c0_249], %230 {strides = array<i32>} : memref<10x10x3xf32, #tpu.memory_space<vmem>>, vector<10x1x3xf32>,
      %c0_250 = arith.constant 0 : index
      %c9_251 = arith.constant 9 : index
      %c0_252 = arith.constant 0 : index
      %234 = vector.load %arg21[%c0_250, %c9_251, %c0_252] : memref<10x10x3xf32, #tpu.memory_space<vmem>>, vector<10x1x3xf32>
      tpu.vector_store %arg21[%c0_250, %c9_251, %c0_252], %230 {strides = array<i32>} : memref<10x10x3xf32, #tpu.memory_space<vmem>>, vector<10x1x3xf32>,
      %cst_253 = arith.constant 0.000000e+00 : f32
      %235 = vector.broadcast %cst_253 : f32 to vector<1x10x32xf32>
      %cst_254 = arith.constant 0.000000e+00 : f32
      %236 = vector.broadcast %cst_254 : f32 to vector<10x1x32xf32>
      %c0_255 = arith.constant 0 : index
      %c0_256 = arith.constant 0 : index
      %c0_257 = arith.constant 0 : index
      %237 = vector.load %arg22[%c0_255, %c0_256, %c0_257] : memref<10x10x32xf32, #tpu.memory_space<vmem>>, vector<1x10x32xf32>
      tpu.vector_store %arg22[%c0_255, %c0_256, %c0_257], %235 {strides = array<i32>} : memref<10x10x32xf32, #tpu.memory_space<vmem>>, vector<1x10x32xf32>,
      %c9_258 = arith.constant 9 : index
      %c0_259 = arith.constant 0 : index
      %c0_260 = arith.constant 0 : index
      %238 = vector.load %arg22[%c9_258, %c0_259, %c0_260] : memref<10x10x32xf32, #tpu.memory_space<vmem>>, vector<1x10x32xf32>
      tpu.vector_store %arg22[%c9_258, %c0_259, %c0_260], %235 {strides = array<i32>} : memref<10x10x32xf32, #tpu.memory_space<vmem>>, vector<1x10x32xf32>,
      %c0_261 = arith.constant 0 : index
      %c0_262 = arith.constant 0 : index
      %c0_263 = arith.constant 0 : index
      %239 = vector.load %arg22[%c0_261, %c0_262, %c0_263] : memref<10x10x32xf32, #tpu.memory_space<vmem>>, vector<10x1x32xf32>
      tpu.vector_store %arg22[%c0_261, %c0_262, %c0_263], %236 {strides = array<i32>} : memref<10x10x32xf32, #tpu.memory_space<vmem>>, vector<10x1x32xf32>,
      %c0_264 = arith.constant 0 : index
      %c9_265 = arith.constant 9 : index
      %c0_266 = arith.constant 0 : index
      %240 = vector.load %arg22[%c0_264, %c9_265, %c0_266] : memref<10x10x32xf32, #tpu.memory_space<vmem>>, vector<10x1x32xf32>
      tpu.vector_store %arg22[%c0_264, %c9_265, %c0_266], %236 {strides = array<i32>} : memref<10x10x32xf32, #tpu.memory_space<vmem>>, vector<10x1x32xf32>,
      %cst_267 = arith.constant 0.000000e+00 : f32
      %241 = vector.broadcast %cst_267 : f32 to vector<1x10x64xf32>
      %cst_268 = arith.constant 0.000000e+00 : f32
      %242 = vector.broadcast %cst_268 : f32 to vector<10x1x64xf32>
      %c0_269 = arith.constant 0 : index
      %c0_270 = arith.constant 0 : index
      %c0_271 = arith.constant 0 : index
      %243 = vector.load %arg23[%c0_269, %c0_270, %c0_271] : memref<10x10x64xf32, #tpu.memory_space<vmem>>, vector<1x10x64xf32>
      tpu.vector_store %arg23[%c0_269, %c0_270, %c0_271], %241 {strides = array<i32>} : memref<10x10x64xf32, #tpu.memory_space<vmem>>, vector<1x10x64xf32>,
      %c9_272 = arith.constant 9 : index
      %c0_273 = arith.constant 0 : index
      %c0_274 = arith.constant 0 : index
      %244 = vector.load %arg23[%c9_272, %c0_273, %c0_274] : memref<10x10x64xf32, #tpu.memory_space<vmem>>, vector<1x10x64xf32>
      tpu.vector_store %arg23[%c9_272, %c0_273, %c0_274], %241 {strides = array<i32>} : memref<10x10x64xf32, #tpu.memory_space<vmem>>, vector<1x10x64xf32>,
      %c0_275 = arith.constant 0 : index
      %c0_276 = arith.constant 0 : index
      %c0_277 = arith.constant 0 : index
      %245 = vector.load %arg23[%c0_275, %c0_276, %c0_277] : memref<10x10x64xf32, #tpu.memory_space<vmem>>, vector<10x1x64xf32>
      tpu.vector_store %arg23[%c0_275, %c0_276, %c0_277], %242 {strides = array<i32>} : memref<10x10x64xf32, #tpu.memory_space<vmem>>, vector<10x1x64xf32>,
      %c0_278 = arith.constant 0 : index
      %c9_279 = arith.constant 9 : index
      %c0_280 = arith.constant 0 : index
      %246 = vector.load %arg23[%c0_278, %c9_279, %c0_280] : memref<10x10x64xf32, #tpu.memory_space<vmem>>, vector<10x1x64xf32>
      tpu.vector_store %arg23[%c0_278, %c9_279, %c0_280], %242 {strides = array<i32>} : memref<10x10x64xf32, #tpu.memory_space<vmem>>, vector<10x1x64xf32>,
      %cst_281 = arith.constant 0.000000e+00 : f32
      %247 = vector.broadcast %cst_281 : f32 to vector<1x10x32xf32>
      %cst_282 = arith.constant 0.000000e+00 : f32
      %248 = vector.broadcast %cst_282 : f32 to vector<10x1x32xf32>
      %c0_283 = arith.constant 0 : index
      %c0_284 = arith.constant 0 : index
      %c0_285 = arith.constant 0 : index
      %249 = vector.load %arg24[%c0_283, %c0_284, %c0_285] : memref<10x10x32xf32, #tpu.memory_space<vmem>>, vector<1x10x32xf32>
      tpu.vector_store %arg24[%c0_283, %c0_284, %c0_285], %247 {strides = array<i32>} : memref<10x10x32xf32, #tpu.memory_space<vmem>>, vector<1x10x32xf32>,
      %c9_286 = arith.constant 9 : index
      %c0_287 = arith.constant 0 : index
      %c0_288 = arith.constant 0 : index
      %250 = vector.load %arg24[%c9_286, %c0_287, %c0_288] : memref<10x10x32xf32, #tpu.memory_space<vmem>>, vector<1x10x32xf32>
      tpu.vector_store %arg24[%c9_286, %c0_287, %c0_288], %247 {strides = array<i32>} : memref<10x10x32xf32, #tpu.memory_space<vmem>>, vector<1x10x32xf32>,
      %c0_289 = arith.constant 0 : index
      %c0_290 = arith.constant 0 : index
      %c0_291 = arith.constant 0 : index
      %251 = vector.load %arg24[%c0_289, %c0_290, %c0_291] : memref<10x10x32xf32, #tpu.memory_space<vmem>>, vector<10x1x32xf32>
      tpu.vector_store %arg24[%c0_289, %c0_290, %c0_291], %248 {strides = array<i32>} : memref<10x10x32xf32, #tpu.memory_space<vmem>>, vector<10x1x32xf32>,
      %c0_292 = arith.constant 0 : index
      %c9_293 = arith.constant 9 : index
      %c0_294 = arith.constant 0 : index
      %252 = vector.load %arg24[%c0_292, %c9_293, %c0_294] : memref<10x10x32xf32, #tpu.memory_space<vmem>>, vector<10x1x32xf32>
      tpu.vector_store %arg24[%c0_292, %c9_293, %c0_294], %248 {strides = array<i32>} : memref<10x10x32xf32, #tpu.memory_space<vmem>>, vector<10x1x32xf32>,
    } else {
    }
    %c0 = arith.constant 0 : index
    %c0_1 = arith.constant 0 : index
    %c0_2 = arith.constant 0 : index
    %c0_3 = arith.constant 0 : index
    %3 = vector.load %arg2[%c0, %c0_1, %c0_2, %c0_3] : memref<1x8x8x3xf32, #tpu.memory_space<vmem>>, vector<1x8x8x3xf32>
    %4 = vector.shape_cast %3 : vector<1x8x8x3xf32> to vector<8x8x3xf32>
    %c0_4 = arith.constant 0 : index
    %c0_5 = arith.constant 0 : index
    %c0_6 = arith.constant 0 : index
    %5 = vector.load %arg4[%c0_4, %c0_5, %c0_6] : memref<1x1x32xf32, #tpu.memory_space<vmem>>, vector<1x1x32xf32>
    %6 = vector.shape_cast %5 : vector<1x1x32xf32> to vector<1x32xf32>
    %c1 = arith.constant 1 : index
    %c1_7 = arith.constant 1 : index
    %c0_8 = arith.constant 0 : index
    %7 = vector.load %arg21[%c1, %c1_7, %c0_8] : memref<10x10x3xf32, #tpu.memory_space<vmem>>, vector<8x8x3xf32>
    tpu.vector_store %arg21[%c1, %c1_7, %c0_8], %4 {strides = array<i32>} : memref<10x10x3xf32, #tpu.memory_space<vmem>>, vector<8x8x3xf32>,
    %cst = arith.constant 0.000000e+00 : f32
    %8 = vector.broadcast %cst : f32 to vector<64x32xf32>
    %c0_9 = arith.constant 0 : index
    %c0_10 = arith.constant 0 : index
    %c0_11 = arith.constant 0 : index
    %9 = vector.load %arg21[%c0_9, %c0_10, %c0_11] : memref<10x10x3xf32, #tpu.memory_space<vmem>>, vector<8x8x3xf32>
    %10 = vector.shape_cast %9 : vector<8x8x3xf32> to vector<64x3xf32>
    %11 = arith.truncf %10 : vector<64x3xf32> to vector<64x3xbf16>
    %c0_12 = arith.constant 0 : index
    %c0_13 = arith.constant 0 : index
    %c0_14 = arith.constant 0 : index
    %c0_15 = arith.constant 0 : index
    %12 = vector.load %arg3[%c0_12, %c0_13, %c0_14, %c0_15] : memref<1x9x3x32xbf16, #tpu.memory_space<vmem>>, vector<1x1x3x32xbf16>
    %13 = vector.shape_cast %12 : vector<1x1x3x32xbf16> to vector<3x32xbf16>
    %cst_16 = arith.constant dense<0.000000e+00> : vector<64x32xf32>
    %14 = tpu.matmul %11, %13, %cst_16 {dimension_numbers = #tpu.dot_dimension_numbers<[1], [0], [0], [1], [0, 0, 1, 1], [], []>} : vector<64x3xbf16>, vector<3x32xbf16>, vector<64x32xf32> -> vector<64x32xf32>
    %15 = arith.addf %8, %14 : vector<64x32xf32>
    %c0_17 = arith.constant 0 : index
    %c1_18 = arith.constant 1 : index
    %c0_19 = arith.constant 0 : index
    %16 = vector.load %arg21[%c0_17, %c1_18, %c0_19] : memref<10x10x3xf32, #tpu.memory_space<vmem>>, vector<8x8x3xf32>
    %17 = vector.shape_cast %16 : vector<8x8x3xf32> to vector<64x3xf32>
    %18 = arith.truncf %17 : vector<64x3xf32> to vector<64x3xbf16>
    %c0_20 = arith.constant 0 : index
    %c1_21 = arith.constant 1 : index
    %c0_22 = arith.constant 0 : index
    %c0_23 = arith.constant 0 : index
    %19 = vector.load %arg3[%c0_20, %c1_21, %c0_22, %c0_23] : memref<1x9x3x32xbf16, #tpu.memory_space<vmem>>, vector<1x1x3x32xbf16>
    %20 = vector.shape_cast %19 : vector<1x1x3x32xbf16> to vector<3x32xbf16>
    %cst_24 = arith.constant dense<0.000000e+00> : vector<64x32xf32>
    %21 = tpu.matmul %18, %20, %cst_24 {dimension_numbers = #tpu.dot_dimension_numbers<[1], [0], [0], [1], [0, 0, 1, 1], [], []>} : vector<64x3xbf16>, vector<3x32xbf16>, vector<64x32xf32> -> vector<64x32xf32>
    %22 = arith.addf %15, %21 : vector<64x32xf32>
    %c0_25 = arith.constant 0 : index
    %c2 = arith.constant 2 : index
    %c0_26 = arith.constant 0 : index
    %23 = vector.load %arg21[%c0_25, %c2, %c0_26] : memref<10x10x3xf32, #tpu.memory_space<vmem>>, vector<8x8x3xf32>
    %24 = vector.shape_cast %23 : vector<8x8x3xf32> to vector<64x3xf32>
    %25 = arith.truncf %24 : vector<64x3xf32> to vector<64x3xbf16>
    %c0_27 = arith.constant 0 : index
    %c2_28 = arith.constant 2 : index
    %c0_29 = arith.constant 0 : index
    %c0_30 = arith.constant 0 : index
    %26 = vector.load %arg3[%c0_27, %c2_28, %c0_29, %c0_30] : memref<1x9x3x32xbf16, #tpu.memory_space<vmem>>, vector<1x1x3x32xbf16>
    %27 = vector.shape_cast %26 : vector<1x1x3x32xbf16> to vector<3x32xbf16>
    %cst_31 = arith.constant dense<0.000000e+00> : vector<64x32xf32>
    %28 = tpu.matmul %25, %27, %cst_31 {dimension_numbers = #tpu.dot_dimension_numbers<[1], [0], [0], [1], [0, 0, 1, 1], [], []>} : vector<64x3xbf16>, vector<3x32xbf16>, vector<64x32xf32> -> vector<64x32xf32>
    %29 = arith.addf %22, %28 : vector<64x32xf32>
    %c1_32 = arith.constant 1 : index
    %c0_33 = arith.constant 0 : index
    %c0_34 = arith.constant 0 : index
    %30 = vector.load %arg21[%c1_32, %c0_33, %c0_34] : memref<10x10x3xf32, #tpu.memory_space<vmem>>, vector<8x8x3xf32>
    %31 = vector.shape_cast %30 : vector<8x8x3xf32> to vector<64x3xf32>
    %32 = arith.truncf %31 : vector<64x3xf32> to vector<64x3xbf16>
    %c0_35 = arith.constant 0 : index
    %c3 = arith.constant 3 : index
    %c0_36 = arith.constant 0 : index
    %c0_37 = arith.constant 0 : index
    %33 = vector.load %arg3[%c0_35, %c3, %c0_36, %c0_37] : memref<1x9x3x32xbf16, #tpu.memory_space<vmem>>, vector<1x1x3x32xbf16>
    %34 = vector.shape_cast %33 : vector<1x1x3x32xbf16> to vector<3x32xbf16>
    %cst_38 = arith.constant dense<0.000000e+00> : vector<64x32xf32>
    %35 = tpu.matmul %32, %34, %cst_38 {dimension_numbers = #tpu.dot_dimension_numbers<[1], [0], [0], [1], [0, 0, 1, 1], [], []>} : vector<64x3xbf16>, vector<3x32xbf16>, vector<64x32xf32> -> vector<64x32xf32>
    %36 = arith.addf %29, %35 : vector<64x32xf32>
    %c1_39 = arith.constant 1 : index
    %c1_40 = arith.constant 1 : index
    %c0_41 = arith.constant 0 : index
    %37 = vector.load %arg21[%c1_39, %c1_40, %c0_41] : memref<10x10x3xf32, #tpu.memory_space<vmem>>, vector<8x8x3xf32>
    %38 = vector.shape_cast %37 : vector<8x8x3xf32> to vector<64x3xf32>
    %39 = arith.truncf %38 : vector<64x3xf32> to vector<64x3xbf16>
    %c0_42 = arith.constant 0 : index
    %c4 = arith.constant 4 : index
    %c0_43 = arith.constant 0 : index
    %c0_44 = arith.constant 0 : index
    %40 = vector.load %arg3[%c0_42, %c4, %c0_43, %c0_44] : memref<1x9x3x32xbf16, #tpu.memory_space<vmem>>, vector<1x1x3x32xbf16>
    %41 = vector.shape_cast %40 : vector<1x1x3x32xbf16> to vector<3x32xbf16>
    %cst_45 = arith.constant dense<0.000000e+00> : vector<64x32xf32>
    %42 = tpu.matmul %39, %41, %cst_45 {dimension_numbers = #tpu.dot_dimension_numbers<[1], [0], [0], [1], [0, 0, 1, 1], [], []>} : vector<64x3xbf16>, vector<3x32xbf16>, vector<64x32xf32> -> vector<64x32xf32>
    %43 = arith.addf %36, %42 : vector<64x32xf32>
    %c1_46 = arith.constant 1 : index
    %c2_47 = arith.constant 2 : index
    %c0_48 = arith.constant 0 : index
    %44 = vector.load %arg21[%c1_46, %c2_47, %c0_48] : memref<10x10x3xf32, #tpu.memory_space<vmem>>, vector<8x8x3xf32>
    %45 = vector.shape_cast %44 : vector<8x8x3xf32> to vector<64x3xf32>
    %46 = arith.truncf %45 : vector<64x3xf32> to vector<64x3xbf16>
    %c0_49 = arith.constant 0 : index
    %c5 = arith.constant 5 : index
    %c0_50 = arith.constant 0 : index
    %c0_51 = arith.constant 0 : index
    %47 = vector.load %arg3[%c0_49, %c5, %c0_50, %c0_51] : memref<1x9x3x32xbf16, #tpu.memory_space<vmem>>, vector<1x1x3x32xbf16>
    %48 = vector.shape_cast %47 : vector<1x1x3x32xbf16> to vector<3x32xbf16>
    %cst_52 = arith.constant dense<0.000000e+00> : vector<64x32xf32>
    %49 = tpu.matmul %46, %48, %cst_52 {dimension_numbers = #tpu.dot_dimension_numbers<[1], [0], [0], [1], [0, 0, 1, 1], [], []>} : vector<64x3xbf16>, vector<3x32xbf16>, vector<64x32xf32> -> vector<64x32xf32>
    %50 = arith.addf %43, %49 : vector<64x32xf32>
    %c2_53 = arith.constant 2 : index
    %c0_54 = arith.constant 0 : index
    %c0_55 = arith.constant 0 : index
    %51 = vector.load %arg21[%c2_53, %c0_54, %c0_55] : memref<10x10x3xf32, #tpu.memory_space<vmem>>, vector<8x8x3xf32>
    %52 = vector.shape_cast %51 : vector<8x8x3xf32> to vector<64x3xf32>
    %53 = arith.truncf %52 : vector<64x3xf32> to vector<64x3xbf16>
    %c0_56 = arith.constant 0 : index
    %c6 = arith.constant 6 : index
    %c0_57 = arith.constant 0 : index
    %c0_58 = arith.constant 0 : index
    %54 = vector.load %arg3[%c0_56, %c6, %c0_57, %c0_58] : memref<1x9x3x32xbf16, #tpu.memory_space<vmem>>, vector<1x1x3x32xbf16>
    %55 = vector.shape_cast %54 : vector<1x1x3x32xbf16> to vector<3x32xbf16>
    %cst_59 = arith.constant dense<0.000000e+00> : vector<64x32xf32>
    %56 = tpu.matmul %53, %55, %cst_59 {dimension_numbers = #tpu.dot_dimension_numbers<[1], [0], [0], [1], [0, 0, 1, 1], [], []>} : vector<64x3xbf16>, vector<3x32xbf16>, vector<64x32xf32> -> vector<64x32xf32>
    %57 = arith.addf %50, %56 : vector<64x32xf32>
    %c2_60 = arith.constant 2 : index
    %c1_61 = arith.constant 1 : index
    %c0_62 = arith.constant 0 : index
    %58 = vector.load %arg21[%c2_60, %c1_61, %c0_62] : memref<10x10x3xf32, #tpu.memory_space<vmem>>, vector<8x8x3xf32>
    %59 = vector.shape_cast %58 : vector<8x8x3xf32> to vector<64x3xf32>
    %60 = arith.truncf %59 : vector<64x3xf32> to vector<64x3xbf16>
    %c0_63 = arith.constant 0 : index
    %c7 = arith.constant 7 : index
    %c0_64 = arith.constant 0 : index
    %c0_65 = arith.constant 0 : index
    %61 = vector.load %arg3[%c0_63, %c7, %c0_64, %c0_65] : memref<1x9x3x32xbf16, #tpu.memory_space<vmem>>, vector<1x1x3x32xbf16>
    %62 = vector.shape_cast %61 : vector<1x1x3x32xbf16> to vector<3x32xbf16>
    %cst_66 = arith.constant dense<0.000000e+00> : vector<64x32xf32>
    %63 = tpu.matmul %60, %62, %cst_66 {dimension_numbers = #tpu.dot_dimension_numbers<[1], [0], [0], [1], [0, 0, 1, 1], [], []>} : vector<64x3xbf16>, vector<3x32xbf16>, vector<64x32xf32> -> vector<64x32xf32>
    %64 = arith.addf %57, %63 : vector<64x32xf32>
    %c2_67 = arith.constant 2 : index
    %c2_68 = arith.constant 2 : index
    %c0_69 = arith.constant 0 : index
    %65 = vector.load %arg21[%c2_67, %c2_68, %c0_69] : memref<10x10x3xf32, #tpu.memory_space<vmem>>, vector<8x8x3xf32>
    %66 = vector.shape_cast %65 : vector<8x8x3xf32> to vector<64x3xf32>
    %67 = arith.truncf %66 : vector<64x3xf32> to vector<64x3xbf16>
    %c0_70 = arith.constant 0 : index
    %c8 = arith.constant 8 : index
    %c0_71 = arith.constant 0 : index
    %c0_72 = arith.constant 0 : index
    %68 = vector.load %arg3[%c0_70, %c8, %c0_71, %c0_72] : memref<1x9x3x32xbf16, #tpu.memory_space<vmem>>, vector<1x1x3x32xbf16>
    %69 = vector.shape_cast %68 : vector<1x1x3x32xbf16> to vector<3x32xbf16>
    %cst_73 = arith.constant dense<0.000000e+00> : vector<64x32xf32>
    %70 = tpu.matmul %67, %69, %cst_73 {dimension_numbers = #tpu.dot_dimension_numbers<[1], [0], [0], [1], [0, 0, 1, 1], [], []>} : vector<64x3xbf16>, vector<3x32xbf16>, vector<64x32xf32> -> vector<64x32xf32>
    %71 = arith.addf %64, %70 : vector<64x32xf32>
    %72 = vector.broadcast %6 : vector<1x32xf32> to vector<64x32xf32>
    %73 = arith.addf %71, %72 : vector<64x32xf32>
    %cst_74 = arith.constant 0.000000e+00 : f32
    %74 = vector.broadcast %cst_74 : f32 to vector<64x32xf32>
    %75 = arith.maximumf %73, %74 : vector<64x32xf32>
    %76 = vector.shape_cast %75 : vector<64x32xf32> to vector<8x8x32xf32>
    %c0_75 = arith.constant 0 : index
    %c0_76 = arith.constant 0 : index
    %c0_77 = arith.constant 0 : index
    %77 = vector.load %arg6[%c0_75, %c0_76, %c0_77] : memref<1x1x64xf32, #tpu.memory_space<vmem>>, vector<1x1x64xf32>
    %78 = vector.shape_cast %77 : vector<1x1x64xf32> to vector<1x64xf32>
    %c1_78 = arith.constant 1 : index
    %c1_79 = arith.constant 1 : index
    %c0_80 = arith.constant 0 : index
    %79 = vector.load %arg22[%c1_78, %c1_79, %c0_80] : memref<10x10x32xf32, #tpu.memory_space<vmem>>, vector<8x8x32xf32>
    tpu.vector_store %arg22[%c1_78, %c1_79, %c0_80], %76 {strides = array<i32>} : memref<10x10x32xf32, #tpu.memory_space<vmem>>, vector<8x8x32xf32>,
    %cst_81 = arith.constant 0.000000e+00 : f32
    %80 = vector.broadcast %cst_81 : f32 to vector<64x64xf32>
    %c0_82 = arith.constant 0 : index
    %c0_83 = arith.constant 0 : index
    %c0_84 = arith.constant 0 : index
    %81 = vector.load %arg22[%c0_82, %c0_83, %c0_84] : memref<10x10x32xf32, #tpu.memory_space<vmem>>, vector<8x8x32xf32>
    %82 = vector.shape_cast %81 : vector<8x8x32xf32> to vector<64x32xf32>
    %83 = arith.truncf %82 : vector<64x32xf32> to vector<64x32xbf16>
    %c0_85 = arith.constant 0 : index
    %c0_86 = arith.constant 0 : index
    %c0_87 = arith.constant 0 : index
    %c0_88 = arith.constant 0 : index
    %84 = vector.load %arg5[%c0_85, %c0_86, %c0_87, %c0_88] : memref<1x9x32x64xbf16, #tpu.memory_space<vmem>>, vector<1x1x32x64xbf16>
    %85 = vector.shape_cast %84 : vector<1x1x32x64xbf16> to vector<32x64xbf16>
    %cst_89 = arith.constant dense<0.000000e+00> : vector<64x64xf32>
    %86 = tpu.matmul %83, %85, %cst_89 {dimension_numbers = #tpu.dot_dimension_numbers<[1], [0], [0], [1], [0, 0, 1, 1], [], []>} : vector<64x32xbf16>, vector<32x64xbf16>, vector<64x64xf32> -> vector<64x64xf32>
    %87 = arith.addf %80, %86 : vector<64x64xf32>
    %c0_90 = arith.constant 0 : index
    %c1_91 = arith.constant 1 : index
    %c0_92 = arith.constant 0 : index
    %88 = vector.load %arg22[%c0_90, %c1_91, %c0_92] : memref<10x10x32xf32, #tpu.memory_space<vmem>>, vector<8x8x32xf32>
    %89 = vector.shape_cast %88 : vector<8x8x32xf32> to vector<64x32xf32>
    %90 = arith.truncf %89 : vector<64x32xf32> to vector<64x32xbf16>
    %c0_93 = arith.constant 0 : index
    %c1_94 = arith.constant 1 : index
    %c0_95 = arith.constant 0 : index
    %c0_96 = arith.constant 0 : index
    %91 = vector.load %arg5[%c0_93, %c1_94, %c0_95, %c0_96] : memref<1x9x32x64xbf16, #tpu.memory_space<vmem>>, vector<1x1x32x64xbf16>
    %92 = vector.shape_cast %91 : vector<1x1x32x64xbf16> to vector<32x64xbf16>
    %cst_97 = arith.constant dense<0.000000e+00> : vector<64x64xf32>
    %93 = tpu.matmul %90, %92, %cst_97 {dimension_numbers = #tpu.dot_dimension_numbers<[1], [0], [0], [1], [0, 0, 1, 1], [], []>} : vector<64x32xbf16>, vector<32x64xbf16>, vector<64x64xf32> -> vector<64x64xf32>
    %94 = arith.addf %87, %93 : vector<64x64xf32>
    %c0_98 = arith.constant 0 : index
    %c2_99 = arith.constant 2 : index
    %c0_100 = arith.constant 0 : index
    %95 = vector.load %arg22[%c0_98, %c2_99, %c0_100] : memref<10x10x32xf32, #tpu.memory_space<vmem>>, vector<8x8x32xf32>
    %96 = vector.shape_cast %95 : vector<8x8x32xf32> to vector<64x32xf32>
    %97 = arith.truncf %96 : vector<64x32xf32> to vector<64x32xbf16>
    %c0_101 = arith.constant 0 : index
    %c2_102 = arith.constant 2 : index
    %c0_103 = arith.constant 0 : index
    %c0_104 = arith.constant 0 : index
    %98 = vector.load %arg5[%c0_101, %c2_102, %c0_103, %c0_104] : memref<1x9x32x64xbf16, #tpu.memory_space<vmem>>, vector<1x1x32x64xbf16>
    %99 = vector.shape_cast %98 : vector<1x1x32x64xbf16> to vector<32x64xbf16>
    %cst_105 = arith.constant dense<0.000000e+00> : vector<64x64xf32>
    %100 = tpu.matmul %97, %99, %cst_105 {dimension_numbers = #tpu.dot_dimension_numbers<[1], [0], [0], [1], [0, 0, 1, 1], [], []>} : vector<64x32xbf16>, vector<32x64xbf16>, vector<64x64xf32> -> vector<64x64xf32>
    %101 = arith.addf %94, %100 : vector<64x64xf32>
    %c1_106 = arith.constant 1 : index
    %c0_107 = arith.constant 0 : index
    %c0_108 = arith.constant 0 : index
    %102 = vector.load %arg22[%c1_106, %c0_107, %c0_108] : memref<10x10x32xf32, #tpu.memory_space<vmem>>, vector<8x8x32xf32>
    %103 = vector.shape_cast %102 : vector<8x8x32xf32> to vector<64x32xf32>
    %104 = arith.truncf %103 : vector<64x32xf32> to vector<64x32xbf16>
    %c0_109 = arith.constant 0 : index
    %c3_110 = arith.constant 3 : index
    %c0_111 = arith.constant 0 : index
    %c0_112 = arith.constant 0 : index
    %105 = vector.load %arg5[%c0_109, %c3_110, %c0_111, %c0_112] : memref<1x9x32x64xbf16, #tpu.memory_space<vmem>>, vector<1x1x32x64xbf16>
    %106 = vector.shape_cast %105 : vector<1x1x32x64xbf16> to vector<32x64xbf16>
    %cst_113 = arith.constant dense<0.000000e+00> : vector<64x64xf32>
    %107 = tpu.matmul %104, %106, %cst_113 {dimension_numbers = #tpu.dot_dimension_numbers<[1], [0], [0], [1], [0, 0, 1, 1], [], []>} : vector<64x32xbf16>, vector<32x64xbf16>, vector<64x64xf32> -> vector<64x64xf32>
    %108 = arith.addf %101, %107 : vector<64x64xf32>
    %c1_114 = arith.constant 1 : index
    %c1_115 = arith.constant 1 : index
    %c0_116 = arith.constant 0 : index
    %109 = vector.load %arg22[%c1_114, %c1_115, %c0_116] : memref<10x10x32xf32, #tpu.memory_space<vmem>>, vector<8x8x32xf32>
    %110 = vector.shape_cast %109 : vector<8x8x32xf32> to vector<64x32xf32>
    %111 = arith.truncf %110 : vector<64x32xf32> to vector<64x32xbf16>
    %c0_117 = arith.constant 0 : index
    %c4_118 = arith.constant 4 : index
    %c0_119 = arith.constant 0 : index
    %c0_120 = arith.constant 0 : index
    %112 = vector.load %arg5[%c0_117, %c4_118, %c0_119, %c0_120] : memref<1x9x32x64xbf16, #tpu.memory_space<vmem>>, vector<1x1x32x64xbf16>
    %113 = vector.shape_cast %112 : vector<1x1x32x64xbf16> to vector<32x64xbf16>
    %cst_121 = arith.constant dense<0.000000e+00> : vector<64x64xf32>
    %114 = tpu.matmul %111, %113, %cst_121 {dimension_numbers = #tpu.dot_dimension_numbers<[1], [0], [0], [1], [0, 0, 1, 1], [], []>} : vector<64x32xbf16>, vector<32x64xbf16>, vector<64x64xf32> -> vector<64x64xf32>
    %115 = arith.addf %108, %114 : vector<64x64xf32>
    %c1_122 = arith.constant 1 : index
    %c2_123 = arith.constant 2 : index
    %c0_124 = arith.constant 0 : index
    %116 = vector.load %arg22[%c1_122, %c2_123, %c0_124] : memref<10x10x32xf32, #tpu.memory_space<vmem>>, vector<8x8x32xf32>
    %117 = vector.shape_cast %116 : vector<8x8x32xf32> to vector<64x32xf32>
    %118 = arith.truncf %117 : vector<64x32xf32> to vector<64x32xbf16>
    %c0_125 = arith.constant 0 : index
    %c5_126 = arith.constant 5 : index
    %c0_127 = arith.constant 0 : index
    %c0_128 = arith.constant 0 : index
    %119 = vector.load %arg5[%c0_125, %c5_126, %c0_127, %c0_128] : memref<1x9x32x64xbf16, #tpu.memory_space<vmem>>, vector<1x1x32x64xbf16>
    %120 = vector.shape_cast %119 : vector<1x1x32x64xbf16> to vector<32x64xbf16>
    %cst_129 = arith.constant dense<0.000000e+00> : vector<64x64xf32>
    %121 = tpu.matmul %118, %120, %cst_129 {dimension_numbers = #tpu.dot_dimension_numbers<[1], [0], [0], [1], [0, 0, 1, 1], [], []>} : vector<64x32xbf16>, vector<32x64xbf16>, vector<64x64xf32> -> vector<64x64xf32>
    %122 = arith.addf %115, %121 : vector<64x64xf32>
    %c2_130 = arith.constant 2 : index
    %c0_131 = arith.constant 0 : index
    %c0_132 = arith.constant 0 : index
    %123 = vector.load %arg22[%c2_130, %c0_131, %c0_132] : memref<10x10x32xf32, #tpu.memory_space<vmem>>, vector<8x8x32xf32>
    %124 = vector.shape_cast %123 : vector<8x8x32xf32> to vector<64x32xf32>
    %125 = arith.truncf %124 : vector<64x32xf32> to vector<64x32xbf16>
    %c0_133 = arith.constant 0 : index
    %c6_134 = arith.constant 6 : index
    %c0_135 = arith.constant 0 : index
    %c0_136 = arith.constant 0 : index
    %126 = vector.load %arg5[%c0_133, %c6_134, %c0_135, %c0_136] : memref<1x9x32x64xbf16, #tpu.memory_space<vmem>>, vector<1x1x32x64xbf16>
    %127 = vector.shape_cast %126 : vector<1x1x32x64xbf16> to vector<32x64xbf16>
    %cst_137 = arith.constant dense<0.000000e+00> : vector<64x64xf32>
    %128 = tpu.matmul %125, %127, %cst_137 {dimension_numbers = #tpu.dot_dimension_numbers<[1], [0], [0], [1], [0, 0, 1, 1], [], []>} : vector<64x32xbf16>, vector<32x64xbf16>, vector<64x64xf32> -> vector<64x64xf32>
    %129 = arith.addf %122, %128 : vector<64x64xf32>
    %c2_138 = arith.constant 2 : index
    %c1_139 = arith.constant 1 : index
    %c0_140 = arith.constant 0 : index
    %130 = vector.load %arg22[%c2_138, %c1_139, %c0_140] : memref<10x10x32xf32, #tpu.memory_space<vmem>>, vector<8x8x32xf32>
    %131 = vector.shape_cast %130 : vector<8x8x32xf32> to vector<64x32xf32>
    %132 = arith.truncf %131 : vector<64x32xf32> to vector<64x32xbf16>
    %c0_141 = arith.constant 0 : index
    %c7_142 = arith.constant 7 : index
    %c0_143 = arith.constant 0 : index
    %c0_144 = arith.constant 0 : index
    %133 = vector.load %arg5[%c0_141, %c7_142, %c0_143, %c0_144] : memref<1x9x32x64xbf16, #tpu.memory_space<vmem>>, vector<1x1x32x64xbf16>
    %134 = vector.shape_cast %133 : vector<1x1x32x64xbf16> to vector<32x64xbf16>
    %cst_145 = arith.constant dense<0.000000e+00> : vector<64x64xf32>
    %135 = tpu.matmul %132, %134, %cst_145 {dimension_numbers = #tpu.dot_dimension_numbers<[1], [0], [0], [1], [0, 0, 1, 1], [], []>} : vector<64x32xbf16>, vector<32x64xbf16>, vector<64x64xf32> -> vector<64x64xf32>
    %136 = arith.addf %129, %135 : vector<64x64xf32>
    %c2_146 = arith.constant 2 : index
    %c2_147 = arith.constant 2 : index
    %c0_148 = arith.constant 0 : index
    %137 = vector.load %arg22[%c2_146, %c2_147, %c0_148] : memref<10x10x32xf32, #tpu.memory_space<vmem>>, vector<8x8x32xf32>
    %138 = vector.shape_cast %137 : vector<8x8x32xf32> to vector<64x32xf32>
    %139 = arith.truncf %138 : vector<64x32xf32> to vector<64x32xbf16>
    %c0_149 = arith.constant 0 : index
    %c8_150 = arith.constant 8 : index
    %c0_151 = arith.constant 0 : index
    %c0_152 = arith.constant 0 : index
    %140 = vector.load %arg5[%c0_149, %c8_150, %c0_151, %c0_152] : memref<1x9x32x64xbf16, #tpu.memory_space<vmem>>, vector<1x1x32x64xbf16>
    %141 = vector.shape_cast %140 : vector<1x1x32x64xbf16> to vector<32x64xbf16>
    %cst_153 = arith.constant dense<0.000000e+00> : vector<64x64xf32>
    %142 = tpu.matmul %139, %141, %cst_153 {dimension_numbers = #tpu.dot_dimension_numbers<[1], [0], [0], [1], [0, 0, 1, 1], [], []>} : vector<64x32xbf16>, vector<32x64xbf16>, vector<64x64xf32> -> vector<64x64xf32>
    %143 = arith.addf %136, %142 : vector<64x64xf32>
    %144 = vector.broadcast %78 : vector<1x64xf32> to vector<64x64xf32>
    %145 = arith.addf %143, %144 : vector<64x64xf32>
    %cst_154 = arith.constant 0.000000e+00 : f32
    %146 = vector.broadcast %cst_154 : f32 to vector<64x64xf32>
    %147 = arith.maximumf %145, %146 : vector<64x64xf32>
    %148 = vector.shape_cast %147 : vector<64x64xf32> to vector<8x8x64xf32>
    %c0_155 = arith.constant 0 : index
    %c0_156 = arith.constant 0 : index
    %c0_157 = arith.constant 0 : index
    %149 = vector.load %arg8[%c0_155, %c0_156, %c0_157] : memref<1x1x32xf32, #tpu.memory_space<vmem>>, vector<1x1x32xf32>
    %150 = vector.shape_cast %149 : vector<1x1x32xf32> to vector<1x32xf32>
    %c1_158 = arith.constant 1 : index
    %c1_159 = arith.constant 1 : index
    %c0_160 = arith.constant 0 : index
    %151 = vector.load %arg23[%c1_158, %c1_159, %c0_160] : memref<10x10x64xf32, #tpu.memory_space<vmem>>, vector<8x8x64xf32>
    tpu.vector_store %arg23[%c1_158, %c1_159, %c0_160], %148 {strides = array<i32>} : memref<10x10x64xf32, #tpu.memory_space<vmem>>, vector<8x8x64xf32>,
    %cst_161 = arith.constant 0.000000e+00 : f32
    %152 = vector.broadcast %cst_161 : f32 to vector<64x32xf32>
    %c0_162 = arith.constant 0 : index
    %c0_163 = arith.constant 0 : index
    %c0_164 = arith.constant 0 : index
    %153 = vector.load %arg23[%c0_162, %c0_163, %c0_164] : memref<10x10x64xf32, #tpu.memory_space<vmem>>, vector<8x8x64xf32>
    %154 = vector.shape_cast %153 : vector<8x8x64xf32> to vector<64x64xf32>
    %155 = arith.truncf %154 : vector<64x64xf32> to vector<64x64xbf16>
    %c0_165 = arith.constant 0 : index
    %c0_166 = arith.constant 0 : index
    %c0_167 = arith.constant 0 : index
    %c0_168 = arith.constant 0 : index
    %156 = vector.load %arg7[%c0_165, %c0_166, %c0_167, %c0_168] : memref<1x9x64x32xbf16, #tpu.memory_space<vmem>>, vector<1x1x64x32xbf16>
    %157 = vector.shape_cast %156 : vector<1x1x64x32xbf16> to vector<64x32xbf16>
    %cst_169 = arith.constant dense<0.000000e+00> : vector<64x32xf32>
    %158 = tpu.matmul %155, %157, %cst_169 {dimension_numbers = #tpu.dot_dimension_numbers<[1], [0], [0], [1], [0, 0, 1, 1], [], []>} : vector<64x64xbf16>, vector<64x32xbf16>, vector<64x32xf32> -> vector<64x32xf32>
    %159 = arith.addf %152, %158 : vector<64x32xf32>
    %c0_170 = arith.constant 0 : index
    %c1_171 = arith.constant 1 : index
    %c0_172 = arith.constant 0 : index
    %160 = vector.load %arg23[%c0_170, %c1_171, %c0_172] : memref<10x10x64xf32, #tpu.memory_space<vmem>>, vector<8x8x64xf32>
    %161 = vector.shape_cast %160 : vector<8x8x64xf32> to vector<64x64xf32>
    %162 = arith.truncf %161 : vector<64x64xf32> to vector<64x64xbf16>
    %c0_173 = arith.constant 0 : index
    %c1_174 = arith.constant 1 : index
    %c0_175 = arith.constant 0 : index
    %c0_176 = arith.constant 0 : index
    %163 = vector.load %arg7[%c0_173, %c1_174, %c0_175, %c0_176] : memref<1x9x64x32xbf16, #tpu.memory_space<vmem>>, vector<1x1x64x32xbf16>
    %164 = vector.shape_cast %163 : vector<1x1x64x32xbf16> to vector<64x32xbf16>
    %cst_177 = arith.constant dense<0.000000e+00> : vector<64x32xf32>
    %165 = tpu.matmul %162, %164, %cst_177 {dimension_numbers = #tpu.dot_dimension_numbers<[1], [0], [0], [1], [0, 0, 1, 1], [], []>} : vector<64x64xbf16>, vector<64x32xbf16>, vector<64x32xf32> -> vector<64x32xf32>
    %166 = arith.addf %159, %165 : vector<64x32xf32>
    %c0_178 = arith.constant 0 : index
    %c2_179 = arith.constant 2 : index
    %c0_180 = arith.constant 0 : index
    %167 = vector.load %arg23[%c0_178, %c2_179, %c0_180] : memref<10x10x64xf32, #tpu.memory_space<vmem>>, vector<8x8x64xf32>
    %168 = vector.shape_cast %167 : vector<8x8x64xf32> to vector<64x64xf32>
    %169 = arith.truncf %168 : vector<64x64xf32> to vector<64x64xbf16>
    %c0_181 = arith.constant 0 : index
    %c2_182 = arith.constant 2 : index
    %c0_183 = arith.constant 0 : index
    %c0_184 = arith.constant 0 : index
    %170 = vector.load %arg7[%c0_181, %c2_182, %c0_183, %c0_184] : memref<1x9x64x32xbf16, #tpu.memory_space<vmem>>, vector<1x1x64x32xbf16>
    %171 = vector.shape_cast %170 : vector<1x1x64x32xbf16> to vector<64x32xbf16>
    %cst_185 = arith.constant dense<0.000000e+00> : vector<64x32xf32>
    %172 = tpu.matmul %169, %171, %cst_185 {dimension_numbers = #tpu.dot_dimension_numbers<[1], [0], [0], [1], [0, 0, 1, 1], [], []>} : vector<64x64xbf16>, vector<64x32xbf16>, vector<64x32xf32> -> vector<64x32xf32>
    %173 = arith.addf %166, %172 : vector<64x32xf32>
    %c1_186 = arith.constant 1 : index
    %c0_187 = arith.constant 0 : index
    %c0_188 = arith.constant 0 : index
    %174 = vector.load %arg23[%c1_186, %c0_187, %c0_188] : memref<10x10x64xf32, #tpu.memory_space<vmem>>, vector<8x8x64xf32>
    %175 = vector.shape_cast %174 : vector<8x8x64xf32> to vector<64x64xf32>
    %176 = arith.truncf %175 : vector<64x64xf32> to vector<64x64xbf16>
    %c0_189 = arith.constant 0 : index
    %c3_190 = arith.constant 3 : index
    %c0_191 = arith.constant 0 : index
    %c0_192 = arith.constant 0 : index
    %177 = vector.load %arg7[%c0_189, %c3_190, %c0_191, %c0_192] : memref<1x9x64x32xbf16, #tpu.memory_space<vmem>>, vector<1x1x64x32xbf16>
    %178 = vector.shape_cast %177 : vector<1x1x64x32xbf16> to vector<64x32xbf16>
    %cst_193 = arith.constant dense<0.000000e+00> : vector<64x32xf32>
    %179 = tpu.matmul %176, %178, %cst_193 {dimension_numbers = #tpu.dot_dimension_numbers<[1], [0], [0], [1], [0, 0, 1, 1], [], []>} : vector<64x64xbf16>, vector<64x32xbf16>, vector<64x32xf32> -> vector<64x32xf32>
    %180 = arith.addf %173, %179 : vector<64x32xf32>
    %c1_194 = arith.constant 1 : index
    %c1_195 = arith.constant 1 : index
    %c0_196 = arith.constant 0 : index
    %181 = vector.load %arg23[%c1_194, %c1_195, %c0_196] : memref<10x10x64xf32, #tpu.memory_space<vmem>>, vector<8x8x64xf32>
    %182 = vector.shape_cast %181 : vector<8x8x64xf32> to vector<64x64xf32>
    %183 = arith.truncf %182 : vector<64x64xf32> to vector<64x64xbf16>
    %c0_197 = arith.constant 0 : index
    %c4_198 = arith.constant 4 : index
    %c0_199 = arith.constant 0 : index
    %c0_200 = arith.constant 0 : index
    %184 = vector.load %arg7[%c0_197, %c4_198, %c0_199, %c0_200] : memref<1x9x64x32xbf16, #tpu.memory_space<vmem>>, vector<1x1x64x32xbf16>
    %185 = vector.shape_cast %184 : vector<1x1x64x32xbf16> to vector<64x32xbf16>
    %cst_201 = arith.constant dense<0.000000e+00> : vector<64x32xf32>
    %186 = tpu.matmul %183, %185, %cst_201 {dimension_numbers = #tpu.dot_dimension_numbers<[1], [0], [0], [1], [0, 0, 1, 1], [], []>} : vector<64x64xbf16>, vector<64x32xbf16>, vector<64x32xf32> -> vector<64x32xf32>
    %187 = arith.addf %180, %186 : vector<64x32xf32>
    %c1_202 = arith.constant 1 : index
    %c2_203 = arith.constant 2 : index
    %c0_204 = arith.constant 0 : index
    %188 = vector.load %arg23[%c1_202, %c2_203, %c0_204] : memref<10x10x64xf32, #tpu.memory_space<vmem>>, vector<8x8x64xf32>
    %189 = vector.shape_cast %188 : vector<8x8x64xf32> to vector<64x64xf32>
    %190 = arith.truncf %189 : vector<64x64xf32> to vector<64x64xbf16>
    %c0_205 = arith.constant 0 : index
    %c5_206 = arith.constant 5 : index
    %c0_207 = arith.constant 0 : index
    %c0_208 = arith.constant 0 : index
    %191 = vector.load %arg7[%c0_205, %c5_206, %c0_207, %c0_208] : memref<1x9x64x32xbf16, #tpu.memory_space<vmem>>, vector<1x1x64x32xbf16>
    %192 = vector.shape_cast %191 : vector<1x1x64x32xbf16> to vector<64x32xbf16>
    %cst_209 = arith.constant dense<0.000000e+00> : vector<64x32xf32>
    %193 = tpu.matmul %190, %192, %cst_209 {dimension_numbers = #tpu.dot_dimension_numbers<[1], [0], [0], [1], [0, 0, 1, 1], [], []>} : vector<64x64xbf16>, vector<64x32xbf16>, vector<64x32xf32> -> vector<64x32xf32>
    %194 = arith.addf %187, %193 : vector<64x32xf32>
    %c2_210 = arith.constant 2 : index
    %c0_211 = arith.constant 0 : index
    %c0_212 = arith.constant 0 : index
    %195 = vector.load %arg23[%c2_210, %c0_211, %c0_212] : memref<10x10x64xf32, #tpu.memory_space<vmem>>, vector<8x8x64xf32>
    %196 = vector.shape_cast %195 : vector<8x8x64xf32> to vector<64x64xf32>
    %197 = arith.truncf %196 : vector<64x64xf32> to vector<64x64xbf16>
    %c0_213 = arith.constant 0 : index
    %c6_214 = arith.constant 6 : index
    %c0_215 = arith.constant 0 : index
    %c0_216 = arith.constant 0 : index
    %198 = vector.load %arg7[%c0_213, %c6_214, %c0_215, %c0_216] : memref<1x9x64x32xbf16, #tpu.memory_space<vmem>>, vector<1x1x64x32xbf16>
    %199 = vector.shape_cast %198 : vector<1x1x64x32xbf16> to vector<64x32xbf16>
    %cst_217 = arith.constant dense<0.000000e+00> : vector<64x32xf32>
    %200 = tpu.matmul %197, %199, %cst_217 {dimension_numbers = #tpu.dot_dimension_numbers<[1], [0], [0], [1], [0, 0, 1, 1], [], []>} : vector<64x64xbf16>, vector<64x32xbf16>, vector<64x32xf32> -> vector<64x32xf32>
    %201 = arith.addf %194, %200 : vector<64x32xf32>
    %c2_218 = arith.constant 2 : index
    %c1_219 = arith.constant 1 : index
    %c0_220 = arith.constant 0 : index
    %202 = vector.load %arg23[%c2_218, %c1_219, %c0_220] : memref<10x10x64xf32, #tpu.memory_space<vmem>>, vector<8x8x64xf32>
    %203 = vector.shape_cast %202 : vector<8x8x64xf32> to vector<64x64xf32>
    %204 = arith.truncf %203 : vector<64x64xf32> to vector<64x64xbf16>
    %c0_221 = arith.constant 0 : index
    %c7_222 = arith.constant 7 : index
    %c0_223 = arith.constant 0 : index
    %c0_224 = arith.constant 0 : index
    %205 = vector.load %arg7[%c0_221, %c7_222, %c0_223, %c0_224] : memref<1x9x64x32xbf16, #tpu.memory_space<vmem>>, vector<1x1x64x32xbf16>
    %206 = vector.shape_cast %205 : vector<1x1x64x32xbf16> to vector<64x32xbf16>
    %cst_225 = arith.constant dense<0.000000e+00> : vector<64x32xf32>
    %207 = tpu.matmul %204, %206, %cst_225 {dimension_numbers = #tpu.dot_dimension_numbers<[1], [0], [0], [1], [0, 0, 1, 1], [], []>} : vector<64x64xbf16>, vector<64x32xbf16>, vector<64x32xf32> -> vector<64x32xf32>
    %208 = arith.addf %201, %207 : vector<64x32xf32>
    %c2_226 = arith.constant 2 : index
    %c2_227 = arith.constant 2 : index
    %c0_228 = arith.constant 0 : index
    %209 = vector.load %arg23[%c2_226, %c2_227, %c0_228] : memref<10x10x64xf32, #tpu.memory_space<vmem>>, vector<8x8x64xf32>
    %210 = vector.shape_cast %209 : vector<8x8x64xf32> to vector<64x64xf32>
    %211 = arith.truncf %210 : vector<64x64xf32> to vector<64x64xbf16>
    %c0_229 = arith.constant 0 : index
    %c8_230 = arith.constant 8 : index
    %c0_231 = arith.constant 0 : index
    %c0_232 = arith.constant 0 : index
    %212 = vector.load %arg7[%c0_229, %c8_230, %c0_231, %c0_232] : memref<1x9x64x32xbf16, #tpu.memory_space<vmem>>, vector<1x1x64x32xbf16>
    %213 = vector.shape_cast %212 : vector<1x1x64x32xbf16> to vector<64x32xbf16>
    %cst_233 = arith.constant dense<0.000000e+00> : vector<64x32xf32>
    %214 = tpu.matmul %211, %213, %cst_233 {dimension_numbers = #tpu.dot_dimension_numbers<[1], [0], [0], [1], [0, 0, 1, 1], [], []>} : vector<64x64xbf16>, vector<64x32xbf16>, vector<64x32xf32> -> vector<64x32xf32>
    %215 = arith.addf %208, %214 : vector<64x32xf32>
    %216 = vector.broadcast %150 : vector<1x32xf32> to vector<64x32xf32>
    %217 = arith.addf %215, %216 : vector<64x32xf32>
    %cst_234 = arith.constant 0.000000e+00 : f32
    %218 = vector.broadcast %cst_234 : f32 to vector<64x32xf32>
    %219 = arith.maximumf %217, %218 : vector<64x32xf32>
    %c0_i32_235 = arith.constant 0 : i32
    %220 = arith.cmpi eq, %arg1, %c0_i32_235 : i32
    %221 = arith.extui %220 : i1 to i32
    %c0_i32_236 = arith.constant 0 : i32
    %222 = arith.cmpi ne, %221, %c0_i32_236 : i32
    scf.if %222 {
      %c0_240 = arith.constant 0 : index
      %c0_241 = arith.constant 0 : index
      %229 = vector.load %arg25[%c0_240, %c0_241] : memref<64x32xf32, #tpu.memory_space<vmem>>, vector<64x32xf32>
      tpu.vector_store %arg25[%c0_240, %c0_241], %219 {strides = array<i32>} : memref<64x32xf32, #tpu.memory_space<vmem>>, vector<64x32xf32>,
    } else {
    }
    %c0_i32_237 = arith.constant 0 : i32
    %223 = arith.cmpi sgt, %arg1, %c0_i32_237 : i32
    %224 = arith.extui %223 : i1 to i32
    %c0_i32_238 = arith.constant 0 : i32
    %225 = arith.cmpi ne, %224, %c0_i32_238 : i32
    scf.if %225 {
      %c0_240 = arith.constant 0 : index
      %c0_241 = arith.constant 0 : index
      %229 = vector.load %arg25[%c0_240, %c0_241] : memref<64x32xf32, #tpu.memory_space<vmem>>, vector<64x32xf32>
      %230 = arith.addf %229, %219 : vector<64x32xf32>
      %c0_242 = arith.constant 0 : index
      %c0_243 = arith.constant 0 : index
      %231 = vector.load %arg25[%c0_242, %c0_243] : memref<64x32xf32, #tpu.memory_space<vmem>>, vector<64x32xf32>
      tpu.vector_store %arg25[%c0_242, %c0_243], %230 {strides = array<i32>} : memref<64x32xf32, #tpu.memory_space<vmem>>, vector<64x32xf32>,
    } else {
    }
    %c1_i32 = arith.constant 1 : i32
    %226 = arith.cmpi eq, %arg1, %c1_i32 : i32
    %227 = arith.extui %226 : i1 to i32
    %c0_i32_239 = arith.constant 0 : i32
    %228 = arith.cmpi ne, %227, %c0_i32_239 : i32
    scf.if %228 {
      %c0_240 = arith.constant 0 : index
      %c0_241 = arith.constant 0 : index
      %229 = vector.load %arg25[%c0_240, %c0_241] : memref<64x32xf32, #tpu.memory_space<vmem>>, vector<64x32xf32>
      %c0_242 = arith.constant 0 : index
      %c0_243 = arith.constant 0 : index
      %c0_244 = arith.constant 0 : index
      %230 = vector.load %arg15[%c0_242, %c0_243, %c0_244] : memref<2x6x32xf32, #tpu.memory_space<vmem>>, vector<1x6x32xf32>
      %231 = vector.shape_cast %230 : vector<1x6x32xf32> to vector<6x32xf32>
      %232 = vector.extract_strided_slice %231 {offsets = [0, 0], sizes = [1, 32], strides = [1, 1]} : vector<6x32xf32> to vector<1x32xf32>
      %233 = vector.extract_strided_slice %231 {offsets = [1, 0], sizes = [1, 32], strides = [1, 1]} : vector<6x32xf32> to vector<1x32xf32>
      %234 = vector.extract_strided_slice %231 {offsets = [2, 0], sizes = [1, 32], strides = [1, 1]} : vector<6x32xf32> to vector<1x32xf32>
      %235 = vector.extract_strided_slice %231 {offsets = [3, 0], sizes = [1, 32], strides = [1, 1]} : vector<6x32xf32> to vector<1x32xf32>
      %236 = vector.extract_strided_slice %231 {offsets = [4, 0], sizes = [1, 32], strides = [1, 1]} : vector<6x32xf32> to vector<1x32xf32>
      %237 = vector.extract_strided_slice %231 {offsets = [5, 0], sizes = [1, 32], strides = [1, 1]} : vector<6x32xf32> to vector<1x32xf32>
      %238 = arith.truncf %229 : vector<64x32xf32> to vector<64x32xbf16>
      %c0_245 = arith.constant 0 : index
      %c0_246 = arith.constant 0 : index
      %c0_247 = arith.constant 0 : index
      %239 = vector.load %arg9[%c0_245, %c0_246, %c0_247] : memref<2x32x96xbf16, #tpu.memory_space<vmem>>, vector<1x32x96xbf16>
      %240 = vector.shape_cast %239 : vector<1x32x96xbf16> to vector<32x96xbf16>
      %cst_248 = arith.constant dense<0.000000e+00> : vector<64x96xf32>
      %241 = tpu.matmul %238, %240, %cst_248 {dimension_numbers = #tpu.dot_dimension_numbers<[1], [0], [0], [1], [0, 0, 1, 1], [], []>} : vector<64x32xbf16>, vector<32x96xbf16>, vector<64x96xf32> -> vector<64x96xf32>
      %c0_249 = arith.constant 0 : index
      %c0_250 = arith.constant 0 : index
      %c0_251 = arith.constant 0 : index
      %242 = vector.load %arg10[%c0_249, %c0_250, %c0_251] : memref<2x1x96xf32, #tpu.memory_space<vmem>>, vector<1x1x96xf32>
      %243 = vector.shape_cast %242 : vector<1x1x96xf32> to vector<1x96xf32>
      %244 = vector.broadcast %243 : vector<1x96xf32> to vector<64x96xf32>
      %245 = arith.addf %241, %244 : vector<64x96xf32>
      %c0_252 = arith.constant 0 : index
      %c0_253 = arith.constant 0 : index
      %c0_254 = arith.constant 0 : index
      %246 = vector.load %arg11[%c0_252, %c0_253, %c0_254] : memref<2x32x32xbf16, #tpu.memory_space<vmem>>, vector<1x32x32xbf16>
      %247 = vector.shape_cast %246 : vector<1x32x32xbf16> to vector<32x32xbf16>
      %cst_255 = arith.constant 0.000000e+00 : f32
      %248 = vector.broadcast %cst_255 : f32 to vector<64x32xf32>
      %249 = vector.extract_strided_slice %245 {offsets = [0, 0], sizes = [64, 16], strides = [1, 1]} : vector<64x96xf32> to vector<64x16xf32>
      %250 = vector.extract_strided_slice %245 {offsets = [0, 32], sizes = [64, 16], strides = [1, 1]} : vector<64x96xf32> to vector<64x16xf32>
      %251 = vector.extract_strided_slice %245 {offsets = [0, 64], sizes = [64, 16], strides = [1, 1]} : vector<64x96xf32> to vector<64x16xf32>
      %252 = arith.truncf %249 : vector<64x16xf32> to vector<64x16xbf16>
      %cst_256 = arith.constant 0xFF800000 : f32
      %253 = vector.broadcast %cst_256 : f32 to vector<64x1xf32>
      %cst_257 = arith.constant 0.000000e+00 : f32
      %254 = vector.broadcast %cst_257 : f32 to vector<64x1xf32>
      %cst_258 = arith.constant 0.000000e+00 : f32
      %255 = vector.broadcast %cst_258 : f32 to vector<64x16xf32>
      %256 = arith.truncf %250 : vector<64x16xf32> to vector<64x16xbf16>
      %257 = arith.truncf %251 : vector<64x16xf32> to vector<64x16xbf16>
      %cst_259 = arith.constant dense<0.000000e+00> : vector<64x64xf32>
      %258 = tpu.matmul %252, %256, %cst_259 {dimension_numbers = #tpu.dot_dimension_numbers<[1], [1], [0], [0], [0, 0, 1, 0], [], []>} : vector<64x16xbf16>, vector<64x16xbf16>, vector<64x64xf32> -> vector<64x64xf32>
      %cst_260 = arith.constant 2.500000e-01 : f32
      %259 = vector.broadcast %cst_260 : f32 to vector<64x64xf32>
      %260 = arith.mulf %258, %259 : vector<64x64xf32>
      %cst_261 = arith.constant dense<0xFF800000> : vector<64xf32>
      %261 = vector.multi_reduction <maximumf>, %260, %cst_261 [1] : vector<64x64xf32> to vector<64xf32>
      %262 = vector.shape_cast %261 : vector<64xf32> to vector<64x1xf32>
      %263 = arith.maximumf %253, %262 : vector<64x1xf32>
      %264 = arith.subf %253, %263 : vector<64x1xf32>
      %265 = math.exp %264 : vector<64x1xf32>
      %266 = vector.broadcast %263 : vector<64x1xf32> to vector<64x64xf32>
      %267 = arith.subf %260, %266 : vector<64x64xf32>
      %268 = math.exp %267 : vector<64x64xf32>
      %269 = arith.mulf %265, %254 : vector<64x1xf32>
      %cst_262 = arith.constant dense<0.000000e+00> : vector<64xf32>
      %270 = vector.multi_reduction <add>, %268, %cst_262 [1] : vector<64x64xf32> to vector<64xf32>
      %271 = vector.shape_cast %270 : vector<64xf32> to vector<64x1xf32>
      %272 = arith.addf %269, %271 : vector<64x1xf32>
      %273 = vector.broadcast %265 : vector<64x1xf32> to vector<64x16xf32>
      %274 = arith.mulf %273, %255 : vector<64x16xf32>
      %275 = arith.truncf %268 : vector<64x64xf32> to vector<64x64xbf16>
      %cst_263 = arith.constant dense<0.000000e+00> : vector<64x16xf32>
      %276 = tpu.matmul %275, %257, %cst_263 {dimension_numbers = #tpu.dot_dimension_numbers<[1], [0], [0], [1], [0, 0, 1, 1], [], []>} : vector<64x64xbf16>, vector<64x16xbf16>, vector<64x16xf32> -> vector<64x16xf32>
      %277 = arith.addf %274, %276 : vector<64x16xf32>
      %278 = tpu.reciprocal %272 {approx = true} : vector<64x1xf32> -> vector<64x1xf32>
      %279 = vector.broadcast %278 : vector<64x1xf32> to vector<64x16xf32>
      %280 = arith.mulf %277, %279 : vector<64x16xf32>
      %281 = arith.truncf %280 : vector<64x16xf32> to vector<64x16xbf16>
      %282 = vector.extract_strided_slice %247 {offsets = [0, 0], sizes = [16, 32], strides = [1, 1]} : vector<32x32xbf16> to vector<16x32xbf16>
      %cst_264 = arith.constant dense<0.000000e+00> : vector<64x32xf32>
      %283 = tpu.matmul %281, %282, %cst_264 {dimension_numbers = #tpu.dot_dimension_numbers<[1], [0], [0], [1], [0, 0, 1, 1], [], []>} : vector<64x16xbf16>, vector<16x32xbf16>, vector<64x32xf32> -> vector<64x32xf32>
      %284 = arith.addf %248, %283 : vector<64x32xf32>
      %285 = vector.extract_strided_slice %245 {offsets = [0, 16], sizes = [64, 16], strides = [1, 1]} : vector<64x96xf32> to vector<64x16xf32>
      %286 = vector.extract_strided_slice %245 {offsets = [0, 48], sizes = [64, 16], strides = [1, 1]} : vector<64x96xf32> to vector<64x16xf32>
      %287 = vector.extract_strided_slice %245 {offsets = [0, 80], sizes = [64, 16], strides = [1, 1]} : vector<64x96xf32> to vector<64x16xf32>
      %288 = arith.truncf %285 : vector<64x16xf32> to vector<64x16xbf16>
      %cst_265 = arith.constant 0xFF800000 : f32
      %289 = vector.broadcast %cst_265 : f32 to vector<64x1xf32>
      %cst_266 = arith.constant 0.000000e+00 : f32
      %290 = vector.broadcast %cst_266 : f32 to vector<64x1xf32>
      %cst_267 = arith.constant 0.000000e+00 : f32
      %291 = vector.broadcast %cst_267 : f32 to vector<64x16xf32>
      %292 = arith.truncf %286 : vector<64x16xf32> to vector<64x16xbf16>
      %293 = arith.truncf %287 : vector<64x16xf32> to vector<64x16xbf16>
      %cst_268 = arith.constant dense<0.000000e+00> : vector<64x64xf32>
      %294 = tpu.matmul %288, %292, %cst_268 {dimension_numbers = #tpu.dot_dimension_numbers<[1], [1], [0], [0], [0, 0, 1, 0], [], []>} : vector<64x16xbf16>, vector<64x16xbf16>, vector<64x64xf32> -> vector<64x64xf32>
      %cst_269 = arith.constant 2.500000e-01 : f32
      %295 = vector.broadcast %cst_269 : f32 to vector<64x64xf32>
      %296 = arith.mulf %294, %295 : vector<64x64xf32>
      %cst_270 = arith.constant dense<0xFF800000> : vector<64xf32>
      %297 = vector.multi_reduction <maximumf>, %296, %cst_270 [1] : vector<64x64xf32> to vector<64xf32>
      %298 = vector.shape_cast %297 : vector<64xf32> to vector<64x1xf32>
      %299 = arith.maximumf %289, %298 : vector<64x1xf32>
      %300 = arith.subf %289, %299 : vector<64x1xf32>
      %301 = math.exp %300 : vector<64x1xf32>
      %302 = vector.broadcast %299 : vector<64x1xf32> to vector<64x64xf32>
      %303 = arith.subf %296, %302 : vector<64x64xf32>
      %304 = math.exp %303 : vector<64x64xf32>
      %305 = arith.mulf %301, %290 : vector<64x1xf32>
      %cst_271 = arith.constant dense<0.000000e+00> : vector<64xf32>
      %306 = vector.multi_reduction <add>, %304, %cst_271 [1] : vector<64x64xf32> to vector<64xf32>
      %307 = vector.shape_cast %306 : vector<64xf32> to vector<64x1xf32>
      %308 = arith.addf %305, %307 : vector<64x1xf32>
      %309 = vector.broadcast %301 : vector<64x1xf32> to vector<64x16xf32>
      %310 = arith.mulf %309, %291 : vector<64x16xf32>
      %311 = arith.truncf %304 : vector<64x64xf32> to vector<64x64xbf16>
      %cst_272 = arith.constant dense<0.000000e+00> : vector<64x16xf32>
      %312 = tpu.matmul %311, %293, %cst_272 {dimension_numbers = #tpu.dot_dimension_numbers<[1], [0], [0], [1], [0, 0, 1, 1], [], []>} : vector<64x64xbf16>, vector<64x16xbf16>, vector<64x16xf32> -> vector<64x16xf32>
      %313 = arith.addf %310, %312 : vector<64x16xf32>
      %314 = tpu.reciprocal %308 {approx = true} : vector<64x1xf32> -> vector<64x1xf32>
      %315 = vector.broadcast %314 : vector<64x1xf32> to vector<64x16xf32>
      %316 = arith.mulf %313, %315 : vector<64x16xf32>
      %317 = arith.truncf %316 : vector<64x16xf32> to vector<64x16xbf16>
      %318 = vector.extract_strided_slice %247 {offsets = [16, 0], sizes = [16, 32], strides = [1, 1]} : vector<32x32xbf16> to vector<16x32xbf16>
      %cst_273 = arith.constant dense<0.000000e+00> : vector<64x32xf32>
      %319 = tpu.matmul %317, %318, %cst_273 {dimension_numbers = #tpu.dot_dimension_numbers<[1], [0], [0], [1], [0, 0, 1, 1], [], []>} : vector<64x16xbf16>, vector<16x32xbf16>, vector<64x32xf32> -> vector<64x32xf32>
      %320 = arith.addf %284, %319 : vector<64x32xf32>
      %321 = vector.broadcast %232 : vector<1x32xf32> to vector<64x32xf32>
      %322 = arith.addf %320, %321 : vector<64x32xf32>
      %323 = arith.addf %229, %322 : vector<64x32xf32>
      %cst_274 = arith.constant dense<0.000000e+00> : vector<64xf32>
      %324 = vector.multi_reduction <add>, %323, %cst_274 [1] : vector<64x32xf32> to vector<64xf32>
      %325 = vector.shape_cast %324 : vector<64xf32> to vector<64x1xf32>
      %cst_275 = arith.constant 3.200000e+01 : f32
      %326 = vector.broadcast %cst_275 : f32 to vector<64x1xf32>
      %327 = arith.divf %325, %326 : vector<64x1xf32>
      %328 = vector.broadcast %327 : vector<64x1xf32> to vector<64x32xf32>
      %329 = arith.subf %323, %328 : vector<64x32xf32>
      %330 = arith.mulf %329, %329 : vector<64x32xf32>
      %cst_276 = arith.constant dense<0.000000e+00> : vector<64xf32>
      %331 = vector.multi_reduction <add>, %330, %cst_276 [1] : vector<64x32xf32> to vector<64xf32>
      %332 = vector.shape_cast %331 : vector<64xf32> to vector<64x1xf32>
      %cst_277 = arith.constant 3.200000e+01 : f32
      %333 = vector.broadcast %cst_277 : f32 to vector<64x1xf32>
      %334 = arith.divf %332, %333 : vector<64x1xf32>
      %335 = vector.broadcast %327 : vector<64x1xf32> to vector<64x32xf32>
      %336 = arith.subf %323, %335 : vector<64x32xf32>
      %cst_278 = arith.constant 9.99999974E-6 : f32
      %337 = vector.broadcast %cst_278 : f32 to vector<64x1xf32>
      %338 = arith.addf %334, %337 : vector<64x1xf32>
      %339 = math.rsqrt %338 : vector<64x1xf32>
      %340 = vector.broadcast %339 : vector<64x1xf32> to vector<64x32xf32>
      %341 = arith.mulf %336, %340 : vector<64x32xf32>
      %342 = vector.broadcast %234 : vector<1x32xf32> to vector<64x32xf32>
      %343 = arith.mulf %341, %342 : vector<64x32xf32>
      %344 = vector.broadcast %235 : vector<1x32xf32> to vector<64x32xf32>
      %345 = arith.addf %343, %344 : vector<64x32xf32>
      %346 = arith.truncf %345 : vector<64x32xf32> to vector<64x32xbf16>
      %c0_279 = arith.constant 0 : index
      %c0_280 = arith.constant 0 : index
      %c0_281 = arith.constant 0 : index
      %347 = vector.load %arg12[%c0_279, %c0_280, %c0_281] : memref<2x32x64xbf16, #tpu.memory_space<vmem>>, vector<1x32x64xbf16>
      %348 = vector.shape_cast %347 : vector<1x32x64xbf16> to vector<32x64xbf16>
      %cst_282 = arith.constant dense<0.000000e+00> : vector<64x64xf32>
      %349 = tpu.matmul %346, %348, %cst_282 {dimension_numbers = #tpu.dot_dimension_numbers<[1], [0], [0], [1], [0, 0, 1, 1], [], []>} : vector<64x32xbf16>, vector<32x64xbf16>, vector<64x64xf32> -> vector<64x64xf32>
      %c0_283 = arith.constant 0 : index
      %c0_284 = arith.constant 0 : index
      %c0_285 = arith.constant 0 : index
      %350 = vector.load %arg13[%c0_283, %c0_284, %c0_285] : memref<2x1x64xf32, #tpu.memory_space<vmem>>, vector<1x1x64xf32>
      %351 = vector.shape_cast %350 : vector<1x1x64xf32> to vector<1x64xf32>
      %352 = vector.broadcast %351 : vector<1x64xf32> to vector<64x64xf32>
      %353 = arith.addf %349, %352 : vector<64x64xf32>
      %cst_286 = arith.constant 0.000000e+00 : f32
      %354 = vector.broadcast %cst_286 : f32 to vector<64x64xf32>
      %355 = arith.maximumf %353, %354 : vector<64x64xf32>
      %356 = arith.truncf %355 : vector<64x64xf32> to vector<64x64xbf16>
      %c0_287 = arith.constant 0 : index
      %c0_288 = arith.constant 0 : index
      %c0_289 = arith.constant 0 : index
      %357 = vector.load %arg14[%c0_287, %c0_288, %c0_289] : memref<2x64x32xbf16, #tpu.memory_space<vmem>>, vector<1x64x32xbf16>
      %358 = vector.shape_cast %357 : vector<1x64x32xbf16> to vector<64x32xbf16>
      %cst_290 = arith.constant dense<0.000000e+00> : vector<64x32xf32>
      %359 = tpu.matmul %356, %358, %cst_290 {dimension_numbers = #tpu.dot_dimension_numbers<[1], [0], [0], [1], [0, 0, 1, 1], [], []>} : vector<64x64xbf16>, vector<64x32xbf16>, vector<64x32xf32> -> vector<64x32xf32>
      %360 = vector.broadcast %233 : vector<1x32xf32> to vector<64x32xf32>
      %361 = arith.addf %359, %360 : vector<64x32xf32>
      %362 = arith.addf %345, %361 : vector<64x32xf32>
      %cst_291 = arith.constant dense<0.000000e+00> : vector<64xf32>
      %363 = vector.multi_reduction <add>, %362, %cst_291 [1] : vector<64x32xf32> to vector<64xf32>
      %364 = vector.shape_cast %363 : vector<64xf32> to vector<64x1xf32>
      %cst_292 = arith.constant 3.200000e+01 : f32
      %365 = vector.broadcast %cst_292 : f32 to vector<64x1xf32>
      %366 = arith.divf %364, %365 : vector<64x1xf32>
      %367 = vector.broadcast %366 : vector<64x1xf32> to vector<64x32xf32>
      %368 = arith.subf %362, %367 : vector<64x32xf32>
      %369 = arith.mulf %368, %368 : vector<64x32xf32>
      %cst_293 = arith.constant dense<0.000000e+00> : vector<64xf32>
      %370 = vector.multi_reduction <add>, %369, %cst_293 [1] : vector<64x32xf32> to vector<64xf32>
      %371 = vector.shape_cast %370 : vector<64xf32> to vector<64x1xf32>
      %cst_294 = arith.constant 3.200000e+01 : f32
      %372 = vector.broadcast %cst_294 : f32 to vector<64x1xf32>
      %373 = arith.divf %371, %372 : vector<64x1xf32>
      %374 = vector.broadcast %366 : vector<64x1xf32> to vector<64x32xf32>
      %375 = arith.subf %362, %374 : vector<64x32xf32>
      %cst_295 = arith.constant 9.99999974E-6 : f32
      %376 = vector.broadcast %cst_295 : f32 to vector<64x1xf32>
      %377 = arith.addf %373, %376 : vector<64x1xf32>
      %378 = math.rsqrt %377 : vector<64x1xf32>
      %379 = vector.broadcast %378 : vector<64x1xf32> to vector<64x32xf32>
      %380 = arith.mulf %375, %379 : vector<64x32xf32>
      %381 = vector.broadcast %236 : vector<1x32xf32> to vector<64x32xf32>
      %382 = arith.mulf %380, %381 : vector<64x32xf32>
      %383 = vector.broadcast %237 : vector<1x32xf32> to vector<64x32xf32>
      %384 = arith.addf %382, %383 : vector<64x32xf32>
      %c1_296 = arith.constant 1 : index
      %c0_297 = arith.constant 0 : index
      %c0_298 = arith.constant 0 : index
      %385 = vector.load %arg15[%c1_296, %c0_297, %c0_298] : memref<2x6x32xf32, #tpu.memory_space<vmem>>, vector<1x6x32xf32>
      %386 = vector.shape_cast %385 : vector<1x6x32xf32> to vector<6x32xf32>
      %387 = vector.extract_strided_slice %386 {offsets = [0, 0], sizes = [1, 32], strides = [1, 1]} : vector<6x32xf32> to vector<1x32xf32>
      %388 = vector.extract_strided_slice %386 {offsets = [1, 0], sizes = [1, 32], strides = [1, 1]} : vector<6x32xf32> to vector<1x32xf32>
      %389 = vector.extract_strided_slice %386 {offsets = [2, 0], sizes = [1, 32], strides = [1, 1]} : vector<6x32xf32> to vector<1x32xf32>
      %390 = vector.extract_strided_slice %386 {offsets = [3, 0], sizes = [1, 32], strides = [1, 1]} : vector<6x32xf32> to vector<1x32xf32>
      %391 = vector.extract_strided_slice %386 {offsets = [4, 0], sizes = [1, 32], strides = [1, 1]} : vector<6x32xf32> to vector<1x32xf32>
      %392 = vector.extract_strided_slice %386 {offsets = [5, 0], sizes = [1, 32], strides = [1, 1]} : vector<6x32xf32> to vector<1x32xf32>
      %393 = arith.truncf %384 : vector<64x32xf32> to vector<64x32xbf16>
      %c1_299 = arith.constant 1 : index
      %c0_300 = arith.constant 0 : index
      %c0_301 = arith.constant 0 : index
      %394 = vector.load %arg9[%c1_299, %c0_300, %c0_301] : memref<2x32x96xbf16, #tpu.memory_space<vmem>>, vector<1x32x96xbf16>
      %395 = vector.shape_cast %394 : vector<1x32x96xbf16> to vector<32x96xbf16>
      %cst_302 = arith.constant dense<0.000000e+00> : vector<64x96xf32>
      %396 = tpu.matmul %393, %395, %cst_302 {dimension_numbers = #tpu.dot_dimension_numbers<[1], [0], [0], [1], [0, 0, 1, 1], [], []>} : vector<64x32xbf16>, vector<32x96xbf16>, vector<64x96xf32> -> vector<64x96xf32>
      %c1_303 = arith.constant 1 : index
      %c0_304 = arith.constant 0 : index
      %c0_305 = arith.constant 0 : index
      %397 = vector.load %arg10[%c1_303, %c0_304, %c0_305] : memref<2x1x96xf32, #tpu.memory_space<vmem>>, vector<1x1x96xf32>
      %398 = vector.shape_cast %397 : vector<1x1x96xf32> to vector<1x96xf32>
      %399 = vector.broadcast %398 : vector<1x96xf32> to vector<64x96xf32>
      %400 = arith.addf %396, %399 : vector<64x96xf32>
      %c1_306 = arith.constant 1 : index
      %c0_307 = arith.constant 0 : index
      %c0_308 = arith.constant 0 : index
      %401 = vector.load %arg11[%c1_306, %c0_307, %c0_308] : memref<2x32x32xbf16, #tpu.memory_space<vmem>>, vector<1x32x32xbf16>
      %402 = vector.shape_cast %401 : vector<1x32x32xbf16> to vector<32x32xbf16>
      %cst_309 = arith.constant 0.000000e+00 : f32
      %403 = vector.broadcast %cst_309 : f32 to vector<64x32xf32>
      %404 = vector.extract_strided_slice %400 {offsets = [0, 0], sizes = [64, 16], strides = [1, 1]} : vector<64x96xf32> to vector<64x16xf32>
      %405 = vector.extract_strided_slice %400 {offsets = [0, 32], sizes = [64, 16], strides = [1, 1]} : vector<64x96xf32> to vector<64x16xf32>
      %406 = vector.extract_strided_slice %400 {offsets = [0, 64], sizes = [64, 16], strides = [1, 1]} : vector<64x96xf32> to vector<64x16xf32>
      %407 = arith.truncf %404 : vector<64x16xf32> to vector<64x16xbf16>
      %cst_310 = arith.constant 0xFF800000 : f32
      %408 = vector.broadcast %cst_310 : f32 to vector<64x1xf32>
      %cst_311 = arith.constant 0.000000e+00 : f32
      %409 = vector.broadcast %cst_311 : f32 to vector<64x1xf32>
      %cst_312 = arith.constant 0.000000e+00 : f32
      %410 = vector.broadcast %cst_312 : f32 to vector<64x16xf32>
      %411 = arith.truncf %405 : vector<64x16xf32> to vector<64x16xbf16>
      %412 = arith.truncf %406 : vector<64x16xf32> to vector<64x16xbf16>
      %cst_313 = arith.constant dense<0.000000e+00> : vector<64x64xf32>
      %413 = tpu.matmul %407, %411, %cst_313 {dimension_numbers = #tpu.dot_dimension_numbers<[1], [1], [0], [0], [0, 0, 1, 0], [], []>} : vector<64x16xbf16>, vector<64x16xbf16>, vector<64x64xf32> -> vector<64x64xf32>
      %cst_314 = arith.constant 2.500000e-01 : f32
      %414 = vector.broadcast %cst_314 : f32 to vector<64x64xf32>
      %415 = arith.mulf %413, %414 : vector<64x64xf32>
      %cst_315 = arith.constant dense<0xFF800000> : vector<64xf32>
      %416 = vector.multi_reduction <maximumf>, %415, %cst_315 [1] : vector<64x64xf32> to vector<64xf32>
      %417 = vector.shape_cast %416 : vector<64xf32> to vector<64x1xf32>
      %418 = arith.maximumf %408, %417 : vector<64x1xf32>
      %419 = arith.subf %408, %418 : vector<64x1xf32>
      %420 = math.exp %419 : vector<64x1xf32>
      %421 = vector.broadcast %418 : vector<64x1xf32> to vector<64x64xf32>
      %422 = arith.subf %415, %421 : vector<64x64xf32>
      %423 = math.exp %422 : vector<64x64xf32>
      %424 = arith.mulf %420, %409 : vector<64x1xf32>
      %cst_316 = arith.constant dense<0.000000e+00> : vector<64xf32>
      %425 = vector.multi_reduction <add>, %423, %cst_316 [1] : vector<64x64xf32> to vector<64xf32>
      %426 = vector.shape_cast %425 : vector<64xf32> to vector<64x1xf32>
      %427 = arith.addf %424, %426 : vector<64x1xf32>
      %428 = vector.broadcast %420 : vector<64x1xf32> to vector<64x16xf32>
      %429 = arith.mulf %428, %410 : vector<64x16xf32>
      %430 = arith.truncf %423 : vector<64x64xf32> to vector<64x64xbf16>
      %cst_317 = arith.constant dense<0.000000e+00> : vector<64x16xf32>
      %431 = tpu.matmul %430, %412, %cst_317 {dimension_numbers = #tpu.dot_dimension_numbers<[1], [0], [0], [1], [0, 0, 1, 1], [], []>} : vector<64x64xbf16>, vector<64x16xbf16>, vector<64x16xf32> -> vector<64x16xf32>
      %432 = arith.addf %429, %431 : vector<64x16xf32>
      %433 = tpu.reciprocal %427 {approx = true} : vector<64x1xf32> -> vector<64x1xf32>
      %434 = vector.broadcast %433 : vector<64x1xf32> to vector<64x16xf32>
      %435 = arith.mulf %432, %434 : vector<64x16xf32>
      %436 = arith.truncf %435 : vector<64x16xf32> to vector<64x16xbf16>
      %437 = vector.extract_strided_slice %402 {offsets = [0, 0], sizes = [16, 32], strides = [1, 1]} : vector<32x32xbf16> to vector<16x32xbf16>
      %cst_318 = arith.constant dense<0.000000e+00> : vector<64x32xf32>
      %438 = tpu.matmul %436, %437, %cst_318 {dimension_numbers = #tpu.dot_dimension_numbers<[1], [0], [0], [1], [0, 0, 1, 1], [], []>} : vector<64x16xbf16>, vector<16x32xbf16>, vector<64x32xf32> -> vector<64x32xf32>
      %439 = arith.addf %403, %438 : vector<64x32xf32>
      %440 = vector.extract_strided_slice %400 {offsets = [0, 16], sizes = [64, 16], strides = [1, 1]} : vector<64x96xf32> to vector<64x16xf32>
      %441 = vector.extract_strided_slice %400 {offsets = [0, 48], sizes = [64, 16], strides = [1, 1]} : vector<64x96xf32> to vector<64x16xf32>
      %442 = vector.extract_strided_slice %400 {offsets = [0, 80], sizes = [64, 16], strides = [1, 1]} : vector<64x96xf32> to vector<64x16xf32>
      %443 = arith.truncf %440 : vector<64x16xf32> to vector<64x16xbf16>
      %cst_319 = arith.constant 0xFF800000 : f32
      %444 = vector.broadcast %cst_319 : f32 to vector<64x1xf32>
      %cst_320 = arith.constant 0.000000e+00 : f32
      %445 = vector.broadcast %cst_320 : f32 to vector<64x1xf32>
      %cst_321 = arith.constant 0.000000e+00 : f32
      %446 = vector.broadcast %cst_321 : f32 to vector<64x16xf32>
      %447 = arith.truncf %441 : vector<64x16xf32> to vector<64x16xbf16>
      %448 = arith.truncf %442 : vector<64x16xf32> to vector<64x16xbf16>
      %cst_322 = arith.constant dense<0.000000e+00> : vector<64x64xf32>
      %449 = tpu.matmul %443, %447, %cst_322 {dimension_numbers = #tpu.dot_dimension_numbers<[1], [1], [0], [0], [0, 0, 1, 0], [], []>} : vector<64x16xbf16>, vector<64x16xbf16>, vector<64x64xf32> -> vector<64x64xf32>
      %cst_323 = arith.constant 2.500000e-01 : f32
      %450 = vector.broadcast %cst_323 : f32 to vector<64x64xf32>
      %451 = arith.mulf %449, %450 : vector<64x64xf32>
      %cst_324 = arith.constant dense<0xFF800000> : vector<64xf32>
      %452 = vector.multi_reduction <maximumf>, %451, %cst_324 [1] : vector<64x64xf32> to vector<64xf32>
      %453 = vector.shape_cast %452 : vector<64xf32> to vector<64x1xf32>
      %454 = arith.maximumf %444, %453 : vector<64x1xf32>
      %455 = arith.subf %444, %454 : vector<64x1xf32>
      %456 = math.exp %455 : vector<64x1xf32>
      %457 = vector.broadcast %454 : vector<64x1xf32> to vector<64x64xf32>
      %458 = arith.subf %451, %457 : vector<64x64xf32>
      %459 = math.exp %458 : vector<64x64xf32>
      %460 = arith.mulf %456, %445 : vector<64x1xf32>
      %cst_325 = arith.constant dense<0.000000e+00> : vector<64xf32>
      %461 = vector.multi_reduction <add>, %459, %cst_325 [1] : vector<64x64xf32> to vector<64xf32>
      %462 = vector.shape_cast %461 : vector<64xf32> to vector<64x1xf32>
      %463 = arith.addf %460, %462 : vector<64x1xf32>
      %464 = vector.broadcast %456 : vector<64x1xf32> to vector<64x16xf32>
      %465 = arith.mulf %464, %446 : vector<64x16xf32>
      %466 = arith.truncf %459 : vector<64x64xf32> to vector<64x64xbf16>
      %cst_326 = arith.constant dense<0.000000e+00> : vector<64x16xf32>
      %467 = tpu.matmul %466, %448, %cst_326 {dimension_numbers = #tpu.dot_dimension_numbers<[1], [0], [0], [1], [0, 0, 1, 1], [], []>} : vector<64x64xbf16>, vector<64x16xbf16>, vector<64x16xf32> -> vector<64x16xf32>
      %468 = arith.addf %465, %467 : vector<64x16xf32>
      %469 = tpu.reciprocal %463 {approx = true} : vector<64x1xf32> -> vector<64x1xf32>
      %470 = vector.broadcast %469 : vector<64x1xf32> to vector<64x16xf32>
      %471 = arith.mulf %468, %470 : vector<64x16xf32>
      %472 = arith.truncf %471 : vector<64x16xf32> to vector<64x16xbf16>
      %473 = vector.extract_strided_slice %402 {offsets = [16, 0], sizes = [16, 32], strides = [1, 1]} : vector<32x32xbf16> to vector<16x32xbf16>
      %cst_327 = arith.constant dense<0.000000e+00> : vector<64x32xf32>
      %474 = tpu.matmul %472, %473, %cst_327 {dimension_numbers = #tpu.dot_dimension_numbers<[1], [0], [0], [1], [0, 0, 1, 1], [], []>} : vector<64x16xbf16>, vector<16x32xbf16>, vector<64x32xf32> -> vector<64x32xf32>
      %475 = arith.addf %439, %474 : vector<64x32xf32>
      %476 = vector.broadcast %387 : vector<1x32xf32> to vector<64x32xf32>
      %477 = arith.addf %475, %476 : vector<64x32xf32>
      %478 = arith.addf %384, %477 : vector<64x32xf32>
      %cst_328 = arith.constant dense<0.000000e+00> : vector<64xf32>
      %479 = vector.multi_reduction <add>, %478, %cst_328 [1] : vector<64x32xf32> to vector<64xf32>
      %480 = vector.shape_cast %479 : vector<64xf32> to vector<64x1xf32>
      %cst_329 = arith.constant 3.200000e+01 : f32
      %481 = vector.broadcast %cst_329 : f32 to vector<64x1xf32>
      %482 = arith.divf %480, %481 : vector<64x1xf32>
      %483 = vector.broadcast %482 : vector<64x1xf32> to vector<64x32xf32>
      %484 = arith.subf %478, %483 : vector<64x32xf32>
      %485 = arith.mulf %484, %484 : vector<64x32xf32>
      %cst_330 = arith.constant dense<0.000000e+00> : vector<64xf32>
      %486 = vector.multi_reduction <add>, %485, %cst_330 [1] : vector<64x32xf32> to vector<64xf32>
      %487 = vector.shape_cast %486 : vector<64xf32> to vector<64x1xf32>
      %cst_331 = arith.constant 3.200000e+01 : f32
      %488 = vector.broadcast %cst_331 : f32 to vector<64x1xf32>
      %489 = arith.divf %487, %488 : vector<64x1xf32>
      %490 = vector.broadcast %482 : vector<64x1xf32> to vector<64x32xf32>
      %491 = arith.subf %478, %490 : vector<64x32xf32>
      %cst_332 = arith.constant 9.99999974E-6 : f32
      %492 = vector.broadcast %cst_332 : f32 to vector<64x1xf32>
      %493 = arith.addf %489, %492 : vector<64x1xf32>
      %494 = math.rsqrt %493 : vector<64x1xf32>
      %495 = vector.broadcast %494 : vector<64x1xf32> to vector<64x32xf32>
      %496 = arith.mulf %491, %495 : vector<64x32xf32>
      %497 = vector.broadcast %389 : vector<1x32xf32> to vector<64x32xf32>
      %498 = arith.mulf %496, %497 : vector<64x32xf32>
      %499 = vector.broadcast %390 : vector<1x32xf32> to vector<64x32xf32>
      %500 = arith.addf %498, %499 : vector<64x32xf32>
      %501 = arith.truncf %500 : vector<64x32xf32> to vector<64x32xbf16>
      %c1_333 = arith.constant 1 : index
      %c0_334 = arith.constant 0 : index
      %c0_335 = arith.constant 0 : index
      %502 = vector.load %arg12[%c1_333, %c0_334, %c0_335] : memref<2x32x64xbf16, #tpu.memory_space<vmem>>, vector<1x32x64xbf16>
      %503 = vector.shape_cast %502 : vector<1x32x64xbf16> to vector<32x64xbf16>
      %cst_336 = arith.constant dense<0.000000e+00> : vector<64x64xf32>
      %504 = tpu.matmul %501, %503, %cst_336 {dimension_numbers = #tpu.dot_dimension_numbers<[1], [0], [0], [1], [0, 0, 1, 1], [], []>} : vector<64x32xbf16>, vector<32x64xbf16>, vector<64x64xf32> -> vector<64x64xf32>
      %c1_337 = arith.constant 1 : index
      %c0_338 = arith.constant 0 : index
      %c0_339 = arith.constant 0 : index
      %505 = vector.load %arg13[%c1_337, %c0_338, %c0_339] : memref<2x1x64xf32, #tpu.memory_space<vmem>>, vector<1x1x64xf32>
      %506 = vector.shape_cast %505 : vector<1x1x64xf32> to vector<1x64xf32>
      %507 = vector.broadcast %506 : vector<1x64xf32> to vector<64x64xf32>
      %508 = arith.addf %504, %507 : vector<64x64xf32>
      %cst_340 = arith.constant 0.000000e+00 : f32
      %509 = vector.broadcast %cst_340 : f32 to vector<64x64xf32>
      %510 = arith.maximumf %508, %509 : vector<64x64xf32>
      %511 = arith.truncf %510 : vector<64x64xf32> to vector<64x64xbf16>
      %c1_341 = arith.constant 1 : index
      %c0_342 = arith.constant 0 : index
      %c0_343 = arith.constant 0 : index
      %512 = vector.load %arg14[%c1_341, %c0_342, %c0_343] : memref<2x64x32xbf16, #tpu.memory_space<vmem>>, vector<1x64x32xbf16>
      %513 = vector.shape_cast %512 : vector<1x64x32xbf16> to vector<64x32xbf16>
      %cst_344 = arith.constant dense<0.000000e+00> : vector<64x32xf32>
      %514 = tpu.matmul %511, %513, %cst_344 {dimension_numbers = #tpu.dot_dimension_numbers<[1], [0], [0], [1], [0, 0, 1, 1], [], []>} : vector<64x64xbf16>, vector<64x32xbf16>, vector<64x32xf32> -> vector<64x32xf32>
      %515 = vector.broadcast %388 : vector<1x32xf32> to vector<64x32xf32>
      %516 = arith.addf %514, %515 : vector<64x32xf32>
      %517 = arith.addf %500, %516 : vector<64x32xf32>
      %cst_345 = arith.constant dense<0.000000e+00> : vector<64xf32>
      %518 = vector.multi_reduction <add>, %517, %cst_345 [1] : vector<64x32xf32> to vector<64xf32>
      %519 = vector.shape_cast %518 : vector<64xf32> to vector<64x1xf32>
      %cst_346 = arith.constant 3.200000e+01 : f32
      %520 = vector.broadcast %cst_346 : f32 to vector<64x1xf32>
      %521 = arith.divf %519, %520 : vector<64x1xf32>
      %522 = vector.broadcast %521 : vector<64x1xf32> to vector<64x32xf32>
      %523 = arith.subf %517, %522 : vector<64x32xf32>
      %524 = arith.mulf %523, %523 : vector<64x32xf32>
      %cst_347 = arith.constant dense<0.000000e+00> : vector<64xf32>
      %525 = vector.multi_reduction <add>, %524, %cst_347 [1] : vector<64x32xf32> to vector<64xf32>
      %526 = vector.shape_cast %525 : vector<64xf32> to vector<64x1xf32>
      %cst_348 = arith.constant 3.200000e+01 : f32
      %527 = vector.broadcast %cst_348 : f32 to vector<64x1xf32>
      %528 = arith.divf %526, %527 : vector<64x1xf32>
      %529 = vector.broadcast %521 : vector<64x1xf32> to vector<64x32xf32>
      %530 = arith.subf %517, %529 : vector<64x32xf32>
      %cst_349 = arith.constant 9.99999974E-6 : f32
      %531 = vector.broadcast %cst_349 : f32 to vector<64x1xf32>
      %532 = arith.addf %528, %531 : vector<64x1xf32>
      %533 = math.rsqrt %532 : vector<64x1xf32>
      %534 = vector.broadcast %533 : vector<64x1xf32> to vector<64x32xf32>
      %535 = arith.mulf %530, %534 : vector<64x32xf32>
      %536 = vector.broadcast %391 : vector<1x32xf32> to vector<64x32xf32>
      %537 = arith.mulf %535, %536 : vector<64x32xf32>
      %538 = vector.broadcast %392 : vector<1x32xf32> to vector<64x32xf32>
      %539 = arith.addf %537, %538 : vector<64x32xf32>
      %540 = vector.shape_cast %539 : vector<64x32xf32> to vector<8x8x32xf32>
      %c0_350 = arith.constant 0 : index
      %c0_351 = arith.constant 0 : index
      %541 = vector.load %arg17[%c0_350, %c0_351] : memref<1x64xf32, #tpu.memory_space<vmem>>, vector<1x64xf32>
      %c1_352 = arith.constant 1 : index
      %c1_353 = arith.constant 1 : index
      %c0_354 = arith.constant 0 : index
      %542 = vector.load %arg24[%c1_352, %c1_353, %c0_354] : memref<10x10x32xf32, #tpu.memory_space<vmem>>, vector<8x8x32xf32>
      tpu.vector_store %arg24[%c1_352, %c1_353, %c0_354], %540 {strides = array<i32>} : memref<10x10x32xf32, #tpu.memory_space<vmem>>, vector<8x8x32xf32>,
      %cst_355 = arith.constant 0.000000e+00 : f32
      %543 = vector.broadcast %cst_355 : f32 to vector<64x64xf32>
      %c0_356 = arith.constant 0 : index
      %c0_357 = arith.constant 0 : index
      %c0_358 = arith.constant 0 : index
      %544 = vector.load %arg24[%c0_356, %c0_357, %c0_358] : memref<10x10x32xf32, #tpu.memory_space<vmem>>, vector<8x8x32xf32>
      %545 = vector.shape_cast %544 : vector<8x8x32xf32> to vector<64x32xf32>
      %546 = arith.truncf %545 : vector<64x32xf32> to vector<64x32xbf16>
      %c0_359 = arith.constant 0 : index
      %c0_360 = arith.constant 0 : index
      %c0_361 = arith.constant 0 : index
      %547 = vector.load %arg16[%c0_359, %c0_360, %c0_361] : memref<9x32x64xbf16, #tpu.memory_space<vmem>>, vector<1x32x64xbf16>
      %548 = vector.shape_cast %547 : vector<1x32x64xbf16> to vector<32x64xbf16>
      %cst_362 = arith.constant dense<0.000000e+00> : vector<64x64xf32>
      %549 = tpu.matmul %546, %548, %cst_362 {dimension_numbers = #tpu.dot_dimension_numbers<[1], [0], [0], [1], [0, 0, 1, 1], [], []>} : vector<64x32xbf16>, vector<32x64xbf16>, vector<64x64xf32> -> vector<64x64xf32>
      %550 = arith.addf %543, %549 : vector<64x64xf32>
      %c0_363 = arith.constant 0 : index
      %c1_364 = arith.constant 1 : index
      %c0_365 = arith.constant 0 : index
      %551 = vector.load %arg24[%c0_363, %c1_364, %c0_365] : memref<10x10x32xf32, #tpu.memory_space<vmem>>, vector<8x8x32xf32>
      %552 = vector.shape_cast %551 : vector<8x8x32xf32> to vector<64x32xf32>
      %553 = arith.truncf %552 : vector<64x32xf32> to vector<64x32xbf16>
      %c1_366 = arith.constant 1 : index
      %c0_367 = arith.constant 0 : index
      %c0_368 = arith.constant 0 : index
      %554 = vector.load %arg16[%c1_366, %c0_367, %c0_368] : memref<9x32x64xbf16, #tpu.memory_space<vmem>>, vector<1x32x64xbf16>
      %555 = vector.shape_cast %554 : vector<1x32x64xbf16> to vector<32x64xbf16>
      %cst_369 = arith.constant dense<0.000000e+00> : vector<64x64xf32>
      %556 = tpu.matmul %553, %555, %cst_369 {dimension_numbers = #tpu.dot_dimension_numbers<[1], [0], [0], [1], [0, 0, 1, 1], [], []>} : vector<64x32xbf16>, vector<32x64xbf16>, vector<64x64xf32> -> vector<64x64xf32>
      %557 = arith.addf %550, %556 : vector<64x64xf32>
      %c0_370 = arith.constant 0 : index
      %c2_371 = arith.constant 2 : index
      %c0_372 = arith.constant 0 : index
      %558 = vector.load %arg24[%c0_370, %c2_371, %c0_372] : memref<10x10x32xf32, #tpu.memory_space<vmem>>, vector<8x8x32xf32>
      %559 = vector.shape_cast %558 : vector<8x8x32xf32> to vector<64x32xf32>
      %560 = arith.truncf %559 : vector<64x32xf32> to vector<64x32xbf16>
      %c2_373 = arith.constant 2 : index
      %c0_374 = arith.constant 0 : index
      %c0_375 = arith.constant 0 : index
      %561 = vector.load %arg16[%c2_373, %c0_374, %c0_375] : memref<9x32x64xbf16, #tpu.memory_space<vmem>>, vector<1x32x64xbf16>
      %562 = vector.shape_cast %561 : vector<1x32x64xbf16> to vector<32x64xbf16>
      %cst_376 = arith.constant dense<0.000000e+00> : vector<64x64xf32>
      %563 = tpu.matmul %560, %562, %cst_376 {dimension_numbers = #tpu.dot_dimension_numbers<[1], [0], [0], [1], [0, 0, 1, 1], [], []>} : vector<64x32xbf16>, vector<32x64xbf16>, vector<64x64xf32> -> vector<64x64xf32>
      %564 = arith.addf %557, %563 : vector<64x64xf32>
      %c1_377 = arith.constant 1 : index
      %c0_378 = arith.constant 0 : index
      %c0_379 = arith.constant 0 : index
      %565 = vector.load %arg24[%c1_377, %c0_378, %c0_379] : memref<10x10x32xf32, #tpu.memory_space<vmem>>, vector<8x8x32xf32>
      %566 = vector.shape_cast %565 : vector<8x8x32xf32> to vector<64x32xf32>
      %567 = arith.truncf %566 : vector<64x32xf32> to vector<64x32xbf16>
      %c3_380 = arith.constant 3 : index
      %c0_381 = arith.constant 0 : index
      %c0_382 = arith.constant 0 : index
      %568 = vector.load %arg16[%c3_380, %c0_381, %c0_382] : memref<9x32x64xbf16, #tpu.memory_space<vmem>>, vector<1x32x64xbf16>
      %569 = vector.shape_cast %568 : vector<1x32x64xbf16> to vector<32x64xbf16>
      %cst_383 = arith.constant dense<0.000000e+00> : vector<64x64xf32>
      %570 = tpu.matmul %567, %569, %cst_383 {dimension_numbers = #tpu.dot_dimension_numbers<[1], [0], [0], [1], [0, 0, 1, 1], [], []>} : vector<64x32xbf16>, vector<32x64xbf16>, vector<64x64xf32> -> vector<64x64xf32>
      %571 = arith.addf %564, %570 : vector<64x64xf32>
      %c1_384 = arith.constant 1 : index
      %c1_385 = arith.constant 1 : index
      %c0_386 = arith.constant 0 : index
      %572 = vector.load %arg24[%c1_384, %c1_385, %c0_386] : memref<10x10x32xf32, #tpu.memory_space<vmem>>, vector<8x8x32xf32>
      %573 = vector.shape_cast %572 : vector<8x8x32xf32> to vector<64x32xf32>
      %574 = arith.truncf %573 : vector<64x32xf32> to vector<64x32xbf16>
      %c4_387 = arith.constant 4 : index
      %c0_388 = arith.constant 0 : index
      %c0_389 = arith.constant 0 : index
      %575 = vector.load %arg16[%c4_387, %c0_388, %c0_389] : memref<9x32x64xbf16, #tpu.memory_space<vmem>>, vector<1x32x64xbf16>
      %576 = vector.shape_cast %575 : vector<1x32x64xbf16> to vector<32x64xbf16>
      %cst_390 = arith.constant dense<0.000000e+00> : vector<64x64xf32>
      %577 = tpu.matmul %574, %576, %cst_390 {dimension_numbers = #tpu.dot_dimension_numbers<[1], [0], [0], [1], [0, 0, 1, 1], [], []>} : vector<64x32xbf16>, vector<32x64xbf16>, vector<64x64xf32> -> vector<64x64xf32>
      %578 = arith.addf %571, %577 : vector<64x64xf32>
      %c1_391 = arith.constant 1 : index
      %c2_392 = arith.constant 2 : index
      %c0_393 = arith.constant 0 : index
      %579 = vector.load %arg24[%c1_391, %c2_392, %c0_393] : memref<10x10x32xf32, #tpu.memory_space<vmem>>, vector<8x8x32xf32>
      %580 = vector.shape_cast %579 : vector<8x8x32xf32> to vector<64x32xf32>
      %581 = arith.truncf %580 : vector<64x32xf32> to vector<64x32xbf16>
      %c5_394 = arith.constant 5 : index
      %c0_395 = arith.constant 0 : index
      %c0_396 = arith.constant 0 : index
      %582 = vector.load %arg16[%c5_394, %c0_395, %c0_396] : memref<9x32x64xbf16, #tpu.memory_space<vmem>>, vector<1x32x64xbf16>
      %583 = vector.shape_cast %582 : vector<1x32x64xbf16> to vector<32x64xbf16>
      %cst_397 = arith.constant dense<0.000000e+00> : vector<64x64xf32>
      %584 = tpu.matmul %581, %583, %cst_397 {dimension_numbers = #tpu.dot_dimension_numbers<[1], [0], [0], [1], [0, 0, 1, 1], [], []>} : vector<64x32xbf16>, vector<32x64xbf16>, vector<64x64xf32> -> vector<64x64xf32>
      %585 = arith.addf %578, %584 : vector<64x64xf32>
      %c2_398 = arith.constant 2 : index
      %c0_399 = arith.constant 0 : index
      %c0_400 = arith.constant 0 : index
      %586 = vector.load %arg24[%c2_398, %c0_399, %c0_400] : memref<10x10x32xf32, #tpu.memory_space<vmem>>, vector<8x8x32xf32>
      %587 = vector.shape_cast %586 : vector<8x8x32xf32> to vector<64x32xf32>
      %588 = arith.truncf %587 : vector<64x32xf32> to vector<64x32xbf16>
      %c6_401 = arith.constant 6 : index
      %c0_402 = arith.constant 0 : index
      %c0_403 = arith.constant 0 : index
      %589 = vector.load %arg16[%c6_401, %c0_402, %c0_403] : memref<9x32x64xbf16, #tpu.memory_space<vmem>>, vector<1x32x64xbf16>
      %590 = vector.shape_cast %589 : vector<1x32x64xbf16> to vector<32x64xbf16>
      %cst_404 = arith.constant dense<0.000000e+00> : vector<64x64xf32>
      %591 = tpu.matmul %588, %590, %cst_404 {dimension_numbers = #tpu.dot_dimension_numbers<[1], [0], [0], [1], [0, 0, 1, 1], [], []>} : vector<64x32xbf16>, vector<32x64xbf16>, vector<64x64xf32> -> vector<64x64xf32>
      %592 = arith.addf %585, %591 : vector<64x64xf32>
      %c2_405 = arith.constant 2 : index
      %c1_406 = arith.constant 1 : index
      %c0_407 = arith.constant 0 : index
      %593 = vector.load %arg24[%c2_405, %c1_406, %c0_407] : memref<10x10x32xf32, #tpu.memory_space<vmem>>, vector<8x8x32xf32>
      %594 = vector.shape_cast %593 : vector<8x8x32xf32> to vector<64x32xf32>
      %595 = arith.truncf %594 : vector<64x32xf32> to vector<64x32xbf16>
      %c7_408 = arith.constant 7 : index
      %c0_409 = arith.constant 0 : index
      %c0_410 = arith.constant 0 : index
      %596 = vector.load %arg16[%c7_408, %c0_409, %c0_410] : memref<9x32x64xbf16, #tpu.memory_space<vmem>>, vector<1x32x64xbf16>
      %597 = vector.shape_cast %596 : vector<1x32x64xbf16> to vector<32x64xbf16>
      %cst_411 = arith.constant dense<0.000000e+00> : vector<64x64xf32>
      %598 = tpu.matmul %595, %597, %cst_411 {dimension_numbers = #tpu.dot_dimension_numbers<[1], [0], [0], [1], [0, 0, 1, 1], [], []>} : vector<64x32xbf16>, vector<32x64xbf16>, vector<64x64xf32> -> vector<64x64xf32>
      %599 = arith.addf %592, %598 : vector<64x64xf32>
      %c2_412 = arith.constant 2 : index
      %c2_413 = arith.constant 2 : index
      %c0_414 = arith.constant 0 : index
      %600 = vector.load %arg24[%c2_412, %c2_413, %c0_414] : memref<10x10x32xf32, #tpu.memory_space<vmem>>, vector<8x8x32xf32>
      %601 = vector.shape_cast %600 : vector<8x8x32xf32> to vector<64x32xf32>
      %602 = arith.truncf %601 : vector<64x32xf32> to vector<64x32xbf16>
      %c8_415 = arith.constant 8 : index
      %c0_416 = arith.constant 0 : index
      %c0_417 = arith.constant 0 : index
      %603 = vector.load %arg16[%c8_415, %c0_416, %c0_417] : memref<9x32x64xbf16, #tpu.memory_space<vmem>>, vector<1x32x64xbf16>
      %604 = vector.shape_cast %603 : vector<1x32x64xbf16> to vector<32x64xbf16>
      %cst_418 = arith.constant dense<0.000000e+00> : vector<64x64xf32>
      %605 = tpu.matmul %602, %604, %cst_418 {dimension_numbers = #tpu.dot_dimension_numbers<[1], [0], [0], [1], [0, 0, 1, 1], [], []>} : vector<64x32xbf16>, vector<32x64xbf16>, vector<64x64xf32> -> vector<64x64xf32>
      %606 = arith.addf %599, %605 : vector<64x64xf32>
      %607 = vector.broadcast %541 : vector<1x64xf32> to vector<64x64xf32>
      %608 = arith.addf %606, %607 : vector<64x64xf32>
      %cst_419 = arith.constant 0.000000e+00 : f32
      %609 = vector.broadcast %cst_419 : f32 to vector<64x64xf32>
      %610 = arith.maximumf %608, %609 : vector<64x64xf32>
      %c0_420 = arith.constant 0 : index
      %c0_421 = arith.constant 0 : index
      %611 = vector.load %arg18[%c0_420, %c0_421] : memref<3x64xbf16, #tpu.memory_space<vmem>>, vector<3x64xbf16>
      %612 = arith.truncf %610 : vector<64x64xf32> to vector<64x64xbf16>
      %cst_422 = arith.constant dense<0.000000e+00> : vector<3x64xf32>
      %613 = tpu.matmul %611, %612, %cst_422 {dimension_numbers = #tpu.dot_dimension_numbers<[1], [1], [0], [0], [0, 0, 1, 0], [], []>} : vector<3x64xbf16>, vector<64x64xbf16>, vector<3x64xf32> -> vector<3x64xf32>
      %c0_423 = arith.constant 0 : index
      %c0_424 = arith.constant 0 : index
      %614 = vector.load %arg19[%c0_423, %c0_424] : memref<3x1xf32, #tpu.memory_space<vmem>>, vector<3x1xf32>
      %615 = vector.broadcast %614 : vector<3x1xf32> to vector<3x64xf32>
      %616 = arith.addf %613, %615 : vector<3x64xf32>
      %617 = vector.shape_cast %616 : vector<3x64xf32> to vector<1x3x64xf32>
      %c0_425 = arith.constant 0 : index
      %c0_426 = arith.constant 0 : index
      %c0_427 = arith.constant 0 : index
      %618 = vector.load %arg20[%c0_425, %c0_426, %c0_427] : memref<1x3x64xf32, #tpu.memory_space<vmem>>, vector<1x3x64xf32>
      tpu.vector_store %arg20[%c0_425, %c0_426, %c0_427], %617 {strides = array<i32>} : memref<1x3x64xf32, #tpu.memory_space<vmem>>, vector<1x3x64xf32>,
    } else {
    }
    return
  }
  func.func @transform_0(%arg0: i32, %arg1: i32) -> (i32, i32, i32, i32) {
    %c2_i32 = arith.constant 2 : i32
    %0 = arith.muli %arg0, %c2_i32 : i32
    %1 = arith.addi %0, %arg1 : i32
    %c0_i32 = arith.constant 0 : i32
    %c0_i32_0 = arith.constant 0 : i32
    %c0_i32_1 = arith.constant 0 : i32
    %c0_i32_2 = arith.constant 0 : i32
    return %1, %c0_i32, %c0_i32_0, %c0_i32_1 : i32, i32, i32, i32
  }
  func.func @transform_1(%arg0: i32, %arg1: i32) -> (i32, i32, i32, i32) {
    %c0_i32 = arith.constant 0 : i32
    %c0_i32_0 = arith.constant 0 : i32
    %c0_i32_1 = arith.constant 0 : i32
    %c0_i32_2 = arith.constant 0 : i32
    return %arg1, %c0_i32, %c0_i32_0, %c0_i32_1 : i32, i32, i32, i32
  }
  func.func @transform_2(%arg0: i32, %arg1: i32) -> (i32, i32, i32) {
    %c0_i32 = arith.constant 0 : i32
    %c0_i32_0 = arith.constant 0 : i32
    %c0_i32_1 = arith.constant 0 : i32
    return %arg1, %c0_i32, %c0_i32_0 : i32, i32, i32
  }
  func.func @transform_3(%arg0: i32, %arg1: i32) -> (i32, i32, i32, i32) {
    %c0_i32 = arith.constant 0 : i32
    %c0_i32_0 = arith.constant 0 : i32
    %c0_i32_1 = arith.constant 0 : i32
    %c0_i32_2 = arith.constant 0 : i32
    return %arg1, %c0_i32, %c0_i32_0, %c0_i32_1 : i32, i32, i32, i32
  }
  func.func @transform_4(%arg0: i32, %arg1: i32) -> (i32, i32, i32) {
    %c0_i32 = arith.constant 0 : i32
    %c0_i32_0 = arith.constant 0 : i32
    %c0_i32_1 = arith.constant 0 : i32
    return %arg1, %c0_i32, %c0_i32_0 : i32, i32, i32
  }
  func.func @transform_5(%arg0: i32, %arg1: i32) -> (i32, i32, i32, i32) {
    %c0_i32 = arith.constant 0 : i32
    %c0_i32_0 = arith.constant 0 : i32
    %c0_i32_1 = arith.constant 0 : i32
    %c0_i32_2 = arith.constant 0 : i32
    return %arg1, %c0_i32, %c0_i32_0, %c0_i32_1 : i32, i32, i32, i32
  }
  func.func @transform_6(%arg0: i32, %arg1: i32) -> (i32, i32, i32) {
    %c0_i32 = arith.constant 0 : i32
    %c0_i32_0 = arith.constant 0 : i32
    %c0_i32_1 = arith.constant 0 : i32
    return %arg1, %c0_i32, %c0_i32_0 : i32, i32, i32
  }
  func.func @transform_7(%arg0: i32, %arg1: i32) -> (i32, i32, i32) {
    %c0_i32 = arith.constant 0 : i32
    %c0_i32_0 = arith.constant 0 : i32
    %c0_i32_1 = arith.constant 0 : i32
    %c0_i32_2 = arith.constant 0 : i32
    return %c0_i32, %c0_i32_0, %c0_i32_1 : i32, i32, i32
  }
  func.func @transform_8(%arg0: i32, %arg1: i32) -> (i32, i32, i32) {
    %c0_i32 = arith.constant 0 : i32
    %c0_i32_0 = arith.constant 0 : i32
    %c0_i32_1 = arith.constant 0 : i32
    %c0_i32_2 = arith.constant 0 : i32
    return %c0_i32, %c0_i32_0, %c0_i32_1 : i32, i32, i32
  }
  func.func @transform_9(%arg0: i32, %arg1: i32) -> (i32, i32, i32) {
    %c0_i32 = arith.constant 0 : i32
    %c0_i32_0 = arith.constant 0 : i32
    %c0_i32_1 = arith.constant 0 : i32
    %c0_i32_2 = arith.constant 0 : i32
    return %c0_i32, %c0_i32_0, %c0_i32_1 : i32, i32, i32
  }
  func.func @transform_10(%arg0: i32, %arg1: i32) -> (i32, i32, i32) {
    %c0_i32 = arith.constant 0 : i32
    %c0_i32_0 = arith.constant 0 : i32
    %c0_i32_1 = arith.constant 0 : i32
    %c0_i32_2 = arith.constant 0 : i32
    return %c0_i32, %c0_i32_0, %c0_i32_1 : i32, i32, i32
  }
  func.func @transform_11(%arg0: i32, %arg1: i32) -> (i32, i32, i32) {
    %c0_i32 = arith.constant 0 : i32
    %c0_i32_0 = arith.constant 0 : i32
    %c0_i32_1 = arith.constant 0 : i32
    %c0_i32_2 = arith.constant 0 : i32
    return %c0_i32, %c0_i32_0, %c0_i32_1 : i32, i32, i32
  }
  func.func @transform_12(%arg0: i32, %arg1: i32) -> (i32, i32, i32) {
    %c0_i32 = arith.constant 0 : i32
    %c0_i32_0 = arith.constant 0 : i32
    %c0_i32_1 = arith.constant 0 : i32
    %c0_i32_2 = arith.constant 0 : i32
    return %c0_i32, %c0_i32_0, %c0_i32_1 : i32, i32, i32
  }
  func.func @transform_13(%arg0: i32, %arg1: i32) -> (i32, i32, i32) {
    %c0_i32 = arith.constant 0 : i32
    %c0_i32_0 = arith.constant 0 : i32
    %c0_i32_1 = arith.constant 0 : i32
    %c0_i32_2 = arith.constant 0 : i32
    return %c0_i32, %c0_i32_0, %c0_i32_1 : i32, i32, i32
  }
  func.func @transform_14(%arg0: i32, %arg1: i32) -> (i32, i32, i32) {
    %c0_i32 = arith.constant 0 : i32
    %c0_i32_0 = arith.constant 0 : i32
    %c0_i32_1 = arith.constant 0 : i32
    %c0_i32_2 = arith.constant 0 : i32
    return %c0_i32, %c0_i32_0, %c0_i32_1 : i32, i32, i32
  }
  func.func @transform_15(%arg0: i32, %arg1: i32) -> (i32, i32) {
    %c0_i32 = arith.constant 0 : i32
    %c0_i32_0 = arith.constant 0 : i32
    %c0_i32_1 = arith.constant 0 : i32
    return %c0_i32, %c0_i32_0 : i32, i32
  }
  func.func @transform_16(%arg0: i32, %arg1: i32) -> (i32, i32) {
    %c0_i32 = arith.constant 0 : i32
    %c0_i32_0 = arith.constant 0 : i32
    %c0_i32_1 = arith.constant 0 : i32
    return %c0_i32, %c0_i32_0 : i32, i32
  }
  func.func @transform_17(%arg0: i32, %arg1: i32) -> (i32, i32) {
    %c0_i32 = arith.constant 0 : i32
    %c0_i32_0 = arith.constant 0 : i32
    %c0_i32_1 = arith.constant 0 : i32
    return %c0_i32, %c0_i32_0 : i32, i32
  }
  func.func @transform_18(%arg0: i32, %arg1: i32) -> (i32, i32, i32) {
    %c0_i32 = arith.constant 0 : i32
    %c0_i32_0 = arith.constant 0 : i32
    %c0_i32_1 = arith.constant 0 : i32
    return %arg0, %c0_i32, %c0_i32_0 : i32, i32, i32
  }
}

</mosaic_0001>

<bundles_post_ra>
// kernel: _lambda_.1
= control target key start
LH: loop header
LB: loop body
LE: loop exit
PB: predicated region body
PF: predicated region fallthrough
CT: control target
= control target key end

     0   :  { %s13208_s0 = inlined_call_operand.vmem [shape: f32[4,8,8,3], index: 0, kind: input, shape index: {}]   ;;  %s13209_s1 = inlined_call_operand.hbm [shape: bf16[2,9,3,32], index: 1, kind: input, shape index: {}]   ;;  %s13210_s2 = inlined_call_operand.hbm [shape: f32[2,1,32], index: 2, kind: input, shape index: {}]   ;;  %s13211_s3 = inlined_call_operand.vmem [shape: bf16[2,9,32,64], index: 3, kind: input, shape index: {}]   ;;  %s13212_s4 = inlined_call_operand.hbm [shape: f32[2,1,64], index: 4, kind: input, shape index: {}]   ;;  %s13213_s5 = inlined_call_operand.hbm [shape: bf16[2,9,64,32], index: 5, kind: input, shape index: {}]   ;;  %s13214_s6 = inlined_call_operand.hbm [shape: f32[2,1,32], index: 6, kind: input, shape index: {}]   ;;  %s13215_s7 = inlined_call_operand.hbm [shape: bf16[2,32,96], index: 7, kind: input, shape index: {}]   ;;  %s13216_s8 = inlined_call_operand.hbm [shape: f32[2,1,96], index: 8, kind: input, shape index: {}]   ;;  %s13217_s9 = inlined_call_operand.hbm [shape: bf16[2,32,32], index: 9, kind: input, shape index: {}]   ;;  %s13218_s10 = inlined_call_operand.hbm [shape: bf16[2,32,64], index: 10, kind: input, shape index: {}]   ;;  %s13219_s11 = inlined_call_operand.hbm [shape: f32[2,1,64], index: 11, kind: input, shape index: {}]   ;;  %s13220_s12 = inlined_call_operand.vmem [shape: bf16[2,64,32], index: 12, kind: input, shape index: {}]   ;;  %s13221_s13 = inlined_call_operand.vmem [shape: f32[2,6,32], index: 13, kind: input, shape index: {}]   ;;  %s13222_s14 = inlined_call_operand.hbm [shape: bf16[9,32,64], index: 14, kind: input, shape index: {}]   ;;  %s13223_s15 = inlined_call_operand.vmem [shape: f32[1,64], index: 15, kind: input, shape index: {}]   ;;  %s13224_s16 = inlined_call_operand.vmem [shape: bf16[3,64], index: 16, kind: input, shape index: {}]   ;;  %s13225_s17 = inlined_call_operand.vmem [shape: f32[3,1], index: 17, kind: input, shape index: {}]   ;;  %s13226_s18 = inlined_call_operand.vmem [shape: f32[2,3,64], index: 18, kind: output, shape index: {}]  }
   0x1   :  { %13253 = sst [smem:[#allocation45_spill]] %s13208_s0 }
   0x2   :  { %13254 = sst [smem:[#allocation46_spill]] %s13209_s1 }
   0x3   :  { %13255 = sst [smem:[#allocation47_spill]] %s13210_s2 }
   0x4   :  { %13256 = sst [smem:[#allocation48_spill]] %s13211_s3 }
   0x5   :  { %13257 = sst [smem:[#allocation49_spill]] %s13215_s7 }
   0x6   :  { %13258 = sst [smem:[#allocation50_spill]] %s13217_s9 }
   0x7   :  { %13259 = sst [smem:[#allocation51_spill]] %s13219_s11 }
   0x8   :  { %13260 = sst [smem:[#allocation52_spill]] %s13220_s12 }
   0x9   :  { %13261 = sst [smem:[#allocation53_spill]] %s13221_s13 }
   0xa   :  { %13262 = sst [smem:[#allocation54_spill]] %s13223_s15 }
   0xb   :  { %13263 = sst [smem:[#allocation55_spill]] %s13224_s16 }
   0xc   :  { %13264 = sst [smem:[#allocation56_spill]] %s13225_s17 }
   0xd   :  { %13265 = sst [smem:[#allocation57_spill]] %s13226_s18 }
   0xe   :  { %23 = vsyncpa [#allocation8], 0 }
   0xf   :  { %25 = vsyncpa [#allocation8 + $0x1], 0 }
  0x10   :  { %26 = vsyncpa [#allocation10], 0 }
  0x11   :  { %28 = vsyncpa [#allocation10 + $0x1], 0 }
  0x12   :  { %29 = vsyncpa [#allocation13], 0 }
  0x13   :  { %31 = vsyncpa [#allocation13 + $0x1], 0 }
  0x14   :  { %32 = vsyncpa [#allocation16], 0 }
  0x15   :  { %33 = vsyncpa [#allocation19], 0 }
  0x16   :  { %34 = vsyncpa [#allocation22], 0  ;;  %s11133_s27 = smov 0   ;;  %s11135_s28 = smov 0  }
  0x17   :  { %s11137_s29 = smov 0   ;;  %s11139_s30 = smov 0  }
  0x18   :  { %s11141_s0 = smov 0   ;;  %s11143_s19 = smov 0  }
  0x19   :  { %s11145_s1 = smov 0   ;;  %s11147_s20 = smov 0  }
  0x1a LB: > { %13266 = sst [smem:[#allocation30_spill]] %s10989_s29  ;;  %s13227_s21 = sadd.s32 4294967295, %s11009_s20   ;;  %s11009_s20 = sphi %s11147_s20, %s40_s20   ;;  %s11005_s1 = sphi %s11145_s1, %s13334_s1   ;;  %s11001_s19 = sphi %s11143_s19, %s13338_s19   ;;  %s10997_s0 = sphi %s11141_s0, %s13332_s0   ;;  %s10993_s30 = sphi %s11139_s30, %s13337_s30   ;;  %s10989_s29 = sphi %s11137_s29, %s13331_s29   ;;  %s10985_s28 = sphi %s11135_s28, %s13336_s28   ;;  %s10981_s27 = sphi %s11133_s27, %s13335_s27  }
  0x1b   : > { %13267 = sst [smem:[#allocation31_spill]] %s10993_s30  ;;  %p8542_p0 = scmp.ge.s32.totalorder %s11009_s20, 1 }
  0x1c   : > { %13268 = sst [smem:[#allocation32_spill]] %s10997_s0  ;;  %p11177_p1 = scmp.eq.s32.totalorder %s13227_s21, 0 }
  0x1d   : > { %13269 = sst [smem:[#allocation33_spill]] %s11005_s1  ;;  %p500_p2 = scmp.lt.s32.totalorder %s11009_s20, 5 }
  0x1e   : > { %13270 = sst [smem:[#allocation34_spill]] %s11009_s20  ;;  %s11011_s23 = smov [#allocation15]  }
  0x1f   : > { %s13271_s22 = scalar_select %p11177_p1, 1, 0 }
  0x20   : > { %p11182_p3 = pnand %p8542_p0, %p500_p2  ;;  %s512_s24 = sshll.u32 %s11011_s23, 4  ;;  %s513_s24 = int_to_ptr.vmem [resolvable:$true] %s512_s24 }
  0x21   : > { %13272 = sst [smem:[#allocation35_spill]] %s13271_s22  ;;  %s11012_s26 = smov [#allocation18]  }
  0x22   : > { %p10135_p4 = pneg %p11182_p3  ;;  %s538_s21 = sshll.u32 %s11012_s26, 4  ;;  %s539_s21 = int_to_ptr.vmem [resolvable:$true] %s538_s21 }
  0x23   : > { %s10638_s15 = scalar_lea.vmem %s513_s24, 512  ;;  %p10646_p10 = scmp.lt.s32.totalorder %s513_s24, %s513_s24 }
  0x24   : > { %p11190_p5 = pnand %p10135_p4, %p11177_p1  ;;  %p10639_p7 = scmp.ne.s32.totalorder %s513_s24, %s10638_s15 }
  0x25   : > { %p10647_p11 = scmp.lt.s32.totalorder %s10638_s15, %s10638_s15 }
  0x26   : > { %p11196_p6 = pneg %p11190_p5 }
  0x27   : > { %p10648_p12 = por %p10647_p11, %p10646_p10 }
  0x28   : > { %p10641_p8 = pnand %p10639_p7, %p11196_p6 }
  0x2a   : > { %p10642_p9 = pneg %p10641_p8 }
  0x2c   : > { %p10649_p13 = pnand %p10648_p12, %p10642_p9 }
  0x2e   : > { %10652 = shalt.err (!%p10649_p13)
}
  0x2f   : > { %s13230_s23 = smov 64   ;;  %s13232_s26 = smov 4  }
  0x30   : > { %s13276_s7 = sld [smem:[#allocation49_spill]]  ;;  %s10664_s13 = scalar_lea.vmem %s539_s21, 512 }
  0x31   : > { %p10665_p0 = scmp.ne.s32.totalorder %s539_s21, %s10664_s13  ;;  %p10672_p7 = scmp.lt.s32.totalorder %s539_s21, %s539_s21 }
  0x32   : > { %p10673_p8 = scmp.lt.s32.totalorder %s10664_s13, %s10664_s13 }
  0x33   : > { %p10667_p2 = pnand %p10665_p0, %p11196_p6 }
  0x34   : > { %p10674_p9 = por %p10673_p8, %p10672_p7 }
  0x35   : > { %p10668_p4 = pneg %p10667_p2 }
  0x36   : > { %10138 = dma.hbm_to_vmem [thread:$0]  (!%p11190_p5), %s13276_s7, 512, %s513_s24, [#allocation16], %s13230_s23, %s13230_s23, %s13232_s26  }
  0x37   : > { %p10675_p10 = pnand %p10674_p9, %p10668_p4 }
  0x39   : > { %10678 = shalt.err (!%p10675_p10)
}
  0x3a   : > { %s13277_s9 = sld [smem:[#allocation50_spill]]  ;;  %s11015_s12 = smov [#allocation21]  }
  0x3b   : > { %s564_s17 = sshll.u32 %s11015_s12, 4  ;;  %s565_s17 = int_to_ptr.vmem [resolvable:$true] %s564_s17 }
  0x3c   : > { %s10690_s24 = scalar_lea.vmem %s565_s17, 32  ;;  %p10698_p0 = scmp.lt.s32.totalorder %s565_s17, %s565_s17 }
  0x3d   : > { %p10691_p11 = scmp.ne.s32.totalorder %s565_s17, %s10690_s24  ;;  %p10699_p2 = scmp.lt.s32.totalorder %s10690_s24, %s10690_s24 }
  0x3f   : > { %p10693_p12 = pnand %p10691_p11, %p11196_p6  ;;  %p10700_p4 = por %p10699_p2, %p10698_p0 }
  0x40   : > { %10144 = dma.hbm_to_vmem [thread:$0]  (!%p11190_p5), %s13277_s9, 512, %s539_s21, [#allocation19], %s13230_s23, %s13230_s23, %s13232_s26  }
  0x41   : > { %p10694_p13 = pneg %p10693_p12 }
  0x43   : > { %p10701_p7 = pnand %p10700_p4, %p10694_p13 }
  0x45   : > { %10704 = shalt.err (!%p10701_p7)
}
  0x46   : > { %s13234_s13 = smov 16   ;;  %s13235_s18 = smov 1  }
  0x47   : > { %s13278_s11 = sld [smem:[#allocation51_spill]]  ;;  %s49_s12 = sadd.s32 1, %s11001_s19 }
  0x48   : > { %p50_p8 = scmp.ge.s32.totalorder %s49_s12, 2  ;;  %s52_s24 = sadd.s32 1, %s11005_s1 }
  0x49   : > { %s89_s23 = sadd.s32 1, %s10989_s29  ;;  %p96_p9 = scmp.ne.s32.totalorder %s10989_s29, %s10985_s28 }
  0x4a   : > { %s13340_s12 = smov (%p50_p8, %s49_s12), 0  ;;  %s13342_s24 = smov (!%p50_p8, %s52_s24), %s11005_s1 }
  0x4b   : > { %13279 = sst [smem:[#allocation36_spill]] %s13340_s12  ;;  %s86_s26 = ssub.s32 %s11001_s19, %s13340_s12 }
  0x4c   : > { %p97_p10 = scmp.eq.s32.totalorder %s11009_s20, 0  ;;  %p54_p11 = scmp.ge.s32.totalorder %s13342_s24, 2 }
  0x4d   : > { %10150 = dma.hbm_to_vmem [thread:$0]  (!%p11190_p5), %s13278_s11, 32, %s565_s17, [#allocation22], %s13234_s13, %s13234_s13, %s13235_s18  }
  0x4e   : > { %p87_p12 = scmp.eq.s32.totalorder %s86_s26, 0  ;;  %p98_p13 = por %p97_p10, %p96_p9 }
  0x4f   : > { %p102_p0 = scmp.ne.s32.totalorder %s10985_s28, %s10981_s27  ;;  %s13344_s24 = smov (%p54_p11, %s13342_s24), 0 }
  0x50   : > { %13280 = sst [smem:[#allocation37_spill]] %s13344_s24  ;;  %p10176_p4 = scmp.lt.s32.totalorder %s11009_s20, 4 }
  0x51   : > { %s11246_s17 = scalar_select %p87_p12, %s10989_s29, %s89_s23  }
  0x52   : > { %p11250_p2 = por %p11177_p1, %p102_p0  ;;  %s11256_s15 = sand.u32 1, %s10989_s29  }
  0x53   : > { %13281 = sst [smem:[#allocation38_spill]] %s11246_s17  ;;  %s639_s13 = sand.u32 1, %s11009_s20  }
  0x54   : > { %s13282_s21 = scalar_select %p11250_p2, 1, 0 }
  0x55   : > { %p11259_p7 = pnand %p10176_p4, %p98_p13  ;;  %s11264_s27 = sshll.u32 %s11001_s19, 4 }
  0x56   : > { %13283 = sst [smem:[#allocation39_spill]] %s13282_s21  ;;  %s642_s11 = scalar_lea.vmem [#allocation9], %s11256_s15 }
  0x57   : > { %s13285_s7 = sld [smem:[#allocation47_spill]]  ;;  %s649_s24 = sshll.u32 %s642_s11, 4  ;;  %s650_s24 = int_to_ptr.vmem [resolvable:$true] %s649_s24 }
  0x58   : > { %s10096_s12 = smul.u32 288, %s11256_s15  ;;  %s11272_s1 = scalar_lea.sflag [#allocation10], %s639_s13 }
  0x59   : > { %p11276_p8 = pneg %p11259_p7  ;;  %s10718_s29 = scalar_lea.vmem %s650_s24, 16 }
  0x5a   : > { %p10719_p9 = scmp.ne.s32.totalorder %s650_s24, %s10718_s29  ;;  %s11018_s3 = smov [#allocation9]  }
  0x5b   : > { %s10723_s23 = sshll.u32 %s11018_s3, 4  ;;  %s10724_s23 = int_to_ptr.vmem [resolvable:$false] %s10723_s23 }
  0x5c   : > { %p10721_p10 = pnand %p10719_p9, %p11276_p8  ;;  %p10726_p12 = scmp.lt.s32.totalorder %s650_s24, %s10724_s23 }
  0x5d   : > { %s647_s9 = scalar_lea.hbm %s13285_s7, %s11264_s27  ;;  %s10725_s7 = scalar_lea.vmem %s10724_s23, 32 }
  0x5e   : > { %p10722_p11 = pneg %p10721_p10  ;;  %p10727_p13 = scmp.lt.s32.totalorder %s10725_s7, %s10718_s29 }
  0x60   : > { %p10728_p0 = por %p10727_p13, %p10726_p12 }
  0x62   : > { %p10729_p4 = pnand %p10728_p0, %p10722_p11 }
  0x64   : > { %10732 = shalt.err (!%p10729_p4)
}
  0x65   : > { %10160 = dma.hbm_to_vmem [thread:$0]  (!%p11259_p7), %s647_s9, 16, %s650_s24, %s11272_s1  }
  0x66   : > { %s10097_s11 = smul.u32 4608, %s11001_s19  ;;  %s685_s26 = scalar_lea.vmem [#allocation12], %s10096_s12 }
  0x67   : > { %s692_s30 = sshll.u32 %s685_s26, 4  ;;  %s11289_s20 = scalar_lea.sflag [#allocation13], %s639_s13  ;;  %s693_s30 = int_to_ptr.vmem [resolvable:$true] %s692_s30 }
  0x68   : > { %s691_s3 = scalar_lea.hbm %s13213_s5, %s10097_s11  ;;  %s10746_s29 = scalar_lea.vmem %s693_s30, 4608 }
  0x69   : > { %p10747_p9 = scmp.ne.s32.totalorder %s693_s30, %s10746_s29  ;;  %s11019_s23 = smov [#allocation12]  }
  0x6a   : > { %s10751_s7 = sshll.u32 %s11019_s23, 4  ;;  %s10752_s7 = int_to_ptr.vmem [resolvable:$false] %s10751_s7 }
  0x6b   : > { %p10749_p10 = pnand %p10747_p9, %p11276_p8  ;;  %s10753_s21 = scalar_lea.vmem %s10752_s7, 9216 }
  0x6c   : > { %p10754_p12 = scmp.lt.s32.totalorder %s693_s30, %s10752_s7  ;;  %p10755_p13 = scmp.lt.s32.totalorder %s10753_s21, %s10746_s29 }
  0x6d   : > { %p10750_p11 = pneg %p10749_p10 }
  0x6e   : > { %p10756_p0 = por %p10755_p13, %p10754_p12 }
  0x70   : > { %p10757_p4 = pnand %p10756_p0, %p10750_p11 }
  0x72   : > { %10760 = shalt.err (!%p10757_p4)
}
  0x73   : > { %s13287_s9 = smov 4   ;;  %s13288_s0 = smov 64  }
  0x74   : > { %10166 = dma.hbm_to_vmem [thread:$0]  (!%p11259_p7), %s691_s3, 4608, %s693_s30, %s11289_s20, %s13288_s0, %s13288_s0, %s13287_s9  }
  0x75   : > { %s11020_s22 = smov [#allocation17]   ;;  %s11021_s12 = smov [#allocation20]  }
  0x76   : > { %s525_s13 = sshll.u32 %s11020_s22, 4  ;;  %s551_s24 = sshll.u32 %s11021_s12, 4  ;;  %s526_s13 = int_to_ptr.vmem [resolvable:$true] %s525_s13  ;;  %s552_s24 = int_to_ptr.vmem [resolvable:$true] %s551_s24 }
  0x77   : > { %s10772_s11 = scalar_lea.vmem %s526_s13, 32  ;;  %p10780_p11 = scmp.lt.s32.totalorder %s526_s13, %s526_s13 }
  0x78   : > { %p10773_p9 = scmp.ne.s32.totalorder %s526_s13, %s10772_s11  ;;  %p10781_p13 = scmp.lt.s32.totalorder %s10772_s11, %s10772_s11 }
  0x7a   : > { %p10775_p10 = pnand %p10773_p9, %p11196_p6  ;;  %p10782_p0 = por %p10781_p13, %p10780_p11 }
  0x7c   : > { %p10776_p12 = pneg %p10775_p10 }
  0x7e   : > { %p10783_p4 = pnand %p10782_p0, %p10776_p12 }
  0x80   : > { %10786 = shalt.err (!%p10783_p4)
}
  0x81   : > { %s13289_s21 = smov 1   ;;  %s13290_s26 = smov 16  }
  0x82   : > { %10141 = dma.hbm_to_vmem [thread:$0]  (!%p11190_p5), %s13216_s8, 32, %s526_s13, [#allocation16], %s13290_s26, %s13290_s26, %s13289_s21  }
  0x83   : > { %s10798_s29 = scalar_lea.vmem %s552_s24, 512  ;;  %p10806_p2 = scmp.lt.s32.totalorder %s552_s24, %s552_s24 }
  0x84   : > { %p10799_p1 = scmp.ne.s32.totalorder %s552_s24, %s10798_s29  ;;  %p10807_p11 = scmp.lt.s32.totalorder %s10798_s29, %s10798_s29 }
  0x86   : > { %p10801_p9 = pnand %p10799_p1, %p11196_p6  ;;  %p10808_p12 = por %p10807_p11, %p10806_p2 }
  0x88   : > { %p10802_p10 = pneg %p10801_p9 }
  0x8a   : > { %p10809_p13 = pnand %p10808_p12, %p10802_p10 }
  0x8c   : > { %10812 = shalt.err (!%p10809_p13)
}
  0x8d   : > { %10147 = dma.hbm_to_vmem [thread:$0]  (!%p11190_p5), %s13218_s10, 512, %s552_s24, [#allocation19], %s13288_s0, %s13288_s0, %s13287_s9  }
  0x8e   : > { %s11022_s22 = smov [#allocation23]   ;;  %s10094_s12 = smul.u32 18, %s11256_s15 }
  0x8f   : > { %s583_s13 = sshll.u32 %s11022_s22, 4  ;;  %s584_s13 = int_to_ptr.vmem [resolvable:$true] %s583_s13 }
  0x90   : > { %s10824_s11 = scalar_lea.vmem %s584_s13, 2304  ;;  %p10832_p4 = scmp.lt.s32.totalorder %s584_s13, %s584_s13 }
  0x91   : > { %p10825_p1 = scmp.ne.s32.totalorder %s584_s13, %s10824_s11  ;;  %p10833_p9 = scmp.lt.s32.totalorder %s10824_s11, %s10824_s11 }
  0x93   : > { %p10827_p2 = pnand %p10825_p1, %p11196_p6  ;;  %p10834_p10 = por %p10833_p9, %p10832_p4 }
  0x95   : > { %p10828_p0 = pneg %p10827_p2 }
  0x97   : > { %p10835_p11 = pnand %p10834_p10, %p10828_p0 }
  0x99   : > { %10838 = shalt.err (!%p10835_p11)
}
  0x9a   : > { %10153 = dma.hbm_to_vmem [thread:$0]  (!%p11190_p5), %s13222_s14, 2304, %s584_s13, [#allocation22], %s13288_s0, %s13288_s0, %s13287_s9  }
  0x9b   : > { %s10095_s16 = smul.u32 288, %s11001_s19  ;;  %s622_s26 = scalar_lea.vmem [#allocation7], %s10094_s12 }
  0x9c   : > { %s629_s30 = sshll.u32 %s622_s26, 4  ;;  %s13291_s23 = sld [smem:[#allocation46_spill]]  ;;  %s630_s30 = int_to_ptr.vmem [resolvable:$true] %s629_s30 }
  0x9d   : > { %s619_s22 = scalar_lea.sflag [#allocation8], %s11256_s15  ;;  %s10852_s25 = scalar_lea.vmem %s630_s30, 288 }
  0x9e   : > { %p10853_p6 = scmp.ne.s32.totalorder %s630_s30, %s10852_s25  ;;  %s11023_s11 = smov [#allocation7]  }
  0x9f   : > { %s10857_s24 = sshll.u32 %s11023_s11, 4  ;;  %s10858_s24 = int_to_ptr.vmem [resolvable:$false] %s10857_s24 }
  0xa0   : > { %p10855_p12 = pnand %p10853_p6, %p11276_p8  ;;  %s10859_s21 = scalar_lea.vmem %s10858_s24, 576 }
  0xa1   : > { %p10860_p1 = scmp.lt.s32.totalorder %s630_s30, %s10858_s24  ;;  %p10861_p5 = scmp.lt.s32.totalorder %s10859_s21, %s10852_s25 }
  0xa2   : > { %s628_s7 = scalar_lea.hbm %s13291_s23, %s10095_s16  ;;  %p10856_p13 = pneg %p10855_p12 }
  0xa3   : > { %p10862_p2 = por %p10861_p5, %p10860_p1 }
  0xa5   : > { %p10863_p0 = pnand %p10862_p2, %p10856_p13 }
  0xa7   : > { %10866 = shalt.err (!%p10863_p0)
}
  0xa8   : > { %s11024_s9 = smov 32   ;;  %s11025_s0 = smov 2  }
  0xa9   : > { %10157 = dma.hbm_to_vmem [thread:$0]  (!%p11259_p7), %s628_s7, 288, %s630_s30, %s619_s22, %s11024_s9, %s11024_s9, %s11025_s0  }
  0xaa   : > { %s672_s16 = scalar_lea.hbm %s13212_s4, %s11264_s27  ;;  %s667_s26 = scalar_lea.vmem [#allocation11], %s11256_s15 }
  0xab   : > { %s674_s3 = sshll.u32 %s667_s26, 4  ;;  %s11026_s23 = smov [#allocation11]   ;;  %s675_s3 = int_to_ptr.vmem [resolvable:$true] %s674_s3 }
  0xac   : > { %s10880_s29 = scalar_lea.vmem %s675_s3, 16  ;;  %s10885_s25 = sshll.u32 %s11026_s23, 4  ;;  %s10886_s25 = int_to_ptr.vmem [resolvable:$false] %s10885_s25 }
  0xad   : > { %p10881_p4 = scmp.ne.s32.totalorder %s675_s3, %s10880_s29  ;;  %s10887_s11 = scalar_lea.vmem %s10886_s25, 32 }
  0xae   : > { %p10888_p11 = scmp.lt.s32.totalorder %s675_s3, %s10886_s25  ;;  %p10889_p6 = scmp.lt.s32.totalorder %s10887_s11, %s10880_s29 }
  0xaf   : > { %p10883_p9 = pnand %p10881_p4, %p11276_p8 }
  0xb0   : > { %p10890_p12 = por %p10889_p6, %p10888_p11 }
  0xb1   : > { %p10884_p10 = pneg %p10883_p9 }
  0xb3   : > { %p10891_p13 = pnand %p10890_p12, %p10884_p10 }
  0xb5   : > { %10894 = shalt.err (!%p10891_p13)
}
  0xb6   : > { %10163 = dma.hbm_to_vmem [thread:$0]  (!%p11259_p7), %s672_s16, 16, %s675_s3, %s11272_s1  }
  0xb7   : > { %s710_s22 = scalar_lea.hbm %s13214_s6, %s11264_s27  ;;  %s705_s24 = scalar_lea.vmem [#allocation14], %s11256_s15 }
  0xb8   : > { %s712_s21 = sshll.u32 %s705_s24, 4  ;;  %s11027_s0 = smov [#allocation14]   ;;  %s713_s21 = int_to_ptr.vmem [resolvable:$true] %s712_s21 }
  0xb9   : > { %s10908_s9 = scalar_lea.vmem %s713_s21, 16  ;;  %s10913_s13 = sshll.u32 %s11027_s0, 4  ;;  %s10914_s13 = int_to_ptr.vmem [resolvable:$false] %s10913_s13 }
  0xba   : > { %p10909_p1 = scmp.ne.s32.totalorder %s713_s21, %s10908_s9  ;;  %s10915_s12 = scalar_lea.vmem %s10914_s13, 32 }
  0xbb   : > { %p10916_p0 = scmp.lt.s32.totalorder %s713_s21, %s10914_s13  ;;  %p10917_p4 = scmp.lt.s32.totalorder %s10915_s12, %s10908_s9 }
  0xbc   : > { %p10911_p5 = pnand %p10909_p1, %p11276_p8 }
  0xbd   : > { %p10918_p9 = por %p10917_p4, %p10916_p0 }
  0xbe   : > { %p10912_p2 = pneg %p10911_p5 }
  0xc0   : > { %p10919_p10 = pnand %p10918_p9, %p10912_p2 }
  0xc2   : > { %10922 = shalt.err (!%p10919_p10)
}
  0xc3   : > { %10169 = dma.hbm_to_vmem [thread:$0]  (!%p11259_p7), %s710_s22, 16, %s713_s21, %s11289_s20  }
  0xc4   : > { %721 = sbr.rel (%p11182_p3) target bundleno = 6908 (0x1afc), region = 92 }
  0xc9   : > { %s13292_s1 = sld [smem:[#allocation39_spill]]  ;;  %s11362_s17 = sand.u32 1, %s10985_s28  }
  0xca   : > { %s10098_s15 = smul.u32 18, %s11362_s17  ;;  %s724_s27 = scalar_lea.sflag [#allocation8], %s11362_s17 }
  0xcc   : > { %s11366_s16 = scalar_lea.vmem [#allocation7], %s10098_s15 }
  0xcf   : > { %p13293_p8 = scmp.ne.s32.totalorder %s13292_s1, 0 }
  0xd1   : > { %10956 = dma.done.wait (%p13293_p8), %s724_s27, 288  }
  0xd2   : > { %10958 = vsyncadd (%p13293_p8), %s724_s27, 4294967008  ;;  %s13294_s18 = sld [smem:[#allocation34_spill]]  ;;  %s735_s3 = scalar_lea.vmem [#allocation9], %s11362_s17 }
  0xd8   : > { %s13295_s20 = sadd.s32 4294967295, %s13294_s18  }
  0xd9   : > { %s732_s2 = sand.u32 1, %s13295_s20  }
  0xda   : > { %s733_s26 = scalar_lea.sflag [#allocation10], %s732_s2 }
  0xdb   : > { %10960 = dma.done.wait (%p13293_p8), %s733_s26, 32  }
  0xdc   : > { %10962 = vsyncadd (%p13293_p8), %s733_s26, 4294967264  ;;  %s10099_s29 = smul.u32 288, %s11362_s17  ;;  %s749_s25 = scalar_lea.sflag [#allocation13], %s732_s2 }
  0xde   : > { %s11381_s11 = scalar_lea.vmem [#allocation12], %s10099_s29 }
  0xdf   : > { %10964 = dma.done.wait (%p13293_p8), %s749_s25, 4624  }
  0xe0   : > { %10966 = vsyncadd (%p13293_p8), %s749_s25, 4294962672  ;;  %s13296_s30 = sld [smem:[#allocation35_spill]] }
  0xe6   : > { %p13297_p3 = scmp.ne.s32.totalorder %s13296_s30, 0 }
  0xe8   : > { %10968 = dma.done.wait (%p13297_p3), [#allocation16], 544  }
  0xe9   : > { %10970 = vsyncadd (%p13297_p3), [#allocation16], 4294966752 }
  0xea   : > { %10972 = dma.done.wait (%p13297_p3), [#allocation19], 1024  }
  0xeb   : > { %10974 = vsyncadd (%p13297_p3), [#allocation19], 4294966272 }
  0xec   : > { %10976 = dma.done.wait (%p13297_p3), [#allocation22], 2336  }
  0xed   : > { %10978 = vsyncadd (%p13297_p3), [#allocation22], 4294964960  ;;  %s13298_s22 = sld [smem:[#allocation32_spill]] }
  0xee   : > { %s13299_s24 = sld [smem:[#allocation31_spill]] }
  0xef   : > { %s13300_s27 = sld [smem:[#allocation45_spill]] }
  0xf0   : > { %s13301_s26 = sld [smem:[#allocation48_spill]] }
  0xf1   : > { %s13302_s7 = sld [smem:[#allocation57_spill]] }
  0xf3   : > { %s8562_s21 = sshll.u32 %s13298_s22, 1  ;;  %p879_p6 = scmp.lt.s32.totalorder %s13298_s22, 1 }
  0xf4   : > { %p874_p7 = scmp.lt.s32.totalorder %s13299_s24, 1  ;;  %s866_s9 = sadd.s32 %s13299_s24, %s8562_s21 }
  0xf5   : > { %p867_p11 = scmp.lt.s32.totalorder %s866_s9, 3  ;;  %s13348_s22 = smov (!%p879_p6, %s13298_s22), 1 }
  0xf6   : > { %s875_s0 = scalar_select %p874_p7, %s13299_s24, 1 }
  0xf7   : > { %s13346_s9 = smov (!%p867_p11, %s866_s9), 3  ;;  %s8566_s25 = sshll.u32 %s13348_s22, 2 }
  0xf8   : > { %s10100_s13 = smul.u32 144, %s875_s0  ;;  %s9003_s12 = sshll.u32 %s13346_s9, 6 }
  0xf9   : > { %s11408_s18 = scalar_lea.vmem %s13300_s27, %s9003_s12  ;;  %s11419_s23 = scalar_lea.vmem %s13302_s7, %s8566_s25 }
  0xfa   : > { %s11413_s29 = scalar_lea.vmem %s13301_s26, %s10100_s13  ;;  %p8567_p12 = scmp.ne.s32.totalorder %s13299_s24, 0 }
  0xfc   : > { %887 = sbr.rel (%p8567_p12) target bundleno = 306 (0x132), region = 140 }
 0x101   : > { %vm888_vm0 = vcmask 23552   ;;  %vm890_vm1 = vcmask 17408   ;;  %vm916_vm2 = vcmask 261120   ;;  %v11028_v0 = vmov 0.0  }
 0x102   : > { %889 = vst.msk [vmem:[#allocation2] sm:$0xff] %vm888_vm0, %v11028_v0  ;;  %893 = vst.msk [vmem:[#allocation2 + $0x90] sm:$0xff] %vm888_vm0, %v11028_v0  ;;  %vm918_vm3 = vcmask 254976   ;;  %vm944_vm4 = vcmask 523264   ;;  %vm946_vm5 = vcmask 517120   ;;  %vm895_vm6 = vcmask 16384  }
 0x103   : > { %891 = vst.msk [vmem:[#allocation2 + $0x8] sm:$0x3] %vm890_vm1, %v11028_v0  ;;  %894 = vst.msk [vmem:[#allocation2 + $0x98] sm:$0x3] %vm890_vm1, %v11028_v0  ;;  %vm923_vm7 = vcmask 253952   ;;  %vm951_vm8 = vcmask 516096  }
 0x104   : > { %917 = vst.msk [vmem:[#allocation3] sm:$0xff] %vm916_vm2, %v11028_v0  ;;  %921 = vst.msk [vmem:[#allocation3 + $0x90] sm:$0xff] %vm916_vm2, %v11028_v0 }
 0x105   : > { %972 = vst.msk [vmem:[#allocation5] sm:$0xff] %vm916_vm2, %v11028_v0  ;;  %975 = vst.msk [vmem:[#allocation5 + $0x90] sm:$0xff] %vm916_vm2, %v11028_v0 }
 0x106   : > { %919 = vst.msk [vmem:[#allocation3 + $0x8] sm:$0x3] %vm918_vm3, %v11028_v0  ;;  %922 = vst.msk [vmem:[#allocation3 + $0x98] sm:$0x3] %vm918_vm3, %v11028_v0 }
 0x107   : > { %973 = vst.msk [vmem:[#allocation5 + $0x8] sm:$0x3] %vm918_vm3, %v11028_v0  ;;  %976 = vst.msk [vmem:[#allocation5 + $0x98] sm:$0x3] %vm918_vm3, %v11028_v0 }
 0x108   : > { %945 = vst.msk [vmem:[#allocation4] sm:$0xff] %vm944_vm4, %v11028_v0  ;;  %949 = vst.msk [vmem:[#allocation4 + $0x90] sm:$0xff] %vm944_vm4, %v11028_v0 }
 0x109   : > { %947 = vst.msk [vmem:[#allocation4 + $0x8] sm:$0x3] %vm946_vm5, %v11028_v0  ;;  %950 = vst.msk [vmem:[#allocation4 + $0x98] sm:$0x3] %vm946_vm5, %v11028_v0 }
 0x10a   : > { %896 = vst.msk [vmem:[#allocation2] sm:$0x1] %vm895_vm6, %v11028_v0  ;;  %897 = vst.msk [vmem:[#allocation2 + $0x10] sm:$0x1] %vm895_vm6, %v11028_v0 }
 0x10b   : > { %898 = vst.msk [vmem:[#allocation2 + $0x20] sm:$0x1] %vm895_vm6, %v11028_v0  ;;  %899 = vst.msk [vmem:[#allocation2 + $0x30] sm:$0x1] %vm895_vm6, %v11028_v0 }
 0x10c   : > { %900 = vst.msk [vmem:[#allocation2 + $0x40] sm:$0x1] %vm895_vm6, %v11028_v0  ;;  %901 = vst.msk [vmem:[#allocation2 + $0x50] sm:$0x1] %vm895_vm6, %v11028_v0 }
 0x10d   : > { %902 = vst.msk [vmem:[#allocation2 + $0x60] sm:$0x1] %vm895_vm6, %v11028_v0  ;;  %903 = vst.msk [vmem:[#allocation2 + $0x70] sm:$0x1] %vm895_vm6, %v11028_v0 }
 0x10e   : > { %904 = vst.msk [vmem:[#allocation2 + $0x80] sm:$0x1] %vm895_vm6, %v11028_v0  ;;  %905 = vst.msk [vmem:[#allocation2 + $0x90] sm:$0x1] %vm895_vm6, %v11028_v0 }
 0x10f   : > { %906 = vst.msk [vmem:[#allocation2 + $0x9] sm:$0x1] %vm895_vm6, %v11028_v0  ;;  %907 = vst.msk [vmem:[#allocation2 + $0x19] sm:$0x1] %vm895_vm6, %v11028_v0 }
 0x110   : > { %908 = vst.msk [vmem:[#allocation2 + $0x29] sm:$0x1] %vm895_vm6, %v11028_v0  ;;  %909 = vst.msk [vmem:[#allocation2 + $0x39] sm:$0x1] %vm895_vm6, %v11028_v0 }
 0x111   : > { %910 = vst.msk [vmem:[#allocation2 + $0x49] sm:$0x1] %vm895_vm6, %v11028_v0  ;;  %911 = vst.msk [vmem:[#allocation2 + $0x59] sm:$0x1] %vm895_vm6, %v11028_v0 }
 0x112   : > { %912 = vst.msk [vmem:[#allocation2 + $0x69] sm:$0x1] %vm895_vm6, %v11028_v0  ;;  %913 = vst.msk [vmem:[#allocation2 + $0x79] sm:$0x1] %vm895_vm6, %v11028_v0 }
 0x113   : > { %914 = vst.msk [vmem:[#allocation2 + $0x89] sm:$0x1] %vm895_vm6, %v11028_v0  ;;  %915 = vst.msk [vmem:[#allocation2 + $0x99] sm:$0x1] %vm895_vm6, %v11028_v0 }
 0x114   : > { %924 = vst.msk [vmem:[#allocation3] sm:$0x1] %vm923_vm7, %v11028_v0  ;;  %925 = vst.msk [vmem:[#allocation3 + $0x10] sm:$0x1] %vm923_vm7, %v11028_v0 }
 0x115   : > { %926 = vst.msk [vmem:[#allocation3 + $0x20] sm:$0x1] %vm923_vm7, %v11028_v0  ;;  %927 = vst.msk [vmem:[#allocation3 + $0x30] sm:$0x1] %vm923_vm7, %v11028_v0 }
 0x116   : > { %928 = vst.msk [vmem:[#allocation3 + $0x40] sm:$0x1] %vm923_vm7, %v11028_v0  ;;  %929 = vst.msk [vmem:[#allocation3 + $0x50] sm:$0x1] %vm923_vm7, %v11028_v0 }
 0x117   : > { %930 = vst.msk [vmem:[#allocation3 + $0x60] sm:$0x1] %vm923_vm7, %v11028_v0  ;;  %931 = vst.msk [vmem:[#allocation3 + $0x70] sm:$0x1] %vm923_vm7, %v11028_v0 }
 0x118   : > { %932 = vst.msk [vmem:[#allocation3 + $0x80] sm:$0x1] %vm923_vm7, %v11028_v0  ;;  %933 = vst.msk [vmem:[#allocation3 + $0x90] sm:$0x1] %vm923_vm7, %v11028_v0 }
 0x119   : > { %934 = vst.msk [vmem:[#allocation3 + $0x9] sm:$0x1] %vm923_vm7, %v11028_v0  ;;  %935 = vst.msk [vmem:[#allocation3 + $0x19] sm:$0x1] %vm923_vm7, %v11028_v0 }
 0x11a   : > { %936 = vst.msk [vmem:[#allocation3 + $0x29] sm:$0x1] %vm923_vm7, %v11028_v0  ;;  %937 = vst.msk [vmem:[#allocation3 + $0x39] sm:$0x1] %vm923_vm7, %v11028_v0 }
 0x11b   : > { %938 = vst.msk [vmem:[#allocation3 + $0x49] sm:$0x1] %vm923_vm7, %v11028_v0  ;;  %939 = vst.msk [vmem:[#allocation3 + $0x59] sm:$0x1] %vm923_vm7, %v11028_v0 }
 0x11c   : > { %940 = vst.msk [vmem:[#allocation3 + $0x69] sm:$0x1] %vm923_vm7, %v11028_v0  ;;  %941 = vst.msk [vmem:[#allocation3 + $0x79] sm:$0x1] %vm923_vm7, %v11028_v0 }
 0x11d   : > { %942 = vst.msk [vmem:[#allocation3 + $0x89] sm:$0x1] %vm923_vm7, %v11028_v0  ;;  %943 = vst.msk [vmem:[#allocation3 + $0x99] sm:$0x1] %vm923_vm7, %v11028_v0 }
 0x11e   : > { %977 = vst.msk [vmem:[#allocation5] sm:$0x1] %vm923_vm7, %v11028_v0  ;;  %978 = vst.msk [vmem:[#allocation5 + $0x10] sm:$0x1] %vm923_vm7, %v11028_v0 }
 0x11f   : > { %979 = vst.msk [vmem:[#allocation5 + $0x20] sm:$0x1] %vm923_vm7, %v11028_v0  ;;  %980 = vst.msk [vmem:[#allocation5 + $0x30] sm:$0x1] %vm923_vm7, %v11028_v0 }
 0x120   : > { %981 = vst.msk [vmem:[#allocation5 + $0x40] sm:$0x1] %vm923_vm7, %v11028_v0  ;;  %982 = vst.msk [vmem:[#allocation5 + $0x50] sm:$0x1] %vm923_vm7, %v11028_v0 }
 0x121   : > { %983 = vst.msk [vmem:[#allocation5 + $0x60] sm:$0x1] %vm923_vm7, %v11028_v0  ;;  %984 = vst.msk [vmem:[#allocation5 + $0x70] sm:$0x1] %vm923_vm7, %v11028_v0 }
 0x122   : > { %985 = vst.msk [vmem:[#allocation5 + $0x80] sm:$0x1] %vm923_vm7, %v11028_v0  ;;  %986 = vst.msk [vmem:[#allocation5 + $0x90] sm:$0x1] %vm923_vm7, %v11028_v0 }
 0x123   : > { %987 = vst.msk [vmem:[#allocation5 + $0x9] sm:$0x1] %vm923_vm7, %v11028_v0  ;;  %988 = vst.msk [vmem:[#allocation5 + $0x19] sm:$0x1] %vm923_vm7, %v11028_v0 }
 0x124   : > { %989 = vst.msk [vmem:[#allocation5 + $0x29] sm:$0x1] %vm923_vm7, %v11028_v0  ;;  %990 = vst.msk [vmem:[#allocation5 + $0x39] sm:$0x1] %vm923_vm7, %v11028_v0 }
 0x125   : > { %991 = vst.msk [vmem:[#allocation5 + $0x49] sm:$0x1] %vm923_vm7, %v11028_v0  ;;  %992 = vst.msk [vmem:[#allocation5 + $0x59] sm:$0x1] %vm923_vm7, %v11028_v0 }
 0x126   : > { %993 = vst.msk [vmem:[#allocation5 + $0x69] sm:$0x1] %vm923_vm7, %v11028_v0  ;;  %994 = vst.msk [vmem:[#allocation5 + $0x79] sm:$0x1] %vm923_vm7, %v11028_v0 }
 0x127   : > { %995 = vst.msk [vmem:[#allocation5 + $0x89] sm:$0x1] %vm923_vm7, %v11028_v0  ;;  %996 = vst.msk [vmem:[#allocation5 + $0x99] sm:$0x1] %vm923_vm7, %v11028_v0 }
 0x128   : > { %952 = vst.msk [vmem:[#allocation4] sm:$0x1] %vm951_vm8, %v11028_v0  ;;  %953 = vst.msk [vmem:[#allocation4 + $0x10] sm:$0x1] %vm951_vm8, %v11028_v0 }
 0x129   : > { %954 = vst.msk [vmem:[#allocation4 + $0x20] sm:$0x1] %vm951_vm8, %v11028_v0  ;;  %955 = vst.msk [vmem:[#allocation4 + $0x30] sm:$0x1] %vm951_vm8, %v11028_v0 }
 0x12a   : > { %956 = vst.msk [vmem:[#allocation4 + $0x40] sm:$0x1] %vm951_vm8, %v11028_v0  ;;  %957 = vst.msk [vmem:[#allocation4 + $0x50] sm:$0x1] %vm951_vm8, %v11028_v0 }
 0x12b   : > { %958 = vst.msk [vmem:[#allocation4 + $0x60] sm:$0x1] %vm951_vm8, %v11028_v0  ;;  %959 = vst.msk [vmem:[#allocation4 + $0x70] sm:$0x1] %vm951_vm8, %v11028_v0 }
 0x12c   : > { %960 = vst.msk [vmem:[#allocation4 + $0x80] sm:$0x1] %vm951_vm8, %v11028_v0  ;;  %961 = vst.msk [vmem:[#allocation4 + $0x90] sm:$0x1] %vm951_vm8, %v11028_v0 }
 0x12d   : > { %962 = vst.msk [vmem:[#allocation4 + $0x9] sm:$0x1] %vm951_vm8, %v11028_v0  ;;  %963 = vst.msk [vmem:[#allocation4 + $0x19] sm:$0x1] %vm951_vm8, %v11028_v0 }
 0x12e   : > { %964 = vst.msk [vmem:[#allocation4 + $0x29] sm:$0x1] %vm951_vm8, %v11028_v0  ;;  %965 = vst.msk [vmem:[#allocation4 + $0x39] sm:$0x1] %vm951_vm8, %v11028_v0 }
 0x12f   : > { %966 = vst.msk [vmem:[#allocation4 + $0x49] sm:$0x1] %vm951_vm8, %v11028_v0  ;;  %967 = vst.msk [vmem:[#allocation4 + $0x59] sm:$0x1] %vm951_vm8, %v11028_v0 }
 0x130   : > { %968 = vst.msk [vmem:[#allocation4 + $0x69] sm:$0x1] %vm951_vm8, %v11028_v0  ;;  %969 = vst.msk [vmem:[#allocation4 + $0x79] sm:$0x1] %vm951_vm8, %v11028_v0 }
 0x131   : > { %970 = vst.msk [vmem:[#allocation4 + $0x89] sm:$0x1] %vm951_vm8, %v11028_v0  ;;  %971 = vst.msk [vmem:[#allocation4 + $0x99] sm:$0x1] %vm951_vm8, %v11028_v0 }
 0x132 PF: > { %v8568_v1 = vld [vmem:[%s11366_s16 + $0x2] sm:$0x3]  ;;  %vm1055_vm9 = vcmask 1040384   ;;  %vm1056_vm10 = vcmask 1041408   ;;  %v11029_v3 = vmov 65535   ;;  %vm1007_vm11 = vcmask 23552  }
 0x133   : > { %v997_v2 = vld [vmem:[%s11408_s18] sm:$0xff]  ;;  %v1057_v4 = vsel %vm1055_vm9, 4294967295, %v11029_v3  ;;  %v1000_v5 = vld [vmem:[%s11408_s18 + $0x18] sm:$0xff]  ;;  %v998_v9 = vld [vmem:[%s11408_s18 + $0x8] sm:$0xff]  ;;  %vm1946_vm12 = vcmask 261120   ;;  %vm2989_vm13 = vcmask 523264  }
 0x134   : > { %v1001_v6 = vld [vmem:[%s11408_s18 + $0x20] sm:$0xff]  ;;  %v11604_v7 = vsel %vm1056_vm10, %v1057_v4, 0  ;;  %1008 = vst.msk [vmem:[#allocation2 + $0x11] sm:$0xff] %vm1007_vm11, %v997_v2  ;;  %1011 = vst.msk [vmem:[#allocation2 + $0x41] sm:$0xff] %vm1007_vm11, %v1000_v5  ;;  %v999_v10 = vld [vmem:[%s11408_s18 + $0x10] sm:$0xff] }
 0x135   : > { %1012 = vst.msk [vmem:[#allocation2 + $0x51] sm:$0xff] %vm1007_vm11, %v1001_v6  ;;  %v1028_v8 = vld [vmem:[%s11366_s16] sm:$0x3]  ;;  %v1060_v11 = vand.u32 %v8568_v1, %v11604_v7  ;;  %1009 = vst.msk [vmem:[#allocation2 + $0x21] sm:$0xff] %vm1007_vm11, %v998_v9  ;;  %v1002_v13 = vld [vmem:[%s11408_s18 + $0x28] sm:$0xff] }
 0x136   : > { %v1140_v12 = vand.u32 %v11604_v7, %v1028_v8  ;;  %1010 = vst.msk [vmem:[#allocation2 + $0x31] sm:$0xff] %vm1007_vm11, %v999_v10  ;;  %v1003_v14 = vld [vmem:[%s11408_s18 + $0x30] sm:$0xff]  ;;  %1013 = vst.msk [vmem:[#allocation2 + $0x61] sm:$0xff] %vm1007_vm11, %v1002_v13  ;;  %v1029_v17 = vld [vmem:[#allocation2 + $0x1] sm:$0xff] }
 0x137   : > { %v8577_v15 = vld [vmem:[%s11366_s16 + $0x4] sm:$0x3]  ;;  %1014 = vst.msk [vmem:[#allocation2 + $0x71] sm:$0xff] %vm1007_vm11, %v1003_v14  ;;  %10068 = vmatprep.subr.bf16.mxu1 %v1060_v11  ;;  %9358 = vmatprep.subr.bf16.mxu0 %v1060_v11  ;;  %v1004_v18 = vld [vmem:[%s11408_s18 + $0x38] sm:$0xff]  ;;  %v8602_v0 = vld [vmem:[%s11366_s16 + $0xe] sm:$0x3] }
 0x138   : > { %v1234_v16 = vand.u32 %v8577_v15, %v11604_v7  ;;  %10069 = vmatpush3.bf16.msra.mxu1 %v1060_v11  ;;  %9359 = vmatpush3.bf16.msra.mxu0 %v1060_v11  ;;  %v1016_v19 = vld [vmem:[#allocation2] sm:$0xff]  ;;  %1015 = vst.msk [vmem:[#allocation2 + $0x81] sm:$0xff] %vm1007_vm11, %v1004_v18  ;;  %v8587_v22 = vld [vmem:[%s11366_s16 + $0x8] sm:$0x3]  ;;  %v8592_v45 = vld [vmem:[%s11366_s16 + $0xa] sm:$0x3]  ;;  %v1745_v8 = vand.u32 %v8602_v0, %v11604_v7 }
 0x139   : > { %9368 = vmatprep.subr.bf16.mxu1 %v1140_v12  ;;  %v1207_v20 = vld [vmem:[#allocation2 + $0x2] sm:$0xff]  ;;  %v1438_v39 = vand.u32 %v8587_v22, %v11604_v7  ;;  %v8597_v49 = vld [vmem:[%s11366_s16 + $0xc] sm:$0x3]  ;;  %v1540_v56 = vand.u32 %v8592_v45, %v11604_v7  ;;  %v1623_v15 = vld [vmem:[#allocation2 + $0x90] sm:$0xff] }
 0x13a   : > { %9378 = vmatprep.subr.bf16.mxu0 %v1234_v16  ;;  %v8582_v21 = vld [vmem:[%s11366_s16 + $0x6] sm:$0x3]  ;;  %v1643_v59 = vand.u32 %v8597_v49, %v11604_v7  ;;  %v8607_v1 = vld [vmem:[%s11366_s16 + $0x10] sm:$0x3]  ;;  %s13308_s16 = scalar_lea.vmem [#allocation11], %s11362_s17 }
 0x13b   : > { %v1030_v23 = vld [vmem:[#allocation2 + $0x11] sm:$0xff]  ;;  %v11626_v24 = vld [vmem:[#allocation2 + $0x41] sm:$0xff]  ;;  %v1336_v38 = vand.u32 %v8582_v21, %v11604_v7  ;;  %v1847_v10 = vand.u32 %v8607_v1, %v11604_v7 }
 0x13c   : > { %v11628_v25 = vld [vmem:[#allocation2 + $0x51] sm:$0xff]  ;;  %v1037_v26 = vpack.c.bf16 %v1030_v23, %v1029_v17  ;;  %v1031_v28 = vld [vmem:[#allocation2 + $0x21] sm:$0xff] }
 0x13d   : > { %v11632_v27 = vpack.c.bf16 %v11628_v25, %v11626_v24  ;;  %v11634_v29 = vld [vmem:[#allocation2 + $0x31] sm:$0xff]  ;;  %v11639_v32 = vld [vmem:[#allocation2 + $0x61] sm:$0xff]  ;;  %v1419_v62 = vpack.c.bf16 %v1031_v28, %v1030_v23 }
 0x13e   : > { %v1017_v30 = vld [vmem:[#allocation2 + $0x10] sm:$0xff]  ;;  %v11637_v31 = vpack.c.bf16 %v11634_v29, %v1031_v28  ;;  %9360 = vmatprep.mubr.msk.bf16.mxu0 %vm1007_vm11, %v1037_v26  ;;  %v11659_v40 = vld [vmem:[#allocation2 + $0x22] sm:$0xff]  ;;  %v1420_v2 = vpack.c.bf16 %v11626_v24, %v11634_v29  ;;  %v1421_v5 = vpack.c.bf16 %v11639_v32, %v11628_v25  ;;  %v10269_v23 = vld [vmem:[%s11413_s29 + $0x18] sm:$0xff]  }
 0x13f   : > { %v11641_v33 = vld [vmem:[#allocation2 + $0x71] sm:$0xff]  ;;  %v1024_v34 = vpack.c.bf16 %v1017_v30, %v1016_v19  ;;  %9364 = vmatprep.mubr.msk.bf16.mxu1 %vm1007_vm11, %v11632_v27  ;;  %v1018_v42 = vld [vmem:[#allocation2 + $0x20] sm:$0xff]  ;;  %v10271_v24 = vld [vmem:[%s11413_s29 + $0x8] sm:$0xff]  }
 0x140   : > { %v11643_v35 = vld [vmem:[#allocation2 + $0x12] sm:$0xff]  ;;  %v11650_v36 = vpack.c.bf16 %v11641_v33, %v11639_v32  ;;  %9361 = vmatmul.mubr.msk.bf16.vlgmr.msra.gmra.mxu0 %vm1007_vm11, %v11637_v31  ;;  %v1020_v44 = vld [vmem:[#allocation2 + $0x40] sm:$0xff]  ;;  %v1317_v63 = vpack.c.bf16 %v1018_v42, %v1017_v30 }
 0x141   : > { %v1215_v37 = vpack.c.bf16 %v11643_v35, %v1207_v20  ;;  %9379 = vmatpush3.bf16.msra.mxu0 %v1234_v16  ;;  %v11661_v41 = vld [vmem:[#allocation2 + $0x32] sm:$0xff]  ;;  %v1211_v47 = vld [vmem:[#allocation2 + $0x42] sm:$0xff]  ;;  %v1521_v13 = vpack.c.bf16 %v11659_v40, %v11643_v35 }
 0x142   : > { %9365 = vmatmul.mubr.msk.bf16.vlgmr.msra.gmra.mxu1 %vm1007_vm11, %v11650_v36  ;;  %v1019_v43 = vld [vmem:[#allocation2 + $0x30] sm:$0xff]  ;;  %v11669_v50 = vpack.c.bf16 %v11661_v41, %v11659_v40  ;;  %9398 = vmatprep.subr.bf16.mxu0 %v1438_v39  ;;  %v1213_v54 = vld [vmem:[#allocation2 + $0x62] sm:$0xff]  ;;  %v1522_v7 = vpack.c.bf16 %v1211_v47, %v11661_v41  ;;  %v11733_v28 = vld [vmem:[%s11413_s29 + $0x38] sm:$0xff]  }
 0x143   : > { %9369 = vmatpush3.bf16.msra.mxu1 %v1140_v12  ;;  %9370 = vmatprep.mubr.msk.bf16.mxu1 %vm1007_vm11, %v1024_v34  ;;  %v1021_v46 = vld [vmem:[#allocation2 + $0x50] sm:$0xff]  ;;  %v1025_v51 = vpack.c.bf16 %v1019_v43, %v1018_v42  ;;  %v1022_v57 = vld [vmem:[#allocation2 + $0x60] sm:$0xff]  ;;  %v1318_v3 = vpack.c.bf16 %v1020_v44, %v1019_v43 }
 0x144   : > { %9380 = vmatprep.mubr.msk.bf16.mxu0 %vm1007_vm11, %v1215_v37  ;;  %9388 = vmatprep.subr.bf16.mxu1 %v1336_v38  ;;  %v1212_v48 = vld [vmem:[#allocation2 + $0x52] sm:$0xff]  ;;  %v1026_v52 = vpack.c.bf16 %v1021_v46, %v1020_v44  ;;  %v1319_v4 = vpack.c.bf16 %v1022_v57, %v1021_v46  ;;  %v1418_v6 = vld [vmem:[#allocation2 + $0x81] sm:$0xff] }
 0x145   : > { %v11671_v53 = vpack.c.bf16 %v1212_v48, %v1211_v47  ;;  %v1214_v55 = vld [vmem:[#allocation2 + $0x72] sm:$0xff]  ;;  %v1316_v9 = vld [vmem:[#allocation2 + $0x80] sm:$0xff]  ;;  %v1422_v11 = vpack.c.bf16 %v1418_v6, %v11641_v33  ;;  %v1523_v14 = vpack.c.bf16 %v1213_v54, %v1212_v48 }
 0x146   : > { %v1023_v58 = vld [vmem:[#allocation2 + $0x70] sm:$0xff]  ;;  %v1218_v60 = vpack.c.bf16 %v1214_v55, %v1213_v54  ;;  %v1520_v16 = vld [vmem:[#allocation2 + $0x82] sm:$0xff]  ;;  %v1627_v17 = vpack.c.bf16 %v1623_v15, %v1316_v9 }
 0x147   : > { %v1027_v61 = vpack.c.bf16 %v1023_v58, %v1022_v57  ;;  %v1320_v12 = vpack.c.bf16 %v1316_v9, %v1023_v58  ;;  %v1524_v18 = vpack.c.bf16 %v1520_v16, %v1214_v55  ;;  %v1827_v19 = vld [vmem:[#allocation2 + $0x92] sm:$0xff]  ;;  %v10272_v26 = vld [vmem:[%s11413_s29] sm:$0xff]  }
 0x148   : > { %9381 = vmatmul.mubr.msk.bf16.vlgmr.msra.gmra.mxu0 %vm1007_vm11, %v11669_v50  ;;  %v1725_v20 = vld [vmem:[#allocation2 + $0x91] sm:$0xff]  ;;  %v1831_v21 = vpack.c.bf16 %v1827_v19, %v1520_v16 }
 0x149   : > { %9399 = vmatpush3.bf16.msra.mxu0 %v1438_v39  ;;  %9384 = vmatprep.mubr.msk.bf16.mxu0 %vm1007_vm11, %v11671_v53  ;;  %v1729_v22 = vpack.c.bf16 %v1725_v20, %v1418_v6  ;;  %v10270_v25 = vld [vmem:[%s11413_s29 + $0x10] sm:$0xff]  }
 0x14a   : > { %9371 = vmatmul.mubr.msk.bf16.vlgmr.msra.gmra.mxu1 %vm1007_vm11, %v1025_v51  ;;  %9418 = vmatprep.subr.bf16.mxu0 %v1643_v59 }
 0x14b   : > { %9389 = vmatpush3.bf16.msra.mxu1 %v1336_v38  ;;  %9374 = vmatprep.mubr.msk.bf16.mxu1 %vm1007_vm11, %v1026_v52 }
 0x14c   : > { %9408 = vmatprep.subr.bf16.mxu1 %v1540_v56 }
 0x150   : > { %9385 = vmatmul.mubr.msk.bf16.gmra.mxu0 %vm1007_vm11, %v1218_v60 }
 0x151   : > { %9400 = vmatprep.mubr.msk.bf16.mxu0 %vm1007_vm11, %v1419_v62 }
 0x152   : > { %9375 = vmatmul.mubr.msk.bf16.gmra.mxu1 %vm1007_vm11, %v1027_v61 }
 0x153   : > { %9390 = vmatprep.mubr.msk.bf16.mxu1 %vm1007_vm11, %v1317_v63 }
 0x158   : > { %9401 = vmatmul.mubr.msk.bf16.vlgmr.msra.gmra.mxu0 %vm1007_vm11, %v1420_v2 }
 0x159   : > { %9419 = vmatpush3.bf16.msra.mxu0 %v1643_v59  ;;  %9404 = vmatprep.mubr.msk.bf16.mxu0 %vm1007_vm11, %v1421_v5 }
 0x15a   : > { %9391 = vmatmul.mubr.msk.bf16.vlgmr.msra.gmra.mxu1 %vm1007_vm11, %v1318_v3  ;;  %9438 = vmatprep.subr.bf16.mxu0 %v1847_v10 }
 0x15b   : > { %9409 = vmatpush3.bf16.msra.mxu1 %v1540_v56  ;;  %9394 = vmatprep.mubr.msk.bf16.mxu1 %vm1007_vm11, %v1319_v4 }
 0x15c   : > { %9428 = vmatprep.subr.bf16.mxu1 %v1745_v8 }
 0x160   : > { %9405 = vmatmul.mubr.msk.bf16.gmra.mxu0 %vm1007_vm11, %v1422_v11 }
 0x161   : > { %9420 = vmatprep.mubr.msk.bf16.mxu0 %vm1007_vm11, %v1025_v51 }
 0x162   : > { %9395 = vmatmul.mubr.msk.bf16.gmra.mxu1 %vm1007_vm11, %v1320_v12 }
 0x163   : > { %9410 = vmatprep.mubr.msk.bf16.mxu1 %vm1007_vm11, %v1521_v13 }
 0x168   : > { %9421 = vmatmul.mubr.msk.bf16.vlgmr.msra.gmra.mxu0 %vm1007_vm11, %v1026_v52 }
 0x169   : > { %9439 = vmatpush3.bf16.msra.mxu0 %v1847_v10  ;;  %9424 = vmatprep.mubr.msk.bf16.mxu0 %vm1007_vm11, %v1027_v61 }
 0x16a   : > { %9411 = vmatmul.mubr.msk.bf16.vlgmr.msra.gmra.mxu1 %vm1007_vm11, %v1522_v7  ;;  %9460 = vmatprep.subr.bf16.mxu0 %v10271_v24 }
 0x16b   : > { %9429 = vmatpush3.bf16.msra.mxu1 %v1745_v8  ;;  %9414 = vmatprep.mubr.msk.bf16.mxu1 %vm1007_vm11, %v1523_v14 }
 0x16c   : > { %9448 = vmatprep.subr.bf16.mxu1 %v10269_v23 }
 0x170   : > { %9425 = vmatmul.mubr.msk.bf16.gmra.mxu0 %vm1007_vm11, %v1627_v17 }
 0x171   : > { %9440 = vmatprep.mubr.msk.bf16.mxu0 %vm1007_vm11, %v11669_v50 }
 0x172   : > { %9415 = vmatmul.mubr.msk.bf16.gmra.mxu1 %vm1007_vm11, %v1524_v18 }
 0x173   : > { %9430 = vmatprep.mubr.msk.bf16.mxu1 %vm1007_vm11, %v11637_v31 }
 0x178   : > { %9441 = vmatmul.mubr.msk.bf16.vlgmr.msra.gmra.mxu0 %vm1007_vm11, %v11671_v53 }
 0x179   : > { %9444 = vmatprep.mubr.msk.bf16.mxu0 %vm1007_vm11, %v1218_v60  ;;  %9461 = vmatpush3.bf16.msra.mxu0 %v10271_v24 }
 0x17a   : > { %9431 = vmatmul.mubr.msk.bf16.vlgmr.msra.gmra.mxu1 %vm1007_vm11, %v11632_v27  ;;  %9462 = vmatprep.subr.bf16.mxu0 %v10272_v26  ;;  %v11729_v27 = vld [vmem:[%s11413_s29 + $0x28] sm:$0xff]  }
 0x17b   : > { %9434 = vmatprep.mubr.msk.bf16.mxu1 %vm1007_vm11, %v11650_v36  ;;  %9449 = vmatpush3.bf16.msra.mxu1 %v10269_v23 }
 0x17c   : > { %9450 = vmatprep.subr.bf16.mxu1 %v10270_v25 }
 0x17d   : > { %9463 = vmatpush3.bf16.msra.mxu0 %v10272_v26 }
 0x17e   : > { %9484 = vmatprep.subr.bf16.mxu0 %v11733_v28 }
 0x17f   : > { %9451 = vmatpush3.bf16.msra.mxu1 %v10270_v25 }
 0x180   : > { %9445 = vmatmul.mubr.msk.bf16.gmra.mxu0 %vm1007_vm11, %v1831_v21  ;;  %9472 = vmatprep.subr.bf16.mxu1 %v11729_v27 }
 0x182   : > { %9435 = vmatmul.mubr.msk.bf16.gmra.mxu1 %vm1007_vm11, %v1729_v22 }
 0x200   : > { %v9362_v29 = vpop.f32.mrf.mxu0 }
 0x202   : > { %v9366_v30 = vpop.f32.mrf.mxu1  ;;  %v1096_v31 = vpop.f32.mrf.mxu0 }
 0x204   : > { %v1112_v32 = vpop.f32.mrf.mxu1  ;;  %v9363_v33 = vpop.f32.mrf.mxu0 }
 0x206   : > { %v9367_v34 = vpop.f32.mrf.mxu1  ;;  %v1099_v35 = vpop.f32.mrf.mxu0 }
 0x208   : > { %v11736_v36 = vpop.f32.mrf.mxu1  ;;  %v9382_v37 = vpop.f32.mrf.mxu0 }
 0x20a   : > { %v9372_v38 = vpop.f32.mrf.mxu1  ;;  %v1270_v39 = vpop.f32.mrf.mxu0 }
 0x20b   : > { %v1185_v5 = vadd.f32 %v9372_v38, %v9362_v29 }
 0x20c   : > { %v1176_v40 = vpop.f32.mrf.mxu1  ;;  %v9383_v41 = vpop.f32.mrf.mxu0 }
 0x20d   : > { %v1177_v9 = vadd.f32 %v1176_v40, %v1096_v31  ;;  %v1303_v12 = vadd.f32 %v9382_v37, %v1185_v5 }
 0x20e   : > { %v9373_v42 = vpop.f32.mrf.mxu1  ;;  %v1273_v43 = vpop.f32.mrf.mxu0 }
 0x20f   : > { %v1188_v13 = vadd.f32 %v9373_v42, %v9363_v33  ;;  %v1301_v15 = vadd.f32 %v1270_v39, %v1177_v9 }
 0x210   : > { %v1179_v44 = vpop.f32.mrf.mxu1  ;;  %v9386_v45 = vpop.f32.mrf.mxu0 }
 0x211   : > { %v1180_v16 = vadd.f32 %v1179_v44, %v1099_v35  ;;  %v1304_v21 = vadd.f32 %v9383_v41, %v1188_v13 }
 0x212   : > { %v9376_v46 = vpop.f32.mrf.mxu1  ;;  %v1286_v47 = vpop.f32.mrf.mxu0 }
 0x213   : > { %v1201_v19 = vadd.f32 %v9376_v46, %v9366_v30  ;;  %v1302_v26 = vadd.f32 %v1273_v43, %v1180_v16 }
 0x214   : > { %v1192_v48 = vpop.f32.mrf.mxu1  ;;  %v9387_v49 = vpop.f32.mrf.mxu0 }
 0x215   : > { %v1193_v24 = vadd.f32 %v1192_v48, %v1112_v32  ;;  %v1307_v40 = vadd.f32 %v9386_v45, %v1201_v19 }
 0x216   : > { %v9377_v50 = vpop.f32.mrf.mxu1  ;;  %v11738_v51 = vpop.f32.mrf.mxu0 }
 0x217   : > { %v1204_v37 = vadd.f32 %v9377_v50, %v9367_v34  ;;  %v1305_v44 = vadd.f32 %v1286_v47, %v1193_v24 }
 0x218   : > { %v1195_v52 = vpop.f32.mrf.mxu1  ;;  %v9402_v53 = vpop.f32.mrf.mxu0 }
 0x219   : > { %v1196_v30 = vadd.f32 %v1195_v52, %v11736_v36  ;;  %v1308_v48 = vadd.f32 %v9387_v49, %v1204_v37  ;;  %v11748_v49 = vld [vmem:[%s735_s3] ss:$0 sm:$0xff]  ;;  %s13316_s3 = scalar_lea.vmem [#allocation14], %s11362_s17 }
 0x21a   : > { %v9392_v54 = vpop.f32.mrf.mxu1  ;;  %v1474_v55 = vpop.f32.mrf.mxu0 }
 0x21b   : > { %v1405_v17 = vadd.f32 %v9392_v54, %v1303_v12 }
 0x21c   : > { %v1372_v56 = vpop.f32.mrf.mxu1  ;;  %v9403_v57 = vpop.f32.mrf.mxu0 }
 0x21d   : > { %v1403_v22 = vadd.f32 %v1372_v56, %v1301_v15  ;;  %v1507_v29 = vadd.f32 %v9402_v53, %v1405_v17 }
 0x21e   : > { %v9393_v58 = vpop.f32.mrf.mxu1  ;;  %v1477_v59 = vpop.f32.mrf.mxu0 }
 0x21f   : > { %v1406_v31 = vadd.f32 %v9393_v58, %v1304_v21  ;;  %v1505_v42 = vadd.f32 %v1474_v55, %v1403_v22  ;;  %v1306_v55 = vadd.f32 %v11738_v51, %v1196_v30 }
 0x220   : > { %v1375_v60 = vpop.f32.mrf.mxu1  ;;  %v9406_v61 = vpop.f32.mrf.mxu0 }
 0x221   : > { %v1404_v5 = vadd.f32 %v1375_v60, %v1302_v26  ;;  %v1508_v54 = vadd.f32 %v9403_v57, %v1406_v31 }
 0x222   : > { %v9396_v62 = vpop.f32.mrf.mxu1  ;;  %v1490_v63 = vpop.f32.mrf.mxu0 }
 0x223   : > { %v1409_v46 = vadd.f32 %v9396_v62, %v1307_v40  ;;  %v1506_v58 = vadd.f32 %v1477_v59, %v1404_v5 }
 0x224   : > { %v1388_v0 = vpop.f32.mrf.mxu1  ;;  %v11740_v1 = vpop.f32.mrf.mxu0 }
 0x225   : > { %v1407_v43 = vadd.f32 %v1388_v0, %v1305_v44  ;;  %v1511_v60 = vadd.f32 %v9406_v61, %v1409_v46 }
 0x226   : > { %v9397_v2 = vpop.f32.mrf.mxu1  ;;  %v11742_v3 = vpop.f32.mrf.mxu0 }
 0x227   : > { %v1509_v57 = vadd.f32 %v1490_v63, %v1407_v43 }
 0x228   : > { %v1391_v4 = vpop.f32.mrf.mxu1  ;;  %v9422_v6 = vpop.f32.mrf.mxu0 }
 0x22a   : > { %v9412_v8 = vpop.f32.mrf.mxu1  ;;  %v1679_v10 = vpop.f32.mrf.mxu0 }
 0x22b   : > { %v1609_v39 = vadd.f32 %v9412_v8, %v1507_v29  ;;  %v1410_v8 = vadd.f32 %v9397_v2, %v1308_v48 }
 0x22c   : > { %v1576_v11 = vpop.f32.mrf.mxu1  ;;  %v9423_v7 = vpop.f32.mrf.mxu0 }
 0x22d   : > { %v1607_v56 = vadd.f32 %v1576_v11, %v1505_v42  ;;  %v1712_v45 = vadd.f32 %v9422_v6, %v1609_v39  ;;  %v1408_v11 = vadd.f32 %v1391_v4, %v1306_v55  ;;  %v1512_v51 = vadd.f32 %v11740_v1, %v1410_v8  ;;  %v1971_v55 = vld [vmem:[#allocation3 + $0x1] sm:$0xff] }
 0x22e   : > { %v9413_v14 = vpop.f32.mrf.mxu1  ;;  %v1682_v18 = vpop.f32.mrf.mxu0 }
 0x22f   : > { %v1610_v34 = vadd.f32 %v9413_v14, %v1508_v54  ;;  %v1710_v9 = vadd.f32 %v1679_v10, %v1607_v56  ;;  %v1510_v4 = vadd.f32 %v11742_v3, %v1408_v11 }
 0x230   : > { %v1579_v20 = vpop.f32.mrf.mxu1  ;;  %v9426_v23 = vpop.f32.mrf.mxu0 }
 0x231   : > { %v1608_v36 = vadd.f32 %v1579_v20, %v1506_v58  ;;  %v1713_v59 = vadd.f32 %v9423_v7, %v1610_v34 }
 0x232   : > { %v9416_v25 = vpop.f32.mrf.mxu1  ;;  %v1695_v38 = vpop.f32.mrf.mxu0 }
 0x233   : > { %v1613_v12 = vadd.f32 %v9416_v25, %v1511_v60  ;;  %v1711_v15 = vadd.f32 %v1682_v18, %v1608_v36 }
 0x234   : > { %v1592_v33 = vpop.f32.mrf.mxu1  ;;  %v9427_v35 = vpop.f32.mrf.mxu0 }
 0x235   : > { %v1611_v61 = vadd.f32 %v1592_v33, %v1509_v57  ;;  %v1716_v19 = vadd.f32 %v9426_v23, %v1613_v12 }
 0x236   : > { %v9417_v41 = vpop.f32.mrf.mxu1  ;;  %v1698_v32 = vpop.f32.mrf.mxu0 }
 0x237   : > { %v1614_v20 = vadd.f32 %v9417_v41, %v1512_v51  ;;  %v1714_v26 = vadd.f32 %v1695_v38, %v1611_v61  ;;  %v10274_v51 = vld [vmem:[%s11413_s29 + $0x20] sm:$0xff]   ;;  %v10276_v61 = vld [vmem:[%s11413_s29 + $0x30] sm:$0xff]  }
 0x238   : > { %v1595_v53 = vpop.f32.mrf.mxu1  ;;  %v9442_v50 = vpop.f32.mrf.mxu0 }
 0x239   : > { %v1612_v29 = vadd.f32 %v1595_v53, %v1510_v4  ;;  %v1717_v33 = vadd.f32 %v9427_v35, %v1614_v20  ;;  %v10277_v4 = vld [vmem:[%s11413_s29 + $0x48] sm:$0xff]  }
 0x23a   : > { %v9432_v47 = vpop.f32.mrf.mxu1  ;;  %v1883_v62 = vpop.f32.mrf.mxu0  ;;  %v2166_v20 = vld [vmem:[#allocation3 + $0x2] sm:$0xff] }
 0x23b   : > { %v1814_v52 = vadd.f32 %v9432_v47, %v1712_v45  ;;  %v1715_v38 = vadd.f32 %v1698_v32, %v1612_v29  ;;  %v1955_v32 = vld [vmem:[#allocation3] sm:$0xff] }
 0x23c   : > { %v1781_v0 = vpop.f32.mrf.mxu1  ;;  %v9443_v14 = vpop.f32.mrf.mxu0 }
 0x23d   : > { %v1916_v6 = vadd.f32 %v9442_v50, %v1814_v52  ;;  %v1812_v13 = vadd.f32 %v1781_v0, %v1710_v9 }
 0x23e   : > { %v9433_v2 = vpop.f32.mrf.mxu1  ;;  %v1886_v63 = vpop.f32.mrf.mxu0 }
 0x23f   : > { %v1930_v10 = vadd.f32 %v11748_v49, %v1916_v6  ;;  %v1914_v16 = vadd.f32 %v1883_v62, %v1812_v13  ;;  %v1815_v17 = vadd.f32 %v9433_v2, %v1713_v59 }
 0x240   : > { %v1784_v21 = vpop.f32.mrf.mxu1  ;;  %v9446_v1 = vpop.f32.mrf.mxu0 }
 0x241   : > { %v1938_v7 = vmax.f32 %v1930_v10, 0.0  ;;  %v1928_v22 = vadd.f32 %v11748_v49, %v1914_v16  ;;  %v1917_v24 = vadd.f32 %v9443_v14, %v1815_v17  ;;  %v1813_v25 = vadd.f32 %v1784_v21, %v1711_v15 }
 0x242   : > { %v9436_v18 = vpop.f32.mrf.mxu1  ;;  %v1899_v23 = vpop.f32.mrf.mxu0 }
 0x243   : > { %1949 = vst.msk [vmem:[#allocation3 + $0x31] sm:$0xff] %vm1946_vm12, %v1938_v7  ;;  %v1936_v31 = vmax.f32 %v1928_v22, 0.0  ;;  %v1931_v40 = vadd.f32 %v11748_v49, %v1917_v24  ;;  %v1915_v37 = vadd.f32 %v1886_v63, %v1813_v25  ;;  %v1818_v3 = vadd.f32 %v9436_v18, %v1716_v19  ;;  %v10279_v19 = vld [vmem:[%s11413_s29 + $0x58] sm:$0xff]  }
 0x244   : > { %v1797_v42 = vpop.f32.mrf.mxu1  ;;  %v9447_v41 = vpop.f32.mrf.mxu0 }
 0x245   : > { %1947 = vst.msk [vmem:[#allocation3 + $0x11] sm:$0xff] %vm1946_vm12, %v1936_v31  ;;  %v1939_v5 = vmax.f32 %v1931_v40, 0.0  ;;  %v1929_v39 = vadd.f32 %v11748_v49, %v1915_v37  ;;  %v1920_v44 = vadd.f32 %v9446_v1, %v1818_v3  ;;  %v1816_v30 = vadd.f32 %v1797_v42, %v1714_v26 }
 0x246   : > { %v9437_v46 = vpop.f32.mrf.mxu1  ;;  %v1902_v50 = vpop.f32.mrf.mxu0 }
 0x247   : > { %1950 = vst.msk [vmem:[#allocation3 + $0x41] sm:$0xff] %vm1946_vm12, %v1939_v5  ;;  %v1937_v54 = vmax.f32 %v1929_v39, 0.0  ;;  %v1934_v56 = vadd.f32 %v11748_v49, %v1920_v44  ;;  %v1918_v48 = vadd.f32 %v1899_v23, %v1816_v30  ;;  %v1819_v43 = vadd.f32 %v9437_v46, %v1717_v33  ;;  %v10278_v23 = vld [vmem:[%s11413_s29 + $0x40] sm:$0xff]   ;;  %v10280_v5 = vld [vmem:[%s11413_s29 + $0x50] sm:$0xff]   ;;  %v10281_v39 = vld [vmem:[%s11413_s29 + $0x68] sm:$0xff]  }
 0x248   : > { %v1800_v53 = vpop.f32.mrf.mxu1 }
 0x249   : > { %1948 = vst.msk [vmem:[#allocation3 + $0x21] sm:$0xff] %vm1946_vm12, %v1937_v54  ;;  %v1942_v35 = vmax.f32 %v1934_v56, 0.0  ;;  %v1932_v58 = vadd.f32 %v11748_v49, %v1918_v48  ;;  %v1921_v45 = vadd.f32 %v9447_v41, %v1819_v43  ;;  %v1817_v34 = vadd.f32 %v1800_v53, %v1715_v38  ;;  %v10283_v54 = vld [vmem:[%s11413_s29 + $0x78] sm:$0xff]  }
 0x24a   : > { %v11772_v0 = vld [vmem:[#allocation3 + $0x31] sm:$0xff] }
 0x24b   : > { %1953 = vst.msk [vmem:[#allocation3 + $0x71] sm:$0xff] %vm1946_vm12, %v1942_v35  ;;  %v1940_v60 = vmax.f32 %v1932_v58, 0.0  ;;  %v1935_v8 = vadd.f32 %v11748_v49, %v1921_v45  ;;  %v1919_v47 = vadd.f32 %v1902_v50, %v1817_v34  ;;  %v1958_v13 = vld [vmem:[#allocation3 + $0x30] sm:$0xff]  ;;  %v10282_v35 = vld [vmem:[%s11413_s29 + $0x60] sm:$0xff]   ;;  %v10285_v50 = vld [vmem:[%s11413_s29 + $0x88] sm:$0xff]  }
 0x24c   : > { %v11764_v9 = vld [vmem:[#allocation3 + $0x11] sm:$0xff] }
 0x24d   : > { %v1956_v36 = vld [vmem:[#allocation3 + $0x10] sm:$0xff]  ;;  %1951 = vst.msk [vmem:[#allocation3 + $0x51] sm:$0xff] %vm1946_vm12, %v1940_v60  ;;  %v1943_v52 = vmax.f32 %v1935_v8, 0.0  ;;  %v1933_v62 = vadd.f32 %v11748_v49, %v1919_v47  ;;  %v1979_v57 = vpack.c.bf16 %v11764_v9, %v1971_v55  ;;  %v10286_v47 = vld [vmem:[%s11413_s29 + $0x80] sm:$0xff]  }
 0x24e   : > { %v1963_v11 = vpack.c.bf16 %v1956_v36, %v1955_v32  ;;  %v11789_v2 = vld [vmem:[#allocation3 + $0x41] sm:$0xff]  ;;  %v2169_v31 = vld [vmem:[#allocation3 + $0x32] sm:$0xff] }
 0x24f   : > { %1954 = vst.msk [vmem:[#allocation3 + $0x81] sm:$0xff] %vm1946_vm12, %v1943_v52  ;;  %v1941_v12 = vmax.f32 %v1933_v62, 0.0  ;;  %9452 = vmatprep.mubr.msk.bf16.mxu1 %vm1946_vm12, %v1979_v57  ;;  %v1959_v10 = vld [vmem:[#allocation3 + $0x40] sm:$0xff]  ;;  %v2403_v43 = vpack.c.bf16 %v11789_v2, %v11772_v0  ;;  %v10284_v34 = vld [vmem:[%s11413_s29 + $0x70] sm:$0xff]  }
 0x250   : > { %9464 = vmatprep.mubr.msk.bf16.mxu0 %vm1946_vm12, %v1963_v11  ;;  %v11774_v59 = vld [vmem:[#allocation3 + $0x21] sm:$0xff]  ;;  %v2289_v37 = vpack.c.bf16 %v1959_v10, %v1958_v13  ;;  %v2858_v57 = vld [vmem:[#allocation3 + $0x92] sm:$0xff] }
 0x251   : > { %v1957_v6 = vld [vmem:[#allocation3 + $0x20] sm:$0xff]  ;;  %1952 = vst.msk [vmem:[#allocation3 + $0x61] sm:$0xff] %vm1946_vm12, %v1941_v12  ;;  %v11779_v49 = vpack.c.bf16 %v11772_v0, %v11774_v59  ;;  %v2402_v56 = vpack.c.bf16 %v11774_v59, %v11764_v9  ;;  %v2630_v9 = vld [vmem:[#allocation3 + $0x90] sm:$0xff]  ;;  %v10289_v59 = vld [vmem:[%s11381_s11 + $0x30] sm:$0xff]  }
 0x252   : > { %v11781_v14 = vpack.c.bf16 %v1958_v13, %v1957_v6  ;;  %v1962_v22 = vld [vmem:[#allocation3 + $0x70] sm:$0xff]  ;;  %v2288_v26 = vpack.c.bf16 %v1957_v6, %v1956_v36  ;;  %v2168_v29 = vld [vmem:[#allocation3 + $0x22] sm:$0xff]  ;;  %v10290_v6 = vld [vmem:[%s11381_s11 + $0x10] sm:$0xff]  }
 0x253   : > { %9453 = vmatmul.mubr.msk.bf16.vlgmr.msra.gmra.mxu1 %vm1946_vm12, %v11779_v49  ;;  %v11820_v40 = vpack.c.bf16 %v2169_v31, %v2168_v29  ;;  %v2170_v3 = vld [vmem:[#allocation3 + $0x42] sm:$0xff]  ;;  %v2173_v38 = vld [vmem:[#allocation3 + $0x72] sm:$0xff] }
 0x254   : > { %9465 = vmatmul.mubr.msk.bf16.vlgmr.msra.gmra.mxu0 %vm1946_vm12, %v11781_v14  ;;  %9473 = vmatpush3.bf16.msra.mxu1 %v11729_v27  ;;  %v11792_v15 = vld [vmem:[#allocation3 + $0x51] sm:$0xff]  ;;  %v2517_v53 = vpack.c.bf16 %v2170_v3, %v2169_v31  ;;  %v10287_v12 = vld [vmem:[%s11381_s11 + $0x38] sm:$0xff]  }
 0x255   : > { %v1960_v16 = vld [vmem:[#allocation3 + $0x50] sm:$0xff]  ;;  %9485 = vmatpush3.bf16.msra.mxu0 %v11733_v28  ;;  %v11797_v17 = vpack.c.bf16 %v11792_v15, %v11789_v2  ;;  %9474 = vmatprep.subr.bf16.mxu1 %v10274_v51  ;;  %v10288_v0 = vld [vmem:[%s11381_s11 + $0x18] sm:$0xff]  }
 0x256   : > { %v11799_v63 = vpack.c.bf16 %v1960_v16, %v1959_v10  ;;  %9486 = vmatprep.subr.bf16.mxu0 %v10276_v61  ;;  %v11807_v27 = vld [vmem:[#allocation3 + $0x71] sm:$0xff]  ;;  %v2287_v30 = vld [vmem:[#allocation3 + $0x80] sm:$0xff] }
 0x257   : > { %9456 = vmatprep.mubr.msk.bf16.mxu1 %vm1946_vm12, %v11797_v17  ;;  %v2167_v28 = vld [vmem:[#allocation3 + $0x12] sm:$0xff]  ;;  %v2291_v41 = vpack.c.bf16 %v2287_v30, %v1962_v22  ;;  %v2401_v55 = vld [vmem:[#allocation3 + $0x81] sm:$0xff]  ;;  %v2634_v52 = vpack.c.bf16 %v2630_v9, %v2287_v30 }
 0x258   : > { %9468 = vmatprep.mubr.msk.bf16.mxu0 %vm1946_vm12, %v11799_v63  ;;  %v1977_v21 = vld [vmem:[#allocation3 + $0x61] sm:$0xff]  ;;  %9475 = vmatpush3.bf16.msra.mxu1 %v10274_v51  ;;  %v2174_v1 = vpack.c.bf16 %v2167_v28, %v2166_v20  ;;  %v2171_v18 = vld [vmem:[#allocation3 + $0x52] sm:$0xff]  ;;  %v2516_v48 = vpack.c.bf16 %v2168_v29, %v2167_v28  ;;  %v2405_v60 = vpack.c.bf16 %v2401_v55, %v11807_v27 }
 0x259   : > { %v1961_v7 = vld [vmem:[#allocation3 + $0x60] sm:$0xff]  ;;  %9487 = vmatpush3.bf16.msra.mxu0 %v10276_v61  ;;  %v11810_v24 = vpack.c.bf16 %v11807_v27, %v1977_v21  ;;  %9496 = vmatprep.subr.bf16.mxu1 %v10277_v4  ;;  %v11823_v33 = vpack.c.bf16 %v2171_v18, %v2170_v3  ;;  %v2404_v58 = vpack.c.bf16 %v1977_v21, %v11792_v15  ;;  %v2744_v36 = vld [vmem:[#allocation3 + $0x91] sm:$0xff]  ;;  %v10294_v51 = vld [vmem:[%s11381_s11] sm:$0xff]  }
 0x25a   : > { %v11812_v25 = vpack.c.bf16 %v1962_v22, %v1961_v7  ;;  %9508 = vmatprep.subr.bf16.mxu0 %v10279_v19  ;;  %v2290_v42 = vpack.c.bf16 %v1961_v7, %v1960_v16  ;;  %v2172_v44 = vld [vmem:[#allocation3 + $0x62] sm:$0xff]  ;;  %v2748_v62 = vpack.c.bf16 %v2744_v36, %v2401_v55  ;;  %v10291_v13 = vld [vmem:[%s11381_s11 + $0x28] sm:$0xff]  }
 0x25b   : > { %9457 = vmatmul.mubr.msk.bf16.gmra.mxu1 %vm1946_vm12, %v11810_v24  ;;  %v2177_v46 = vpack.c.bf16 %v2173_v38, %v2172_v44  ;;  %v2518_v45 = vpack.c.bf16 %v2172_v44, %v2171_v18  ;;  %v2515_v32 = vld [vmem:[#allocation3 + $0x82] sm:$0xff] }
 0x25c   : > { %9469 = vmatmul.mubr.msk.bf16.gmra.mxu0 %vm1946_vm12, %v11812_v25  ;;  %9476 = vmatprep.mubr.msk.bf16.mxu1 %vm1946_vm12, %v2174_v1  ;;  %v2519_v8 = vpack.c.bf16 %v2515_v32, %v2173_v38  ;;  %v2862_v11 = vpack.c.bf16 %v2858_v57, %v2515_v32  ;;  %v11883_v61 = vld [vmem:[%s11381_s11 + $0x58] sm:$0xff]  }
 0x25d   : > { %9488 = vmatprep.mubr.msk.bf16.mxu0 %vm1946_vm12, %v2288_v26  ;;  %13303 = vst [vmem:[#allocation40_spill] sm:$0xff] %v11883_v61  ;;  %v11886_v2 = vld [vmem:[%s11381_s11 + $0x78] sm:$0xff]  }
 0x25e   : > { %13304 = vst [vmem:[#allocation41_spill] sm:$0xff] %v11886_v2 }
 0x263   : > { %9477 = vmatmul.mubr.msk.bf16.vlgmr.msra.gmra.mxu1 %vm1946_vm12, %v11820_v40 }
 0x264   : > { %9489 = vmatmul.mubr.msk.bf16.vlgmr.msra.gmra.mxu0 %vm1946_vm12, %v2289_v37  ;;  %9497 = vmatpush3.bf16.msra.mxu1 %v10277_v4 }
 0x265   : > { %9480 = vmatprep.mubr.msk.bf16.mxu1 %vm1946_vm12, %v11823_v33  ;;  %9492 = vmatprep.mubr.msk.bf16.mxu0 %vm1946_vm12, %v2290_v42 }
 0x266   : > { %9498 = vmatprep.subr.bf16.mxu1 %v10278_v23  ;;  %9509 = vmatpush3.bf16.msra.mxu0 %v10279_v19 }
 0x267   : > { %9510 = vmatprep.subr.bf16.mxu0 %v10280_v5 }
 0x268   : > { %9499 = vmatpush3.bf16.msra.mxu1 %v10278_v23 }
 0x269   : > { %9520 = vmatprep.subr.bf16.mxu1 %v10281_v39 }
 0x26a   : > { %9511 = vmatpush3.bf16.msra.mxu0 %v10280_v5 }
 0x26b   : > { %9481 = vmatmul.mubr.msk.bf16.gmra.mxu1 %vm1946_vm12, %v2177_v46  ;;  %9532 = vmatprep.subr.bf16.mxu0 %v10283_v54 }
 0x26c   : > { %9493 = vmatmul.mubr.msk.bf16.gmra.mxu0 %vm1946_vm12, %v2291_v41  ;;  %9500 = vmatprep.mubr.msk.bf16.mxu1 %vm1946_vm12, %v2402_v56 }
 0x26d   : > { %9512 = vmatprep.mubr.msk.bf16.mxu0 %vm1946_vm12, %v2516_v48 }
 0x273   : > { %9501 = vmatmul.mubr.msk.bf16.vlgmr.msra.gmra.mxu1 %vm1946_vm12, %v2403_v43 }
 0x274   : > { %9513 = vmatmul.mubr.msk.bf16.vlgmr.msra.gmra.mxu0 %vm1946_vm12, %v2517_v53  ;;  %9521 = vmatpush3.bf16.msra.mxu1 %v10281_v39 }
 0x275   : > { %9504 = vmatprep.mubr.msk.bf16.mxu1 %vm1946_vm12, %v2404_v58  ;;  %9516 = vmatprep.mubr.msk.bf16.mxu0 %vm1946_vm12, %v2518_v45 }
 0x276   : > { %9522 = vmatprep.subr.bf16.mxu1 %v10282_v35  ;;  %9533 = vmatpush3.bf16.msra.mxu0 %v10283_v54 }
 0x277   : > { %9534 = vmatprep.subr.bf16.mxu0 %v10284_v34 }
 0x278   : > { %9523 = vmatpush3.bf16.msra.mxu1 %v10282_v35 }
 0x279   : > { %9544 = vmatprep.subr.bf16.mxu1 %v10285_v50 }
 0x27a   : > { %9535 = vmatpush3.bf16.msra.mxu0 %v10284_v34 }
 0x27b   : > { %9505 = vmatmul.mubr.msk.bf16.gmra.mxu1 %vm1946_vm12, %v2405_v60  ;;  %9556 = vmatprep.subr.bf16.mxu0 %v10287_v12 }
 0x27c   : > { %9517 = vmatmul.mubr.msk.bf16.gmra.mxu0 %vm1946_vm12, %v2519_v8  ;;  %9524 = vmatprep.mubr.msk.bf16.mxu1 %vm1946_vm12, %v11781_v14  ;;  %v10293_v14 = vld [vmem:[%s11381_s11 + $0x20] sm:$0xff]  }
 0x27d   : > { %9536 = vmatprep.mubr.msk.bf16.mxu0 %vm1946_vm12, %v11779_v49  ;;  %v10292_v49 = vld [vmem:[%s11381_s11 + $0x8] sm:$0xff]  }
 0x283   : > { %9525 = vmatmul.mubr.msk.bf16.vlgmr.msra.gmra.mxu1 %vm1946_vm12, %v11799_v63 }
 0x284   : > { %9537 = vmatmul.mubr.msk.bf16.vlgmr.msra.gmra.mxu0 %vm1946_vm12, %v11797_v17  ;;  %9545 = vmatpush3.bf16.msra.mxu1 %v10285_v50 }
 0x285   : > { %9528 = vmatprep.mubr.msk.bf16.mxu1 %vm1946_vm12, %v11812_v25  ;;  %9540 = vmatprep.mubr.msk.bf16.mxu0 %vm1946_vm12, %v11810_v24 }
 0x286   : > { %9546 = vmatprep.subr.bf16.mxu1 %v10286_v47  ;;  %9557 = vmatpush3.bf16.msra.mxu0 %v10287_v12 }
 0x287   : > { %9558 = vmatprep.subr.bf16.mxu0 %v10289_v59 }
 0x288   : > { %9547 = vmatpush3.bf16.msra.mxu1 %v10286_v47 }
 0x289   : > { %9572 = vmatprep.subr.bf16.mxu1 %v10288_v0 }
 0x28a   : > { %9559 = vmatpush3.bf16.msra.mxu0 %v10289_v59 }
 0x28b   : > { %9529 = vmatmul.mubr.msk.bf16.gmra.mxu1 %vm1946_vm12, %v2634_v52  ;;  %9560 = vmatprep.subr.bf16.mxu0 %v10291_v13 }
 0x28c   : > { %9541 = vmatmul.mubr.msk.bf16.gmra.mxu0 %vm1946_vm12, %v2748_v62  ;;  %9548 = vmatprep.mubr.msk.bf16.mxu1 %vm1946_vm12, %v11820_v40 }
 0x28e   : > { %9561 = vmatpush3.bf16.msra.mxu0 %v10291_v13 }
 0x28f   : > { %9562 = vmatprep.subr.bf16.mxu0 %v10293_v14 }
 0x292   : > { %9563 = vmatpush3.bf16.msra.mxu0 %v10293_v14 }
 0x293   : > { %9549 = vmatmul.mubr.msk.bf16.vlgmr.msra.gmra.mxu1 %vm1946_vm12, %v11823_v33  ;;  %9588 = vmatprep.subr.bf16.mxu0 %v11883_v61 }
 0x294   : > { %9552 = vmatprep.mubr.msk.bf16.mxu1 %vm1946_vm12, %v2177_v46  ;;  %9573 = vmatpush3.bf16.msra.mxu1 %v10288_v0 }
 0x295   : > { %9574 = vmatprep.subr.bf16.mxu1 %v10290_v6 }
 0x298   : > { %9575 = vmatpush3.bf16.msra.mxu1 %v10290_v6 }
 0x299   : > { %9576 = vmatprep.subr.bf16.mxu1 %v10292_v49 }
 0x29b   : > { %9553 = vmatmul.mubr.msk.bf16.gmra.mxu1 %vm1946_vm12, %v2862_v11 }
 0x29c   : > { %9577 = vmatpush3.bf16.msra.mxu1 %v10292_v49 }
 0x29d   : > { %9578 = vmatprep.subr.bf16.mxu1 %v10294_v51 }
 0x2a0   : > { %9579 = vmatpush3.bf16.msra.mxu1 %v10294_v51 }
 0x2a1   : > { %9604 = vmatprep.subr.bf16.mxu1 %v11886_v2 }
 0x313   : > { %v9454_v15 = vpop.f32.mrf.mxu1 }
 0x314   : > { %v9466_v10 = vpop.f32.mrf.mxu0 }
 0x315   : > { %v2046_v16 = vpop.f32.mrf.mxu1  ;;  %v2144_v8 = vadd.f32 %v9466_v10, %v9454_v15 }
 0x316   : > { %v2135_v17 = vpop.f32.mrf.mxu0 }
 0x317   : > { %v9455_v63 = vpop.f32.mrf.mxu1  ;;  %v2136_v36 = vadd.f32 %v2135_v17, %v2046_v16 }
 0x318   : > { %v9467_v4 = vpop.f32.mrf.mxu0 }
 0x319   : > { %v2049_v19 = vpop.f32.mrf.mxu1  ;;  %v2147_v11 = vadd.f32 %v9467_v4, %v9455_v63 }
 0x31a   : > { %v2138_v27 = vpop.f32.mrf.mxu0 }
 0x31b   : > { %v9458_v20 = vpop.f32.mrf.mxu1  ;;  %v2139_v59 = vadd.f32 %v2138_v27, %v2049_v19 }
 0x31c   : > { %v9470_v28 = vpop.f32.mrf.mxu0 }
 0x31d   : > { %v2062_v21 = vpop.f32.mrf.mxu1  ;;  %v2160_v49 = vadd.f32 %v9470_v28, %v9458_v20 }
 0x31e   : > { %v2151_v7 = vpop.f32.mrf.mxu0 }
 0x31f   : > { %v9459_v22 = vpop.f32.mrf.mxu1  ;;  %v2152_v15 = vadd.f32 %v2151_v7, %v2062_v21 }
 0x320   : > { %v9471_v24 = vpop.f32.mrf.mxu0 }
 0x321   : > { %v11890_v25 = vpop.f32.mrf.mxu1  ;;  %v2163_v17 = vadd.f32 %v9471_v24, %v9459_v22 }
 0x322   : > { %v2154_v1 = vpop.f32.mrf.mxu0 }
 0x323   : > { %v9478_v26 = vpop.f32.mrf.mxu1  ;;  %v2155_v27 = vadd.f32 %v2154_v1, %v11890_v25 }
 0x324   : > { %v9490_v29 = vpop.f32.mrf.mxu0  ;;  %v2274_v52 = vadd.f32 %v9478_v26, %v2144_v8 }
 0x325   : > { %v2241_v18 = vpop.f32.mrf.mxu1 }
 0x326   : > { %v2355_v31 = vpop.f32.mrf.mxu0  ;;  %v2272_v12 = vadd.f32 %v2241_v18, %v2136_v36  ;;  %v2388_v6 = vadd.f32 %v9490_v29, %v2274_v52 }
 0x327   : > { %v9479_v40 = vpop.f32.mrf.mxu1 }
 0x328   : > { %v9491_v37 = vpop.f32.mrf.mxu0  ;;  %v2275_v13 = vadd.f32 %v9479_v40, %v2147_v11  ;;  %v2386_v2 = vadd.f32 %v2355_v31, %v2272_v12 }
 0x329   : > { %v2244_v3 = vpop.f32.mrf.mxu1 }
 0x32a   : > { %v2358_v23 = vpop.f32.mrf.mxu0  ;;  %v2273_v61 = vadd.f32 %v2244_v3, %v2139_v59 }
 0x32b   : > { %v9482_v33 = vpop.f32.mrf.mxu1 }
 0x32c   : > { %v9494_v42 = vpop.f32.mrf.mxu0  ;;  %v2278_v10 = vadd.f32 %v9482_v33, %v2160_v49  ;;  %v2387_v4 = vadd.f32 %v2358_v23, %v2273_v61 }
 0x32d   : > { %v2257_v5 = vpop.f32.mrf.mxu1 }
 0x32e   : > { %v2371_v39 = vpop.f32.mrf.mxu0  ;;  %v2276_v26 = vadd.f32 %v2257_v5, %v2152_v15  ;;  %v2392_v20 = vadd.f32 %v9494_v42, %v2278_v10 }
 0x32f   : > { %v9483_v44 = vpop.f32.mrf.mxu1 }
 0x330   : > { %v9495_v30 = vpop.f32.mrf.mxu0  ;;  %v2279_v28 = vadd.f32 %v9483_v44, %v2163_v17  ;;  %v2390_v21 = vadd.f32 %v2371_v39, %v2276_v26  ;;  %v8699_v39 = vld [vmem:[%s13308_s16] ss:$0 sm:$0xff] }
 0x331   : > { %v2260_v38 = vpop.f32.mrf.mxu1 }
 0x332   : > { %v11892_v46 = vpop.f32.mrf.mxu0  ;;  %v2277_v7 = vadd.f32 %v2260_v38, %v2155_v27  ;;  %v2393_v5 = vadd.f32 %v9495_v30, %v2279_v28 }
 0x333   : > { %v9502_v41 = vpop.f32.mrf.mxu1 }
 0x334   : > { %v9514_v54 = vpop.f32.mrf.mxu0  ;;  %v2391_v1 = vadd.f32 %v11892_v46, %v2277_v7 }
 0x335   : > { %v2469_v56 = vpop.f32.mrf.mxu1 }
 0x336   : > { %v2583_v48 = vpop.f32.mrf.mxu0  ;;  %v2500_v16 = vadd.f32 %v2469_v56, %v2386_v2 }
 0x337   : > { %v9503_v43 = vpop.f32.mrf.mxu1 }
 0x338   : > { %v9515_v53 = vpop.f32.mrf.mxu0  ;;  %v2614_v31 = vadd.f32 %v2583_v48, %v2500_v16 }
 0x339   : > { %v2472_v35 = vpop.f32.mrf.mxu1 }
 0x33a   : > { %v2586_v58 = vpop.f32.mrf.mxu0  ;;  %v2501_v40 = vadd.f32 %v2472_v35, %v2387_v4 }
 0x33b   : > { %v9506_v45 = vpop.f32.mrf.mxu1 }
 0x33c   : > { %v9518_v34 = vpop.f32.mrf.mxu0 }
 0x33d   : > { %v2485_v50 = vpop.f32.mrf.mxu1 }
 0x33e   : > { %v11894_v55 = vpop.f32.mrf.mxu0  ;;  %v2504_v61 = vadd.f32 %v2485_v50, %v2390_v21 }
 0x33f   : > { %13305 = vst [vmem:[#allocation42_spill] sm:$0xff] %v11894_v55  ;;  %v9507_v32 = vpop.f32.mrf.mxu1 }
 0x340   : > { %v11896_v60 = vpop.f32.mrf.mxu0  ;;  %v2507_v44 = vadd.f32 %v9507_v32, %v2393_v5 }
 0x341   : > { %13306 = vst [vmem:[#allocation43_spill] sm:$0xff] %v11896_v60  ;;  %v2488_v47 = vpop.f32.mrf.mxu1  ;;  %v2502_v60 = vadd.f32 %v9502_v41, %v2388_v6  ;;  %v2615_v41 = vadd.f32 %v2586_v58, %v2501_v40 }
 0x342   : > { %v11898_v9 = vpop.f32.mrf.mxu0 }
 0x343   : > { %13307 = vst [vmem:[#allocation44_spill] sm:$0xff] %v11898_v9  ;;  %v9526_v62 = vpop.f32.mrf.mxu1  ;;  %v2389_v9 = vadd.f32 %v9491_v37, %v2275_v13  ;;  %v2616_v18 = vadd.f32 %v9514_v54, %v2502_v60  ;;  %v2506_v37 = vadd.f32 %v9506_v45, %v2392_v20  ;;  %v2505_v60 = vadd.f32 %v2488_v47, %v2391_v1 }
 0x344   : > { %v9538_v57 = vpop.f32.mrf.mxu0 }
 0x345   : > { %v2698_v0 = vpop.f32.mrf.mxu1  ;;  %v2503_v19 = vadd.f32 %v9503_v43, %v2389_v9  ;;  %v2731_v3 = vadd.f32 %v9526_v62, %v2616_v18  ;;  %v2620_v42 = vadd.f32 %v9518_v34, %v2506_v37  ;;  %v3018_v37 = vld [vmem:[#allocation4 + $0x1] sm:$0xff] }
 0x346   : > { %v2812_v14 = vpop.f32.mrf.mxu0  ;;  %v2729_v33 = vadd.f32 %v2698_v0, %v2614_v31  ;;  %v13309_v45 = vld [vmem:[#allocation42_spill] sm:$0xff] }
 0x347   : > { %v9527_v51 = vpop.f32.mrf.mxu1  ;;  %v2617_v24 = vadd.f32 %v9515_v53, %v2503_v19  ;;  %v2845_v54 = vadd.f32 %v9538_v57, %v2731_v3  ;;  %v2618_v53 = vadd.f32 %v13309_v45, %v2504_v61 }
 0x348   : > { %v9539_v8 = vpop.f32.mrf.mxu0  ;;  %v2843_v48 = vadd.f32 %v2812_v14, %v2729_v33  ;;  %v13310_v52 = vld [vmem:[#allocation43_spill] sm:$0xff] }
 0x349   : > { %v2701_v55 = vpop.f32.mrf.mxu1  ;;  %v2732_v25 = vadd.f32 %v9527_v51, %v2617_v24  ;;  %v2621_v62 = vadd.f32 %v13310_v52, %v2507_v44  ;;  %v10299_v52 = vld [vmem:[%s11381_s11 + $0x48] sm:$0xff]  }
 0x34a   : > { %v2815_v2 = vpop.f32.mrf.mxu0  ;;  %v2730_v43 = vadd.f32 %v2701_v55, %v2615_v41  ;;  %v13311_v55 = vld [vmem:[#allocation44_spill] sm:$0xff] }
 0x34b   : > { %v9530_v63 = vpop.f32.mrf.mxu1  ;;  %v2846_v9 = vadd.f32 %v9539_v8, %v2732_v25  ;;  %v2619_v59 = vadd.f32 %v13311_v55, %v2505_v60  ;;  %v13313_v60 = vld [vmem:[#allocation41_spill] sm:$0xff] }
 0x34c   : > { %v9542_v56 = vpop.f32.mrf.mxu0  ;;  %v2735_v30 = vadd.f32 %v9530_v63, %v2620_v42  ;;  %v2844_v57 = vadd.f32 %v2815_v2, %v2730_v43  ;;  %v2998_v2 = vld [vmem:[#allocation4] sm:$0xff]  ;;  %v10297_v43 = vld [vmem:[%s11381_s11 + $0x50] sm:$0xff]  }
 0x34d   : > { %v2714_v29 = vpop.f32.mrf.mxu1 }
 0x34e   : > { %v2733_v46 = vadd.f32 %v2714_v29, %v2618_v53  ;;  %v2828_v34 = vpop.f32.mrf.mxu0  ;;  %v2849_v6 = vadd.f32 %v9542_v56, %v2735_v30  ;;  %v13312_v53 = vld [vmem:[#allocation40_spill] sm:$0xff] }
 0x34f   : > { %v9531_v22 = vpop.f32.mrf.mxu1 }
 0x350   : > { %v2736_v47 = vadd.f32 %v9531_v22, %v2621_v62  ;;  %v2847_v15 = vadd.f32 %v2828_v34, %v2733_v46  ;;  %v9543_v10 = vpop.f32.mrf.mxu0  ;;  %v10300_v62 = vld [vmem:[%s11381_s11 + $0x68] sm:$0xff]   ;;  %v3241_v34 = vld [vmem:[#allocation4 + $0x2] sm:$0xff] }
 0x351   : > { %v2717_v23 = vpop.f32.mrf.mxu1 }
 0x352   : > { %v2734_v17 = vadd.f32 %v2717_v23, %v2619_v59  ;;  %v2850_v18 = vadd.f32 %v9543_v10, %v2736_v47  ;;  %v2831_v28 = vpop.f32.mrf.mxu0 }
 0x353   : > { %v9550_v38 = vpop.f32.mrf.mxu1 }
 0x354   : > { %v2959_v35 = vadd.f32 %v9550_v38, %v2845_v54  ;;  %v2848_v31 = vadd.f32 %v2831_v28, %v2734_v17  ;;  %v10308_v28 = vld [vmem:[%s11381_s11 + $0xa8] sm:$0xff]  }
 0x355   : > { %v2926_v50 = vpop.f32.mrf.mxu1 }
 0x356   : > { %v2973_v58 = vadd.f32 %v8699_v39, %v2959_v35  ;;  %v2957_v36 = vadd.f32 %v2926_v50, %v2843_v48  ;;  %v10298_v35 = vld [vmem:[%s11381_s11 + $0x70] sm:$0xff]  }
 0x357   : > { %v9551_v32 = vpop.f32.mrf.mxu1 }
 0x358   : > { %v2981_v11 = vmax.f32 %v2973_v58, 0.0  ;;  %v2971_v12 = vadd.f32 %v8699_v39, %v2957_v36  ;;  %v2960_v0 = vadd.f32 %v9551_v32, %v2846_v9 }
 0x359   : > { %v2929_v13 = vpop.f32.mrf.mxu1 }
 0x35a   : > { %2992 = vst.msk [vmem:[#allocation4 + $0x31] sm:$0xff] %vm2989_vm13, %v2981_v11  ;;  %v2979_v49 = vmax.f32 %v2971_v12, 0.0  ;;  %v2974_v14 = vadd.f32 %v8699_v39, %v2960_v0  ;;  %v2958_v51 = vadd.f32 %v2929_v13, %v2844_v57  ;;  %v10302_v13 = vld [vmem:[%s11381_s11 + $0x60] sm:$0xff]  }
 0x35b   : > { %v9554_v16 = vpop.f32.mrf.mxu1 }
 0x35c   : > { %2990 = vst.msk [vmem:[#allocation4 + $0x11] sm:$0xff] %vm2989_vm13, %v2979_v49  ;;  %v2982_v26 = vmax.f32 %v2974_v14, 0.0  ;;  %v2972_v8 = vadd.f32 %v8699_v39, %v2958_v51  ;;  %v2963_v63 = vadd.f32 %v9554_v16, %v2849_v6  ;;  %v10301_v6 = vld [vmem:[%s11381_s11 + $0x40] sm:$0xff]   ;;  %v10303_v49 = vld [vmem:[%s11381_s11 + $0x98] sm:$0xff]  }
 0x35d   : > { %v2942_v4 = vpop.f32.mrf.mxu1  ;;  %v10304_v51 = vld [vmem:[%s11381_s11 + $0xb8] sm:$0xff]  }
 0x35e   : > { %2993 = vst.msk [vmem:[#allocation4 + $0x41] sm:$0xff] %vm2989_vm13, %v2982_v26  ;;  %v2980_v19 = vmax.f32 %v2972_v8, 0.0  ;;  %v2977_v27 = vadd.f32 %v8699_v39, %v2963_v63  ;;  %v2961_v20 = vadd.f32 %v2942_v4, %v2847_v15  ;;  %v10305_v8 = vld [vmem:[%s11381_s11 + $0x90] sm:$0xff]  }
 0x35f   : > { %v9555_v29 = vpop.f32.mrf.mxu1 }
 0x360   : > { %2991 = vst.msk [vmem:[#allocation4 + $0x21] sm:$0xff] %vm2989_vm13, %v2980_v19  ;;  %v2985_v40 = vmax.f32 %v2977_v27, 0.0  ;;  %v2975_v3 = vadd.f32 %v8699_v39, %v2961_v20  ;;  %v2964_v21 = vadd.f32 %v9555_v29, %v2850_v18  ;;  %v10306_v18 = vld [vmem:[%s11381_s11 + $0xb0] sm:$0xff]   ;;  %v10307_v19 = vld [vmem:[%s11381_s11 + $0x88] sm:$0xff]  }
 0x361   : > { %v2945_v7 = vpop.f32.mrf.mxu1  ;;  %v11919_v42 = vld [vmem:[#allocation4 + $0x31] sm:$0xff] }
 0x362   : > { %2996 = vst.msk [vmem:[#allocation4 + $0x71] sm:$0xff] %vm2989_vm13, %v2985_v40  ;;  %v2983_v22 = vmax.f32 %v2975_v3, 0.0  ;;  %v2978_v24 = vadd.f32 %v8699_v39, %v2964_v21  ;;  %v2962_v33 = vadd.f32 %v2945_v7, %v2848_v31  ;;  %v11923_v38 = vld [vmem:[#allocation4 + $0x30] sm:$0xff]  ;;  %v10309_v3 = vld [vmem:[%s11381_s11 + $0x80] sm:$0xff]  }
 0x363   : > { %v11912_v5 = vld [vmem:[#allocation4 + $0x11] sm:$0xff] }
 0x364   : > { %v2999_v61 = vld [vmem:[#allocation4 + $0x10] sm:$0xff]  ;;  %2994 = vst.msk [vmem:[#allocation4 + $0x51] sm:$0xff] %vm2989_vm13, %v2983_v22  ;;  %v2986_v23 = vmax.f32 %v2978_v24, 0.0  ;;  %v2976_v41 = vadd.f32 %v8699_v39, %v2962_v33  ;;  %v3026_v54 = vpack.c.bf16 %v11912_v5, %v3018_v37  ;;  %v10310_v37 = vld [vmem:[%s11381_s11 + $0xa0] sm:$0xff]   ;;  %v10312_v22 = vld [vmem:[%s11381_s11 + $0xf8] sm:$0xff]  }
 0x365   : > { %v3006_v25 = vpack.c.bf16 %v2999_v61, %v2998_v2  ;;  %v11939_v45 = vld [vmem:[#allocation4 + $0x41] sm:$0xff]  ;;  %v11959_v32 = vld [vmem:[#allocation4 + $0x12] sm:$0xff] }
 0x366   : > { %2997 = vst.msk [vmem:[#allocation4 + $0x81] sm:$0xff] %vm2989_vm13, %v2986_v23  ;;  %v2984_v1 = vmax.f32 %v2976_v41, 0.0  ;;  %9564 = vmatprep.mubr.msk.bf16.mxu0 %vm2989_vm13, %v3026_v54  ;;  %v3002_v50 = vld [vmem:[#allocation4 + $0x40] sm:$0xff]  ;;  %v3249_v59 = vpack.c.bf16 %v11959_v32, %v3241_v34  ;;  %v3244_v15 = vld [vmem:[#allocation4 + $0x32] sm:$0xff]  ;;  %v3510_v24 = vpack.c.bf16 %v11939_v45, %v11919_v42 }
 0x367   : > { %9580 = vmatprep.mubr.msk.bf16.mxu1 %vm2989_vm13, %v3006_v25  ;;  %v11921_v44 = vld [vmem:[#allocation4 + $0x21] sm:$0xff]  ;;  %v3380_v17 = vpack.c.bf16 %v3002_v50, %v11923_v38  ;;  %v10313_v33 = vld [vmem:[%s11381_s11 + $0xd0] sm:$0xff]   ;;  %v10315_v54 = vld [vmem:[%s11381_s11 + $0xc8] sm:$0xff]  }
 0x368   : > { %v3000_v56 = vld [vmem:[#allocation4 + $0x20] sm:$0xff]  ;;  %2995 = vst.msk [vmem:[#allocation4 + $0x61] sm:$0xff] %vm2989_vm13, %v2984_v1  ;;  %v11928_v39 = vpack.c.bf16 %v11919_v42, %v11921_v44  ;;  %v3509_v21 = vpack.c.bf16 %v11921_v44, %v11912_v5  ;;  %v10314_v23 = vld [vmem:[%s11381_s11 + $0xf0] sm:$0xff]   ;;  %v10316_v1 = vld [vmem:[%s11381_s11 + $0xe8] sm:$0xff]  }
 0x369   : > { %v11931_v48 = vpack.c.bf16 %v11923_v38, %v3000_v56  ;;  %v11957_v46 = vld [vmem:[#allocation4 + $0x71] sm:$0xff]  ;;  %v3379_v47 = vpack.c.bf16 %v3000_v56, %v2999_v61  ;;  %v3243_v14 = vld [vmem:[#allocation4 + $0x22] sm:$0xff] }
 0x36a   : > { %9565 = vmatmul.mubr.msk.bf16.vlgmr.msra.gmra.mxu0 %vm2989_vm13, %v11928_v39  ;;  %v3005_v12 = vld [vmem:[#allocation4 + $0x70] sm:$0xff]  ;;  %v11980_v16 = vpack.c.bf16 %v3244_v15, %v3243_v14  ;;  %v3245_v26 = vld [vmem:[#allocation4 + $0x42] sm:$0xff]  ;;  %v3639_v7 = vpack.c.bf16 %v3243_v14, %v11959_v32 }
 0x36b   : > { %9581 = vmatmul.mubr.msk.bf16.vlgmr.msra.gmra.mxu1 %vm2989_vm13, %v11931_v48  ;;  %9589 = vmatpush3.bf16.msra.mxu0 %v13312_v53  ;;  %v11943_v30 = vld [vmem:[#allocation4 + $0x51] sm:$0xff]  ;;  %v10311_v2 = vld [vmem:[%s11381_s11 + $0xd8] sm:$0xff]   ;;  %v3640_v61 = vpack.c.bf16 %v3245_v26, %v3244_v15  ;;  %v10317_v56 = vld [vmem:[%s11381_s11 + $0xc0] sm:$0xff]  }
 0x36c   : > { %9605 = vmatpush3.bf16.msra.mxu1 %v13313_v60  ;;  %v3003_v9 = vld [vmem:[#allocation4 + $0x50] sm:$0xff]  ;;  %9590 = vmatprep.subr.bf16.mxu0 %v10297_v43  ;;  %v11947_v58 = vpack.c.bf16 %v11943_v30, %v11939_v45  ;;  %v10320_v45 = vld [vmem:[%s11381_s11 + $0x110] sm:$0xff]  }
 0x36d   : > { %v11949_v36 = vpack.c.bf16 %v3003_v9, %v3002_v50  ;;  %9606 = vmatprep.subr.bf16.mxu1 %v10298_v35  ;;  %v3246_v10 = vld [vmem:[#allocation4 + $0x52] sm:$0xff]  ;;  %v11994_v20 = vld [vmem:[#allocation4 + $0x80] sm:$0xff] }
 0x36e   : > { %9568 = vmatprep.mubr.msk.bf16.mxu0 %vm2989_vm13, %v11947_v58  ;;  %v11986_v63 = vpack.c.bf16 %v3246_v10, %v3245_v26  ;;  %v3248_v29 = vld [vmem:[#allocation4 + $0x72] sm:$0xff]  ;;  %v3382_v40 = vpack.c.bf16 %v11994_v20, %v3005_v12  ;;  %v3508_v25 = vld [vmem:[#allocation4 + $0x81] sm:$0xff] }
 0x36f   : > { %9584 = vmatprep.mubr.msk.bf16.mxu1 %vm2989_vm13, %v11949_v36  ;;  %9591 = vmatpush3.bf16.msra.mxu0 %v10297_v43  ;;  %v11961_v57 = vld [vmem:[#allocation4 + $0x61] sm:$0xff]  ;;  %v3512_v44 = vpack.c.bf16 %v3508_v25, %v11957_v46  ;;  %v3899_v53 = vld [vmem:[#allocation4 + $0x91] sm:$0xff] }
 0x370   : > { %9607 = vmatpush3.bf16.msra.mxu1 %v10298_v35  ;;  %v3004_v11 = vld [vmem:[#allocation4 + $0x60] sm:$0xff]  ;;  %9592 = vmatprep.subr.bf16.mxu0 %v10299_v52  ;;  %v11965_v0 = vpack.c.bf16 %v11957_v46, %v11961_v57  ;;  %v3511_v5 = vpack.c.bf16 %v11961_v57, %v11943_v30  ;;  %v10318_v43 = vld [vmem:[%s11381_s11 + $0xe0] sm:$0xff]   ;;  %v3903_v50 = vpack.c.bf16 %v3899_v53, %v3508_v25 }
 0x371   : > { %v11967_v55 = vpack.c.bf16 %v3005_v12, %v3004_v11  ;;  %9608 = vmatprep.subr.bf16.mxu1 %v10300_v62  ;;  %v3381_v4 = vpack.c.bf16 %v3004_v11, %v3003_v9  ;;  %v3247_v27 = vld [vmem:[#allocation4 + $0x62] sm:$0xff]  ;;  %v4029_v9 = vld [vmem:[#allocation4 + $0x92] sm:$0xff] }
 0x372   : > { %9569 = vmatmul.mubr.msk.bf16.gmra.mxu0 %vm2989_vm13, %v11965_v0  ;;  %v11997_v31 = vpack.c.bf16 %v3248_v29, %v3247_v27  ;;  %v3641_v41 = vpack.c.bf16 %v3247_v27, %v3246_v10  ;;  %v3638_v42 = vld [vmem:[#allocation4 + $0x82] sm:$0xff] }
 0x373   : > { %9585 = vmatmul.mubr.msk.bf16.gmra.mxu1 %vm2989_vm13, %v11967_v55  ;;  %9593 = vmatpush3.bf16.msra.mxu0 %v10299_v52  ;;  %v3642_v38 = vpack.c.bf16 %v3638_v42, %v3248_v29  ;;  %v10319_v35 = vld [vmem:[%s11381_s11 + $0x118] sm:$0xff]   ;;  %v10322_v30 = vld [vmem:[%s11381_s11 + $0x100] sm:$0xff]  }
 0x374   : > { %9596 = vmatprep.mubr.msk.bf16.mxu0 %vm2989_vm13, %v3249_v59  ;;  %9609 = vmatpush3.bf16.msra.mxu1 %v10300_v62 }
 0x375   : > { %9612 = vmatprep.mubr.msk.bf16.mxu1 %vm2989_vm13, %v3379_v47  ;;  %9594 = vmatprep.subr.bf16.mxu0 %v10301_v6 }
 0x376   : > { %9610 = vmatprep.subr.bf16.mxu1 %v10302_v13 }
 0x377   : > { %9595 = vmatpush3.bf16.msra.mxu0 %v10301_v6 }
 0x378   : > { %9611 = vmatpush3.bf16.msra.mxu1 %v10302_v13  ;;  %9620 = vmatprep.subr.bf16.mxu0 %v10303_v49 }
 0x379   : > { %9636 = vmatprep.subr.bf16.mxu1 %v10304_v51 }
 0x37a   : > { %9597 = vmatmul.mubr.msk.bf16.vlgmr.msra.gmra.mxu0 %vm2989_vm13, %v11980_v16 }
 0x37b   : > { %9613 = vmatmul.mubr.msk.bf16.vlgmr.msra.gmra.mxu1 %vm2989_vm13, %v3380_v17  ;;  %9621 = vmatpush3.bf16.msra.mxu0 %v10303_v49 }
 0x37c   : > { %9600 = vmatprep.mubr.msk.bf16.mxu0 %vm2989_vm13, %v11986_v63  ;;  %9616 = vmatprep.mubr.msk.bf16.mxu1 %vm2989_vm13, %v3381_v4 }
 0x37d   : > { %9637 = vmatpush3.bf16.msra.mxu1 %v10304_v51  ;;  %9622 = vmatprep.subr.bf16.mxu0 %v10305_v8 }
 0x37e   : > { %9638 = vmatprep.subr.bf16.mxu1 %v10306_v18 }
 0x37f   : > { %9623 = vmatpush3.bf16.msra.mxu0 %v10305_v8 }
 0x380   : > { %9624 = vmatprep.subr.bf16.mxu0 %v10307_v19 }
 0x381   : > { %9639 = vmatpush3.bf16.msra.mxu1 %v10306_v18 }
 0x382   : > { %9601 = vmatmul.mubr.msk.bf16.gmra.mxu0 %vm2989_vm13, %v11997_v31  ;;  %9640 = vmatprep.subr.bf16.mxu1 %v10308_v28 }
 0x383   : > { %9617 = vmatmul.mubr.msk.bf16.gmra.mxu1 %vm2989_vm13, %v3382_v40  ;;  %9625 = vmatpush3.bf16.msra.mxu0 %v10307_v19 }
 0x384   : > { %9628 = vmatprep.mubr.msk.bf16.mxu0 %vm2989_vm13, %v3509_v21  ;;  %9644 = vmatprep.mubr.msk.bf16.mxu1 %vm2989_vm13, %v3639_v7 }
 0x385   : > { %9641 = vmatpush3.bf16.msra.mxu1 %v10308_v28  ;;  %9626 = vmatprep.subr.bf16.mxu0 %v10309_v3 }
 0x386   : > { %9642 = vmatprep.subr.bf16.mxu1 %v10310_v37 }
 0x387   : > { %9627 = vmatpush3.bf16.msra.mxu0 %v10309_v3 }
 0x388   : > { %9652 = vmatprep.subr.bf16.mxu0 %v10311_v2 }
 0x389   : > { %9643 = vmatpush3.bf16.msra.mxu1 %v10310_v37 }
 0x38a   : > { %9629 = vmatmul.mubr.msk.bf16.vlgmr.msra.gmra.mxu0 %vm2989_vm13, %v3510_v24  ;;  %9668 = vmatprep.subr.bf16.mxu1 %v10312_v22 }
 0x38b   : > { %9653 = vmatpush3.bf16.msra.mxu0 %v10311_v2  ;;  %9632 = vmatprep.mubr.msk.bf16.mxu0 %vm2989_vm13, %v3511_v5 }
 0x38c   : > { %9645 = vmatmul.mubr.msk.bf16.vlgmr.msra.gmra.mxu1 %vm2989_vm13, %v3640_v61  ;;  %9654 = vmatprep.subr.bf16.mxu0 %v10313_v33 }
 0x38d   : > { %9648 = vmatprep.mubr.msk.bf16.mxu1 %vm2989_vm13, %v3641_v41  ;;  %9669 = vmatpush3.bf16.msra.mxu1 %v10312_v22 }
 0x38e   : > { %9670 = vmatprep.subr.bf16.mxu1 %v10314_v23 }
 0x38f   : > { %9655 = vmatpush3.bf16.msra.mxu0 %v10313_v33 }
 0x390   : > { %9656 = vmatprep.subr.bf16.mxu0 %v10315_v54 }
 0x391   : > { %9671 = vmatpush3.bf16.msra.mxu1 %v10314_v23 }
 0x392   : > { %9633 = vmatmul.mubr.msk.bf16.gmra.mxu0 %vm2989_vm13, %v3512_v44  ;;  %9672 = vmatprep.subr.bf16.mxu1 %v10316_v1 }
 0x393   : > { %9657 = vmatpush3.bf16.msra.mxu0 %v10315_v54  ;;  %9660 = vmatprep.mubr.msk.bf16.mxu0 %vm2989_vm13, %v11931_v48  ;;  %v10321_v48 = vld [vmem:[%s11381_s11 + $0x108] sm:$0xff]  }
 0x394   : > { %9649 = vmatmul.mubr.msk.bf16.gmra.mxu1 %vm2989_vm13, %v3642_v38  ;;  %9658 = vmatprep.subr.bf16.mxu0 %v10317_v56 }
 0x395   : > { %9673 = vmatpush3.bf16.msra.mxu1 %v10316_v1  ;;  %9676 = vmatprep.mubr.msk.bf16.mxu1 %vm2989_vm13, %v11928_v39  ;;  %v3769_v39 = vld [vmem:[#allocation4 + $0x90] sm:$0xff] }
 0x396   : > { %9674 = vmatprep.subr.bf16.mxu1 %v10318_v43  ;;  %v3773_v60 = vpack.c.bf16 %v3769_v39, %v11994_v20 }
 0x397   : > { %9659 = vmatpush3.bf16.msra.mxu0 %v10317_v56 }
 0x398   : > { %9684 = vmatprep.subr.bf16.mxu0 %v10319_v35 }
 0x399   : > { %9675 = vmatpush3.bf16.msra.mxu1 %v10318_v43 }
 0x39a   : > { %9661 = vmatmul.mubr.msk.bf16.vlgmr.msra.gmra.mxu0 %vm2989_vm13, %v11949_v36 }
 0x39b   : > { %9685 = vmatpush3.bf16.msra.mxu0 %v10319_v35  ;;  %9664 = vmatprep.mubr.msk.bf16.mxu0 %vm2989_vm13, %v11967_v55 }
 0x39c   : > { %9677 = vmatmul.mubr.msk.bf16.vlgmr.msra.gmra.mxu1 %vm2989_vm13, %v11947_v58  ;;  %9686 = vmatprep.subr.bf16.mxu0 %v10320_v45  ;;  %v4033_v58 = vpack.c.bf16 %v4029_v9, %v3638_v42 }
 0x39d   : > { %9680 = vmatprep.mubr.msk.bf16.mxu1 %vm2989_vm13, %v11965_v0 }
 0x39f   : > { %9687 = vmatpush3.bf16.msra.mxu0 %v10320_v45 }
 0x3a0   : > { %9688 = vmatprep.subr.bf16.mxu0 %v10321_v48 }
 0x3a2   : > { %9665 = vmatmul.mubr.msk.bf16.gmra.mxu0 %vm2989_vm13, %v3773_v60 }
 0x3a3   : > { %9689 = vmatpush3.bf16.msra.mxu0 %v10321_v48  ;;  %9692 = vmatprep.mubr.msk.bf16.mxu0 %vm2989_vm13, %v11980_v16 }
 0x3a4   : > { %9681 = vmatmul.mubr.msk.bf16.gmra.mxu1 %vm2989_vm13, %v3903_v50  ;;  %9690 = vmatprep.subr.bf16.mxu0 %v10322_v30 }
 0x3a7   : > { %9691 = vmatpush3.bf16.msra.mxu0 %v10322_v30 }
 0x3aa   : > { %9693 = vmatmul.mubr.msk.bf16.vlgmr.msra.gmra.mxu0 %vm2989_vm13, %v11986_v63 }
 0x3ab   : > { %9696 = vmatprep.mubr.msk.bf16.mxu0 %vm2989_vm13, %v11997_v31 }
 0x3b2   : > { %9697 = vmatmul.mubr.msk.bf16.gmra.mxu0 %vm2989_vm13, %v4033_v58 }
 0x42a   : > { %v9566_v36 = vpop.f32.mrf.mxu0 }
 0x42b   : > { %v9582_v52 = vpop.f32.mrf.mxu1 }
 0x42c   : > { %v3109_v62 = vpop.f32.mrf.mxu0  ;;  %v3219_v41 = vadd.f32 %v9582_v52, %v9566_v36 }
 0x42d   : > { %v3210_v46 = vpop.f32.mrf.mxu1 }
 0x42e   : > { %v9567_v34 = vpop.f32.mrf.mxu0  ;;  %v3211_v1 = vadd.f32 %v3210_v46, %v3109_v62 }
 0x42f   : > { %v9583_v32 = vpop.f32.mrf.mxu1 }
 0x430   : > { %v3112_v57 = vpop.f32.mrf.mxu0  ;;  %v3222_v38 = vadd.f32 %v9583_v32, %v9567_v34 }
 0x431   : > { %v3213_v11 = vpop.f32.mrf.mxu1 }
 0x432   : > { %v9570_v12 = vpop.f32.mrf.mxu0  ;;  %v3214_v48 = vadd.f32 %v3213_v11, %v3112_v57 }
 0x433   : > { %v9586_v0 = vpop.f32.mrf.mxu1 }
 0x434   : > { %v3125_v55 = vpop.f32.mrf.mxu0  ;;  %v3235_v60 = vadd.f32 %v9586_v0, %v9570_v12 }
 0x435   : > { %v3226_v59 = vpop.f32.mrf.mxu1 }
 0x436   : > { %v9571_v6 = vpop.f32.mrf.mxu0  ;;  %v3227_v52 = vadd.f32 %v3226_v59, %v3125_v55 }
 0x437   : > { %v9587_v13 = vpop.f32.mrf.mxu1 }
 0x438   : > { %v12055_v47 = vpop.f32.mrf.mxu0 }
 0x439   : > { %v3229_v49 = vpop.f32.mrf.mxu1 }
 0x43a   : > { %v9598_v14 = vpop.f32.mrf.mxu0  ;;  %v3230_v11 = vadd.f32 %v3229_v49, %v12055_v47 }
 0x43b   : > { %v9614_v51 = vpop.f32.mrf.mxu1  ;;  %v3365_v42 = vadd.f32 %v9598_v14, %v3219_v41  ;;  %v3238_v41 = vadd.f32 %v9587_v13, %v9571_v6 }
 0x43c   : > { %v3332_v15 = vpop.f32.mrf.mxu0 }
 0x43d   : > { %v3462_v10 = vpop.f32.mrf.mxu1  ;;  %v3363_v43 = vadd.f32 %v3332_v15, %v3211_v1  ;;  %v3495_v39 = vadd.f32 %v9614_v51, %v3365_v42 }
 0x43e   : > { %v9599_v16 = vpop.f32.mrf.mxu0 }
 0x43f   : > { %v9615_v17 = vpop.f32.mrf.mxu1  ;;  %v3366_v53 = vadd.f32 %v9599_v16, %v3222_v38  ;;  %v3493_v9 = vadd.f32 %v3462_v10, %v3363_v43 }
 0x440   : > { %v3335_v26 = vpop.f32.mrf.mxu0 }
 0x441   : > { %v3465_v8 = vpop.f32.mrf.mxu1  ;;  %v3364_v58 = vadd.f32 %v3335_v26, %v3214_v48  ;;  %v3496_v46 = vadd.f32 %v9615_v17, %v3366_v53 }
 0x442   : > { %v9602_v63 = vpop.f32.mrf.mxu0 }
 0x443   : > { %v9618_v4 = vpop.f32.mrf.mxu1  ;;  %v3494_v15 = vadd.f32 %v3465_v8, %v3364_v58 }
 0x444   : > { %v3348_v18 = vpop.f32.mrf.mxu0 }
 0x445   : > { %v3478_v19 = vpop.f32.mrf.mxu1 }
 0x446   : > { %v9603_v27 = vpop.f32.mrf.mxu0 }
 0x447   : > { %v9619_v20 = vpop.f32.mrf.mxu1  ;;  %v3370_v0 = vadd.f32 %v9603_v27, %v3238_v41 }
 0x448   : > { %v3351_v28 = vpop.f32.mrf.mxu0 }
 0x449   : > { %v12057_v29 = vpop.f32.mrf.mxu1  ;;  %v3368_v59 = vadd.f32 %v3351_v28, %v3230_v11 }
 0x44a   : > { %v9630_v31 = vpop.f32.mrf.mxu0 }
 0x44b   : > { %v3625_v36 = vadd.f32 %v9630_v31, %v3495_v39  ;;  %v3500_v31 = vadd.f32 %v9619_v20, %v3370_v0  ;;  %v3498_v49 = vadd.f32 %v12057_v29, %v3368_v59 }
 0x44c   : > { %v9646_v40 = vpop.f32.mrf.mxu1  ;;  %v3592_v3 = vpop.f32.mrf.mxu0 }
 0x44d   : > { %v3623_v14 = vadd.f32 %v3592_v3, %v3493_v9  ;;  %v3755_v1 = vadd.f32 %v9646_v40, %v3625_v36 }
 0x44e   : > { %v3722_v21 = vpop.f32.mrf.mxu1  ;;  %v9631_v7 = vpop.f32.mrf.mxu0 }
 0x44f   : > { %v3626_v57 = vadd.f32 %v9631_v7, %v3496_v46  ;;  %v3753_v10 = vadd.f32 %v3722_v21, %v3623_v14 }
 0x450   : > { %v9647_v37 = vpop.f32.mrf.mxu1  ;;  %v3595_v2 = vpop.f32.mrf.mxu0 }
 0x451   : > { %v3624_v16 = vadd.f32 %v3595_v2, %v3494_v15  ;;  %v3756_v13 = vadd.f32 %v9647_v37, %v3626_v57 }
 0x452   : > { %v3725_v22 = vpop.f32.mrf.mxu1  ;;  %v9634_v24 = vpop.f32.mrf.mxu0 }
 0x453   : > { %v3754_v3 = vadd.f32 %v3725_v22, %v3624_v16 }
 0x454   : > { %v9650_v33 = vpop.f32.mrf.mxu1  ;;  %v3608_v5 = vpop.f32.mrf.mxu0 }
 0x456   : > { %v12059_v61 = vpop.f32.mrf.mxu1  ;;  %v9635_v23 = vpop.f32.mrf.mxu0 }
 0x457   : > { %v3630_v27 = vadd.f32 %v9635_v23, %v3500_v31 }
 0x458   : > { %v12061_v54 = vpop.f32.mrf.mxu1  ;;  %v3611_v25 = vpop.f32.mrf.mxu0 }
 0x459   : > { %13314 = vst [vmem:[#allocation42_spill] sm:$0xff] %v12061_v54  ;;  %v3369_v54 = vadd.f32 %v9602_v63, %v3235_v60  ;;  %v3628_v42 = vadd.f32 %v3611_v25, %v3498_v49 }
 0x45a   : > { %v12063_v44 = vpop.f32.mrf.mxu1  ;;  %v9662_v56 = vpop.f32.mrf.mxu0 }
 0x45b   : > { %13315 = vst [vmem:[#allocation43_spill] sm:$0xff] %v12063_v44  ;;  %v3367_v44 = vadd.f32 %v3348_v18, %v3227_v52  ;;  %v3499_v12 = vadd.f32 %v9618_v4, %v3369_v54  ;;  %v3886_v26 = vadd.f32 %v9662_v56, %v3755_v1 }
 0x45c   : > { %v9678_v35 = vpop.f32.mrf.mxu1  ;;  %v3853_v45 = vpop.f32.mrf.mxu0 }
 0x45d   : > { %v3497_v55 = vadd.f32 %v3478_v19, %v3367_v44  ;;  %v3629_v17 = vadd.f32 %v9634_v24, %v3499_v12  ;;  %v3884_v18 = vadd.f32 %v3853_v45, %v3753_v10  ;;  %v4016_v7 = vadd.f32 %v9678_v35, %v3886_v26  ;;  %v8836_v19 = vld [vmem:[%s13316_s3] ss:$0 sm:$0xff] }
 0x45e   : > { %v3983_v30 = vpop.f32.mrf.mxu1  ;;  %v9663_v50 = vpop.f32.mrf.mxu0 }
 0x45f   : > { %v3627_v8 = vadd.f32 %v3608_v5, %v3497_v55  ;;  %v3887_v47 = vadd.f32 %v9663_v50, %v3756_v13  ;;  %v3759_v4 = vadd.f32 %v9650_v33, %v3629_v17  ;;  %v4014_v2 = vadd.f32 %v3983_v30, %v3884_v18 }
 0x460   : > { %v3856_v62 = vpop.f32.mrf.mxu0  ;;  %v9679_v34 = vpop.f32.mrf.mxu1  ;;  %v13317_v38 = vld [vmem:[#allocation42_spill] sm:$0xff] }
 0x461   : > { %v3885_v24 = vadd.f32 %v3856_v62, %v3754_v3  ;;  %v3757_v37 = vadd.f32 %v12059_v61, %v3627_v8  ;;  %v4017_v44 = vadd.f32 %v9679_v34, %v3887_v47  ;;  %v3760_v43 = vadd.f32 %v13317_v38, %v3630_v27 }
 0x462   : > { %v9666_v32 = vpop.f32.mrf.mxu0  ;;  %v3986_v63 = vpop.f32.mrf.mxu1  ;;  %v13318_v53 = vld [vmem:[#allocation43_spill] sm:$0xff] }
 0x463   : > { %v3890_v20 = vadd.f32 %v9666_v32, %v3759_v4  ;;  %v4015_v35 = vadd.f32 %v3986_v63, %v3885_v24  ;;  %v3758_v60 = vadd.f32 %v13318_v53, %v3628_v42 }
 0x464   : > { %v3869_v51 = vpop.f32.mrf.mxu0  ;;  %v9682_v21 = vpop.f32.mrf.mxu1 }
 0x465   : > { %v3888_v29 = vadd.f32 %v3869_v51, %v3757_v37  ;;  %v4020_v30 = vadd.f32 %v9682_v21, %v3890_v20 }
 0x466   : > { %v9667_v6 = vpop.f32.mrf.mxu0  ;;  %v3999_v33 = vpop.f32.mrf.mxu1 }
 0x467   : > { %v3891_v61 = vadd.f32 %v9667_v6, %v3760_v43  ;;  %v4018_v36 = vadd.f32 %v3999_v33, %v3888_v29 }
 0x468   : > { %v3872_v40 = vpop.f32.mrf.mxu0  ;;  %v9683_v52 = vpop.f32.mrf.mxu1 }
 0x469   : > { %v3889_v46 = vadd.f32 %v3872_v40, %v3758_v60  ;;  %v4021_v15 = vadd.f32 %v9683_v52, %v3891_v61 }
 0x46a   : > { %v9694_v28 = vpop.f32.mrf.mxu0  ;;  %v4002_v12 = vpop.f32.mrf.mxu1 }
 0x46b   : > { %v4146_v54 = vadd.f32 %v9694_v28, %v4016_v7  ;;  %v4019_v51 = vadd.f32 %v4002_v12, %v3889_v46 }
 0x46c   : > { %v4113_v5 = vpop.f32.mrf.mxu0 }
 0x46d   : > { %v4160_v22 = vadd.f32 %v8836_v19, %v4146_v54  ;;  %v4144_v56 = vadd.f32 %v4113_v5, %v4014_v2 }
 0x46e   : > { %v9695_v23 = vpop.f32.mrf.mxu0 }
 0x46f   : > { %v4168_v45 = vmax.f32 %v4160_v22, 0.0  ;;  %v4158_v48 = vadd.f32 %v8836_v19, %v4144_v56  ;;  %v4147_v39 = vadd.f32 %v9695_v23, %v4017_v44 }
 0x470   : > { %v4116_v50 = vpop.f32.mrf.mxu0 }
 0x471   : > { %v4166_v25 = vmax.f32 %v4158_v48, 0.0  ;;  %v4161_v9 = vadd.f32 %v8836_v19, %v4147_v39  ;;  %v4145_v58 = vadd.f32 %v4116_v50, %v4015_v35 }
 0x472   : > { %v9698_v62 = vpop.f32.mrf.mxu0 }
 0x473   : > { %v4169_v14 = vmax.f32 %v4161_v9, 0.0  ;;  %v4159_v41 = vadd.f32 %v8836_v19, %v4145_v58  ;;  %v4150_v34 = vadd.f32 %v9698_v62, %v4020_v30 }
 0x474   : > { %v4129_v32 = vpop.f32.mrf.mxu0 }
 0x475   : > { %v4167_v1 = vmax.f32 %v4159_v41, 0.0  ;;  %v4164_v57 = vadd.f32 %v8836_v19, %v4150_v34  ;;  %v4148_v11 = vadd.f32 %v4129_v32, %v4018_v36 }
 0x476   : > { %v9699_v0 = vpop.f32.mrf.mxu0 }
 0x477   : > { %v4172_v10 = vmax.f32 %v4164_v57, 0.0  ;;  %v4162_v16 = vadd.f32 %v8836_v19, %v4148_v11  ;;  %v4151_v26 = vadd.f32 %v9699_v0, %v4021_v15 }
 0x478   : > { %v4132_v55 = vpop.f32.mrf.mxu0 }
 0x479   : > { %v4170_v59 = vmax.f32 %v4162_v16, 0.0  ;;  %v4165_v17 = vadd.f32 %v8836_v19, %v4151_v26  ;;  %v4149_v63 = vadd.f32 %v4132_v55, %v4019_v51  ;;  %4176 = sbr.rel (%p8567_p12) target bundleno = 1154 (0x482), region = 144 }
 0x47b   : > { %v4173_v6 = vmax.f32 %v4165_v17, 0.0  ;;  %v4163_v13 = vadd.f32 %v8836_v19, %v4149_v63 }
 0x47d   : > { %v4171_v18 = vmax.f32 %v4163_v13, 0.0 }
 0x47e   : > { %4177 = vst.msk [vmem:[#allocation6] sm:$0xff] %vm1946_vm12, %v4166_v25  ;;  %4178 = vst.msk [vmem:[#allocation6 + $0x8] sm:$0xff] %vm1946_vm12, %v4167_v1 }
 0x47f   : > { %4179 = vst.msk [vmem:[#allocation6 + $0x10] sm:$0xff] %vm1946_vm12, %v4168_v45  ;;  %4180 = vst.msk [vmem:[#allocation6 + $0x18] sm:$0xff] %vm1946_vm12, %v4169_v14 }
 0x480   : > { %4181 = vst.msk [vmem:[#allocation6 + $0x20] sm:$0xff] %vm1946_vm12, %v4170_v59  ;;  %4182 = vst.msk [vmem:[#allocation6 + $0x28] sm:$0xff] %vm1946_vm12, %v4171_v18 }
 0x481   : > { %4183 = vst.msk [vmem:[#allocation6 + $0x30] sm:$0xff] %vm1946_vm12, %v4172_v10  ;;  %4184 = vst.msk [vmem:[#allocation6 + $0x38] sm:$0xff] %vm1946_vm12, %v4173_v6 }
 0x482 PF: > { %s13320_s11 = sld [smem:[#allocation31_spill]] }
 0x488   : > { %p8838_p13 = scmp.le.s32.totalorder %s13320_s11, 0 }
 0x48a   : > { %4188 = sbr.rel (%p8838_p13) target bundleno = 1174 (0x496), region = 148 }
 0x48f   : > { %v4189_v31 = vld [vmem:[#allocation6] sm:$0xff]  ;;  %v4190_v8 = vld [vmem:[#allocation6 + $0x8] sm:$0xff]  ;;  %v4191_v40 = vld [vmem:[#allocation6 + $0x10] sm:$0xff] }
 0x490   : > { %v4197_v3 = vadd.f32 %v4189_v31, %v4166_v25  ;;  %v4198_v7 = vadd.f32 %v4190_v8, %v4167_v1  ;;  %v4199_v47 = vadd.f32 %v4191_v40, %v4168_v45  ;;  %v4192_v49 = vld [vmem:[#allocation6 + $0x18] sm:$0xff]  ;;  %v4193_v4 = vld [vmem:[#allocation6 + $0x20] sm:$0xff]  ;;  %v4194_v27 = vld [vmem:[#allocation6 + $0x28] sm:$0xff] }
 0x491   : > { %v4200_v21 = vadd.f32 %v4192_v49, %v4169_v14  ;;  %v4201_v19 = vadd.f32 %v4193_v4, %v4170_v59  ;;  %v4202_v28 = vadd.f32 %v4194_v27, %v4171_v18  ;;  %v4195_v2 = vld [vmem:[#allocation6 + $0x30] sm:$0xff]  ;;  %v4196_v24 = vld [vmem:[#allocation6 + $0x38] sm:$0xff] }
 0x492   : > { %4205 = vst.msk [vmem:[#allocation6] sm:$0xff] %vm1946_vm12, %v4197_v3  ;;  %4206 = vst.msk [vmem:[#allocation6 + $0x8] sm:$0xff] %vm1946_vm12, %v4198_v7  ;;  %v4203_v54 = vadd.f32 %v4195_v2, %v4172_v10  ;;  %v4204_v37 = vadd.f32 %v4196_v24, %v4173_v6 }
 0x493   : > { %4207 = vst.msk [vmem:[#allocation6 + $0x10] sm:$0xff] %vm1946_vm12, %v4199_v47  ;;  %4208 = vst.msk [vmem:[#allocation6 + $0x18] sm:$0xff] %vm1946_vm12, %v4200_v21 }
 0x494   : > { %4209 = vst.msk [vmem:[#allocation6 + $0x20] sm:$0xff] %vm1946_vm12, %v4201_v19  ;;  %4210 = vst.msk [vmem:[#allocation6 + $0x28] sm:$0xff] %vm1946_vm12, %v4202_v28 }
 0x495   : > { %4211 = vst.msk [vmem:[#allocation6 + $0x30] sm:$0xff] %vm1946_vm12, %v4203_v54  ;;  %4212 = vst.msk [vmem:[#allocation6 + $0x38] sm:$0xff] %vm1946_vm12, %v4204_v37 }
 0x496 PF: > { %s13321_s7 = sld [smem:[#allocation31_spill]] }
 0x49c   : > { %p8839_p1 = scmp.ne.s32.totalorder %s13321_s7, 1 }
 0x49d   : > { %s11030_s22 = smov (!%p8839_p1), 96   ;;  %s11031_s24 = smov (!%p8839_p1), 64  }
 0x49e   : > { %4216 = sbr.rel (%p8839_p1) target bundleno = 6908 (0x1afc), region = 152  ;;  %s11032_s9 = smov (!%p8839_p1), 80  }
 0x49f   : > { %s11033_s0 = smov (!%p8839_p1), 112   ;;  %s11034_s13 = smov (!%p8839_p1), 48  }
 0x4a0   : > { %s13322_s15 = sld [smem:[#allocation53_spill]] (!%p8839_p1) }
 0x4a1   : > { %s13323_s20 = sld [smem:[#allocation52_spill]] (!%p8839_p1) }
 0x4a2   : > { %s13325_s18 = sld [smem:[#allocation56_spill]] (!%p8839_p1) }
 0x4a3   : > { %v10325_v42 = vld [vmem:[#allocation15 + $0x8] sm:$0xff]   ;;  %v10326_v20 = vld [vmem:[#allocation15] sm:$0xff]   ;;  %v4217_v5 = vld [vmem:[#allocation6] sm:$0xff]  ;;  %vm4350_vm14 = vcmask 130048   ;;  %vm11036_vm15 = vmmov 0   ;;  %s13326_s29 = sld [smem:[#allocation54_spill]] }
 0x4a4   : > { %9700 = vmatprep.subr.bf16.mxu0 %v10325_v42  ;;  %v4218_v44 = vld [vmem:[#allocation6 + $0x8] sm:$0xff]  ;;  %v4219_v56 = vld [vmem:[#allocation6 + $0x10] sm:$0xff]  ;;  %v4220_v38 = vld [vmem:[#allocation6 + $0x18] sm:$0xff]  ;;  %s13328_s21 = sld [smem:[#allocation55_spill]]  ;;  %vm8302_vm0 = vcmask 518144  }
 0x4a5   : > { %9701 = vmatpush3.bf16.msra.mxu0 %v10325_v42  ;;  %v4226_v22 = vpack.c.bf16 %v4218_v44, %v4217_v5  ;;  %v4221_v43 = vld [vmem:[#allocation6 + $0x20] sm:$0xff]  ;;  %v4222_v29 = vld [vmem:[#allocation6 + $0x28] sm:$0xff]  ;;  %v4227_v33 = vpack.c.bf16 %v4220_v38, %v4219_v56  ;;  %v4223_v35 = vld [vmem:[#allocation6 + $0x30] sm:$0xff] }
 0x4a6   : > { %9702 = vmatprep.subr.bf16.mxu0 %v10326_v20  ;;  %v4228_v23 = vpack.c.bf16 %v4222_v29, %v4221_v43  ;;  %v4224_v45 = vld [vmem:[#allocation6 + $0x38] sm:$0xff]  ;;  %v8840_v53 = vld [vmem:[#allocation17] ss:$0 sm:$0xff] }
 0x4a7   : > { %9704 = vmatprep.mubr.msk.bf16.mxu0 %vm1946_vm12, %v4226_v22  ;;  %v4229_v48 = vpack.c.bf16 %v4224_v45, %v4223_v35  ;;  %s13324_s2 = smov %s13323_s20 }
 0x4a9   : > { %9703 = vmatpush3.bf16.msra.mxu0 %v10326_v20 }
 0x4ac   : > { %9705 = vmatmul.mubr.msk.bf16.vlgmr.msra.gmra.mxu0 %vm1946_vm12, %v4227_v33 }
 0x4ad   : > { %9708 = vmatprep.mubr.msk.bf16.mxu0 %vm1946_vm12, %v4228_v23 }
 0x4b4   : > { %9709 = vmatmul.mubr.msk.bf16.gmra.mxu0 %vm1946_vm12, %v4229_v48 }
 0x56c   : > { %v9706_v39 = vpop.f32.mrf.mxu0 }
 0x56d   : > { %v4308_v50 = vadd.f32 %v9706_v39, %v8840_v53 }
 0x56e   : > { %v4299_v60 = vpop.f32.mrf.mxu0 }
 0x56f   : > { %v4300_v9 = vadd.f32 %v8840_v53, %v4299_v60 }
 0x570   : > { %v9707_v30 = vpop.f32.mrf.mxu0 }
 0x571   : > { %v4311_v61 = vadd.f32 %v9707_v30, %v8840_v53 }
 0x572   : > { %v4302_v25 = vpop.f32.mrf.mxu0 }
 0x573   : > { %v12096_v58 = vpack.c.bf16 %v4311_v61, %v4308_v50  ;;  %v4303_v36 = vadd.f32 %v8840_v53, %v4302_v25 }
 0x574   : > { %v9710_v52 = vpop.f32.mrf.mxu0 }
 0x575   : > { %v12098_v62 = vpack.c.bf16 %v4303_v36, %v4300_v9  ;;  %4344 = vrot.lane.b32.xlu1 %v12096_v58, %s11030_s22  ;;  %v4324_v41 = vadd.f32 %v9710_v52, %v8840_v53 }
 0x576   : > { %v4315_v46 = vpop.f32.mrf.mxu0 }
 0x577   : > { %9720 = vmatprep.mubr.msk.bf16.mxu1 %vm4350_vm14, %v12098_v62  ;;  %v4316_v57 = vadd.f32 %v8840_v53, %v4315_v46 }
 0x578   : > { %v9711_v14 = vpop.f32.mrf.mxu0 }
 0x579   : > { %v4327_v34 = vadd.f32 %v9711_v14, %v8840_v53  ;;  %4342 = vrot.lane.b32.xlu1 %v12098_v62, %s11030_s22 }
 0x57a   : > { %v4318_v32 = vpop.f32.mrf.mxu0 }
 0x57b   : > { %v12106_v15 = vpack.c.bf16 %v4327_v34, %v4324_v41  ;;  %v4319_v1 = vadd.f32 %v8840_v53, %v4318_v32 }
 0x57d   : > { %4348 = vrot.lane.b32.xlu0 %v12106_v15, %s11030_s22  ;;  %4570 = vrot.lane.b32.xlu1 %v12106_v15, %s11031_s24  ;;  %v12112_v11 = vpack.c.bf16 %v4319_v1, %v4316_v57 }
 0x581   : > { %4346 = vrot.lane.b32.xlu0 %v12112_v11, %s11030_s22  ;;  %4566 = vrot.lane.b32.xlu1 %v12096_v58, %s11031_s24 }
 0x585   : > { %4568 = vrot.lane.b32.xlu0 %v12112_v11, %s11031_s24  ;;  %4695 = vrot.lane.b32.xlu1 %v12106_v15, %s11032_s9 }
 0x5e7   : > { %v4345_v12 = vpop.permute.xlu1 %4344 }
 0x5e8   : > { %v4367_v63 = vsel %vm4350_vm14, %v4345_v12, 0 }
 0x5eb   : > { %v4343_v0 = vpop.permute.xlu1 %4342 }
 0x5ec   : > { %v4364_v6 = vsel %vm4350_vm14, %v4343_v0, 0 }
 0x5ef   : > { %v4349_v51 = vpop.permute.xlu0 %4348  ;;  %v4571_v10 = vpop.permute.xlu1 %4570 }
 0x5f0   : > { %10078 = vmatprep.subr.msk.bf16.mxu1 %vm4350_vm14, %v4349_v51  ;;  %9728 = vmatprep.subr.bf16.mxu0 %v4571_v10  ;;  %v4373_v16 = vsel %vm4350_vm14, %v4349_v51, 0 }
 0x5f1   : > { %9713 = vmatpush3.bf16.xpose.msra.mxu1 %v4373_v16  ;;  %9729 = vmatpush3.bf16.msra.mxu0 %v4571_v10 }
 0x5f3   : > { %v4347_v26 = vpop.permute.xlu0 %4346  ;;  %v4567_v17 = vpop.permute.xlu1 %4566 }
 0x5f4   : > { %10079 = vmatprep.subr.msk.bf16.mxu1 %vm4350_vm14, %v4347_v26  ;;  %v4370_v59 = vsel %vm4350_vm14, %v4347_v26, 0 }
 0x5f7   : > { %v4569_v55 = vpop.permute.xlu0 %4568  ;;  %v4696_v43 = vpop.permute.xlu1 %4695 }
 0x5f8   : > { %9730 = vmatprep.subr.bf16.mxu0 %v4569_v55  ;;  %v4719_v41 = vsel %vm4350_vm14, %v4696_v43, 0 }
 0x5f9   : > { %9715 = vmatpush3.bf16.xpose.msra.mxu1 %v4370_v59  ;;  %9731 = vmatpush3.bf16.msra.mxu0 %v4569_v55 }
 0x5fa   : > { %10080 = vmatprep.subr.msk.bf16.mxu1 %vm4350_vm14, %v4345_v12  ;;  %9732 = vmatprep.subr.bf16.mxu0 %v4567_v17 }
 0x5fd   : > { %9733 = vmatpush3.bf16.msra.mxu0 %v4567_v17 }
 0x601   : > { %9717 = vmatpush3.bf16.xpose.msra.mxu1 %v4367_v63 }
 0x602   : > { %10081 = vmatprep.subr.msk.bf16.mxu1 %vm4350_vm14, %v4343_v0 }
 0x609   : > { %9719 = vmatpush3.bf16.xpose.msra.mxu1 %v4364_v6 }
 0x610   : > { %9721 = vmatmul.mubr.msk.bf16.vlgmr.msra.gmra.mxu1 %vm4350_vm14, %v12096_v58 }
 0x611   : > { %9724 = vmatprep.mubr.msk.bf16.mxu1 %vm4350_vm14, %v12112_v11 }
 0x618   : > { %9725 = vmatmul.mubr.msk.bf16.gmra.mxu1 %vm4350_vm14, %v12106_v15 }
 0x6d0   : > { %v9722_v13 = vpop.f32.mrf.mxu1 }
 0x6d1   : > { %v4442_v18 = vmul.f32 0.25, %v9722_v13 }
 0x6d2   : > { %v4409_v31 = vpop.f32.mrf.mxu1 }
 0x6d3   : > { %v4440_v8 = vmul.f32 0.25, %v4409_v31  ;;  %v4454_v40 = vsel %vm2989_vm13, %v4442_v18, -inf }
 0x6d4   : > { %4455 = vmax.xlane.f32.xlu0 %v4454_v40  ;;  %v9723_v3 = vpop.f32.mrf.mxu1 }
 0x6d5   : > { %v4443_v47 = vmul.f32 0.25, %v9723_v3  ;;  %v4448_v4 = vsel %vm2989_vm13, %v4440_v8, -inf }
 0x6d6   : > { %v4412_v7 = vpop.f32.mrf.mxu1 }
 0x6d7   : > { %v4441_v49 = vmul.f32 0.25, %v4412_v7  ;;  %v4457_v21 = vsel %vm2989_vm13, %v4443_v47, -inf }
 0x6d8   : > { %4449 = vmax.xlane.f32.xlu0 %v4448_v4  ;;  %v9726_v19 = vpop.f32.mrf.mxu1 }
 0x6d9   : > { %v4451_v27 = vsel %vm2989_vm13, %v4441_v49, -inf  ;;  %v12144_v24 = vmul.f32 0.25, %v9726_v19 }
 0x6da   : > { %4452 = vmax.xlane.f32.xlu1 %v4451_v27  ;;  %v4425_v28 = vpop.f32.mrf.mxu1 }
 0x6db   : > { %v12146_v42 = vmul.f32 0.25, %v4425_v28  ;;  %v4466_v20 = vsel %vm2989_vm13, %v12144_v24, -inf }
 0x6dc   : > { %4458 = vmax.xlane.f32.xlu0 %v4457_v21  ;;  %v9727_v2 = vpop.f32.mrf.mxu1 }
 0x6dd   : > { %v4447_v54 = vmul.f32 0.25, %v9727_v2  ;;  %v4460_v22 = vsel %vm2989_vm13, %v12146_v42, -inf }
 0x6de   : > { %v4428_v37 = vpop.f32.mrf.mxu1 }
 0x6df   : > { %v12150_v5 = vmul.f32 0.25, %v4428_v37  ;;  %v4469_v44 = vsel %vm2989_vm13, %v4447_v54, -inf }
 0x6e1   : > { %v4463_v56 = vsel %vm2989_vm13, %v12150_v5, -inf }
 0x6eb   : > { %4693 = vrot.lane.b32.xlu1 %v12112_v11, %s11032_s9 }
 0x6f2   : > { %4564 = vrot.lane.b32.xlu0 %v12098_v62, %s11031_s24 }
 0x70f   : > { %4467 = vmax.xlane.f32.xlu1 %v4466_v20 }
 0x711   : > { %4470 = vmax.xlane.f32.xlu0 %v4469_v44 }
 0x713   : > { %4461 = vmax.xlane.f32.xlu1 %v4460_v22 }
 0x715   : > { %4464 = vmax.xlane.f32.xlu0 %v4463_v56 }
 0x724   : > { %4689 = vrot.lane.b32.xlu1 %v12098_v62, %s11032_s9 }
 0x728   : > { %4683 = vrot.lane.b32.xlu1 %v12096_v58, %s11033_s0 }
 0x72b   : > { %4691 = vrot.lane.b32.xlu0 %v12096_v58, %s11032_s9 }
 0x72c   : > { %4687 = vrot.lane.b32.xlu1 %v12106_v15, %s11033_s0 }
 0x72f   : > { %4681 = vrot.lane.b32.xlu0 %v12098_v62, %s11033_s0 }
 0x730   : > { %4916 = vrot.lane.b32.xlu1 %v12106_v15, %s11034_s13 }
 0x733   : > { %4685 = vrot.lane.b32.xlu0 %v12112_v11, %s11033_s0 }
 0x75d   : > { %v12171_v38 = vpop.xlane.xlu0 %4455 }
 0x75e   : > { %v4498_v33 = vsub.f32 %v4442_v18, %v12171_v38 }
 0x760   : > { %v4508_v53 = vmul.f32 1.442695, %v4498_v33 }
 0x761   : > { %v12173_v29 = vpop.xlane.xlu0 %4449 }
 0x762   : > { %v4496_v23 = vsub.f32 %v4440_v8, %v12173_v29 }
 0x763   : > { %v12177_v35 = vpop.xlane.xlu1 %4452 }
 0x764   : > { %v4504_v45 = vmul.f32 1.442695, %v4496_v23  ;;  %v4497_v48 = vsub.f32 %v4441_v49, %v12177_v35 }
 0x765   : > { %v12180_v39 = vpop.xlane.xlu0 %4458 }
 0x766   : > { %v4506_v60 = vmul.f32 1.442695, %v4497_v48  ;;  %v4499_v30 = vsub.f32 %v4443_v47, %v12180_v39  ;;  %10363 = vpow2.f32 %v4504_v45 }
 0x767   : > { %v4694_v34 = vpop.permute.xlu1 %4693 }
 0x768   : > { %10365 = vpow2.f32 %v4506_v60  ;;  %v4510_v50 = vmul.f32 1.442695, %v4499_v30  ;;  %v4716_v32 = vsel %vm4350_vm14, %v4694_v34, 0 }
 0x769   : > { %v4565_v61 = vpop.permute.xlu0 %4564  ;;  %10367 = vpow2.f32 %v4508_v53 }
 0x76a   : > { %9734 = vmatprep.subr.bf16.mxu0 %v4565_v61  ;;  %10369 = vpow2.f32 %v4510_v50 }
 0x76b   : > { %9735 = vmatpush3.bf16.msra.mxu0 %v4565_v61 }
 0x76c   : > { %10082 = vmatprep.subr.msk.bf16.mxu0 %vm4350_vm14, %v4696_v43 }
 0x773   : > { %v12184_v25 = vpop.eup %10363 }
 0x775   : > { %v12186_v9 = vpop.eup %10365 }
 0x776   : > { %v12188_v36 = vpop.eup %10367  ;;  %v4560_v52 = vpack.c.bf16 %v12186_v9, %v12184_v25 }
 0x777   : > { %v12192_v46 = vpop.eup %10369 }
 0x778   : > { %9736 = vmatprep.mubr.msk.bf16.mxu0 %vm2989_vm13, %v4560_v52  ;;  %v4561_v14 = vpack.c.bf16 %v12192_v46, %v12188_v36 }
 0x77a   : > { %9737 = vmatmul.mubr.msk.bf16.vlgmr.msra.gmra.mxu0 %vm2989_vm13, %v4561_v14 }
 0x77b   : > { %9745 = vmatpush3.bf16.xpose.msra.mxu0 %v4719_v41 }
 0x77c   : > { %10083 = vmatprep.subr.msk.bf16.mxu0 %vm4350_vm14, %v4694_v34 }
 0x783   : > { %9747 = vmatpush3.bf16.xpose.msra.mxu0 %v4716_v32 }
 0x798   : > { %v12201_v15 = vpop.xlane.xlu1 %4467 }
 0x799   : > { %v4502_v0 = vsub.f32 %v12144_v24, %v12201_v15 }
 0x79a   : > { %v12203_v1 = vpop.xlane.xlu0 %4470 }
 0x79b   : > { %v4503_v57 = vsub.f32 %v4447_v54, %v12203_v1  ;;  %v4516_v17 = vmul.f32 1.442695, %v4502_v0 }
 0x79c   : > { %v12206_v12 = vpop.xlane.xlu1 %4461 }
 0x79d   : > { %v4518_v51 = vmul.f32 1.442695, %v4503_v57  ;;  %v4500_v10 = vsub.f32 %v12146_v42, %v12206_v12 }
 0x79e   : > { %v12212_v16 = vpop.xlane.xlu0 %4464 }
 0x79f   : > { %v4501_v26 = vsub.f32 %v12150_v5, %v12212_v16  ;;  %v4512_v55 = vmul.f32 1.442695, %v4500_v10  ;;  %10371 = vpow2.f32 %v4518_v51 }
 0x7a0   : > { %v4690_v59 = vpop.permute.xlu1 %4689 }
 0x7a1   : > { %v4514_v63 = vmul.f32 1.442695, %v4501_v26  ;;  %10373 = vpow2.f32 %v4512_v55  ;;  %v4710_v8 = vsel %vm4350_vm14, %v4690_v59, 0 }
 0x7a2   : > { %v4692_v6 = vpop.permute.xlu0 %4691 }
 0x7a3   : > { %10084 = vmatprep.subr.msk.bf16.mxu0 %vm4350_vm14, %v4692_v6  ;;  %v4713_v13 = vsel %vm4350_vm14, %v4692_v6, 0  ;;  %10375 = vpow2.f32 %v4514_v63  ;;  %v4537_v63 = vsel %vm2989_vm13, %v12192_v46, 0.0 }
 0x7a4   : > { %v4684_v18 = vpop.permute.xlu1 %4683  ;;  %9749 = vmatpush3.bf16.xpose.msra.mxu0 %v4713_v13  ;;  %10377 = vpow2.f32 %v4516_v17  ;;  %v4531_v17 = vsel %vm2989_vm13, %v12186_v9, 0.0 }
 0x7a5   : > { %10085 = vmatprep.subr.msk.bf16.mxu0 %vm4350_vm14, %v4690_v59  ;;  %v4528_v59 = vsel %vm2989_vm13, %v12184_v25, 0.0 }
 0x7a6   : > { %v4682_v21 = vpop.permute.xlu0 %4681 }
 0x7a8   : > { %v4688_v31 = vpop.permute.xlu1 %4687 }
 0x7aa   : > { %v4686_v19 = vpop.permute.xlu0 %4685 }
 0x7ac   : > { %v4917_v40 = vpop.permute.xlu1 %4916  ;;  %9751 = vmatpush3.bf16.xpose.msra.mxu0 %v4710_v8  ;;  %v12220_v3 = vpop.eup %10371 }
 0x7ad   : > { %9760 = vmatprep.subr.bf16.mxu0 %v4917_v40  ;;  %10070 = vmatprep.subr.bf16.mxu1 %v4917_v40 }
 0x7ae   : > { %10074 = vmatpush3.bf16.msra.mxu1 %v4917_v40  ;;  %v12222_v7 = vpop.eup %10373 }
 0x7b0   : > { %v12224_v47 = vpop.eup %10375 }
 0x7b1   : > { %v12226_v49 = vpop.eup %10377  ;;  %v4562_v4 = vpack.c.bf16 %v12224_v47, %v12222_v7 }
 0x7b2   : > { %v4563_v27 = vpack.c.bf16 %v12220_v3, %v12226_v49  ;;  %v4546_v25 = vsel %vm2989_vm13, %v12226_v49, 0.0 }
 0x7b3   : > { %9740 = vmatprep.mubr.msk.bf16.mxu0 %vm2989_vm13, %v4562_v4 }
 0x7b4   : > { %9741 = vmatmul.mubr.msk.bf16.gmra.mxu0 %vm2989_vm13, %v4563_v27 }
 0x7b5   : > { %9752 = vmatprep.mubr.msk.bf16.mxu0 %vm4350_vm14, %v4682_v21 }
 0x7bc   : > { %9753 = vmatmul.mubr.msk.bf16.vlgmr.msra.gmra.mxu0 %vm4350_vm14, %v4684_v18 }
 0x7bd   : > { %9761 = vmatpush3.bf16.msra.mxu0 %v4917_v40  ;;  %9756 = vmatprep.mubr.msk.bf16.mxu0 %vm4350_vm14, %v4686_v19 }
 0x7c4   : > { %9757 = vmatmul.mubr.msk.bf16.gmra.mxu0 %vm4350_vm14, %v4688_v31 }
 0x83a   : > { %v12238_v28 = vpop.f32.mrf.mxu0 }
 0x83c   : > { %v12240_v2 = vpop.f32.mrf.mxu0 }
 0x83e   : > { %v12242_v24 = vpop.f32.mrf.mxu0 }
 0x840   : > { %v12244_v54 = vpop.f32.mrf.mxu0 }
 0x874   : > { %v12246_v37 = vpop.f32.mrf.mxu0 }
 0x876   : > { %v12248_v42 = vpop.f32.mrf.mxu0 }
 0x878   : > { %v12250_v20 = vpop.f32.mrf.mxu0 }
 0x87a   : > { %v12252_v5 = vpop.f32.mrf.mxu0 }
 0x87c   : > { %v9754_v44 = vpop.f32.mrf.mxu0 }
 0x87d   : > { %v4788_v22 = vmul.f32 0.25, %v9754_v44 }
 0x87e   : > { %v4755_v56 = vpop.f32.mrf.mxu0 }
 0x87f   : > { %v4786_v43 = vmul.f32 0.25, %v4755_v56  ;;  %v4800_v33 = vsel %vm2989_vm13, %v4788_v22, -inf }
 0x880   : > { %4801 = vmax.xlane.f32.xlu0 %v4800_v33  ;;  %v9755_v23 = vpop.f32.mrf.mxu0 }
 0x881   : > { %v4789_v48 = vmul.f32 0.25, %v9755_v23  ;;  %v4794_v60 = vsel %vm2989_vm13, %v4786_v43, -inf }
 0x882   : > { %v4758_v45 = vpop.f32.mrf.mxu0 }
 0x883   : > { %v4787_v53 = vmul.f32 0.25, %v4758_v45  ;;  %v4803_v14 = vsel %vm2989_vm13, %v4789_v48, -inf }
 0x884   : > { %4795 = vmax.xlane.f32.xlu0 %v4794_v60  ;;  %v9758_v30 = vpop.f32.mrf.mxu0 }
 0x885   : > { %v4792_v50 = vmul.f32 0.25, %v9758_v30  ;;  %v4797_v61 = vsel %vm2989_vm13, %v4787_v53, -inf }
 0x886   : > { %4798 = vmax.xlane.f32.xlu1 %v4797_v61  ;;  %v4771_v52 = vpop.f32.mrf.mxu0 }
 0x887   : > { %v4790_v34 = vmul.f32 0.25, %v4771_v52  ;;  %v4812_v57 = vsel %vm2989_vm13, %v4792_v50, -inf }
 0x888   : > { %4804 = vmax.xlane.f32.xlu0 %v4803_v14  ;;  %v9759_v41 = vpop.f32.mrf.mxu0 }
 0x889   : > { %v4793_v32 = vmul.f32 0.25, %v9759_v41  ;;  %v4806_v26 = vsel %vm2989_vm13, %v4790_v34, -inf }
 0x88a   : > { %4813 = vmax.xlane.f32.xlu1 %v4812_v57  ;;  %v4774_v0 = vpop.f32.mrf.mxu0  ;;  %v10327_v57 = vld [vmem:[#allocation18] sm:$0xff]  }
 0x88b   : > { %v4791_v51 = vmul.f32 0.25, %v4774_v0  ;;  %v4815_v10 = vsel %vm2989_vm13, %v4793_v32, -inf }
 0x88c   : > { %4816 = vmax.xlane.f32.xlu0 %v4815_v10 }
 0x88d   : > { %v4809_v55 = vsel %vm2989_vm13, %v4791_v51, -inf }
 0x88e   : > { %4807 = vmax.xlane.f32.xlu1 %v4806_v26 }
 0x890   : > { %4810 = vmax.xlane.f32.xlu0 %v4809_v55 }
 0x89f   : > { %4912 = vrot.lane.b32.xlu1 %v12096_v58, %s11034_s13  ;;  %v4534_v58 = vsel %vm2989_vm13, %v12188_v36, 0.0 }
 0x8a3   : > { %4910 = vrot.lane.b32.xlu1 %v12098_v62, %s11034_s13  ;;  %v4543_v62 = vsel %vm2989_vm13, %v12224_v47, 0.0 }
 0x8a6   : > { %4914 = vrot.lane.b32.xlu0 %v12112_v11, %s11034_s13  ;;  %v4540_v11 = vsel %vm2989_vm13, %v12222_v7, 0.0 }
 0x8c5   : > { %4529 = vadd.xlane.f32.xlu0 %v4528_v59 }
 0x8c7   : > { %4532 = vadd.xlane.f32.xlu1 %v4531_v17 }
 0x8c9   : > { %4538 = vadd.xlane.f32.xlu0 %v4537_v63 }
 0x8cb   : > { %4535 = vadd.xlane.f32.xlu1 %v4534_v58  ;;  %v4549_v58 = vsel %vm2989_vm13, %v12220_v3, 0.0  ;;  %v4473_v3 = vsub.f32 -inf, %v12177_v35 }
 0x8cd   : > { %4544 = vadd.xlane.f32.xlu0 %v4543_v62 }
 0x8cf   : > { %4541 = vadd.xlane.f32.xlu1 %v4540_v11 }
 0x8d3   : > { %4547 = vadd.xlane.f32.xlu1 %v4546_v25 }
 0x909   : > { %v12282_v9 = vpop.xlane.xlu0 %4801 }
 0x90a   : > { %v4844_v46 = vsub.f32 %v4788_v22, %v12282_v9 }
 0x90c   : > { %v4854_v6 = vmul.f32 1.442695, %v4844_v46 }
 0x90d   : > { %v12285_v13 = vpop.xlane.xlu0 %4795 }
 0x90e   : > { %v4842_v36 = vsub.f32 %v4786_v43, %v12285_v13  ;;  %10379 = vpow2.f32 %v4854_v6  ;;  %v4472_v6 = vsub.f32 -inf, %v12173_v29 }
 0x90f   : > { %v12288_v18 = vpop.xlane.xlu1 %4798 }
 0x910   : > { %v4850_v31 = vmul.f32 1.442695, %v4842_v36  ;;  %v4843_v8 = vsub.f32 %v4787_v53, %v12288_v18 }
 0x911   : > { %v12291_v40 = vpop.xlane.xlu0 %4804 }
 0x912   : > { %v4852_v7 = vmul.f32 1.442695, %v4843_v8  ;;  %10381 = vpow2.f32 %v4850_v31  ;;  %v4845_v47 = vsub.f32 %v4789_v48, %v12291_v40  ;;  %v4480_v31 = vmul.f32 1.442695, %v4472_v6 }
 0x913   : > { %v12294_v49 = vpop.xlane.xlu1 %4813  ;;  %v4475_v8 = vsub.f32 -inf, %v12180_v39 }
 0x914   : > { %v4848_v4 = vsub.f32 %v4792_v50, %v12294_v49  ;;  %10383 = vpow2.f32 %v4852_v7  ;;  %v4856_v27 = vmul.f32 1.442695, %v4845_v47  ;;  %v4474_v7 = vsub.f32 -inf, %v12171_v38 }
 0x915   : > { %v12297_v21 = vpop.xlane.xlu0 %4816  ;;  %v4482_v47 = vmul.f32 1.442695, %v4473_v3 }
 0x916   : > { %10385 = vpow2.f32 %v4856_v27  ;;  %v4849_v19 = vsub.f32 %v4793_v32, %v12297_v21  ;;  %v4862_v22 = vmul.f32 1.442695, %v4848_v4  ;;  %v4486_v4 = vmul.f32 1.442695, %v4475_v8 }
 0x917   : > { %v12300_v44 = vpop.xlane.xlu1 %4807  ;;  %v4477_v27 = vsub.f32 -inf, %v12212_v16 }
 0x918   : > { %v4846_v56 = vsub.f32 %v4790_v34, %v12300_v44  ;;  %v4864_v33 = vmul.f32 1.442695, %v4849_v19  ;;  %10387 = vpow2.f32 %v4862_v22  ;;  %v4484_v19 = vmul.f32 1.442695, %v4474_v7 }
 0x919   : > { %v12303_v43 = vpop.xlane.xlu0 %4810  ;;  %v4476_v22 = vsub.f32 -inf, %v12206_v12  ;;  %v4490_v29 = vmul.f32 1.442695, %v4477_v27 }
 0x91a   : > { %v4858_v23 = vmul.f32 1.442695, %v4846_v56  ;;  %v4847_v45 = vsub.f32 %v4791_v51, %v12303_v43 }
 0x91b   : > { %v10380_v48 = vpop.eup %10379  ;;  %v4913_v60 = vpop.permute.xlu1 %4912  ;;  %v4488_v56 = vmul.f32 1.442695, %v4476_v22 }
 0x91c   : > { %10389 = vpow2.f32 %v4858_v23  ;;  %v4860_v53 = vmul.f32 1.442695, %v4847_v45  ;;  %v4880_v30 = vsel %vm2989_vm13, %v10380_v48, 0.0 }
 0x91d   : > { %v4915_v50 = vpop.permute.xlu0 %4914  ;;  %10391 = vpow2.f32 %v4864_v33  ;;  %4881 = vadd.xlane.f32.xlu1 %v4880_v30 }
 0x91e   : > { %9762 = vmatprep.subr.bf16.mxu0 %v4915_v50  ;;  %10393 = vpow2.f32 %v4860_v53  ;;  %10071 = vmatprep.subr.bf16.mxu1 %v4915_v50 }
 0x91f   : > { %9763 = vmatpush3.bf16.msra.mxu0 %v4915_v50  ;;  %v10382_v61 = vpop.eup %10381  ;;  %10075 = vmatpush3.bf16.msra.mxu1 %v4915_v50  ;;  %v4911_v41 = vpop.permute.xlu1 %4910  ;;  %10395 = vpow2.f32 %v4480_v31 }
 0x920   : > { %9764 = vmatprep.subr.bf16.mxu0 %v4913_v60  ;;  %10072 = vmatprep.subr.bf16.mxu1 %v4913_v60  ;;  %v4874_v52 = vsel %vm2989_vm13, %v10382_v61, 0.0  ;;  %10397 = vpow2.f32 %v4482_v47 }
 0x921   : > { %v10384_v14 = vpop.eup %10383  ;;  %4875 = vadd.xlane.f32.xlu0 %v4874_v52  ;;  %10399 = vpow2.f32 %v4486_v4 }
 0x922   : > { %v4906_v34 = vpack.c.bf16 %v10384_v14, %v10382_v61  ;;  %v4877_v26 = vsel %vm2989_vm13, %v10384_v14, 0.0  ;;  %10401 = vpow2.f32 %v4484_v19  ;;  %v4478_v19 = vsub.f32 -inf, %v12201_v15 }
 0x923   : > { %9765 = vmatpush3.bf16.msra.mxu0 %v4913_v60  ;;  %v10386_v32 = vpop.eup %10385  ;;  %10076 = vmatpush3.bf16.msra.mxu1 %v4913_v60  ;;  %10403 = vpow2.f32 %v4490_v29  ;;  %v4479_v29 = vsub.f32 -inf, %v12203_v1 }
 0x924   : > { %9766 = vmatprep.subr.bf16.mxu0 %v4911_v41  ;;  %10073 = vmatprep.subr.bf16.mxu1 %v4911_v41  ;;  %v4883_v0 = vsel %vm2989_vm13, %v10386_v32, 0.0  ;;  %v4907_v51 = vpack.c.bf16 %v10386_v32, %v10380_v48  ;;  %10405 = vpow2.f32 %v4488_v56  ;;  %v4492_v22 = vmul.f32 1.442695, %v4478_v19 }
 0x925   : > { %9768 = vmatprep.mubr.msk.bf16.mxu0 %vm2989_vm13, %v4906_v34  ;;  %4884 = vadd.xlane.f32.xlu0 %v4883_v0  ;;  %v10388_v10 = vpop.eup %10387 }
 0x926   : > { %v4892_v25 = vsel %vm2989_vm13, %v10388_v10, 0.0 }
 0x927   : > { %9767 = vmatpush3.bf16.msra.mxu0 %v4911_v41  ;;  %10077 = vmatpush3.bf16.msra.mxu1 %v4911_v41 }
 0x928   : > { %9786 = vmatprep.subr.bf16.mxu0 %v10327_v57 }
 0x929   : > { %v10390_v55 = vpop.eup %10389  ;;  %4878 = vadd.xlane.f32.xlu0 %v4877_v26 }
 0x92a   : > { %9769 = vmatmul.mubr.msk.bf16.vlgmr.msra.gmra.mxu0 %vm2989_vm13, %v4907_v51  ;;  %v10392_v59 = vpop.eup %10391  ;;  %v4886_v17 = vsel %vm2989_vm13, %v10390_v55, 0.0 }
 0x92b   : > { %9787 = vmatpush3.bf16.msra.mxu0 %v10327_v57  ;;  %v10394_v63 = vpop.eup %10393  ;;  %4887 = vadd.xlane.f32.xlu1 %v4886_v17  ;;  %v4909_v11 = vpack.c.bf16 %v10392_v59, %v10388_v10  ;;  %v4895_v36 = vsel %vm2989_vm13, %v10392_v59, 0.0 }
 0x92c   : > { %v4908_v62 = vpack.c.bf16 %v10394_v63, %v10390_v55  ;;  %v4889_v46 = vsel %vm2989_vm13, %v10394_v63, 0.0  ;;  %v10396_v35 = vpop.eup %10395 }
 0x92d   : > { %4550 = vadd.xlane.f32.xlu0 %v4549_v58  ;;  %v10398_v33 = vpop.eup %10397  ;;  %v4520_v39 = vmul.f32 0.0, %v10396_v35 }
 0x92e   : > { %9772 = vmatprep.mubr.msk.bf16.mxu1 %vm2989_vm13, %v4908_v62  ;;  %v10400_v23 = vpop.eup %10399  ;;  %v4521_v45 = vmul.f32 0.0, %v10398_v33 }
 0x92f   : > { %4893 = vadd.xlane.f32.xlu1 %v4892_v25  ;;  %9773 = vmatmul.mubr.msk.bf16.vlgmr.msra.gmra.mxu1 %vm2989_vm13, %v4909_v11  ;;  %v10402_v53 = vpop.eup %10401  ;;  %v4523_v16 = vmul.f32 0.0, %v10400_v23  ;;  %v4653_v59 = vadd.f32 %v12240_v2, %v4520_v39 }
 0x930   : > { %v10404_v50 = vpop.eup %10403  ;;  %v4522_v61 = vmul.f32 0.0, %v10402_v53  ;;  %v4654_v17 = vadd.f32 %v12244_v54, %v4521_v45 }
 0x931   : > { %4890 = vadd.xlane.f32.xlu0 %v4889_v46  ;;  %v10406_v14 = vpop.eup %10405  ;;  %v4525_v34 = vmul.f32 0.0, %v10404_v50  ;;  %v4656_v46 = vadd.f32 %v12242_v24, %v4523_v16  ;;  %v10328_v24 = vld [vmem:[#allocation18 + $0x8] sm:$0xff]   ;;  %v4821_v50 = vsub.f32 -inf, %v12291_v40 }
 0x932   : > { %v4524_v0 = vmul.f32 0.0, %v10406_v14  ;;  %v4655_v25 = vadd.f32 %v12238_v28, %v4522_v61  ;;  %9776 = vmatprep.subr.bf16.mxu1 %v10328_v24 }
 0x933   : > { %v4658_v2 = vadd.f32 %v12252_v5, %v4525_v34  ;;  %9777 = vmatpush3.bf16.msra.mxu1 %v10328_v24 }
 0x934   : > { %v4657_v7 = vadd.f32 %v12248_v42, %v4524_v0  ;;  %v4494_v42 = vmul.f32 1.442695, %v4479_v29 }
 0x935   : > { %4896 = vadd.xlane.f32.xlu0 %v4895_v36 }
 0x94e   : > { %v4530_v38 = vpop.xlane.xlu0 %4529 }
 0x94f   : > { %v4552_v48 = vadd.f32 %v4530_v38, %v4520_v39 }
 0x950   : > { %v4533_v60 = vpop.xlane.xlu1 %4532 }
 0x951   : > { %10407 = vrcp.f32 %v4552_v48  ;;  %v4553_v30 = vadd.f32 %v4533_v60, %v4521_v45 }
 0x952   : > { %v4539_v12 = vpop.xlane.xlu0 %4538 }
 0x953   : > { %10409 = vrcp.f32 %v4553_v30  ;;  %v4555_v52 = vadd.f32 %v4539_v12, %v4523_v16  ;;  %v4818_v16 = vsub.f32 -inf, %v12285_v13  ;;  %v4822_v13 = vsub.f32 -inf, %v12300_v44 }
 0x954   : > { %v4536_v41 = vpop.xlane.xlu1 %4535 }
 0x955   : > { %10411 = vrcp.f32 %v4555_v52  ;;  %v4554_v32 = vadd.f32 %v4536_v41, %v4522_v61  ;;  %v4819_v61 = vsub.f32 -inf, %v12288_v18  ;;  %v4820_v52 = vsub.f32 -inf, %v12282_v9 }
 0x956   : > { %v4545_v57 = vpop.xlane.xlu0 %4544  ;;  %v4824_v9 = vsub.f32 -inf, %v12294_v49  ;;  %v4834_v18 = vmul.f32 1.442695, %v4822_v13 }
 0x957   : > { %10413 = vrcp.f32 %v4554_v32  ;;  %v4557_v51 = vadd.f32 %v4545_v57, %v4525_v34  ;;  %v4826_v34 = vmul.f32 1.442695, %v4818_v16  ;;  %v4832_v32 = vmul.f32 1.442695, %v4821_v50 }
 0x958   : > { %v4542_v10 = vpop.xlane.xlu1 %4541 }
 0x959   : > { %10415 = vrcp.f32 %v4557_v51  ;;  %v4556_v26 = vadd.f32 %v4542_v10, %v4524_v0  ;;  %v4828_v0 = vmul.f32 1.442695, %v4819_v61  ;;  %v4830_v51 = vmul.f32 1.442695, %v4820_v52 }
 0x95b   : > { %10417 = vrcp.f32 %v4556_v26  ;;  %v4838_v26 = vmul.f32 1.442695, %v4824_v9 }
 0x95c   : > { %10419 = vpow2.f32 %v4492_v22  ;;  %v4548_v33 = vpop.xlane.xlu1 %4547 }
 0x95d   : > { %10421 = vpow2.f32 %v4494_v42 }
 0x95e   : > { %v10408_v55 = vpop.eup %10407 }
 0x95f   : > { %v4669_v58 = vmul.f32 %v10408_v55, %v4653_v59 }
 0x960   : > { %v10410_v63 = vpop.eup %10409 }
 0x961   : > { %v4670_v62 = vmul.f32 %v10410_v63, %v4654_v17 }
 0x962   : > { %v10412_v11 = vpop.eup %10411 }
 0x963   : > { %v4677_v6 = vpack.c.bf16 %v4670_v62, %v4669_v58  ;;  %v4672_v31 = vmul.f32 %v10412_v11, %v4656_v46 }
 0x964   : > { %v10414_v36 = vpop.eup %10413 }
 0x965   : > { %9788 = vmatprep.mubr.msk.bf16.mxu0 %vm4350_vm14, %v4677_v6  ;;  %v4671_v3 = vmul.f32 %v10414_v36, %v4655_v25 }
 0x966   : > { %v10416_v8 = vpop.eup %10415 }
 0x967   : > { %v4678_v54 = vpack.c.bf16 %v4672_v31, %v4671_v3  ;;  %v4674_v27 = vmul.f32 %v10416_v8, %v4658_v2 }
 0x968   : > { %v10418_v47 = vpop.eup %10417 }
 0x969   : > { %9789 = vmatmul.mubr.msk.bf16.vlgmr.msra.gmra.mxu0 %vm4350_vm14, %v4678_v54  ;;  %v4673_v4 = vmul.f32 %v10418_v47, %v4657_v7  ;;  %v10420_v56 = vpop.eup %10419 }
 0x96a   : > { %v4526_v39 = vmul.f32 0.0, %v10420_v56  ;;  %v10422_v23 = vpop.eup %10421 }
 0x96b   : > { %v4679_v28 = vpack.c.bf16 %v4674_v27, %v4673_v4  ;;  %v4527_v48 = vmul.f32 0.0, %v10422_v23 }
 0x96c   : > { %v4558_v45 = vadd.f32 %v4548_v33, %v4526_v39  ;;  %v4659_v1 = vadd.f32 %v12246_v37, %v4526_v39  ;;  %v4823_v37 = vsub.f32 -inf, %v12303_v43 }
 0x96d   : > { %9792 = vmatprep.mubr.msk.bf16.mxu0 %vm4350_vm14, %v4679_v28  ;;  %v4660_v30 = vadd.f32 %v12250_v20, %v4527_v48  ;;  %v4825_v20 = vsub.f32 -inf, %v12297_v21 }
 0x96e   : > { %10423 = vrcp.f32 %v4558_v45  ;;  %v4836_v40 = vmul.f32 1.442695, %v4823_v37 }
 0x96f   : > { %v4840_v10 = vmul.f32 1.442695, %v4825_v20 }
 0x97b   : > { %v10424_v15 = vpop.eup %10423 }
 0x97c   : > { %v4675_v14 = vmul.f32 %v10424_v15, %v4659_v1 }
 0x9a6   : > { %v4882_v43 = vpop.xlane.xlu1 %4881 }
 0x9aa   : > { %v4876_v5 = vpop.xlane.xlu0 %4875 }
 0x9ae   : > { %v4885_v35 = vpop.xlane.xlu0 %4884 }
 0x9b2   : > { %v4879_v38 = vpop.xlane.xlu0 %4878 }
 0x9b4   : > { %v4888_v36 = vpop.xlane.xlu1 %4887 }
 0x9b6   : > { %v4551_v53 = vpop.xlane.xlu0 %4550 }
 0x9b7   : > { %v4559_v60 = vadd.f32 %v4551_v53, %v4527_v48 }
 0x9b8   : > { %v4894_v28 = vpop.xlane.xlu1 %4893 }
 0x9b9   : > { %10425 = vrcp.f32 %v4559_v60 }
 0x9ba   : > { %10427 = vpow2.f32 %v4826_v34  ;;  %v4891_v11 = vpop.xlane.xlu0 %4890 }
 0x9bb   : > { %10429 = vpow2.f32 %v4832_v32 }
 0x9bc   : > { %10431 = vpow2.f32 %v4828_v0 }
 0x9bd   : > { %10433 = vpow2.f32 %v4830_v51 }
 0x9be   : > { %10435 = vpow2.f32 %v4834_v18  ;;  %v4897_v47 = vpop.xlane.xlu0 %4896 }
 0x9bf   : > { %10437 = vpow2.f32 %v4836_v40 }
 0x9c0   : > { %10439 = vpow2.f32 %v4840_v10 }
 0x9c1   : > { %10441 = vpow2.f32 %v4838_v26 }
 0x9c6   : > { %v10426_v12 = vpop.eup %10425 }
 0x9c7   : > { %v4676_v41 = vmul.f32 %v10426_v12, %v4660_v30  ;;  %v10428_v44 = vpop.eup %10427 }
 0x9c8   : > { %v10430_v55 = vpop.eup %10429  ;;  %v4866_v63 = vmul.f32 0.0, %v10428_v44 }
 0x9c9   : > { %v4680_v57 = vpack.c.bf16 %v4676_v41, %v4675_v14  ;;  %v10432_v59 = vpop.eup %10431  ;;  %v4869_v58 = vmul.f32 0.0, %v10430_v55 }
 0x9ca   : > { %v10434_v17 = vpop.eup %10433  ;;  %v4898_v21 = vadd.f32 %v4876_v5, %v4866_v63  ;;  %v4867_v62 = vmul.f32 0.0, %v10432_v59  ;;  %v5193_v59 = vlaneseq }
 0x9cb   : > { %9793 = vmatmul.mubr.msk.bf16.gmra.mxu0 %vm4350_vm14, %v4680_v57  ;;  %v4868_v25 = vmul.f32 0.0, %v10434_v17  ;;  %v4901_v49 = vadd.f32 %v4885_v35, %v4869_v58  ;;  %v10436_v46 = vpop.eup %10435 }
 0x9cc   : > { %v4899_v6 = vadd.f32 %v4879_v38, %v4867_v62  ;;  %v10438_v3 = vpop.eup %10437  ;;  %10443 = vrcp.f32 %v4898_v21  ;;  %v4870_v7 = vmul.f32 0.0, %v10436_v46  ;;  %v12358_v21 = vld [vmem:[%s13322_s15] sm:$0x3f] }
 0x9cd   : > { %v4900_v31 = vadd.f32 %v4882_v43, %v4868_v25  ;;  %v10440_v8 = vpop.eup %10439  ;;  %10445 = vrcp.f32 %v4901_v49  ;;  %v4871_v54 = vmul.f32 0.0, %v10438_v3  ;;  %v12352_v43 = vshrl.u32 %v5193_v59, 7 }
 0x9ce   : > { %v10442_v2 = vpop.eup %10441  ;;  %10447 = vrcp.f32 %v4899_v6  ;;  %v4902_v4 = vadd.f32 %v4888_v36, %v4870_v7  ;;  %v4873_v27 = vmul.f32 0.0, %v10440_v8 }
 0x9cf   : > { %10449 = vrcp.f32 %v4900_v31  ;;  %v4903_v24 = vadd.f32 %v4891_v11, %v4871_v54  ;;  %v4872_v19 = vmul.f32 0.0, %v10442_v2 }
 0x9d0   : > { %v4905_v22 = vadd.f32 %v4897_v47, %v4873_v27  ;;  %10451 = vrcp.f32 %v4902_v4  ;;  %v10619_v4 = vld [vmem:[#allocation6] sm:$0xff] }
 0x9d1   : > { %v4904_v29 = vadd.f32 %v4894_v28, %v4872_v19  ;;  %10453 = vrcp.f32 %v4903_v24 }
 0x9d2   : > { %10455 = vrcp.f32 %v4905_v22 }
 0x9d3   : > { %10457 = vrcp.f32 %v4904_v29 }
 0x9d9   : > { %v10444_v39 = vpop.eup %10443 }
 0x9da   : > { %v10446_v48 = vpop.eup %10445 }
 0x9db   : > { %v10448_v60 = vpop.eup %10447 }
 0x9dc   : > { %v10450_v1 = vpop.eup %10449 }
 0x9dd   : > { %v10452_v57 = vpop.eup %10451 }
 0x9de   : > { %v10454_v51 = vpop.eup %10453 }
 0x9df   : > { %v10456_v37 = vpop.eup %10455 }
 0x9e0   : > { %v10458_v40 = vpop.eup %10457 }
 0x9ea   : > { %v9770_v42 = vpop.f32.mrf.mxu0 }
 0x9eb   : > { %v5001_v23 = vadd.f32 %v9770_v42, %v4868_v25 }
 0x9ec   : > { %v4968_v5 = vpop.f32.mrf.mxu0 }
 0x9ed   : > { %v4999_v35 = vadd.f32 %v4968_v5, %v4866_v63  ;;  %v5017_v12 = vmul.f32 %v10450_v1, %v5001_v23 }
 0x9ee   : > { %v9771_v56 = vpop.f32.mrf.mxu0 }
 0x9ef   : > { %v5002_v33 = vadd.f32 %v9771_v56, %v4869_v58  ;;  %v9774_v38 = vpop.f32.mrf.mxu1  ;;  %v5015_v30 = vmul.f32 %v10444_v39, %v4999_v35  ;;  %v5195_v58 = vsub.s32 0, %v12352_v43  ;;  %v10621_v39 = vld [vmem:[#allocation6 + $0x8] sm:$0xff] }
 0x9f0   : > { %v4971_v45 = vpop.f32.mrf.mxu0  ;;  %v5005_v13 = vadd.f32 %v9774_v38, %v4872_v19  ;;  %v10620_v19 = vld [vmem:[#allocation6 + $0x10] sm:$0xff] }
 0x9f1   : > { %v5000_v53 = vadd.f32 %v4971_v45, %v4867_v62  ;;  %v5018_v15 = vmul.f32 %v10446_v48, %v5002_v33  ;;  %v4984_v16 = vpop.f32.mrf.mxu1  ;;  %v5196_v25 = vrot.slane %v12358_v21, %v5195_v58  ;;  %v10622_v48 = vld [vmem:[#allocation6 + $0x18] sm:$0xff] }
 0x9f2   : > { %v5003_v14 = vadd.f32 %v4984_v16, %v4870_v7  ;;  %v5021_v26 = vmul.f32 %v10458_v40, %v5005_v13 }
 0x9f3   : > { %v5016_v50 = vmul.f32 %v10448_v60, %v5000_v53  ;;  %v9775_v61 = vpop.f32.mrf.mxu1  ;;  %v5024_v41 = vpack.c.bf16 %v5018_v15, %v5017_v12 }
 0x9f4   : > { %v5006_v34 = vadd.f32 %v9775_v61, %v4873_v27  ;;  %v5019_v20 = vmul.f32 %v10452_v57, %v5003_v14  ;;  %v10623_v61 = vld [vmem:[#allocation6 + $0x20] sm:$0xff]  ;;  %v10624_v57 = vld [vmem:[#allocation6 + $0x30] sm:$0xff] }
 0x9f5   : > { %v5023_v52 = vpack.c.bf16 %v5016_v50, %v5015_v30  ;;  %v4987_v32 = vpop.f32.mrf.mxu1 }
 0x9f6   : > { %v5004_v0 = vadd.f32 %v4987_v32, %v4871_v54  ;;  %v5022_v18 = vmul.f32 %v10456_v37, %v5006_v34 }
 0x9f7   : > { %9778 = vmatprep.mubr.msk.bf16.mxu1 %vm4350_vm14, %v5023_v52 }
 0x9f8   : > { %9779 = vmatmul.mubr.msk.bf16.vlgmr.msra.gmra.mxu1 %vm4350_vm14, %v5024_v41  ;;  %v5020_v9 = vmul.f32 %v10454_v51, %v5004_v0  ;;  %v5026_v44 = vpack.c.bf16 %v5022_v18, %v5021_v26  ;;  %v10625_v51 = vld [vmem:[#allocation6 + $0x28] sm:$0xff] }
 0x9fa   : > { %v5025_v10 = vpack.c.bf16 %v5020_v9, %v5019_v20  ;;  %v10626_v9 = vld [vmem:[#allocation6 + $0x38] sm:$0xff] }
 0x9fc   : > { %9782 = vmatprep.mubr.msk.bf16.mxu1 %vm4350_vm14, %v5025_v10 }
 0xa00   : > { %9783 = vmatmul.mubr.msk.bf16.gmra.mxu1 %vm4350_vm14, %v5026_v44 }
 0xa29   : > { %v9790_v55 = vpop.f32.mrf.mxu0 }
 0xa2b   : > { %v5162_v17 = vpop.f32.mrf.mxu0 }
 0xa2d   : > { %v9791_v63 = vpop.f32.mrf.mxu0 }
 0xa2f   : > { %v5165_v62 = vpop.f32.mrf.mxu0 }
 0xa8b   : > { %v9794_v46 = vpop.f32.mrf.mxu0 }
 0xa8d   : > { %v5178_v2 = vpop.f32.mrf.mxu0 }
 0xa8f   : > { %v9795_v56 = vpop.f32.mrf.mxu0 }
 0xa91   : > { %v5181_v30 = vpop.f32.mrf.mxu0 }
 0xab8   : > { %v9780_v11 = vpop.f32.mrf.mxu1 }
 0xab9   : > { %v5171_v49 = vadd.f32 %v9790_v55, %v9780_v11 }
 0xaba   : > { %v5079_v6 = vpop.f32.mrf.mxu1 }
 0xabb   : > { %v5163_v36 = vadd.f32 %v5162_v17, %v5079_v6  ;;  %v5199_v3 = vadd.f32 %v5196_v25, %v5171_v49 }
 0xabc   : > { %v9781_v31 = vpop.f32.mrf.mxu1 }
 0xabd   : > { %v5197_v8 = vadd.f32 %v5196_v25, %v5163_v36  ;;  %v5174_v7 = vadd.f32 %v9791_v63, %v9781_v31  ;;  %v5207_v22 = vadd.f32 %v10620_v19, %v5199_v3 }
 0xabe   : > { %v5082_v54 = vpop.f32.mrf.mxu1 }
 0xabf   : > { %v5166_v47 = vadd.f32 %v5165_v62, %v5082_v54  ;;  %v5205_v27 = vadd.f32 %v10619_v4, %v5197_v8  ;;  %v5200_v28 = vadd.f32 %v5196_v25, %v5174_v7  ;;  %v5219_v45 = vsel %vm1946_vm12, %v5207_v22, 0.0 }
 0xac0   : > { %v9784_v24 = vpop.f32.mrf.mxu1 }
 0xac1   : > { %v5198_v29 = vadd.f32 %v5196_v25, %v5166_v47  ;;  %v5187_v42 = vadd.f32 %v9794_v46, %v9784_v24  ;;  %v5213_v5 = vsel %vm1946_vm12, %v5205_v27, 0.0  ;;  %v5208_v53 = vadd.f32 %v10622_v48, %v5200_v28 }
 0xac2   : > { %5214 = vadd.xlane.f32.xlu1 %v5213_v5  ;;  %v5095_v35 = vpop.f32.mrf.mxu1 }
 0xac3   : > { %v5179_v33 = vadd.f32 %v5178_v2, %v5095_v35  ;;  %v5206_v23 = vadd.f32 %v10621_v39, %v5198_v29  ;;  %v5203_v60 = vadd.f32 %v5196_v25, %v5187_v42  ;;  %v5222_v14 = vsel %vm1946_vm12, %v5208_v53, 0.0 }
 0xac4   : > { %v9785_v38 = vpop.f32.mrf.mxu1 }
 0xac5   : > { %v5201_v15 = vadd.f32 %v5196_v25, %v5179_v33  ;;  %v5190_v16 = vadd.f32 %v9795_v56, %v9785_v38  ;;  %v5216_v1 = vsel %vm1946_vm12, %v5206_v23, 0.0  ;;  %v5211_v0 = vadd.f32 %v10624_v57, %v5203_v60 }
 0xac6   : > { %5220 = vadd.xlane.f32.xlu1 %v5219_v45  ;;  %5217 = vadd.xlane.f32.xlu0 %v5216_v1  ;;  %v5098_v50 = vpop.f32.mrf.mxu1  ;;  %v10331_v1 = vld [vmem:[%s13323_s20 + $0x18] sm:$0xff]  }
 0xac7   : > { %v5182_v12 = vadd.f32 %v5181_v30, %v5098_v50  ;;  %v5209_v52 = vadd.f32 %v10623_v61, %v5201_v15  ;;  %v5204_v41 = vadd.f32 %v5196_v25, %v5190_v16  ;;  %v5231_v37 = vsel %vm1946_vm12, %v5211_v0, 0.0  ;;  %v10329_v15 = vld [vmem:[#allocation20 + $0x8] sm:$0xff]   ;;  %v10330_v16 = vld [vmem:[#allocation20] sm:$0xff]   ;;  %9808 = vmatprep.subr.bf16.mxu0 %v10331_v1 }
 0xac8   : > { %9796 = vmatprep.subr.bf16.mxu1 %v10329_v15  ;;  %9809 = vmatpush3.bf16.msra.mxu0 %v10331_v1 }
 0xac9   : > { %v5202_v34 = vadd.f32 %v5196_v25, %v5182_v12  ;;  %v5225_v32 = vsel %vm1946_vm12, %v5209_v52, 0.0  ;;  %v5212_v18 = vadd.f32 %v10626_v9, %v5204_v41  ;;  %9797 = vmatpush3.bf16.msra.mxu1 %v10329_v15 }
 0xaca   : > { %5223 = vadd.xlane.f32.xlu0 %v5222_v14  ;;  %5226 = vadd.xlane.f32.xlu1 %v5225_v32 }
 0xacb   : > { %v5210_v13 = vadd.f32 %v10625_v51, %v5202_v34  ;;  %v5234_v40 = vsel %vm1946_vm12, %v5212_v18, 0.0  ;;  %9798 = vmatprep.subr.bf16.mxu1 %v10330_v16 }
 0xacd   : > { %v5228_v20 = vsel %vm1946_vm12, %v5210_v13, 0.0  ;;  %9799 = vmatpush3.bf16.msra.mxu1 %v10330_v16 }
 0xace   : > { %5232 = vadd.xlane.f32.xlu1 %v5231_v37  ;;  %5229 = vadd.xlane.f32.xlu0 %v5228_v20 }
 0xad2   : > { %5235 = vadd.xlane.f32.xlu0 %v5234_v40 }
 0xb4b   : > { %v5215_v10 = vpop.xlane.xlu1 %5214 }
 0xb4c   : > { %v5238_v26 = vmul.f32 0.03125, %v5215_v10 }
 0xb4e   : > { %v12371_v44 = vsub.f32 %v5205_v27, %v5238_v26 }
 0xb4f   : > { %v5221_v55 = vpop.xlane.xlu1 %5220  ;;  %v5218_v59 = vpop.xlane.xlu0 %5217 }
 0xb50   : > { %v5240_v17 = vmul.f32 0.03125, %v5221_v55  ;;  %v5239_v63 = vmul.f32 0.03125, %v5218_v59  ;;  %v5254_v62 = vmul.f32 %v12371_v44, %v12371_v44  ;;  %v5320_v59 = vsub.s32 2, %v12352_v43 }
 0xb52   : > { %v5262_v11 = vsel %vm1946_vm12, %v5254_v62, 0.0  ;;  %v12376_v25 = vsub.f32 %v5207_v22, %v5240_v17  ;;  %v12378_v49 = vsub.f32 %v5206_v23, %v5239_v63 }
 0xb53   : > { %5263 = vadd.xlane.f32.xlu1 %v5262_v11  ;;  %v5227_v46 = vpop.xlane.xlu1 %5226  ;;  %v5224_v6 = vpop.xlane.xlu0 %5223 }
 0xb54   : > { %v5242_v36 = vmul.f32 0.03125, %v5227_v46  ;;  %v5241_v3 = vmul.f32 0.03125, %v5224_v6  ;;  %v5256_v31 = vmul.f32 %v12376_v25, %v12376_v25  ;;  %v5255_v8 = vmul.f32 %v12378_v49, %v12378_v49 }
 0xb55   : > { %v5321_v6 = vrot.slane %v12358_v21, %v5320_v59 }
 0xb56   : > { %v5268_v7 = vsel %vm1946_vm12, %v5256_v31, 0.0  ;;  %v5265_v2 = vsel %vm1946_vm12, %v5255_v8, 0.0  ;;  %v12386_v54 = vsub.f32 %v5209_v52, %v5242_v36  ;;  %v12388_v47 = vsub.f32 %v5208_v53, %v5241_v3 }
 0xb57   : > { %5269 = vadd.xlane.f32.xlu1 %v5268_v7  ;;  %v5233_v4 = vpop.xlane.xlu1 %5232  ;;  %5266 = vadd.xlane.f32.xlu0 %v5265_v2  ;;  %v5230_v27 = vpop.xlane.xlu0 %5229  ;;  %v5332_v36 = vsub.s32 3, %v12352_v43 }
 0xb58   : > { %v5244_v28 = vmul.f32 0.03125, %v5233_v4  ;;  %v5243_v24 = vmul.f32 0.03125, %v5230_v27  ;;  %v5258_v19 = vmul.f32 %v12386_v54, %v12386_v54  ;;  %v5257_v22 = vmul.f32 %v12388_v47, %v12388_v47 }
 0xb59   : > { %v5333_v7 = vrot.slane %v12358_v21, %v5332_v36 }
 0xb5a   : > { %v5274_v29 = vsel %vm1946_vm12, %v5258_v19, 0.0  ;;  %v5271_v42 = vsel %vm1946_vm12, %v5257_v22, 0.0  ;;  %v12396_v5 = vsub.f32 %v5211_v0, %v5244_v28  ;;  %v12398_v56 = vsub.f32 %v5210_v13, %v5243_v24 }
 0xb5b   : > { %5275 = vadd.xlane.f32.xlu1 %v5274_v29  ;;  %5272 = vadd.xlane.f32.xlu0 %v5271_v42  ;;  %v5236_v35 = vpop.xlane.xlu0 %5235 }
 0xb5c   : > { %v5245_v33 = vmul.f32 0.03125, %v5236_v35  ;;  %v5260_v39 = vmul.f32 %v12396_v5, %v12396_v5  ;;  %v5259_v23 = vmul.f32 %v12398_v56, %v12398_v56 }
 0xb5e   : > { %v5280_v38 = vsel %vm1946_vm12, %v5260_v39, 0.0  ;;  %v5277_v45 = vsel %vm1946_vm12, %v5259_v23, 0.0  ;;  %v12406_v48 = vsub.f32 %v5212_v18, %v5245_v33 }
 0xb5f   : > { %5281 = vadd.xlane.f32.xlu1 %v5280_v38  ;;  %5278 = vadd.xlane.f32.xlu0 %v5277_v45 }
 0xb60   : > { %v5261_v53 = vmul.f32 %v12406_v48, %v12406_v48 }
 0xb62   : > { %v5283_v60 = vsel %vm1946_vm12, %v5261_v53, 0.0 }
 0xb63   : > { %5284 = vadd.xlane.f32.xlu0 %v5283_v60 }
 0xbdc   : > { %v5264_v30 = vpop.xlane.xlu1 %5263 }
 0xbdd   : > { %v5286_v50 = vmul.f32 0.03125, %v5264_v30 }
 0xbdf   : > { %v5294_v12 = vadd.f32 1e-05, %v5286_v50 }
 0xbe0   : > { %v5270_v61 = vpop.xlane.xlu1 %5269  ;;  %v5267_v52 = vpop.xlane.xlu0 %5266 }
 0xbe1   : > { %10459 = vrsqrt.f32 %v5294_v12  ;;  %v5288_v14 = vmul.f32 0.03125, %v5270_v61  ;;  %v5287_v41 = vmul.f32 0.03125, %v5267_v52  ;;  %v10332_v61 = vld [vmem:[%s13324_s2 + $0x10] sm:$0xff]   ;;  %v10333_v52 = vld [vmem:[%s13324_s2 + $0x8] sm:$0xff]  }
 0xbe2   : > { %9810 = vmatprep.subr.bf16.mxu0 %v10332_v61 }
 0xbe3   : > { %v5296_v34 = vadd.f32 1e-05, %v5288_v14  ;;  %v5295_v32 = vadd.f32 1e-05, %v5287_v41  ;;  %9811 = vmatpush3.bf16.msra.mxu0 %v10332_v61  ;;  %v10334_v14 = vld [vmem:[%s13324_s2] sm:$0xff]  }
 0xbe4   : > { %v5276_v57 = vpop.xlane.xlu1 %5275  ;;  %v5273_v0 = vpop.xlane.xlu0 %5272  ;;  %9812 = vmatprep.subr.bf16.mxu0 %v10333_v52 }
 0xbe5   : > { %10461 = vrsqrt.f32 %v5296_v34  ;;  %v5290_v51 = vmul.f32 0.03125, %v5276_v57  ;;  %v5289_v13 = vmul.f32 0.03125, %v5273_v0 }
 0xbe6   : > { %10463 = vrsqrt.f32 %v5295_v32  ;;  %v8873_v32 = vld [vmem:[#allocation21] ss:$0 sm:$0xff] }
 0xbe7   : > { %v5298_v37 = vadd.f32 1e-05, %v5290_v51  ;;  %v5297_v20 = vadd.f32 1e-05, %v5289_v13  ;;  %9813 = vmatpush3.bf16.msra.mxu0 %v10333_v52 }
 0xbe8   : > { %v5282_v9 = vpop.xlane.xlu1 %5281  ;;  %v5279_v18 = vpop.xlane.xlu0 %5278  ;;  %9814 = vmatprep.subr.bf16.mxu0 %v10334_v14 }
 0xbe9   : > { %10465 = vrsqrt.f32 %v5298_v37  ;;  %v5292_v40 = vmul.f32 0.03125, %v5282_v9  ;;  %v5291_v10 = vmul.f32 0.03125, %v5279_v18 }
 0xbea   : > { %10467 = vrsqrt.f32 %v5297_v20 }
 0xbeb   : > { %v5300_v26 = vadd.f32 1e-05, %v5292_v40  ;;  %v5299_v55 = vadd.f32 1e-05, %v5291_v10  ;;  %9815 = vmatpush3.bf16.msra.mxu0 %v10334_v14 }
 0xbec   : > { %v5285_v17 = vpop.xlane.xlu0 %5284 }
 0xbed   : > { %10469 = vrsqrt.f32 %v5300_v26  ;;  %v5293_v63 = vmul.f32 0.03125, %v5285_v17 }
 0xbee   : > { %v10460_v62 = vpop.eup %10459  ;;  %10471 = vrsqrt.f32 %v5299_v55 }
 0xbef   : > { %v5301_v11 = vadd.f32 1e-05, %v5293_v63  ;;  %v5310_v46 = vmul.f32 %v10460_v62, %v12371_v44 }
 0xbf1   : > { %10473 = vrsqrt.f32 %v5301_v11  ;;  %v5322_v8 = vmul.f32 %v5321_v6, %v5310_v46 }
 0xbf2   : > { %v10462_v3 = vpop.eup %10461 }
 0xbf3   : > { %v10464_v31 = vpop.eup %10463  ;;  %v5312_v2 = vmul.f32 %v10462_v3, %v12376_v25  ;;  %v12425_v24 = vadd.f32 %v5333_v7, %v5322_v8 }
 0xbf4   : > { %v5311_v4 = vmul.f32 %v10464_v31, %v12378_v49 }
 0xbf5   : > { %v5324_v29 = vmul.f32 %v5321_v6, %v5312_v2 }
 0xbf6   : > { %v10466_v27 = vpop.eup %10465  ;;  %v5323_v44 = vmul.f32 %v5321_v6, %v5311_v4 }
 0xbf7   : > { %v10468_v28 = vpop.eup %10467  ;;  %v5314_v42 = vmul.f32 %v10466_v27, %v12386_v54  ;;  %v12435_v23 = vadd.f32 %v5333_v7, %v5324_v29 }
 0xbf8   : > { %v5313_v19 = vmul.f32 %v10468_v28, %v12388_v47  ;;  %v12428_v22 = vadd.f32 %v5333_v7, %v5323_v44  ;;  %v5468_v28 = vsub.s32 1, %v12352_v43 }
 0xbf9   : > { %v5326_v45 = vmul.f32 %v5321_v6, %v5314_v42 }
 0xbfa   : > { %v10470_v35 = vpop.eup %10469  ;;  %v5342_v33 = vpack.c.bf16 %v12428_v22, %v12425_v24  ;;  %v5325_v39 = vmul.f32 %v5321_v6, %v5313_v19  ;;  %v5469_v19 = vrot.slane %v12358_v21, %v5468_v28 }
 0xbfb   : > { %v10472_v25 = vpop.eup %10471  ;;  %v5316_v49 = vmul.f32 %v10470_v35, %v12396_v5  ;;  %v12444_v5 = vadd.f32 %v5333_v7, %v5326_v45 }
 0xbfc   : > { %9800 = vmatprep.mubr.msk.bf16.mxu1 %vm1946_vm12, %v5342_v33  ;;  %v12437_v38 = vadd.f32 %v5333_v7, %v5325_v39  ;;  %v5315_v47 = vmul.f32 %v10472_v25, %v12398_v56 }
 0xbfd   : > { %v5328_v16 = vmul.f32 %v5321_v6, %v5316_v49 }
 0xbfe   : > { %v10474_v53 = vpop.eup %10473  ;;  %v5343_v54 = vpack.c.bf16 %v12437_v38, %v12435_v23  ;;  %v5327_v60 = vmul.f32 %v5321_v6, %v5315_v47 }
 0xbff   : > { %v5317_v15 = vmul.f32 %v10474_v53, %v12406_v48  ;;  %v12450_v56 = vadd.f32 %v5333_v7, %v5328_v16 }
 0xc00   : > { %9801 = vmatmul.mubr.msk.bf16.vlgmr.msra.gmra.mxu1 %vm1946_vm12, %v5343_v54  ;;  %v12446_v1 = vadd.f32 %v5333_v7, %v5327_v60 }
 0xc01   : > { %v5329_v30 = vmul.f32 %v5321_v6, %v5317_v15 }
 0xc02   : > { %v5344_v50 = vpack.c.bf16 %v12446_v1, %v12444_v5 }
 0xc03   : > { %v12452_v12 = vadd.f32 %v5333_v7, %v5329_v30 }
 0xc04   : > { %9804 = vmatprep.mubr.msk.bf16.mxu1 %vm1946_vm12, %v5344_v50 }
 0xc05   : > { %v5345_v48 = vpack.c.bf16 %v12452_v12, %v12450_v56 }
 0xc08   : > { %9805 = vmatmul.mubr.msk.bf16.gmra.mxu1 %vm1946_vm12, %v5345_v48 }
 0xcc0   : > { %v9802_v41 = vpop.f32.mrf.mxu1 }
 0xcc1   : > { %v5424_v13 = vadd.f32 %v9802_v41, %v8873_v32 }
 0xcc2   : > { %v5415_v34 = vpop.f32.mrf.mxu1 }
 0xcc3   : > { %v5416_v0 = vadd.f32 %v8873_v32, %v5415_v34  ;;  %v5448_v26 = vmax.f32 %v5424_v13, 0.0 }
 0xcc4   : > { %v9803_v57 = vpop.f32.mrf.mxu1 }
 0xcc5   : > { %v5427_v51 = vadd.f32 %v9803_v57, %v8873_v32  ;;  %v5446_v40 = vmax.f32 %v5416_v0, 0.0 }
 0xcc6   : > { %v5418_v37 = vpop.f32.mrf.mxu1 }
 0xcc7   : > { %v5419_v20 = vadd.f32 %v8873_v32, %v5418_v37  ;;  %v5449_v9 = vmax.f32 %v5427_v51, 0.0 }
 0xcc8   : > { %v9806_v18 = vpop.f32.mrf.mxu1 }
 0xcc9   : > { %v5447_v10 = vmax.f32 %v5419_v20, 0.0  ;;  %v5455_v63 = vpack.c.bf16 %v5449_v9, %v5448_v26  ;;  %v5440_v6 = vadd.f32 %v9806_v18, %v8873_v32 }
 0xcca   : > { %v5431_v55 = vpop.f32.mrf.mxu1 }
 0xccb   : > { %v5454_v17 = vpack.c.bf16 %v5447_v10, %v5446_v40  ;;  %v5432_v11 = vadd.f32 %v8873_v32, %v5431_v55  ;;  %v5452_v4 = vmax.f32 %v5440_v6, 0.0 }
 0xccc   : > { %v9807_v62 = vpop.f32.mrf.mxu1 }
 0xccd   : > { %v5443_v46 = vadd.f32 %v9807_v62, %v8873_v32  ;;  %9816 = vmatprep.mubr.msk.bf16.mxu0 %vm2989_vm13, %v5454_v17  ;;  %v5450_v7 = vmax.f32 %v5432_v11, 0.0 }
 0xcce   : > { %v5434_v3 = vpop.f32.mrf.mxu1  ;;  %9817 = vmatmul.mubr.msk.bf16.vlgmr.msra.gmra.mxu0 %vm2989_vm13, %v5455_v63 }
 0xccf   : > { %v5435_v31 = vadd.f32 %v8873_v32, %v5434_v3  ;;  %v5453_v8 = vmax.f32 %v5443_v46, 0.0 }
 0xcd1   : > { %v5451_v2 = vmax.f32 %v5435_v31, 0.0  ;;  %v5457_v44 = vpack.c.bf16 %v5453_v8, %v5452_v4 }
 0xcd3   : > { %v5456_v27 = vpack.c.bf16 %v5451_v2, %v5450_v7 }
 0xcd5   : > { %9820 = vmatprep.mubr.msk.bf16.mxu0 %vm2989_vm13, %v5456_v27 }
 0xcd6   : > { %9821 = vmatmul.mubr.msk.bf16.gmra.mxu0 %vm2989_vm13, %v5457_v44 }
 0xd8e   : > { %v9818_v29 = vpop.f32.mrf.mxu0 }
 0xd8f   : > { %v5549_v35 = vadd.f32 %v9818_v29, %v5469_v19 }
 0xd90   : > { %v5540_v42 = vpop.f32.mrf.mxu0 }
 0xd91   : > { %v5541_v33 = vadd.f32 %v5540_v42, %v5469_v19  ;;  %v5573_v54 = vadd.f32 %v5549_v35, %v12435_v23 }
 0xd92   : > { %v9819_v39 = vpop.f32.mrf.mxu0 }
 0xd93   : > { %v5571_v25 = vadd.f32 %v5541_v33, %v12425_v24  ;;  %v5552_v49 = vadd.f32 %v9819_v39, %v5469_v19  ;;  %v5585_v24 = vsel %vm1946_vm12, %v5573_v54, 0.0 }
 0xd94   : > { %v5543_v47 = vpop.f32.mrf.mxu0 }
 0xd95   : > { %v5544_v45 = vadd.f32 %v5543_v47, %v5469_v19  ;;  %v5579_v53 = vsel %vm1946_vm12, %v5571_v25, 0.0  ;;  %v5574_v30 = vadd.f32 %v5552_v49, %v12437_v38 }
 0xd96   : > { %5580 = vadd.xlane.f32.xlu1 %v5579_v53  ;;  %v9822_v60 = vpop.f32.mrf.mxu0 }
 0xd97   : > { %v5572_v15 = vadd.f32 %v5544_v45, %v12428_v22  ;;  %v5565_v50 = vadd.f32 %v9822_v60, %v5469_v19  ;;  %v5588_v23 = vsel %vm1946_vm12, %v5574_v30, 0.0 }
 0xd98   : > { %v5556_v16 = vpop.f32.mrf.mxu0 }
 0xd99   : > { %v5557_v48 = vadd.f32 %v5556_v16, %v5469_v19  ;;  %v5582_v61 = vsel %vm1946_vm12, %v5572_v15, 0.0  ;;  %v5577_v38 = vadd.f32 %v5565_v50, %v12450_v56  ;;  %v10336_v50 = vld [vmem:[#allocation15 + $0x10] sm:$0xff]  }
 0xd9a   : > { %5583 = vadd.xlane.f32.xlu0 %v5582_v61  ;;  %5586 = vadd.xlane.f32.xlu1 %v5585_v24  ;;  %v9823_v52 = vpop.f32.mrf.mxu0 }
 0xd9b   : > { %v5575_v14 = vadd.f32 %v5557_v48, %v12444_v5  ;;  %v5568_v34 = vadd.f32 %v9823_v52, %v5469_v19  ;;  %v5597_v51 = vsel %vm1946_vm12, %v5577_v38, 0.0 }
 0xd9c   : > { %v5559_v41 = vpop.f32.mrf.mxu0 }
 0xd9d   : > { %v5560_v32 = vadd.f32 %v5559_v41, %v5469_v19  ;;  %v5591_v22 = vsel %vm1946_vm12, %v5575_v14, 0.0  ;;  %v5578_v13 = vadd.f32 %v5568_v34, %v12452_v12 }
 0xd9e   : > { %5589 = vadd.xlane.f32.xlu0 %v5588_v23  ;;  %5592 = vadd.xlane.f32.xlu1 %v5591_v22 }
 0xd9f   : > { %v5576_v57 = vadd.f32 %v5560_v32, %v12446_v1  ;;  %v5600_v5 = vsel %vm1946_vm12, %v5578_v13, 0.0 }
 0xda1   : > { %v5594_v0 = vsel %vm1946_vm12, %v5576_v57, 0.0 }
 0xda2   : > { %5595 = vadd.xlane.f32.xlu0 %v5594_v0  ;;  %5598 = vadd.xlane.f32.xlu1 %v5597_v51 }
 0xda6   : > { %5601 = vadd.xlane.f32.xlu0 %v5600_v5 }
 0xe1f   : > { %v5581_v37 = vpop.xlane.xlu1 %5580 }
 0xe20   : > { %v5603_v20 = vmul.f32 0.03125, %v5581_v37 }
 0xe22   : > { %v12491_v9 = vsub.f32 %v5571_v25, %v5603_v20 }
 0xe23   : > { %v5587_v56 = vpop.xlane.xlu1 %5586  ;;  %v5584_v18 = vpop.xlane.xlu0 %5583 }
 0xe24   : > { %v5605_v40 = vmul.f32 0.03125, %v5587_v56  ;;  %v5604_v10 = vmul.f32 0.03125, %v5584_v18  ;;  %v5619_v1 = vmul.f32 %v12491_v9, %v12491_v9 }
 0xe26   : > { %v5627_v26 = vsel %vm1946_vm12, %v5619_v1, 0.0  ;;  %v12496_v55 = vsub.f32 %v5573_v54, %v5605_v40  ;;  %v12498_v12 = vsub.f32 %v5572_v15, %v5604_v10  ;;  %v5685_v10 = vsub.s32 4, %v12352_v43 }
 0xe27   : > { %5628 = vadd.xlane.f32.xlu1 %v5627_v26  ;;  %v5593_v17 = vpop.xlane.xlu1 %5592  ;;  %v5590_v63 = vpop.xlane.xlu0 %5589 }
 0xe28   : > { %v5607_v62 = vmul.f32 0.03125, %v5593_v17  ;;  %v5606_v11 = vmul.f32 0.03125, %v5590_v63  ;;  %v5621_v46 = vmul.f32 %v12496_v55, %v12496_v55  ;;  %v5620_v6 = vmul.f32 %v12498_v12, %v12498_v12 }
 0xe2a   : > { %v12504_v3 = vsub.f32 %v5575_v14, %v5607_v62  ;;  %v12506_v31 = vsub.f32 %v5574_v30, %v5606_v11  ;;  %v5633_v8 = vsel %vm1946_vm12, %v5621_v46, 0.0  ;;  %v5630_v7 = vsel %vm1946_vm12, %v5620_v6, 0.0  ;;  %v10335_v30 = vld [vmem:[#allocation15 + $0x18] sm:$0xff]  }
 0xe2b   : > { %5634 = vadd.xlane.f32.xlu1 %v5633_v8  ;;  %v5599_v2 = vpop.xlane.xlu1 %5598  ;;  %5631 = vadd.xlane.f32.xlu0 %v5630_v7  ;;  %v5596_v4 = vpop.xlane.xlu0 %5595  ;;  %v5686_v11 = vrot.slane %v12358_v21, %v5685_v10  ;;  %v5697_v46 = vsub.s32 5, %v12352_v43 }
 0xe2c   : > { %v5609_v27 = vmul.f32 0.03125, %v5599_v2  ;;  %v5608_v44 = vmul.f32 0.03125, %v5596_v4  ;;  %v5623_v19 = vmul.f32 %v12504_v3, %v12504_v3  ;;  %v5622_v29 = vmul.f32 %v12506_v31, %v12506_v31  ;;  %9824 = vmatprep.subr.bf16.mxu1 %v10335_v30 }
 0xe2d   : > { %9825 = vmatpush3.bf16.msra.mxu1 %v10335_v30  ;;  %v5698_v2 = vrot.slane %v12358_v21, %v5697_v46 }
 0xe2e   : > { %v12514_v42 = vsub.f32 %v5577_v38, %v5609_v27  ;;  %v12516_v35 = vsub.f32 %v5576_v57, %v5608_v44  ;;  %v5639_v33 = vsel %vm1946_vm12, %v5623_v19, 0.0  ;;  %v5636_v39 = vsel %vm1946_vm12, %v5622_v29, 0.0  ;;  %9826 = vmatprep.subr.bf16.mxu1 %v10336_v50 }
 0xe2f   : > { %5640 = vadd.xlane.f32.xlu1 %v5639_v33  ;;  %5637 = vadd.xlane.f32.xlu0 %v5636_v39  ;;  %v5602_v25 = vpop.xlane.xlu0 %5601 }
 0xe30   : > { %v5610_v49 = vmul.f32 0.03125, %v5602_v25  ;;  %v5625_v47 = vmul.f32 %v12514_v42, %v12514_v42  ;;  %v5624_v45 = vmul.f32 %v12516_v35, %v12516_v35 }
 0xe31   : > { %9827 = vmatpush3.bf16.msra.mxu1 %v10336_v50 }
 0xe32   : > { %v12524_v53 = vsub.f32 %v5578_v13, %v5610_v49  ;;  %v5645_v54 = vsel %vm1946_vm12, %v5625_v47, 0.0  ;;  %v5642_v60 = vsel %vm1946_vm12, %v5624_v45, 0.0 }
 0xe33   : > { %5646 = vadd.xlane.f32.xlu1 %v5645_v54  ;;  %5643 = vadd.xlane.f32.xlu0 %v5642_v60 }
 0xe34   : > { %v5626_v15 = vmul.f32 %v12524_v53, %v12524_v53 }
 0xe36   : > { %v5648_v16 = vsel %vm1946_vm12, %v5626_v15, 0.0 }
 0xe37   : > { %5649 = vadd.xlane.f32.xlu0 %v5648_v16 }
 0xeb0   : > { %v5629_v48 = vpop.xlane.xlu1 %5628 }
 0xeb1   : > { %v5651_v61 = vmul.f32 0.03125, %v5629_v48 }
 0xeb3   : > { %v5659_v24 = vadd.f32 1e-05, %v5651_v61 }
 0xeb4   : > { %v5635_v52 = vpop.xlane.xlu1 %5634  ;;  %v5632_v14 = vpop.xlane.xlu0 %5631 }
 0xeb5   : > { %10475 = vrsqrt.f32 %v5659_v24  ;;  %v5653_v41 = vmul.f32 0.03125, %v5635_v52  ;;  %v5652_v23 = vmul.f32 0.03125, %v5632_v14 }
 0xeb7   : > { %v5661_v34 = vadd.f32 1e-05, %v5653_v41  ;;  %v5660_v32 = vadd.f32 1e-05, %v5652_v23 }
 0xeb8   : > { %v5641_v22 = vpop.xlane.xlu1 %5640  ;;  %v5638_v38 = vpop.xlane.xlu0 %5637 }
 0xeb9   : > { %10477 = vrsqrt.f32 %v5661_v34  ;;  %v5655_v57 = vmul.f32 0.03125, %v5641_v22  ;;  %v5654_v0 = vmul.f32 0.03125, %v5638_v38 }
 0xeba   : > { %10479 = vrsqrt.f32 %v5660_v32  ;;  %v8889_v32 = vld [vmem:[#allocation17 + $0x1] ss:$0 sm:$0xff] }
 0xebb   : > { %v5663_v51 = vadd.f32 1e-05, %v5655_v57  ;;  %v5662_v13 = vadd.f32 1e-05, %v5654_v0 }
 0xebc   : > { %v5647_v5 = vpop.xlane.xlu1 %5646  ;;  %v5644_v37 = vpop.xlane.xlu0 %5643 }
 0xebd   : > { %10481 = vrsqrt.f32 %v5663_v51  ;;  %v5657_v20 = vmul.f32 0.03125, %v5647_v5  ;;  %v5656_v56 = vmul.f32 0.03125, %v5644_v37 }
 0xebe   : > { %10483 = vrsqrt.f32 %v5662_v13 }
 0xebf   : > { %v5665_v18 = vadd.f32 1e-05, %v5657_v20  ;;  %v5664_v40 = vadd.f32 1e-05, %v5656_v56 }
 0xec0   : > { %v5650_v1 = vpop.xlane.xlu0 %5649 }
 0xec1   : > { %10485 = vrsqrt.f32 %v5665_v18  ;;  %v5658_v26 = vmul.f32 0.03125, %v5650_v1 }
 0xec2   : > { %v10476_v17 = vpop.eup %10475  ;;  %10487 = vrsqrt.f32 %v5664_v40 }
 0xec3   : > { %v5666_v63 = vadd.f32 1e-05, %v5658_v26  ;;  %v5675_v62 = vmul.f32 %v10476_v17, %v12491_v9 }
 0xec5   : > { %10489 = vrsqrt.f32 %v5666_v63  ;;  %v5687_v7 = vmul.f32 %v5686_v11, %v5675_v62 }
 0xec6   : > { %v10478_v6 = vpop.eup %10477 }
 0xec7   : > { %v10480_v8 = vpop.eup %10479  ;;  %v5677_v4 = vmul.f32 %v10478_v6, %v12496_v55  ;;  %v12542_v29 = vadd.f32 %v5698_v2, %v5687_v7 }
 0xec8   : > { %v5676_v27 = vmul.f32 %v10480_v8, %v12498_v12 }
 0xec9   : > { %v5689_v25 = vmul.f32 %v5686_v11, %v5677_v4 }
 0xeca   : > { %v10482_v44 = vpop.eup %10481  ;;  %v5688_v9 = vmul.f32 %v5686_v11, %v5676_v27 }
 0xecb   : > { %v10484_v19 = vpop.eup %10483  ;;  %v5679_v49 = vmul.f32 %v10482_v44, %v12504_v3  ;;  %v12552_v54 = vadd.f32 %v5698_v2, %v5689_v25 }
 0xecc   : > { %v5678_v33 = vmul.f32 %v10484_v19, %v12506_v31  ;;  %v12545_v39 = vadd.f32 %v5698_v2, %v5688_v9 }
 0xecd   : > { %v5691_v15 = vmul.f32 %v5686_v11, %v5679_v49 }
 0xece   : > { %v10486_v47 = vpop.eup %10485  ;;  %v5709_v21 = vpack.c.bf16 %v12545_v39, %v12542_v29  ;;  %v5690_v45 = vmul.f32 %v5686_v11, %v5678_v33 }
 0xecf   : > { %v10488_v55 = vpop.eup %10487  ;;  %v5681_v12 = vmul.f32 %v10486_v47, %v12514_v42  ;;  %v12561_v42 = vadd.f32 %v5698_v2, %v5691_v15 }
 0xed0   : > { %9828 = vmatprep.mubr.msk.bf16.mxu1 %vm1946_vm12, %v5709_v21  ;;  %v12554_v60 = vadd.f32 %v5698_v2, %v5690_v45  ;;  %v5680_v31 = vmul.f32 %v10488_v55, %v12516_v35 }
 0xed1   : > { %v5693_v48 = vmul.f32 %v5686_v11, %v5681_v12 }
 0xed2   : > { %v10490_v16 = vpop.eup %10489  ;;  %v5710_v3 = vpack.c.bf16 %v12554_v60, %v12552_v54  ;;  %v5692_v30 = vmul.f32 %v5686_v11, %v5680_v31 }
 0xed3   : > { %v5682_v50 = vmul.f32 %v10490_v16, %v12524_v53  ;;  %v12567_v35 = vadd.f32 %v5698_v2, %v5693_v48 }
 0xed4   : > { %9829 = vmatmul.mubr.msk.bf16.vlgmr.msra.gmra.mxu1 %vm1946_vm12, %v5710_v3  ;;  %v12563_v61 = vadd.f32 %v5698_v2, %v5692_v30 }
 0xed5   : > { %v5694_v24 = vmul.f32 %v5686_v11, %v5682_v50 }
 0xed6   : > { %v5711_v52 = vpack.c.bf16 %v12563_v61, %v12561_v42 }
 0xed7   : > { %v12569_v14 = vadd.f32 %v5698_v2, %v5694_v24 }
 0xed8   : > { %9832 = vmatprep.mubr.msk.bf16.mxu1 %vm1946_vm12, %v5711_v52 }
 0xed9   : > { %v5712_v53 = vpack.c.bf16 %v12569_v14, %v12567_v35 }
 0xedc   : > { %9833 = vmatmul.mubr.msk.bf16.gmra.mxu1 %vm1946_vm12, %v5712_v53 }
 0xf94   : > { %v9830_v41 = vpop.f32.mrf.mxu1 }
 0xf95   : > { %v5793_v17 = vadd.f32 %v9830_v41, %v8889_v32 }
 0xf96   : > { %v5784_v23 = vpop.f32.mrf.mxu1 }
 0xf97   : > { %v5785_v38 = vadd.f32 %v8889_v32, %v5784_v23 }
 0xf98   : > { %v9831_v34 = vpop.f32.mrf.mxu1 }
 0xf99   : > { %v5796_v18 = vadd.f32 %v9831_v34, %v8889_v32 }
 0xf9a   : > { %v5787_v22 = vpop.f32.mrf.mxu1 }
 0xf9b   : > { %v5788_v57 = vadd.f32 %v8889_v32, %v5787_v22  ;;  %v12585_v62 = vpack.c.bf16 %v5796_v18, %v5793_v17 }
 0xf9c   : > { %v9834_v0 = vpop.f32.mrf.mxu1 }
 0xf9d   : > { %v12575_v51 = vpack.c.bf16 %v5788_v57, %v5785_v38  ;;  %v5809_v37 = vadd.f32 %v9834_v0, %v8889_v32 }
 0xf9e   : > { %v5800_v13 = vpop.f32.mrf.mxu1 }
 0xf9f   : > { %9844 = vmatprep.mubr.msk.bf16.mxu0 %vm4350_vm14, %v12575_v51  ;;  %v5801_v40 = vadd.f32 %v8889_v32, %v5800_v13 }
 0xfa0   : > { %v9835_v5 = vpop.f32.mrf.mxu1 }
 0xfa1   : > { %v5812_v20 = vadd.f32 %v9835_v5, %v8889_v32 }
 0xfa2   : > { %v5803_v56 = vpop.f32.mrf.mxu1 }
 0xfa3   : > { %v12579_v1 = vpack.c.bf16 %v5812_v20, %v5809_v37  ;;  %v5804_v26 = vadd.f32 %v8889_v32, %v5803_v56 }
 0xfa5   : > { %v12581_v63 = vpack.c.bf16 %v5804_v26, %v5801_v40  ;;  %5834 = vrot.lane.b32.xlu1 %v12579_v1, %s11030_s22 }
 0xfa7   : > { %5832 = vrot.lane.b32.xlu0 %v12581_v63, %s11030_s22 }
 0xfa9   : > { %5830 = vrot.lane.b32.xlu1 %v12585_v62, %s11030_s22 }
 0xfab   : > { %6053 = vrot.lane.b32.xlu0 %v12581_v63, %s11031_s24 }
 0xfad   : > { %5828 = vrot.lane.b32.xlu1 %v12575_v51, %s11030_s22 }
 0xfb1   : > { %6055 = vrot.lane.b32.xlu1 %v12579_v1, %s11031_s24 }
 0xfb5   : > { %6051 = vrot.lane.b32.xlu1 %v12585_v62, %s11031_s24 }
 0xfb9   : > { %6180 = vrot.lane.b32.xlu1 %v12579_v1, %s11032_s9 }
0x1017   : > { %v5835_v11 = vpop.permute.xlu1 %5834 }
0x1018   : > { %v5858_v6 = vsel %vm4350_vm14, %v5835_v11, 0  ;;  %10086 = vmatprep.subr.msk.bf16.mxu0 %vm4350_vm14, %v5835_v11 }
0x1019   : > { %9837 = vmatpush3.bf16.xpose.msra.mxu0 %v5858_v6  ;;  %v5833_v8 = vpop.permute.xlu0 %5832 }
0x101a   : > { %10087 = vmatprep.subr.msk.bf16.mxu0 %vm4350_vm14, %v5833_v8  ;;  %v5855_v4 = vsel %vm4350_vm14, %v5833_v8, 0 }
0x101b   : > { %v5831_v7 = vpop.permute.xlu1 %5830 }
0x101c   : > { %v5852_v9 = vsel %vm4350_vm14, %v5831_v7, 0 }
0x101d   : > { %v6054_v44 = vpop.permute.xlu0 %6053 }
0x101f   : > { %v5829_v2 = vpop.permute.xlu1 %5828 }
0x1020   : > { %v5849_v33 = vsel %vm4350_vm14, %v5829_v2, 0 }
0x1021   : > { %9839 = vmatpush3.bf16.xpose.msra.mxu0 %v5855_v4 }
0x1022   : > { %10088 = vmatprep.subr.msk.bf16.mxu0 %vm4350_vm14, %v5831_v7 }
0x1023   : > { %v6056_v27 = vpop.permute.xlu1 %6055 }
0x1024   : > { %9852 = vmatprep.subr.bf16.mxu1 %v6056_v27 }
0x1025   : > { %9853 = vmatpush3.bf16.msra.mxu1 %v6056_v27 }
0x1026   : > { %9854 = vmatprep.subr.bf16.mxu1 %v6054_v44 }
0x1027   : > { %v6052_v19 = vpop.permute.xlu1 %6051 }
0x1029   : > { %9841 = vmatpush3.bf16.xpose.msra.mxu0 %v5852_v9  ;;  %9855 = vmatpush3.bf16.msra.mxu1 %v6054_v44 }
0x102a   : > { %10089 = vmatprep.subr.msk.bf16.mxu0 %vm4350_vm14, %v5829_v2  ;;  %9856 = vmatprep.subr.bf16.mxu1 %v6052_v19 }
0x102b   : > { %v6181_v13 = vpop.permute.xlu1 %6180 }
0x102d   : > { %9857 = vmatpush3.bf16.msra.mxu1 %v6052_v19  ;;  %v6204_v19 = vsel %vm4350_vm14, %v6181_v13, 0 }
0x1031   : > { %9843 = vmatpush3.bf16.xpose.msra.mxu0 %v5849_v33 }
0x1038   : > { %9845 = vmatmul.mubr.msk.bf16.vlgmr.msra.gmra.mxu0 %vm4350_vm14, %v12585_v62 }
0x1039   : > { %9848 = vmatprep.mubr.msk.bf16.mxu0 %vm4350_vm14, %v12581_v63 }
0x1040   : > { %9849 = vmatmul.mubr.msk.bf16.gmra.mxu0 %vm4350_vm14, %v12579_v1 }
0x10f8   : > { %v9846_v25 = vpop.f32.mrf.mxu0 }
0x10f9   : > { %v5927_v49 = vmul.f32 0.25, %v9846_v25 }
0x10fa   : > { %v5894_v47 = vpop.f32.mrf.mxu0 }
0x10fb   : > { %v5925_v21 = vmul.f32 0.25, %v5894_v47  ;;  %v5939_v45 = vsel %vm2989_vm13, %v5927_v49, -inf }
0x10fc   : > { %5940 = vmax.xlane.f32.xlu0 %v5939_v45  ;;  %v9847_v55 = vpop.f32.mrf.mxu0 }
0x10fd   : > { %v5928_v31 = vmul.f32 0.25, %v9847_v55  ;;  %v5933_v16 = vsel %vm2989_vm13, %v5925_v21, -inf }
0x10fe   : > { %v5897_v12 = vpop.f32.mrf.mxu0 }
0x10ff   : > { %v5926_v15 = vmul.f32 0.25, %v5897_v12  ;;  %v5942_v30 = vsel %vm2989_vm13, %v5928_v31, -inf }
0x1100   : > { %5934 = vmax.xlane.f32.xlu0 %v5933_v16  ;;  %v9850_v50 = vpop.f32.mrf.mxu0 }
0x1101   : > { %v5936_v3 = vsel %vm2989_vm13, %v5926_v15, -inf  ;;  %v12623_v52 = vmul.f32 0.25, %v9850_v50 }
0x1102   : > { %5937 = vmax.xlane.f32.xlu1 %v5936_v3  ;;  %v5910_v48 = vpop.f32.mrf.mxu0 }
0x1103   : > { %v5929_v23 = vmul.f32 0.25, %v5910_v48  ;;  %v5951_v34 = vsel %vm2989_vm13, %v12623_v52, -inf }
0x1104   : > { %5943 = vmax.xlane.f32.xlu0 %v5942_v30  ;;  %v9851_v24 = vpop.f32.mrf.mxu0 }
0x1105   : > { %v5932_v53 = vmul.f32 0.25, %v9851_v24  ;;  %v5945_v38 = vsel %vm2989_vm13, %v5929_v23, -inf }
0x1106   : > { %v5913_v41 = vpop.f32.mrf.mxu0 }
0x1107   : > { %v5930_v32 = vmul.f32 0.25, %v5913_v41  ;;  %v5954_v22 = vsel %vm2989_vm13, %v5932_v53, -inf }
0x1109   : > { %v5948_v57 = vsel %vm2989_vm13, %v5930_v32, -inf }
0x1113   : > { %6178 = vrot.lane.b32.xlu1 %v12581_v63, %s11032_s9 }
0x111a   : > { %6049 = vrot.lane.b32.xlu0 %v12575_v51, %s11031_s24 }
0x1137   : > { %5952 = vmax.xlane.f32.xlu1 %v5951_v34 }
0x1139   : > { %5955 = vmax.xlane.f32.xlu0 %v5954_v22 }
0x113b   : > { %5946 = vmax.xlane.f32.xlu1 %v5945_v38 }
0x113d   : > { %5949 = vmax.xlane.f32.xlu0 %v5948_v57 }
0x114c   : > { %6174 = vrot.lane.b32.xlu1 %v12575_v51, %s11032_s9 }
0x1150   : > { %6168 = vrot.lane.b32.xlu1 %v12585_v62, %s11033_s0 }
0x1153   : > { %6176 = vrot.lane.b32.xlu0 %v12585_v62, %s11032_s9 }
0x1154   : > { %6172 = vrot.lane.b32.xlu1 %v12579_v1, %s11033_s0 }
0x1157   : > { %6166 = vrot.lane.b32.xlu0 %v12575_v51, %s11033_s0 }
0x1158   : > { %6401 = vrot.lane.b32.xlu1 %v12579_v1, %s11034_s13 }
0x115b   : > { %6170 = vrot.lane.b32.xlu0 %v12581_v63, %s11033_s0 }
0x1185   : > { %v12644_v0 = vpop.xlane.xlu0 %5940 }
0x1186   : > { %v5983_v37 = vsub.f32 %v5927_v49, %v12644_v0 }
0x1188   : > { %v5993_v1 = vmul.f32 1.442695, %v5983_v37 }
0x1189   : > { %v12646_v5 = vpop.xlane.xlu0 %5934 }
0x118a   : > { %v5981_v20 = vsub.f32 %v5925_v21, %v12646_v5 }
0x118b   : > { %v12650_v56 = vpop.xlane.xlu1 %5937 }
0x118c   : > { %v5989_v18 = vmul.f32 1.442695, %v5981_v20  ;;  %v5982_v40 = vsub.f32 %v5926_v15, %v12650_v56 }
0x118d   : > { %v12653_v26 = vpop.xlane.xlu0 %5943 }
0x118e   : > { %v5991_v17 = vmul.f32 1.442695, %v5982_v40  ;;  %v5984_v11 = vsub.f32 %v5928_v31, %v12653_v26  ;;  %10491 = vpow2.f32 %v5989_v18  ;;  %v5959_v40 = vsub.f32 -inf, %v12644_v0 }
0x118f   : > { %v6179_v33 = vpop.permute.xlu1 %6178 }
0x1190   : > { %10493 = vpow2.f32 %v5991_v17  ;;  %v5995_v6 = vmul.f32 1.442695, %v5984_v11  ;;  %v6201_v25 = vsel %vm4350_vm14, %v6179_v33, 0  ;;  %v5969_v17 = vmul.f32 1.442695, %v5959_v40 }
0x1191   : > { %v6050_v8 = vpop.permute.xlu0 %6049  ;;  %10495 = vpow2.f32 %v5993_v1  ;;  %v5957_v1 = vsub.f32 -inf, %v12646_v5  ;;  %v5960_v11 = vsub.f32 -inf, %v12653_v26 }
0x1192   : > { %9858 = vmatprep.subr.bf16.mxu1 %v6050_v8  ;;  %10497 = vpow2.f32 %v5995_v6 }
0x1193   : > { %9859 = vmatpush3.bf16.msra.mxu1 %v6050_v8  ;;  %v5965_v6 = vmul.f32 1.442695, %v5957_v1  ;;  %v5958_v8 = vsub.f32 -inf, %v12650_v56 }
0x1194   : > { %10090 = vmatprep.subr.msk.bf16.mxu1 %vm4350_vm14, %v6181_v13 }
0x119b   : > { %v12657_v7 = vpop.eup %10491 }
0x119d   : > { %v12659_v2 = vpop.eup %10493 }
0x119e   : > { %v12661_v4 = vpop.eup %10495  ;;  %v6045_v27 = vpack.c.bf16 %v12659_v2, %v12657_v7 }
0x119f   : > { %v12665_v44 = vpop.eup %10497 }
0x11a0   : > { %9860 = vmatprep.mubr.msk.bf16.mxu1 %vm2989_vm13, %v6045_v27  ;;  %v6046_v9 = vpack.c.bf16 %v12665_v44, %v12661_v4  ;;  %v5971_v27 = vmul.f32 1.442695, %v5960_v11 }
0x11a2   : > { %9861 = vmatmul.mubr.msk.bf16.vlgmr.msra.gmra.mxu1 %vm2989_vm13, %v6046_v9  ;;  %v5967_v9 = vmul.f32 1.442695, %v5958_v8 }
0x11a3   : > { %9869 = vmatpush3.bf16.xpose.msra.mxu1 %v6204_v19 }
0x11a4   : > { %10091 = vmatprep.subr.msk.bf16.mxu1 %vm4350_vm14, %v6179_v33 }
0x11ab   : > { %9871 = vmatpush3.bf16.xpose.msra.mxu1 %v6201_v25 }
0x11c0   : > { %v12674_v49 = vpop.xlane.xlu1 %5952 }
0x11c1   : > { %v5987_v55 = vsub.f32 %v12623_v52, %v12674_v49 }
0x11c2   : > { %v12676_v47 = vpop.xlane.xlu0 %5955 }
0x11c3   : > { %v5988_v21 = vsub.f32 %v5932_v53, %v12676_v47  ;;  %v6001_v50 = vmul.f32 1.442695, %v5987_v55 }
0x11c4   : > { %v12679_v45 = vpop.xlane.xlu1 %5946 }
0x11c5   : > { %v6003_v12 = vmul.f32 1.442695, %v5988_v21  ;;  %v5985_v31 = vsub.f32 %v5929_v23, %v12679_v45 }
0x11c6   : > { %v12684_v15 = vpop.xlane.xlu0 %5949 }
0x11c7   : > { %v5986_v16 = vsub.f32 %v5930_v32, %v12684_v15  ;;  %v5997_v3 = vmul.f32 1.442695, %v5985_v31  ;;  %10499 = vpow2.f32 %v6003_v12 }
0x11c8   : > { %v6175_v30 = vpop.permute.xlu1 %6174 }
0x11c9   : > { %v5999_v48 = vmul.f32 1.442695, %v5986_v16  ;;  %10501 = vpow2.f32 %v5997_v3  ;;  %v6195_v23 = vsel %vm4350_vm14, %v6175_v30, 0 }
0x11ca   : > { %v6177_v24 = vpop.permute.xlu0 %6176 }
0x11cb   : > { %v6198_v53 = vsel %vm4350_vm14, %v6177_v24, 0  ;;  %10092 = vmatprep.subr.msk.bf16.mxu1 %vm4350_vm14, %v6177_v24  ;;  %10503 = vpow2.f32 %v5999_v48  ;;  %v5963_v24 = vsub.f32 -inf, %v12674_v49 }
0x11cc   : > { %v6169_v52 = vpop.permute.xlu1 %6168  ;;  %9873 = vmatpush3.bf16.xpose.msra.mxu1 %v6198_v53  ;;  %10505 = vpow2.f32 %v6001_v50  ;;  %v5961_v53 = vsub.f32 -inf, %v12679_v45 }
0x11cd   : > { %10093 = vmatprep.subr.msk.bf16.mxu1 %vm4350_vm14, %v6175_v30  ;;  %10507 = vpow2.f32 %v5969_v17 }
0x11ce   : > { %v6167_v20 = vpop.permute.xlu0 %6166  ;;  %10509 = vpow2.f32 %v5965_v6 }
0x11cf   : > { %10511 = vpow2.f32 %v5971_v27 }
0x11d0   : > { %v6173_v41 = vpop.permute.xlu1 %6172  ;;  %10513 = vpow2.f32 %v5967_v9 }
0x11d2   : > { %v6171_v18 = vpop.permute.xlu0 %6170 }
0x11d4   : > { %v6402_v34 = vpop.permute.xlu1 %6401  ;;  %9875 = vmatpush3.bf16.xpose.msra.mxu1 %v6195_v23  ;;  %v12691_v32 = vpop.eup %10499  ;;  %v5973_v23 = vmul.f32 1.442695, %v5961_v53 }
0x11d5   : > { %9884 = vmatprep.subr.bf16.mxu0 %v6402_v34 }
0x11d6   : > { %9885 = vmatpush3.bf16.msra.mxu0 %v6402_v34  ;;  %v12693_v22 = vpop.eup %10501  ;;  %v5962_v34 = vsub.f32 -inf, %v12684_v15 }
0x11d8   : > { %v12695_v38 = vpop.eup %10503 }
0x11d9   : > { %v12697_v57 = vpop.eup %10505  ;;  %v6047_v13 = vpack.c.bf16 %v12695_v38, %v12693_v22 }
0x11da   : > { %v6048_v37 = vpack.c.bf16 %v12691_v32, %v12697_v57  ;;  %v10508_v19 = vpop.eup %10507 }
0x11db   : > { %9864 = vmatprep.mubr.msk.bf16.mxu1 %vm2989_vm13, %v6047_v13  ;;  %v10510_v33 = vpop.eup %10509  ;;  %v12713_v25 = vmul.f32 0.0, %v10508_v19 }
0x11dc   : > { %9865 = vmatmul.mubr.msk.bf16.gmra.mxu1 %vm2989_vm13, %v6048_v37  ;;  %v10512_v21 = vpop.eup %10511  ;;  %v12718_v55 = vmul.f32 0.0, %v10510_v33  ;;  %v5975_v37 = vmul.f32 1.442695, %v5962_v34 }
0x11dd   : > { %9876 = vmatprep.mubr.msk.bf16.mxu1 %vm4350_vm14, %v6167_v20  ;;  %v10514_v26 = vpop.eup %10513  ;;  %v12723_v31 = vmul.f32 0.0, %v10512_v21 }
0x11de   : > { %v12728_v30 = vmul.f32 0.0, %v10514_v26 }
0x11e4   : > { %9877 = vmatmul.mubr.msk.bf16.vlgmr.msra.gmra.mxu1 %vm4350_vm14, %v6169_v52  ;;  %v5977_v52 = vmul.f32 1.442695, %v5963_v24 }
0x11e5   : > { %9880 = vmatprep.mubr.msk.bf16.mxu1 %vm4350_vm14, %v6171_v18 }
0x11e6   : > { %10515 = vpow2.f32 %v5977_v52 }
0x11e7   : > { %10517 = vpow2.f32 %v5973_v23 }
0x11ec   : > { %9881 = vmatmul.mubr.msk.bf16.gmra.mxu1 %vm4350_vm14, %v6173_v41  ;;  %v5964_v41 = vsub.f32 -inf, %v12676_v47 }
0x11ee   : > { %v5979_v13 = vmul.f32 1.442695, %v5964_v41 }
0x11f0   : > { %10519 = vpow2.f32 %v5979_v13 }
0x11f1   : > { %10521 = vpow2.f32 %v5975_v37 }
0x11f3   : > { %v10516_v20 = vpop.eup %10515 }
0x11f4   : > { %v10518_v18 = vpop.eup %10517  ;;  %v12737_v40 = vmul.f32 0.0, %v10516_v20 }
0x11f5   : > { %v12742_v17 = vmul.f32 0.0, %v10518_v18 }
0x11fd   : > { %v10520_v1 = vpop.eup %10519 }
0x11fe   : > { %v10522_v47 = vpop.eup %10521  ;;  %v12747_v6 = vmul.f32 0.0, %v10520_v1 }
0x11ff   : > { %v12752_v9 = vmul.f32 0.0, %v10522_v47 }
0x1262   : > { %v9862_v0 = vpop.f32.mrf.mxu1 }
0x1263   : > { %v12716_v5 = vadd.f32 %v9862_v0, %v12713_v25 }
0x1264   : > { %v6107_v12 = vpop.f32.mrf.mxu1 }
0x1265   : > { %v12721_v56 = vadd.f32 %v6107_v12, %v12718_v55 }
0x1266   : > { %v9863_v16 = vpop.f32.mrf.mxu1 }
0x1267   : > { %v12726_v3 = vadd.f32 %v9863_v16, %v12723_v31 }
0x1268   : > { %v6110_v50 = vpop.f32.mrf.mxu1 }
0x1269   : > { %v12731_v48 = vadd.f32 %v6110_v50, %v12728_v30 }
0x129c   : > { %v9866_v49 = vpop.f32.mrf.mxu1 }
0x129d   : > { %v12740_v45 = vadd.f32 %v9866_v49, %v12737_v40 }
0x129e   : > { %v6123_v11 = vpop.f32.mrf.mxu1 }
0x129f   : > { %v12745_v15 = vadd.f32 %v6123_v11, %v12742_v17 }
0x12a0   : > { %v9867_v8 = vpop.f32.mrf.mxu1 }
0x12a1   : > { %v12750_v27 = vadd.f32 %v9867_v8, %v12747_v6 }
0x12a2   : > { %v6126_v19 = vpop.f32.mrf.mxu1 }
0x12a3   : > { %v12755_v33 = vadd.f32 %v6126_v19, %v12752_v9 }
0x12a4   : > { %v9878_v21 = vpop.f32.mrf.mxu1 }
0x12a5   : > { %v6273_v0 = vmul.f32 0.25, %v9878_v21 }
0x12a6   : > { %v6240_v26 = vpop.f32.mrf.mxu1 }
0x12a7   : > { %v6271_v12 = vmul.f32 0.25, %v6240_v26  ;;  %v6285_v16 = vsel %vm2989_vm13, %v6273_v0, -inf }
0x12a8   : > { %6286 = vmax.xlane.f32.xlu0 %v6285_v16  ;;  %v9879_v50 = vpop.f32.mrf.mxu1  ;;  %v6013_v16 = vsel %vm2989_vm13, %v12657_v7, 0.0  ;;  %v6031_v7 = vsel %vm2989_vm13, %v12697_v57, 0.0 }
0x12a9   : > { %v6274_v53 = vmul.f32 0.25, %v9879_v50  ;;  %v6279_v41 = vsel %vm2989_vm13, %v6271_v12, -inf  ;;  %v6016_v50 = vsel %vm2989_vm13, %v12659_v2, 0.0  ;;  %v10337_v2 = vld [vmem:[#allocation18 + $0x10] sm:$0xff]  }
0x12aa   : > { %v6243_v24 = vpop.f32.mrf.mxu1  ;;  %9910 = vmatprep.subr.bf16.mxu1 %v10337_v2 }
0x12ab   : > { %v6272_v52 = vmul.f32 0.25, %v6243_v24  ;;  %v6288_v20 = vsel %vm2989_vm13, %v6274_v53, -inf  ;;  %v6022_v24 = vsel %vm2989_vm13, %v12665_v44, 0.0  ;;  %9911 = vmatpush3.bf16.msra.mxu1 %v10337_v2 }
0x12ac   : > { %6280 = vmax.xlane.f32.xlu0 %v6279_v41  ;;  %v9882_v23 = vpop.f32.mrf.mxu1 }
0x12ad   : > { %v6277_v34 = vmul.f32 0.25, %v9882_v23  ;;  %v6282_v13 = vsel %vm2989_vm13, %v6272_v52, -inf }
0x12ae   : > { %6283 = vmax.xlane.f32.xlu1 %v6282_v13  ;;  %v6256_v37 = vpop.f32.mrf.mxu1 }
0x12af   : > { %v6275_v1 = vmul.f32 0.25, %v6256_v37  ;;  %v6297_v47 = vsel %vm2989_vm13, %v6277_v34, -inf }
0x12b0   : > { %6289 = vmax.xlane.f32.xlu0 %v6288_v20  ;;  %v9883_v18 = vpop.f32.mrf.mxu1 }
0x12b1   : > { %v6278_v49 = vmul.f32 0.25, %v9883_v18  ;;  %v6291_v21 = vsel %vm2989_vm13, %v6275_v1, -inf }
0x12b2   : > { %6298 = vmax.xlane.f32.xlu1 %v6297_v47  ;;  %v6259_v11 = vpop.f32.mrf.mxu1 }
0x12b3   : > { %v6276_v8 = vmul.f32 0.25, %v6259_v11  ;;  %v6300_v19 = vsel %vm2989_vm13, %v6278_v49, -inf }
0x12b4   : > { %6301 = vmax.xlane.f32.xlu0 %v6300_v19 }
0x12b5   : > { %v6294_v26 = vsel %vm2989_vm13, %v6276_v8, -inf }
0x12b6   : > { %6292 = vmax.xlane.f32.xlu1 %v6291_v21 }
0x12b8   : > { %6295 = vmax.xlane.f32.xlu0 %v6294_v26 }
0x12c7   : > { %6397 = vrot.lane.b32.xlu1 %v12585_v62, %s11034_s13  ;;  %v6019_v62 = vsel %vm2989_vm13, %v12661_v4, 0.0 }
0x12cb   : > { %6395 = vrot.lane.b32.xlu1 %v12575_v51, %s11034_s13  ;;  %v6028_v51 = vsel %vm2989_vm13, %v12695_v38, 0.0 }
0x12ce   : > { %6399 = vrot.lane.b32.xlu0 %v12581_v63, %s11034_s13  ;;  %v6025_v63 = vsel %vm2989_vm13, %v12693_v22, 0.0 }
0x12ed   : > { %6014 = vadd.xlane.f32.xlu0 %v6013_v16 }
0x12ef   : > { %6017 = vadd.xlane.f32.xlu1 %v6016_v50 }
0x12f1   : > { %6023 = vadd.xlane.f32.xlu0 %v6022_v24 }
0x12f3   : > { %6020 = vadd.xlane.f32.xlu1 %v6019_v62 }
0x12f5   : > { %6029 = vadd.xlane.f32.xlu0 %v6028_v51 }
0x12f7   : > { %6026 = vadd.xlane.f32.xlu1 %v6025_v63 }
0x12fb   : > { %6032 = vadd.xlane.f32.xlu1 %v6031_v7 }
0x1331   : > { %v12785_v44 = vpop.xlane.xlu0 %6286 }
0x1332   : > { %v6329_v4 = vsub.f32 %v6273_v0, %v12785_v44 }
0x1334   : > { %v6339_v41 = vmul.f32 1.442695, %v6329_v4 }
0x1335   : > { %v12788_v23 = vpop.xlane.xlu0 %6280 }
0x1336   : > { %v6327_v38 = vsub.f32 %v6271_v12, %v12788_v23  ;;  %10523 = vpow2.f32 %v6339_v41 }
0x1337   : > { %v12791_v13 = vpop.xlane.xlu1 %6283 }
0x1338   : > { %v6335_v22 = vmul.f32 1.442695, %v6327_v38  ;;  %v6328_v37 = vsub.f32 %v6272_v52, %v12791_v13 }
0x1339   : > { %v12794_v57 = vpop.xlane.xlu0 %6289 }
0x133a   : > { %v6337_v20 = vmul.f32 1.442695, %v6328_v37  ;;  %10525 = vpow2.f32 %v6335_v22  ;;  %v6330_v18 = vsub.f32 %v6274_v53, %v12794_v57 }
0x133b   : > { %v12797_v47 = vpop.xlane.xlu1 %6298 }
0x133c   : > { %10527 = vpow2.f32 %v6337_v20  ;;  %v6341_v0 = vmul.f32 1.442695, %v6330_v18  ;;  %v6333_v12 = vsub.f32 %v6277_v34, %v12797_v47 }
0x133d   : > { %v12799_v11 = vpop.xlane.xlu0 %6301 }
0x133e   : > { %10529 = vpow2.f32 %v6341_v0  ;;  %v6334_v21 = vsub.f32 %v6278_v49, %v12799_v11  ;;  %v6347_v16 = vmul.f32 1.442695, %v6333_v12 }
0x133f   : > { %v12802_v19 = vpop.xlane.xlu1 %6292 }
0x1340   : > { %v6331_v52 = vsub.f32 %v6275_v1, %v12802_v19  ;;  %v6349_v62 = vmul.f32 1.442695, %v6334_v21 }
0x1341   : > { %v12806_v26 = vpop.xlane.xlu0 %6295 }
0x1342   : > { %v6343_v50 = vmul.f32 1.442695, %v6331_v52  ;;  %v6332_v53 = vsub.f32 %v6276_v8, %v12806_v26  ;;  %v6034_v52 = vsel %vm2989_vm13, %v12691_v32, 0.0 }
0x1343   : > { %v10524_v24 = vpop.eup %10523  ;;  %v6398_v63 = vpop.permute.xlu1 %6397 }
0x1344   : > { %10531 = vpow2.f32 %v6343_v50  ;;  %v6345_v51 = vmul.f32 1.442695, %v6332_v53  ;;  %v6365_v34 = vsel %vm2989_vm13, %v10524_v24, 0.0 }
0x1345   : > { %v6400_v7 = vpop.permute.xlu0 %6399  ;;  %10533 = vpow2.f32 %v6347_v16  ;;  %6366 = vadd.xlane.f32.xlu1 %v6365_v34 }
0x1346   : > { %9886 = vmatprep.subr.bf16.mxu0 %v6400_v7  ;;  %10535 = vpow2.f32 %v6345_v51  ;;  %v10338_v51 = vld [vmem:[#allocation18 + $0x18] sm:$0xff]  }
0x1347   : > { %9887 = vmatpush3.bf16.msra.mxu0 %v6400_v7  ;;  %v10526_v1 = vpop.eup %10525  ;;  %10537 = vpow2.f32 %v6349_v62  ;;  %v6396_v8 = vpop.permute.xlu1 %6395 }
0x1348   : > { %9888 = vmatprep.subr.bf16.mxu0 %v6398_v63  ;;  %v6359_v49 = vsel %vm2989_vm13, %v10526_v1, 0.0 }
0x1349   : > { %v10528_v2 = vpop.eup %10527  ;;  %6360 = vadd.xlane.f32.xlu0 %v6359_v49 }
0x134a   : > { %v6391_v4 = vpack.c.bf16 %v10528_v2, %v10526_v1  ;;  %v6362_v37 = vsel %vm2989_vm13, %v10528_v2, 0.0 }
0x134b   : > { %9889 = vmatpush3.bf16.msra.mxu0 %v6398_v63  ;;  %v10530_v41 = vpop.eup %10529 }
0x134c   : > { %9890 = vmatprep.subr.bf16.mxu0 %v6396_v8  ;;  %9892 = vmatprep.mubr.msk.bf16.mxu0 %vm2989_vm13, %v6391_v4  ;;  %v6368_v38 = vsel %vm2989_vm13, %v10530_v41, 0.0  ;;  %v6392_v22 = vpack.c.bf16 %v10530_v41, %v10524_v24 }
0x134d   : > { %6369 = vadd.xlane.f32.xlu0 %v6368_v38 }
0x134f   : > { %9891 = vmatpush3.bf16.msra.mxu0 %v6396_v8 }
0x1350   : > { %9900 = vmatprep.subr.bf16.mxu0 %v10338_v51 }
0x1351   : > { %v10532_v20 = vpop.eup %10531  ;;  %6363 = vadd.xlane.f32.xlu0 %v6362_v37 }
0x1352   : > { %9893 = vmatmul.mubr.msk.bf16.vlgmr.msra.gmra.mxu0 %vm2989_vm13, %v6392_v22  ;;  %v10534_v18 = vpop.eup %10533  ;;  %v6371_v0 = vsel %vm2989_vm13, %v10532_v20, 0.0 }
0x1353   : > { %v10536_v12 = vpop.eup %10535  ;;  %6372 = vadd.xlane.f32.xlu1 %v6371_v0  ;;  %v6377_v50 = vsel %vm2989_vm13, %v10534_v18, 0.0  ;;  %9901 = vmatpush3.bf16.msra.mxu0 %v10338_v51 }
0x1354   : > { %v10538_v21 = vpop.eup %10537  ;;  %v6393_v16 = vpack.c.bf16 %v10536_v12, %v10532_v20  ;;  %v6374_v24 = vsel %vm2989_vm13, %v10536_v12, 0.0 }
0x1355   : > { %6035 = vadd.xlane.f32.xlu0 %v6034_v52  ;;  %v6394_v53 = vpack.c.bf16 %v10538_v21, %v10534_v18  ;;  %v6380_v62 = vsel %vm2989_vm13, %v10538_v21, 0.0 }
0x1356   : > { %9896 = vmatprep.mubr.msk.bf16.mxu0 %vm2989_vm13, %v6393_v16 }
0x1357   : > { %6378 = vadd.xlane.f32.xlu1 %v6377_v50 }
0x1359   : > { %6375 = vadd.xlane.f32.xlu0 %v6374_v24 }
0x135a   : > { %9897 = vmatmul.mubr.msk.bf16.gmra.mxu0 %vm2989_vm13, %v6394_v53 }
0x135d   : > { %6381 = vadd.xlane.f32.xlu0 %v6380_v62 }
0x1376   : > { %v6015_v63 = vpop.xlane.xlu0 %6014 }
0x1377   : > { %v6037_v32 = vadd.f32 %v6015_v63, %v12718_v55  ;;  %v6306_v63 = vsub.f32 -inf, %v12794_v57 }
0x1378   : > { %v6018_v34 = vpop.xlane.xlu1 %6017 }
0x1379   : > { %10539 = vrcp.f32 %v6037_v32  ;;  %v6038_v7 = vadd.f32 %v6018_v34, %v12728_v30  ;;  %v6303_v32 = vsub.f32 -inf, %v12788_v23  ;;  %v6304_v34 = vsub.f32 -inf, %v12791_v13 }
0x137a   : > { %v6024_v1 = vpop.xlane.xlu0 %6023  ;;  %v6307_v23 = vsub.f32 -inf, %v12802_v19  ;;  %v6308_v13 = vsub.f32 -inf, %v12806_v26 }
0x137b   : > { %10541 = vrcp.f32 %v6038_v7  ;;  %v6040_v49 = vadd.f32 %v6024_v1, %v12723_v31 }
0x137c   : > { %v6021_v2 = vpop.xlane.xlu1 %6020 }
0x137d   : > { %10543 = vrcp.f32 %v6040_v49  ;;  %v6039_v8 = vadd.f32 %v6021_v2, %v12713_v25  ;;  %v6311_v49 = vmul.f32 1.442695, %v6303_v32 }
0x137e   : > { %v6030_v4 = vpop.xlane.xlu0 %6029 }
0x137f   : > { %10545 = vrcp.f32 %v6039_v8  ;;  %v6042_v41 = vadd.f32 %v6030_v4, %v12752_v9  ;;  %v6313_v8 = vmul.f32 1.442695, %v6304_v34  ;;  %v6319_v4 = vmul.f32 1.442695, %v6307_v23 }
0x1380   : > { %v6027_v38 = vpop.xlane.xlu1 %6026 }
0x1381   : > { %10547 = vrcp.f32 %v6042_v41  ;;  %v6041_v55 = vadd.f32 %v6027_v38, %v12742_v17  ;;  %v6321_v41 = vmul.f32 1.442695, %v6308_v13 }
0x1383   : > { %10549 = vrcp.f32 %v6041_v55 }
0x1384   : > { %v6033_v22 = vpop.xlane.xlu1 %6032 }
0x1385   : > { %v6043_v30 = vadd.f32 %v6033_v22, %v12737_v40 }
0x1386   : > { %v10540_v37 = vpop.eup %10539 }
0x1387   : > { %10551 = vrcp.f32 %v6043_v30  ;;  %v6154_v31 = vmul.f32 %v10540_v37, %v12721_v56 }
0x1388   : > { %v10542_v20 = vpop.eup %10541 }
0x1389   : > { %v6155_v18 = vmul.f32 %v10542_v20, %v12731_v48 }
0x138a   : > { %v10544_v25 = vpop.eup %10543 }
0x138b   : > { %v6157_v0 = vmul.f32 %v10544_v25, %v12726_v3  ;;  %v6162_v12 = vpack.c.bf16 %v6155_v18, %v6154_v31 }
0x138c   : > { %v10546_v9 = vpop.eup %10545 }
0x138d   : > { %v6156_v21 = vmul.f32 %v10546_v9, %v12716_v5  ;;  %9912 = vmatprep.mubr.msk.bf16.mxu1 %vm4350_vm14, %v6162_v12 }
0x138e   : > { %v10548_v17 = vpop.eup %10547 }
0x138f   : > { %v6163_v52 = vpack.c.bf16 %v6157_v0, %v6156_v21  ;;  %v6159_v40 = vmul.f32 %v10548_v17, %v12755_v33  ;;  %v6305_v33 = vsub.f32 -inf, %v12785_v44  ;;  %v6310_v44 = vsub.f32 -inf, %v12799_v11 }
0x1390   : > { %v10550_v16 = vpop.eup %10549 }
0x1391   : > { %9913 = vmatmul.mubr.msk.bf16.vlgmr.msra.gmra.mxu1 %vm4350_vm14, %v6163_v52  ;;  %v6158_v56 = vmul.f32 %v10550_v16, %v12745_v15  ;;  %v6315_v7 = vmul.f32 1.442695, %v6305_v33 }
0x1393   : > { %v6164_v50 = vpack.c.bf16 %v6159_v40, %v6158_v56 }
0x1394   : > { %v10552_v48 = vpop.eup %10551 }
0x1395   : > { %9916 = vmatprep.mubr.msk.bf16.mxu1 %vm4350_vm14, %v6164_v50  ;;  %v6160_v3 = vmul.f32 %v10552_v48, %v12740_v45  ;;  %v6317_v45 = vmul.f32 1.442695, %v6306_v63 }
0x13ce   : > { %v6367_v38 = vpop.xlane.xlu1 %6366 }
0x13d2   : > { %v6361_v53 = vpop.xlane.xlu0 %6360 }
0x13d6   : > { %v6370_v24 = vpop.xlane.xlu0 %6369 }
0x13da   : > { %v6364_v5 = vpop.xlane.xlu0 %6363 }
0x13dc   : > { %v6373_v31 = vpop.xlane.xlu1 %6372 }
0x13de   : > { %v6036_v62 = vpop.xlane.xlu0 %6035 }
0x13df   : > { %v6044_v51 = vadd.f32 %v6036_v62, %v12747_v6  ;;  %v6309_v6 = vsub.f32 -inf, %v12797_v47 }
0x13e0   : > { %v6379_v52 = vpop.xlane.xlu1 %6378 }
0x13e1   : > { %10553 = vrcp.f32 %v6044_v51  ;;  %v6323_v57 = vmul.f32 1.442695, %v6309_v6 }
0x13e2   : > { %10555 = vpow2.f32 %v6315_v7  ;;  %v6376_v18 = vpop.xlane.xlu0 %6375 }
0x13e3   : > { %10557 = vpow2.f32 %v6317_v45 }
0x13e4   : > { %10559 = vpow2.f32 %v6311_v49 }
0x13e5   : > { %10561 = vpow2.f32 %v6313_v8 }
0x13e6   : > { %10563 = vpow2.f32 %v6323_v57  ;;  %v6382_v56 = vpop.xlane.xlu0 %6381 }
0x13ee   : > { %v10554_v15 = vpop.eup %10553 }
0x13ef   : > { %v6161_v1 = vmul.f32 %v10554_v15, %v12750_v27  ;;  %v6325_v27 = vmul.f32 1.442695, %v6310_v44  ;;  %v10556_v47 = vpop.eup %10555 }
0x13f0   : > { %v10558_v55 = vpop.eup %10557  ;;  %v6353_v11 = vmul.f32 0.0, %v10556_v47 }
0x13f1   : > { %v6165_v2 = vpack.c.bf16 %v6161_v1, %v6160_v3  ;;  %10565 = vpow2.f32 %v6325_v27  ;;  %v10560_v22 = vpop.eup %10559  ;;  %v6354_v37 = vmul.f32 0.0, %v10558_v55 }
0x13f2   : > { %10567 = vpow2.f32 %v6319_v4  ;;  %v10562_v30 = vpop.eup %10561  ;;  %v6385_v19 = vadd.f32 %v6367_v38, %v6353_v11  ;;  %v6351_v20 = vmul.f32 0.0, %v10560_v22 }
0x13f3   : > { %9917 = vmatmul.mubr.msk.bf16.gmra.mxu1 %vm4350_vm14, %v6165_v2  ;;  %10569 = vpow2.f32 %v6321_v41  ;;  %v6386_v26 = vadd.f32 %v6370_v24, %v6354_v37  ;;  %v6352_v25 = vmul.f32 0.0, %v10562_v30  ;;  %v10564_v12 = vpop.eup %10563 }
0x13f4   : > { %v6383_v0 = vadd.f32 %v6361_v53, %v6351_v20  ;;  %10571 = vrcp.f32 %v6385_v19  ;;  %v6357_v16 = vmul.f32 0.0, %v10564_v12 }
0x13f5   : > { %v6384_v9 = vadd.f32 %v6364_v5, %v6352_v25  ;;  %10573 = vrcp.f32 %v6386_v26 }
0x13f6   : > { %10575 = vrcp.f32 %v6383_v0  ;;  %v6389_v3 = vadd.f32 %v6379_v52, %v6357_v16 }
0x13f7   : > { %10577 = vrcp.f32 %v6384_v9 }
0x13f8   : > { %10579 = vrcp.f32 %v6389_v3 }
0x13fe   : > { %v10566_v21 = vpop.eup %10565 }
0x13ff   : > { %v10568_v17 = vpop.eup %10567  ;;  %v6358_v50 = vmul.f32 0.0, %v10566_v21 }
0x1400   : > { %v10570_v40 = vpop.eup %10569  ;;  %v6355_v48 = vmul.f32 0.0, %v10568_v17 }
0x1401   : > { %v6356_v62 = vmul.f32 0.0, %v10570_v40  ;;  %v6390_v51 = vadd.f32 %v6382_v56, %v6358_v50  ;;  %v10572_v15 = vpop.eup %10571  ;;  %v12858_v40 = vld [vmem:[%s13322_s15 + $0x8] sm:$0x3f] }
0x1402   : > { %v6387_v24 = vadd.f32 %v6373_v31, %v6355_v48  ;;  %v10574_v1 = vpop.eup %10573 }
0x1403   : > { %v6388_v33 = vadd.f32 %v6376_v18, %v6356_v62  ;;  %10581 = vrcp.f32 %v6390_v51  ;;  %v10576_v49 = vpop.eup %10575 }
0x1404   : > { %10583 = vrcp.f32 %v6387_v24  ;;  %v10578_v44 = vpop.eup %10577 }
0x1405   : > { %10585 = vrcp.f32 %v6388_v33  ;;  %v10580_v55 = vpop.eup %10579 }
0x1412   : > { %v9894_v53 = vpop.f32.mrf.mxu0 }
0x1413   : > { %v6486_v63 = vadd.f32 %v9894_v53, %v6353_v11  ;;  %v10582_v11 = vpop.eup %10581 }
0x1414   : > { %v6453_v5 = vpop.f32.mrf.mxu0  ;;  %v10584_v31 = vpop.eup %10583 }
0x1415   : > { %v6484_v34 = vadd.f32 %v6453_v5, %v6351_v20  ;;  %v6502_v2 = vmul.f32 %v10572_v15, %v6486_v63  ;;  %v10586_v26 = vpop.eup %10585 }
0x1416   : > { %v9895_v32 = vpop.f32.mrf.mxu0 }
0x1417   : > { %v6487_v7 = vadd.f32 %v9895_v32, %v6354_v37  ;;  %v6500_v13 = vmul.f32 %v10576_v49, %v6484_v34 }
0x1418   : > { %v6456_v45 = vpop.f32.mrf.mxu0 }
0x1419   : > { %v6503_v8 = vmul.f32 %v10574_v1, %v6487_v7  ;;  %v6485_v6 = vadd.f32 %v6456_v45, %v6352_v25 }
0x141a   : > { %v9898_v23 = vpop.f32.mrf.mxu0 }
0x141b   : > { %v6509_v57 = vpack.c.bf16 %v6503_v8, %v6502_v2  ;;  %v6501_v27 = vmul.f32 %v10578_v44, %v6485_v6  ;;  %v6490_v47 = vadd.f32 %v9898_v23, %v6357_v16 }
0x141c   : > { %v6469_v4 = vpop.f32.mrf.mxu0 }
0x141d   : > { %v6508_v41 = vpack.c.bf16 %v6501_v27, %v6500_v13  ;;  %v6488_v22 = vadd.f32 %v6469_v4, %v6355_v48  ;;  %v6506_v19 = vmul.f32 %v10580_v55, %v6490_v47 }
0x141e   : > { %v9899_v38 = vpop.f32.mrf.mxu0 }
0x141f   : > { %v6491_v30 = vadd.f32 %v9899_v38, %v6358_v50  ;;  %9902 = vmatprep.mubr.msk.bf16.mxu0 %vm4350_vm14, %v6508_v41  ;;  %v6504_v25 = vmul.f32 %v10584_v31, %v6488_v22  ;;  %v6681_v50 = vrot.slane %v12858_v40, %v5195_v58 }
0x1420   : > { %v6472_v37 = vpop.f32.mrf.mxu0  ;;  %9903 = vmatmul.mubr.msk.bf16.vlgmr.msra.gmra.mxu0 %vm4350_vm14, %v6509_v57 }
0x1421   : > { %v6507_v20 = vmul.f32 %v10582_v11, %v6491_v30  ;;  %v6489_v18 = vadd.f32 %v6472_v37, %v6356_v62 }
0x1423   : > { %v6511_v0 = vpack.c.bf16 %v6507_v20, %v6506_v19  ;;  %v6505_v12 = vmul.f32 %v10586_v26, %v6489_v18 }
0x1425   : > { %v6510_v9 = vpack.c.bf16 %v6505_v12, %v6504_v25 }
0x1427   : > { %9906 = vmatprep.mubr.msk.bf16.mxu0 %vm4350_vm14, %v6510_v9 }
0x1428   : > { %9907 = vmatmul.mubr.msk.bf16.gmra.mxu0 %vm4350_vm14, %v6511_v0 }
0x1451   : > { %v9914_v21 = vpop.f32.mrf.mxu1 }
0x1453   : > { %v6647_v17 = vpop.f32.mrf.mxu1 }
0x1455   : > { %v9915_v52 = vpop.f32.mrf.mxu1 }
0x1457   : > { %v6650_v16 = vpop.f32.mrf.mxu1 }
0x14b3   : > { %v9918_v3 = vpop.f32.mrf.mxu1 }
0x14b5   : > { %v6663_v63 = vpop.f32.mrf.mxu1 }
0x14b7   : > { %v9919_v8 = vpop.f32.mrf.mxu1 }
0x14b9   : > { %v6666_v47 = vpop.f32.mrf.mxu1 }
0x14e0   : > { %v9904_v56 = vpop.f32.mrf.mxu0 }
0x14e1   : > { %v6656_v48 = vadd.f32 %v9914_v21, %v9904_v56 }
0x14e2   : > { %v6564_v62 = vpop.f32.mrf.mxu0 }
0x14e3   : > { %v6648_v51 = vadd.f32 %v6647_v17, %v6564_v62  ;;  %v6684_v24 = vadd.f32 %v6681_v50, %v6656_v48 }
0x14e4   : > { %v9905_v33 = vpop.f32.mrf.mxu0 }
0x14e5   : > { %v6682_v53 = vadd.f32 %v6681_v50, %v6648_v51  ;;  %v6659_v5 = vadd.f32 %v9915_v52, %v9905_v33  ;;  %v6692_v45 = vadd.f32 %v6684_v24, %v12552_v54 }
0x14e6   : > { %v6567_v32 = vpop.f32.mrf.mxu0 }
0x14e7   : > { %v6651_v15 = vadd.f32 %v6650_v16, %v6567_v32  ;;  %v6690_v34 = vadd.f32 %v6682_v53, %v12542_v29  ;;  %v6685_v7 = vadd.f32 %v6681_v50, %v6659_v5  ;;  %v6704_v57 = vsel %vm1946_vm12, %v6692_v45, 0.0 }
0x14e8   : > { %v9908_v1 = vpop.f32.mrf.mxu0 }
0x14e9   : > { %v6683_v49 = vadd.f32 %v6681_v50, %v6651_v15  ;;  %v6672_v2 = vadd.f32 %v9918_v3, %v9908_v1  ;;  %v6698_v58 = vsel %vm1946_vm12, %v6690_v34, 0.0  ;;  %v6693_v27 = vadd.f32 %v6685_v7, %v12554_v60 }
0x14ea   : > { %6699 = vadd.xlane.f32.xlu1 %v6698_v58  ;;  %v6580_v6 = vpop.f32.mrf.mxu0 }
0x14eb   : > { %v6664_v44 = vadd.f32 %v6663_v63, %v6580_v6  ;;  %v6691_v23 = vadd.f32 %v6683_v49, %v12545_v39  ;;  %v6688_v29 = vadd.f32 %v6681_v50, %v6672_v2  ;;  %v6707_v30 = vsel %vm1946_vm12, %v6693_v27, 0.0 }
0x14ec   : > { %v9909_v13 = vpop.f32.mrf.mxu0 }
0x14ed   : > { %v6686_v4 = vadd.f32 %v6681_v50, %v6664_v44  ;;  %v6675_v41 = vadd.f32 %v9919_v8, %v9909_v13  ;;  %v6701_v54 = vsel %vm1946_vm12, %v6691_v23, 0.0  ;;  %v6696_v60 = vadd.f32 %v6688_v29, %v12567_v35 }
0x14ee   : > { %6705 = vadd.xlane.f32.xlu1 %v6704_v57  ;;  %6702 = vadd.xlane.f32.xlu0 %v6701_v54  ;;  %v6583_v38 = vpop.f32.mrf.mxu0  ;;  %v10341_v54 = vld [vmem:[%s13324_s2 + $0x38] sm:$0xff]  }
0x14ef   : > { %v6667_v55 = vadd.f32 %v6666_v47, %v6583_v38  ;;  %v6694_v22 = vadd.f32 %v6686_v4, %v12561_v42  ;;  %v6689_v39 = vadd.f32 %v6681_v50, %v6675_v41  ;;  %v6716_v19 = vsel %vm1946_vm12, %v6696_v60, 0.0  ;;  %v10339_v4 = vld [vmem:[#allocation20 + $0x18] sm:$0xff]   ;;  %v10340_v41 = vld [vmem:[#allocation20 + $0x10] sm:$0xff]   ;;  %9932 = vmatprep.subr.bf16.mxu1 %v10341_v54 }
0x14f0   : > { %9920 = vmatprep.subr.bf16.mxu0 %v10339_v4  ;;  %9933 = vmatpush3.bf16.msra.mxu1 %v10341_v54 }
0x14f1   : > { %v6687_v11 = vadd.f32 %v6681_v50, %v6667_v55  ;;  %v6710_v37 = vsel %vm1946_vm12, %v6694_v22, 0.0  ;;  %v6697_v18 = vadd.f32 %v6689_v39, %v12569_v14  ;;  %9921 = vmatpush3.bf16.msra.mxu0 %v10339_v4 }
0x14f2   : > { %6708 = vadd.xlane.f32.xlu0 %v6707_v30  ;;  %6711 = vadd.xlane.f32.xlu1 %v6710_v37 }
0x14f3   : > { %v6695_v31 = vadd.f32 %v6687_v11, %v12563_v61  ;;  %v6719_v42 = vsel %vm1946_vm12, %v6697_v18, 0.0  ;;  %9922 = vmatprep.subr.bf16.mxu0 %v10340_v41 }
0x14f5   : > { %v6713_v20 = vsel %vm1946_vm12, %v6695_v31, 0.0  ;;  %9923 = vmatpush3.bf16.msra.mxu0 %v10340_v41 }
0x14f6   : > { %6717 = vadd.xlane.f32.xlu1 %v6716_v19  ;;  %6714 = vadd.xlane.f32.xlu0 %v6713_v20 }
0x14fa   : > { %6720 = vadd.xlane.f32.xlu0 %v6719_v42 }
0x1573   : > { %v6700_v26 = vpop.xlane.xlu1 %6699 }
0x1574   : > { %v6722_v25 = vmul.f32 0.03125, %v6700_v26 }
0x1576   : > { %v12879_v0 = vsub.f32 %v6690_v34, %v6722_v25 }
0x1577   : > { %v6706_v35 = vpop.xlane.xlu1 %6705  ;;  %v6703_v12 = vpop.xlane.xlu0 %6702 }
0x1578   : > { %v6724_v9 = vmul.f32 0.03125, %v6706_v35  ;;  %v6723_v21 = vmul.f32 0.03125, %v6703_v12  ;;  %v6738_v61 = vmul.f32 %v12879_v0, %v12879_v0 }
0x157a   : > { %v12883_v17 = vsub.f32 %v6692_v45, %v6724_v9  ;;  %v12885_v52 = vsub.f32 %v6691_v23, %v6723_v21  ;;  %v6746_v14 = vsel %vm1946_vm12, %v6738_v61, 0.0 }
0x157b   : > { %6747 = vadd.xlane.f32.xlu1 %v6746_v14  ;;  %v6712_v16 = vpop.xlane.xlu1 %6711  ;;  %v6709_v56 = vpop.xlane.xlu0 %6708 }
0x157c   : > { %v6726_v50 = vmul.f32 0.03125, %v6712_v16  ;;  %v6725_v48 = vmul.f32 0.03125, %v6709_v56  ;;  %v6740_v3 = vmul.f32 %v12883_v17, %v12883_v17  ;;  %v6739_v62 = vmul.f32 %v12885_v52, %v12885_v52 }
0x157e   : > { %v12892_v51 = vsub.f32 %v6694_v22, %v6726_v50  ;;  %v12894_v24 = vsub.f32 %v6693_v27, %v6725_v48  ;;  %v6752_v33 = vsel %vm1946_vm12, %v6740_v3, 0.0  ;;  %v6749_v53 = vsel %vm1946_vm12, %v6739_v62, 0.0 }
0x157f   : > { %6753 = vadd.xlane.f32.xlu1 %v6752_v33  ;;  %v6718_v5 = vpop.xlane.xlu1 %6717  ;;  %6750 = vadd.xlane.f32.xlu0 %v6749_v53  ;;  %v6715_v63 = vpop.xlane.xlu0 %6714  ;;  %v6805_v3 = vrot.slane %v12858_v40, %v5320_v59 }
0x1580   : > { %v6728_v32 = vmul.f32 0.03125, %v6718_v5  ;;  %v6727_v15 = vmul.f32 0.03125, %v6715_v63  ;;  %v6742_v34 = vmul.f32 %v12892_v51, %v12892_v51  ;;  %v6741_v7 = vmul.f32 %v12894_v24, %v12894_v24 }
0x1581   : > { %v6817_v5 = vrot.slane %v12858_v40, %v5332_v36 }
0x1582   : > { %v12902_v1 = vsub.f32 %v6696_v60, %v6728_v32  ;;  %v12904_v45 = vsub.f32 %v6695_v31, %v6727_v15  ;;  %v6758_v49 = vsel %vm1946_vm12, %v6742_v34, 0.0  ;;  %v6755_v2 = vsel %vm1946_vm12, %v6741_v7, 0.0 }
0x1583   : > { %6759 = vadd.xlane.f32.xlu1 %v6758_v49  ;;  %6756 = vadd.xlane.f32.xlu0 %v6755_v2  ;;  %v6721_v58 = vpop.xlane.xlu0 %6720 }
0x1584   : > { %v6729_v8 = vmul.f32 0.03125, %v6721_v58  ;;  %v6744_v6 = vmul.f32 %v12902_v1, %v12902_v1  ;;  %v6743_v44 = vmul.f32 %v12904_v45, %v12904_v45 }
0x1586   : > { %v12912_v23 = vsub.f32 %v6697_v18, %v6729_v8  ;;  %v6764_v13 = vsel %vm1946_vm12, %v6744_v6, 0.0  ;;  %v6761_v57 = vsel %vm1946_vm12, %v6743_v44, 0.0 }
0x1587   : > { %6765 = vadd.xlane.f32.xlu1 %v6764_v13  ;;  %6762 = vadd.xlane.f32.xlu0 %v6761_v57 }
0x1588   : > { %v6745_v27 = vmul.f32 %v12912_v23, %v12912_v23 }
0x158a   : > { %v6767_v29 = vsel %vm1946_vm12, %v6745_v27, 0.0 }
0x158b   : > { %6768 = vadd.xlane.f32.xlu0 %v6767_v29 }
0x1604   : > { %v6748_v47 = vpop.xlane.xlu1 %6747 }
0x1605   : > { %v6770_v38 = vmul.f32 0.03125, %v6748_v47 }
0x1607   : > { %v6778_v55 = vadd.f32 1e-05, %v6770_v38 }
0x1608   : > { %v6754_v22 = vpop.xlane.xlu1 %6753  ;;  %v6751_v30 = vpop.xlane.xlu0 %6750 }
0x1609   : > { %10587 = vrsqrt.f32 %v6778_v55  ;;  %v6772_v39 = vmul.f32 0.03125, %v6754_v22  ;;  %v6771_v11 = vmul.f32 0.03125, %v6751_v30  ;;  %v10342_v22 = vld [vmem:[%s13324_s2 + $0x30] sm:$0xff]   ;;  %v10343_v30 = vld [vmem:[%s13324_s2 + $0x28] sm:$0xff]  }
0x160a   : > { %9934 = vmatprep.subr.bf16.mxu1 %v10342_v22 }
0x160b   : > { %v6780_v37 = vadd.f32 1e-05, %v6772_v39  ;;  %v6779_v60 = vadd.f32 1e-05, %v6771_v11  ;;  %9935 = vmatpush3.bf16.msra.mxu1 %v10342_v22  ;;  %v10344_v39 = vld [vmem:[%s13324_s2 + $0x20] sm:$0xff]  }
0x160c   : > { %v6760_v31 = vpop.xlane.xlu1 %6759  ;;  %v6757_v19 = vpop.xlane.xlu0 %6756  ;;  %9936 = vmatprep.subr.bf16.mxu1 %v10343_v30 }
0x160d   : > { %10589 = vrsqrt.f32 %v6780_v37  ;;  %v6774_v20 = vmul.f32 0.03125, %v6760_v31  ;;  %v6773_v18 = vmul.f32 0.03125, %v6757_v19 }
0x160e   : > { %10591 = vrsqrt.f32 %v6779_v60  ;;  %v8922_v60 = vld [vmem:[#allocation21 + $0x1] ss:$0 sm:$0xff] }
0x160f   : > { %v6782_v42 = vadd.f32 1e-05, %v6774_v20  ;;  %v6781_v26 = vadd.f32 1e-05, %v6773_v18  ;;  %9937 = vmatpush3.bf16.msra.mxu1 %v10343_v30 }
0x1610   : > { %v6766_v25 = vpop.xlane.xlu1 %6765  ;;  %v6763_v35 = vpop.xlane.xlu0 %6762  ;;  %9938 = vmatprep.subr.bf16.mxu1 %v10344_v39 }
0x1611   : > { %10593 = vrsqrt.f32 %v6782_v42  ;;  %v6776_v12 = vmul.f32 0.03125, %v6766_v25  ;;  %v6775_v9 = vmul.f32 0.03125, %v6763_v35 }
0x1612   : > { %10595 = vrsqrt.f32 %v6781_v26 }
0x1613   : > { %v6784_v21 = vadd.f32 1e-05, %v6776_v12  ;;  %v6783_v61 = vadd.f32 1e-05, %v6775_v9  ;;  %9939 = vmatpush3.bf16.msra.mxu1 %v10344_v39 }
0x1614   : > { %v6769_v14 = vpop.xlane.xlu0 %6768 }
0x1615   : > { %10597 = vrsqrt.f32 %v6784_v21  ;;  %v6777_v16 = vmul.f32 0.03125, %v6769_v14 }
0x1616   : > { %v10588_v56 = vpop.eup %10587  ;;  %10599 = vrsqrt.f32 %v6783_v61 }
0x1617   : > { %v6785_v50 = vadd.f32 1e-05, %v6777_v16  ;;  %v6794_v48 = vmul.f32 %v10588_v56, %v12879_v0 }
0x1619   : > { %10601 = vrsqrt.f32 %v6785_v50  ;;  %v6806_v53 = vmul.f32 %v6805_v3, %v6794_v48 }
0x161a   : > { %v10590_v62 = vpop.eup %10589 }
0x161b   : > { %v10592_v33 = vpop.eup %10591  ;;  %v6796_v63 = vmul.f32 %v10590_v62, %v12883_v17  ;;  %v12931_v0 = vadd.f32 %v6817_v5, %v6806_v53 }
0x161c   : > { %v6795_v32 = vmul.f32 %v10592_v33, %v12885_v52 }
0x161d   : > { %v6808_v2 = vmul.f32 %v6805_v3, %v6796_v63 }
0x161e   : > { %v10594_v15 = vpop.eup %10593  ;;  %v6807_v34 = vmul.f32 %v6805_v3, %v6795_v32 }
0x161f   : > { %v10596_v7 = vpop.eup %10595  ;;  %v6798_v58 = vmul.f32 %v10594_v15, %v12892_v51  ;;  %v12941_v44 = vadd.f32 %v6817_v5, %v6808_v2 }
0x1620   : > { %v6797_v49 = vmul.f32 %v10596_v7, %v12894_v24  ;;  %v12934_v59 = vadd.f32 %v6817_v5, %v6807_v34  ;;  %v6956_v7 = vrot.slane %v12858_v40, %v5468_v28 }
0x1621   : > { %v6810_v57 = vmul.f32 %v6805_v3, %v6798_v58 }
0x1622   : > { %v10598_v8 = vpop.eup %10597  ;;  %v6826_v36 = vpack.c.bf16 %v12934_v59, %v12931_v0  ;;  %v6809_v6 = vmul.f32 %v6805_v3, %v6797_v49 }
0x1623   : > { %v10600_v17 = vpop.eup %10599  ;;  %v6800_v52 = vmul.f32 %v10598_v8, %v12902_v1  ;;  %v12950_v1 = vadd.f32 %v6817_v5, %v6810_v57 }
0x1624   : > { %9924 = vmatprep.mubr.msk.bf16.mxu0 %vm1946_vm12, %v6826_v36  ;;  %v12943_v13 = vadd.f32 %v6817_v5, %v6809_v6  ;;  %v6799_v24 = vmul.f32 %v10600_v17, %v12904_v45 }
0x1625   : > { %v6812_v41 = vmul.f32 %v6805_v3, %v6800_v52 }
0x1626   : > { %v10602_v27 = vpop.eup %10601  ;;  %v6827_v51 = vpack.c.bf16 %v12943_v13, %v12941_v44  ;;  %v6811_v29 = vmul.f32 %v6805_v3, %v6799_v24 }
0x1627   : > { %v6801_v4 = vmul.f32 %v10602_v27, %v12912_v23  ;;  %v12956_v45 = vadd.f32 %v6817_v5, %v6812_v41 }
0x1628   : > { %9925 = vmatmul.mubr.msk.bf16.vlgmr.msra.gmra.mxu0 %vm1946_vm12, %v6827_v51  ;;  %v12952_v54 = vadd.f32 %v6817_v5, %v6811_v29 }
0x1629   : > { %v6813_v47 = vmul.f32 %v6805_v3, %v6801_v4 }
0x162a   : > { %v6828_v38 = vpack.c.bf16 %v12952_v54, %v12950_v1 }
0x162b   : > { %v12958_v55 = vadd.f32 %v6817_v5, %v6813_v47 }
0x162c   : > { %9928 = vmatprep.mubr.msk.bf16.mxu0 %vm1946_vm12, %v6828_v38 }
0x162d   : > { %v6829_v23 = vpack.c.bf16 %v12958_v55, %v12956_v45 }
0x1630   : > { %9929 = vmatmul.mubr.msk.bf16.gmra.mxu0 %vm1946_vm12, %v6829_v23 }
0x16e8   : > { %v9926_v11 = vpop.f32.mrf.mxu0 }
0x16e9   : > { %v6910_v18 = vadd.f32 %v9926_v11, %v8922_v60 }
0x16ea   : > { %v6901_v37 = vpop.f32.mrf.mxu0 }
0x16eb   : > { %v6902_v19 = vadd.f32 %v8922_v60, %v6901_v37  ;;  %v6934_v21 = vmax.f32 %v6910_v18, 0.0 }
0x16ec   : > { %v9927_v31 = vpop.f32.mrf.mxu0 }
0x16ed   : > { %v6913_v20 = vadd.f32 %v9927_v31, %v8922_v60  ;;  %v6932_v12 = vmax.f32 %v6902_v19, 0.0 }
0x16ee   : > { %v6904_v42 = vpop.f32.mrf.mxu0 }
0x16ef   : > { %v6905_v26 = vadd.f32 %v8922_v60, %v6904_v42  ;;  %v6935_v25 = vmax.f32 %v6913_v20, 0.0 }
0x16f0   : > { %v9930_v35 = vpop.f32.mrf.mxu0 }
0x16f1   : > { %v6933_v9 = vmax.f32 %v6905_v26, 0.0  ;;  %v6941_v16 = vpack.c.bf16 %v6935_v25, %v6934_v21  ;;  %v6926_v3 = vadd.f32 %v9930_v35, %v8922_v60 }
0x16f2   : > { %v6917_v61 = vpop.f32.mrf.mxu0 }
0x16f3   : > { %v6940_v14 = vpack.c.bf16 %v6933_v9, %v6932_v12  ;;  %v6918_v50 = vadd.f32 %v8922_v60, %v6917_v61  ;;  %v6938_v32 = vmax.f32 %v6926_v3, 0.0 }
0x16f4   : > { %v9931_v56 = vpop.f32.mrf.mxu0 }
0x16f5   : > { %v6929_v48 = vadd.f32 %v9931_v56, %v8922_v60  ;;  %9940 = vmatprep.mubr.msk.bf16.mxu1 %vm2989_vm13, %v6940_v14  ;;  %v6936_v5 = vmax.f32 %v6918_v50, 0.0 }
0x16f6   : > { %v6920_v62 = vpop.f32.mrf.mxu0  ;;  %9941 = vmatmul.mubr.msk.bf16.vlgmr.msra.gmra.mxu1 %vm2989_vm13, %v6941_v16 }
0x16f7   : > { %v6921_v33 = vadd.f32 %v8922_v60, %v6920_v62  ;;  %v6939_v53 = vmax.f32 %v6929_v48, 0.0 }
0x16f9   : > { %v6937_v63 = vmax.f32 %v6921_v33, 0.0  ;;  %v6943_v34 = vpack.c.bf16 %v6939_v53, %v6938_v32 }
0x16fb   : > { %v6942_v15 = vpack.c.bf16 %v6937_v63, %v6936_v5 }
0x16fd   : > { %9944 = vmatprep.mubr.msk.bf16.mxu1 %vm2989_vm13, %v6942_v15 }
0x16fe   : > { %9945 = vmatmul.mubr.msk.bf16.gmra.mxu1 %vm2989_vm13, %v6943_v34 }
0x17b6   : > { %v9942_v49 = vpop.f32.mrf.mxu1 }
0x17b7   : > { %v7036_v58 = vadd.f32 %v9942_v49, %v6956_v7 }
0x17b8   : > { %v7027_v2 = vpop.f32.mrf.mxu1 }
0x17b9   : > { %v7028_v8 = vadd.f32 %v7027_v2, %v6956_v7  ;;  %v7060_v24 = vadd.f32 %v7036_v58, %v12941_v44 }
0x17ba   : > { %v9943_v36 = vpop.f32.mrf.mxu1 }
0x17bb   : > { %v7058_v6 = vadd.f32 %v7028_v8, %v12931_v0  ;;  %v7039_v17 = vadd.f32 %v9943_v36, %v6956_v7  ;;  %v7072_v0 = vsel %vm1946_vm12, %v7060_v24, 0.0 }
0x17bc   : > { %v7030_v52 = vpop.f32.mrf.mxu1 }
0x17bd   : > { %v7031_v57 = vadd.f32 %v7030_v52, %v6956_v7  ;;  %v7066_v27 = vsel %vm1946_vm12, %v7058_v6, 0.0  ;;  %v7061_v28 = vadd.f32 %v7039_v17, %v12943_v13 }
0x17be   : > { %7067 = vadd.xlane.f32.xlu1 %v7066_v27  ;;  %v9946_v51 = vpop.f32.mrf.mxu1 }
0x17bf   : > { %v7059_v29 = vadd.f32 %v7031_v57, %v12934_v59  ;;  %v7052_v41 = vadd.f32 %v9946_v51, %v6956_v7  ;;  %v7075_v30 = vsel %vm1946_vm12, %v7061_v28, 0.0 }
0x17c0   : > { %v7043_v4 = vpop.f32.mrf.mxu1 }
0x17c1   : > { %v7044_v47 = vadd.f32 %v7043_v4, %v6956_v7  ;;  %v7069_v38 = vsel %vm1946_vm12, %v7059_v29, 0.0  ;;  %v7064_v39 = vadd.f32 %v7052_v41, %v12956_v45  ;;  %v10346_v4 = vld [vmem:[#allocation23 + $0x10] sm:$0xff]   ;;  %v10348_v41 = vld [vmem:[#allocation23] sm:$0xff]  }
0x17c2   : > { %7070 = vadd.xlane.f32.xlu0 %v7069_v38  ;;  %7073 = vadd.xlane.f32.xlu1 %v7072_v0  ;;  %v9947_v23 = vpop.f32.mrf.mxu1  ;;  %v13039_v38 = vld [vmem:[#allocation23 + $0x38] sm:$0xff]  }
0x17c3   : > { %v7062_v44 = vadd.f32 %v7044_v47, %v12950_v1  ;;  %v7055_v59 = vadd.f32 %v9947_v23, %v6956_v7  ;;  %v7084_v19 = vsel %vm1946_vm12, %v7064_v39, 0.0  ;;  %v13036_v47 = vld [vmem:[#allocation23 + $0x28] sm:$0xff]  }
0x17c4   : > { %v7046_v22 = vpop.f32.mrf.mxu1 }
0x17c5   : > { %v7047_v11 = vadd.f32 %v7046_v22, %v6956_v7  ;;  %v7078_v13 = vsel %vm1946_vm12, %v7062_v44, 0.0  ;;  %v7065_v60 = vadd.f32 %v7055_v59, %v12958_v55 }
0x17c6   : > { %7076 = vadd.xlane.f32.xlu0 %v7075_v30  ;;  %7079 = vadd.xlane.f32.xlu1 %v7078_v13 }
0x17c7   : > { %v7063_v37 = vadd.f32 %v7047_v11, %v12952_v54  ;;  %v7087_v1 = vsel %vm1946_vm12, %v7065_v60, 0.0 }
0x17c9   : > { %v7081_v31 = vsel %vm1946_vm12, %v7063_v37, 0.0 }
0x17ca   : > { %7082 = vadd.xlane.f32.xlu0 %v7081_v31  ;;  %7085 = vadd.xlane.f32.xlu1 %v7084_v19 }
0x17ce   : > { %7088 = vadd.xlane.f32.xlu0 %v7087_v1 }
0x1847   : > { %v7068_v45 = vpop.xlane.xlu1 %7067 }
0x1848   : > { %v7090_v20 = vmul.f32 0.03125, %v7068_v45 }
0x184a   : > { %v12996_v18 = vsub.f32 %v7058_v6, %v7090_v20 }
0x184b   : > { %v7074_v42 = vpop.xlane.xlu1 %7073  ;;  %v7071_v26 = vpop.xlane.xlu0 %7070 }
0x184c   : > { %v7092_v25 = vmul.f32 0.03125, %v7074_v42  ;;  %v7091_v35 = vmul.f32 0.03125, %v7071_v26  ;;  %v7106_v54 = vmul.f32 %v12996_v18, %v12996_v18 }
0x184e   : > { %v13000_v55 = vsub.f32 %v7060_v24, %v7092_v25  ;;  %v13002_v12 = vsub.f32 %v7059_v29, %v7091_v35  ;;  %v7114_v9 = vsel %vm1946_vm12, %v7106_v54, 0.0  ;;  %v10345_v29 = vld [vmem:[#allocation23 + $0x18] sm:$0xff]  }
0x184f   : > { %7115 = vadd.xlane.f32.xlu1 %v7114_v9  ;;  %v7080_v21 = vpop.xlane.xlu1 %7079  ;;  %v7077_v61 = vpop.xlane.xlu0 %7076  ;;  %9948 = vmatprep.subr.bf16.mxu0 %v10345_v29 }
0x1850   : > { %v7094_v14 = vmul.f32 0.03125, %v7080_v21  ;;  %v7093_v16 = vmul.f32 0.03125, %v7077_v61  ;;  %v7108_v56 = vmul.f32 %v13000_v55, %v13000_v55  ;;  %v7107_v50 = vmul.f32 %v13002_v12, %v13002_v12  ;;  %9949 = vmatpush3.bf16.msra.mxu0 %v10345_v29 }
0x1851   : > { %9950 = vmatprep.subr.bf16.mxu0 %v10346_v4  ;;  %v7173_v21 = vrot.slane %v12858_v40, %v5685_v10 }
0x1852   : > { %v13009_v48 = vsub.f32 %v7062_v44, %v7094_v14  ;;  %v13011_v3 = vsub.f32 %v7061_v28, %v7093_v16  ;;  %v7120_v62 = vsel %vm1946_vm12, %v7108_v56, 0.0  ;;  %v7117_v33 = vsel %vm1946_vm12, %v7107_v50, 0.0  ;;  %v10347_v28 = vld [vmem:[#allocation23 + $0x8] sm:$0xff]  }
0x1853   : > { %7121 = vadd.xlane.f32.xlu1 %v7120_v62  ;;  %v7086_v53 = vpop.xlane.xlu1 %7085  ;;  %7118 = vadd.xlane.f32.xlu0 %v7117_v33  ;;  %v7083_v5 = vpop.xlane.xlu0 %7082  ;;  %v7185_v16 = vrot.slane %v12858_v40, %v5697_v46 }
0x1854   : > { %v7096_v63 = vmul.f32 0.03125, %v7086_v53  ;;  %v7095_v32 = vmul.f32 0.03125, %v7083_v5  ;;  %v7110_v15 = vmul.f32 %v13009_v48, %v13009_v48  ;;  %v7109_v34 = vmul.f32 %v13011_v3, %v13011_v3  ;;  %9960 = vmatprep.subr.bf16.mxu1 %v10347_v28  ;;  %9951 = vmatpush3.bf16.msra.mxu0 %v10346_v4 }
0x1855   : > { %9961 = vmatpush3.bf16.msra.mxu1 %v10347_v28  ;;  %9972 = vmatprep.subr.bf16.mxu0 %v13036_v47 }
0x1856   : > { %v13019_v7 = vsub.f32 %v7064_v39, %v7096_v63  ;;  %v13021_v49 = vsub.f32 %v7063_v37, %v7095_v32  ;;  %v7126_v2 = vsel %vm1946_vm12, %v7110_v15, 0.0  ;;  %v7123_v58 = vsel %vm1946_vm12, %v7109_v34, 0.0  ;;  %9962 = vmatprep.subr.bf16.mxu1 %v10348_v41 }
0x1857   : > { %7127 = vadd.xlane.f32.xlu1 %v7126_v2  ;;  %7124 = vadd.xlane.f32.xlu0 %v7123_v58  ;;  %v7089_v8 = vpop.xlane.xlu0 %7088 }
0x1858   : > { %v7097_v36 = vmul.f32 0.03125, %v7089_v8  ;;  %v7112_v6 = vmul.f32 %v13019_v7, %v13019_v7  ;;  %v7111_v17 = vmul.f32 %v13021_v49, %v13021_v49 }
0x1859   : > { %9963 = vmatpush3.bf16.msra.mxu1 %v10348_v41 }
0x185a   : > { %v13029_v52 = vsub.f32 %v7065_v60, %v7097_v36  ;;  %v7132_v24 = vsel %vm1946_vm12, %v7112_v6, 0.0  ;;  %v7129_v57 = vsel %vm1946_vm12, %v7111_v17, 0.0  ;;  %9984 = vmatprep.subr.bf16.mxu1 %v13039_v38  ;;  %v7204_v36 = vld [vmem:[#allocation5] sm:$0xff] }
0x185b   : > { %7133 = vadd.xlane.f32.xlu1 %v7132_v24  ;;  %7130 = vadd.xlane.f32.xlu0 %v7129_v57 }
0x185c   : > { %v7113_v27 = vmul.f32 %v13029_v52, %v13029_v52 }
0x185e   : > { %v7135_v51 = vsel %vm1946_vm12, %v7113_v27, 0.0 }
0x185f   : > { %7136 = vadd.xlane.f32.xlu0 %v7135_v51 }
0x18d8   : > { %v7116_v0 = vpop.xlane.xlu1 %7115 }
0x18d9   : > { %v7138_v23 = vmul.f32 0.03125, %v7116_v0 }
0x18db   : > { %v7146_v44 = vadd.f32 1e-05, %v7138_v23 }
0x18dc   : > { %v7122_v22 = vpop.xlane.xlu1 %7121  ;;  %v7119_v30 = vpop.xlane.xlu0 %7118 }
0x18dd   : > { %10603 = vrsqrt.f32 %v7146_v44  ;;  %v7140_v39 = vmul.f32 0.03125, %v7122_v22  ;;  %v7139_v59 = vmul.f32 0.03125, %v7119_v30 }
0x18df   : > { %v7148_v11 = vadd.f32 1e-05, %v7140_v39  ;;  %v7147_v13 = vadd.f32 1e-05, %v7139_v59 }
0x18e0   : > { %v7128_v37 = vpop.xlane.xlu1 %7127  ;;  %v7125_v60 = vpop.xlane.xlu0 %7124 }
0x18e1   : > { %10605 = vrsqrt.f32 %v7148_v11  ;;  %v7142_v31 = vmul.f32 0.03125, %v7128_v37  ;;  %v7141_v19 = vmul.f32 0.03125, %v7125_v60  ;;  %v10350_v11 = vld [vmem:[#allocation23 + $0x20] sm:$0xff]  }
0x18e2   : > { %10607 = vrsqrt.f32 %v7147_v13  ;;  %v10352_v13 = vld [vmem:[#allocation23 + $0x30] sm:$0xff]  }
0x18e3   : > { %v7150_v1 = vadd.f32 1e-05, %v7142_v31  ;;  %v7149_v45 = vadd.f32 1e-05, %v7141_v19 }
0x18e4   : > { %v7134_v20 = vpop.xlane.xlu1 %7133  ;;  %v7131_v42 = vpop.xlane.xlu0 %7130 }
0x18e5   : > { %10609 = vrsqrt.f32 %v7150_v1  ;;  %v7144_v26 = vmul.f32 0.03125, %v7134_v20  ;;  %v7143_v25 = vmul.f32 0.03125, %v7131_v42  ;;  %v10353_v42 = vld [vmem:[#allocation23 + $0x48] sm:$0xff]  }
0x18e6   : > { %10611 = vrsqrt.f32 %v7149_v45 }
0x18e7   : > { %v7152_v35 = vadd.f32 1e-05, %v7144_v26  ;;  %v7151_v54 = vadd.f32 1e-05, %v7143_v25  ;;  %v7415_v26 = vld [vmem:[#allocation5 + $0x2] sm:$0xff] }
0x18e8   : > { %v7137_v9 = vpop.xlane.xlu0 %7136  ;;  %v10355_v25 = vld [vmem:[#allocation23 + $0x58] sm:$0xff]  }
0x18e9   : > { %10613 = vrsqrt.f32 %v7152_v35  ;;  %v7145_v61 = vmul.f32 0.03125, %v7137_v9 }
0x18ea   : > { %v10604_v14 = vpop.eup %10603  ;;  %10615 = vrsqrt.f32 %v7151_v54 }
0x18eb   : > { %v7162_v56 = vmul.f32 %v10604_v14, %v12996_v18  ;;  %v7153_v50 = vadd.f32 1e-05, %v7145_v61 }
0x18ed   : > { %v7174_v62 = vmul.f32 %v7173_v21, %v7162_v56  ;;  %10617 = vrsqrt.f32 %v7153_v50 }
0x18ee   : > { %v10606_v33 = vpop.eup %10605 }
0x18ef   : > { %v10608_v53 = vpop.eup %10607  ;;  %v7186_v5 = vadd.f32 %v7185_v16, %v7174_v62  ;;  %v7164_v63 = vmul.f32 %v10606_v33, %v13000_v55 }
0x18f0   : > { %v7163_v10 = vmul.f32 %v10608_v53, %v13002_v12  ;;  %v7220_v12 = vld [vmem:[#allocation5 + $0x1] sm:$0xff] }
0x18f1   : > { %7196 = vst.msk [vmem:[#allocation5 + $0x11] sm:$0xff] %vm1946_vm12, %v7186_v5  ;;  %v7176_v32 = vmul.f32 %v7173_v21, %v7164_v63 }
0x18f2   : > { %v10610_v15 = vpop.eup %10609  ;;  %v7175_v34 = vmul.f32 %v7173_v21, %v7163_v10 }
0x18f3   : > { %v10612_v43 = vpop.eup %10611  ;;  %v7188_v2 = vadd.f32 %v7185_v16, %v7176_v32  ;;  %v7166_v46 = vmul.f32 %v10610_v15, %v13009_v48  ;;  %v10354_v32 = vld [vmem:[#allocation23 + $0x40] sm:$0xff]   ;;  %v10356_v15 = vld [vmem:[#allocation23 + $0x50] sm:$0xff]  }
0x18f4   : > { %v7187_v40 = vadd.f32 %v7185_v16, %v7175_v34  ;;  %v7165_v18 = vmul.f32 %v10612_v43, %v13011_v3  ;;  %v10357_v34 = vld [vmem:[#allocation23 + $0x68] sm:$0xff]   ;;  %v10359_v43 = vld [vmem:[#allocation23 + $0x78] sm:$0xff]  }
0x18f5   : > { %7198 = vst.msk [vmem:[#allocation5 + $0x31] sm:$0xff] %vm1946_vm12, %v7188_v2  ;;  %v7178_v58 = vmul.f32 %v7173_v21, %v7166_v46 }
0x18f6   : > { %v10614_v8 = vpop.eup %10613  ;;  %7197 = vst.msk [vmem:[#allocation5 + $0x21] sm:$0xff] %vm1946_vm12, %v7187_v40  ;;  %v7177_v55 = vmul.f32 %v7173_v21, %v7165_v18 }
0x18f7   : > { %v10616_v6 = vpop.eup %10615  ;;  %v7190_v17 = vadd.f32 %v7185_v16, %v7178_v58  ;;  %v7168_v24 = vmul.f32 %v10614_v8, %v13019_v7 }
0x18f8   : > { %v7189_v57 = vadd.f32 %v7185_v16, %v7177_v55  ;;  %v7167_v27 = vmul.f32 %v10616_v6, %v13021_v49  ;;  %v13058_v48 = vld [vmem:[#allocation5 + $0x11] sm:$0xff] }
0x18f9   : > { %v7205_v51 = vld [vmem:[#allocation5 + $0x10] sm:$0xff]  ;;  %7200 = vst.msk [vmem:[#allocation5 + $0x51] sm:$0xff] %vm1946_vm12, %v7190_v17  ;;  %v7180_v3 = vmul.f32 %v7173_v21, %v7168_v24  ;;  %v7228_v29 = vpack.c.bf16 %v13058_v48, %v7220_v12 }
0x18fa   : > { %v7212_v28 = vpack.c.bf16 %v7205_v51, %v7204_v36  ;;  %v10618_v4 = vpop.eup %10617  ;;  %7199 = vst.msk [vmem:[#allocation5 + $0x41] sm:$0xff] %vm1946_vm12, %v7189_v57  ;;  %v7179_v41 = vmul.f32 %v7173_v21, %v7167_v27  ;;  %v7416_v35 = vld [vmem:[#allocation5 + $0x12] sm:$0xff]  ;;  %v10360_v57 = vld [vmem:[#allocation23 + $0x70] sm:$0xff]  }
0x18fb   : > { %v7192_v0 = vadd.f32 %v7185_v16, %v7180_v3  ;;  %v7169_v23 = vmul.f32 %v10618_v4, %v13029_v52  ;;  %9952 = vmatprep.mubr.msk.bf16.mxu0 %vm1946_vm12, %v7228_v29  ;;  %v7423_v14 = vpack.c.bf16 %v7416_v35, %v7415_v26  ;;  %v10358_v24 = vld [vmem:[#allocation23 + $0x60] sm:$0xff]  }
0x18fc   : > { %9964 = vmatprep.mubr.msk.bf16.mxu1 %vm1946_vm12, %v7212_v28  ;;  %v7191_v7 = vadd.f32 %v7185_v16, %v7179_v41  ;;  %v13066_v49 = vld [vmem:[#allocation5 + $0x31] sm:$0xff] }
0x18fd   : > { %v7207_v44 = vld [vmem:[#allocation5 + $0x30] sm:$0xff]  ;;  %7202 = vst.msk [vmem:[#allocation5 + $0x71] sm:$0xff] %vm1946_vm12, %v7192_v0  ;;  %v7181_v22 = vmul.f32 %v7173_v21, %v7169_v23  ;;  %v13069_v30 = vld [vmem:[#allocation5 + $0x21] sm:$0xff] }
0x18fe   : > { %v7206_v39 = vld [vmem:[#allocation5 + $0x20] sm:$0xff]  ;;  %7201 = vst.msk [vmem:[#allocation5 + $0x61] sm:$0xff] %vm1946_vm12, %v7191_v7  ;;  %v13074_v59 = vpack.c.bf16 %v13066_v49, %v13069_v30  ;;  %v7418_v50 = vld [vmem:[#allocation5 + $0x32] sm:$0xff]  ;;  %v7651_v8 = vpack.c.bf16 %v13069_v30, %v13058_v48  ;;  %v11037_v30 = vmov 0  }
0x18ff   : > { %v13076_v52 = vpack.c.bf16 %v7207_v44, %v7206_v39  ;;  %v7193_v37 = vadd.f32 %v7185_v16, %v7181_v22  ;;  %v7537_v16 = vpack.c.bf16 %v7206_v39, %v7205_v51  ;;  %v7417_v56 = vld [vmem:[#allocation5 + $0x22] sm:$0xff]  ;;  %v10361_v51 = vld [vmem:[#allocation23 + $0x88] sm:$0xff]   ;;  %v10362_v28 = vld [vmem:[#allocation23 + $0x80] sm:$0xff]   ;;  %10323 = vset.pattern.permute.xlu1 %v11037_v30  ;;  %10324 = vset.pattern.permute.xlu0 %v11037_v30 }
0x1900   : > { %9953 = vmatmul.mubr.msk.bf16.vlgmr.msra.gmra.mxu0 %vm1946_vm12, %v13074_v59  ;;  %v13082_v60 = vld [vmem:[#allocation5 + $0x51] sm:$0xff]  ;;  %v13112_v53 = vpack.c.bf16 %v7418_v50, %v7417_v56  ;;  %v7765_v55 = vpack.c.bf16 %v7417_v56, %v7416_v35  ;;  %v8241_v22 = vld [vmem:[%s13325_s18] sm:$0x7] }
0x1901   : > { %9965 = vmatmul.mubr.msk.bf16.vlgmr.msra.gmra.mxu1 %vm1946_vm12, %v13076_v52  ;;  %v7209_v31 = vld [vmem:[#allocation5 + $0x50] sm:$0xff]  ;;  %7203 = vst.msk [vmem:[#allocation5 + $0x81] sm:$0xff] %vm1946_vm12, %v7193_v37  ;;  %9973 = vmatpush3.bf16.msra.mxu0 %v13036_v47  ;;  %v13086_v19 = vld [vmem:[#allocation5 + $0x41] sm:$0xff] }
0x1902   : > { %v7208_v1 = vld [vmem:[#allocation5 + $0x40] sm:$0xff]  ;;  %9985 = vmatpush3.bf16.msra.mxu1 %v13039_v38  ;;  %v13091_v45 = vpack.c.bf16 %v13082_v60, %v13086_v19  ;;  %9974 = vmatprep.subr.bf16.mxu0 %v10350_v11  ;;  %v7420_v33 = vld [vmem:[#allocation5 + $0x52] sm:$0xff]  ;;  %v7652_v12 = vpack.c.bf16 %v13086_v19, %v13066_v49 }
0x1903   : > { %v13093_v20 = vpack.c.bf16 %v7209_v31, %v7208_v1  ;;  %9986 = vmatprep.subr.bf16.mxu1 %v10352_v13  ;;  %v7419_v62 = vld [vmem:[#allocation5 + $0x42] sm:$0xff]  ;;  %v7538_v5 = vpack.c.bf16 %v7208_v1, %v7207_v44  ;;  %v7879_v4 = vld [vmem:[#allocation5 + $0x90] sm:$0xff]  ;;  %v13251_v44 = vmov 0.0   ;;  %8244 = vperm.xlu1 %10323, %v8241_v22  }
0x1904   : > { %9956 = vmatprep.mubr.msk.bf16.mxu0 %vm1946_vm12, %v13091_v45  ;;  %v13099_v47 = vld [vmem:[#allocation5 + $0x71] sm:$0xff]  ;;  %v13114_v63 = vpack.c.bf16 %v7420_v33, %v7419_v62  ;;  %v7766_v36 = vpack.c.bf16 %v7419_v62, %v7418_v50 }
0x1905   : > { %9968 = vmatprep.mubr.msk.bf16.mxu1 %vm1946_vm12, %v13093_v20  ;;  %v7211_v38 = vld [vmem:[#allocation5 + $0x70] sm:$0xff]  ;;  %v7226_v54 = vld [vmem:[#allocation5 + $0x61] sm:$0xff]  ;;  %9975 = vmatpush3.bf16.msra.mxu0 %v10350_v11 }
0x1906   : > { %v7210_v9 = vld [vmem:[#allocation5 + $0x60] sm:$0xff]  ;;  %9987 = vmatpush3.bf16.msra.mxu1 %v10352_v13  ;;  %v13102_v21 = vpack.c.bf16 %v13099_v47, %v7226_v54  ;;  %9996 = vmatprep.subr.bf16.mxu0 %v10353_v42  ;;  %v7422_v46 = vld [vmem:[#allocation5 + $0x72] sm:$0xff]  ;;  %v7653_v6 = vpack.c.bf16 %v7226_v54, %v13082_v60 }
0x1907   : > { %v13104_v61 = vpack.c.bf16 %v7211_v38, %v7210_v9  ;;  %10008 = vmatprep.subr.bf16.mxu1 %v10355_v25  ;;  %v7539_v10 = vpack.c.bf16 %v7210_v9, %v7209_v31  ;;  %v7421_v2 = vld [vmem:[#allocation5 + $0x62] sm:$0xff]  ;;  %v7993_v41 = vld [vmem:[#allocation5 + $0x91] sm:$0xff] }
0x1908   : > { %9957 = vmatmul.mubr.msk.bf16.gmra.mxu0 %vm1946_vm12, %v13102_v21  ;;  %v7536_v40 = vld [vmem:[#allocation5 + $0x80] sm:$0xff]  ;;  %v7426_v18 = vpack.c.bf16 %v7422_v46, %v7421_v2  ;;  %v7767_v17 = vpack.c.bf16 %v7421_v2, %v7420_v33  ;;  %v8107_v7 = vld [vmem:[#allocation5 + $0x92] sm:$0xff] }
0x1909   : > { %9969 = vmatmul.mubr.msk.bf16.gmra.mxu1 %vm1946_vm12, %v13104_v61  ;;  %9976 = vmatprep.mubr.msk.bf16.mxu0 %vm1946_vm12, %v7423_v14  ;;  %v7540_v58 = vpack.c.bf16 %v7536_v40, %v7211_v38  ;;  %v7650_v27 = vld [vmem:[#allocation5 + $0x81] sm:$0xff]  ;;  %v7883_v0 = vpack.c.bf16 %v7879_v4, %v7536_v40 }
0x190a   : > { %9988 = vmatprep.mubr.msk.bf16.mxu1 %vm1946_vm12, %v7537_v16  ;;  %v7764_v48 = vld [vmem:[#allocation5 + $0x82] sm:$0xff]  ;;  %v7654_v3 = vpack.c.bf16 %v7650_v27, %v13099_v47  ;;  %v7997_v23 = vpack.c.bf16 %v7993_v41, %v7650_v27 }
0x190b   : > { %v7768_v29 = vpack.c.bf16 %v7764_v48, %v7422_v46  ;;  %v8111_v49 = vpack.c.bf16 %v8107_v7, %v7764_v48 }
0x1910   : > { %9977 = vmatmul.mubr.msk.bf16.vlgmr.msra.gmra.mxu0 %vm1946_vm12, %v13112_v53 }
0x1911   : > { %9989 = vmatmul.mubr.msk.bf16.vlgmr.msra.gmra.mxu1 %vm1946_vm12, %v7538_v5  ;;  %9980 = vmatprep.mubr.msk.bf16.mxu0 %vm1946_vm12, %v13114_v63 }
0x1912   : > { %9992 = vmatprep.mubr.msk.bf16.mxu1 %vm1946_vm12, %v7539_v10  ;;  %9997 = vmatpush3.bf16.msra.mxu0 %v10353_v42 }
0x1913   : > { %10009 = vmatpush3.bf16.msra.mxu1 %v10355_v25  ;;  %9998 = vmatprep.subr.bf16.mxu0 %v10354_v32 }
0x1914   : > { %10010 = vmatprep.subr.bf16.mxu1 %v10356_v15 }
0x1916   : > { %9999 = vmatpush3.bf16.msra.mxu0 %v10354_v32 }
0x1917   : > { %10011 = vmatpush3.bf16.msra.mxu1 %v10356_v15  ;;  %10020 = vmatprep.subr.bf16.mxu0 %v10357_v34 }
0x1918   : > { %10032 = vmatprep.subr.bf16.mxu1 %v10359_v43  ;;  %9981 = vmatmul.mubr.msk.bf16.gmra.mxu0 %vm1946_vm12, %v7426_v18 }
0x1919   : > { %9993 = vmatmul.mubr.msk.bf16.gmra.mxu1 %vm1946_vm12, %v7540_v58  ;;  %10000 = vmatprep.mubr.msk.bf16.mxu0 %vm1946_vm12, %v7651_v8 }
0x191a   : > { %10012 = vmatprep.mubr.msk.bf16.mxu1 %vm1946_vm12, %v7765_v55 }
0x1920   : > { %10001 = vmatmul.mubr.msk.bf16.vlgmr.msra.gmra.mxu0 %vm1946_vm12, %v7652_v12 }
0x1921   : > { %10013 = vmatmul.mubr.msk.bf16.vlgmr.msra.gmra.mxu1 %vm1946_vm12, %v7766_v36  ;;  %10004 = vmatprep.mubr.msk.bf16.mxu0 %vm1946_vm12, %v7653_v6 }
0x1922   : > { %10016 = vmatprep.mubr.msk.bf16.mxu1 %vm1946_vm12, %v7767_v17  ;;  %10021 = vmatpush3.bf16.msra.mxu0 %v10357_v34 }
0x1923   : > { %10033 = vmatpush3.bf16.msra.mxu1 %v10359_v43  ;;  %10022 = vmatprep.subr.bf16.mxu0 %v10358_v24 }
0x1924   : > { %10034 = vmatprep.subr.bf16.mxu1 %v10360_v57 }
0x1926   : > { %10023 = vmatpush3.bf16.msra.mxu0 %v10358_v24 }
0x1927   : > { %10035 = vmatpush3.bf16.msra.mxu1 %v10360_v57  ;;  %10044 = vmatprep.subr.bf16.mxu0 %v10361_v51 }
0x1928   : > { %10005 = vmatmul.mubr.msk.bf16.gmra.mxu0 %vm1946_vm12, %v7654_v3  ;;  %10056 = vmatprep.subr.bf16.mxu1 %v13251_v44 }
0x1929   : > { %10017 = vmatmul.mubr.msk.bf16.gmra.mxu1 %vm1946_vm12, %v7768_v29  ;;  %10024 = vmatprep.mubr.msk.bf16.mxu0 %vm1946_vm12, %v13076_v52 }
0x192a   : > { %10036 = vmatprep.mubr.msk.bf16.mxu1 %vm1946_vm12, %v13074_v59 }
0x1930   : > { %10025 = vmatmul.mubr.msk.bf16.vlgmr.msra.gmra.mxu0 %vm1946_vm12, %v13093_v20 }
0x1931   : > { %10037 = vmatmul.mubr.msk.bf16.vlgmr.msra.gmra.mxu1 %vm1946_vm12, %v13091_v45  ;;  %10028 = vmatprep.mubr.msk.bf16.mxu0 %vm1946_vm12, %v13104_v61 }
0x1932   : > { %10040 = vmatprep.mubr.msk.bf16.mxu1 %vm1946_vm12, %v13102_v21  ;;  %10045 = vmatpush3.bf16.msra.mxu0 %v10361_v51 }
0x1933   : > { %10046 = vmatprep.subr.bf16.mxu0 %v10362_v28 }
0x1936   : > { %10047 = vmatpush3.bf16.msra.mxu0 %v10362_v28 }
0x1938   : > { %10029 = vmatmul.mubr.msk.bf16.gmra.mxu0 %vm1946_vm12, %v7883_v0 }
0x1939   : > { %10041 = vmatmul.mubr.msk.bf16.gmra.mxu1 %vm1946_vm12, %v7997_v23  ;;  %10048 = vmatprep.mubr.msk.bf16.mxu0 %vm1946_vm12, %v13112_v53 }
0x193a   : > { %10064 = vmatprep.mubr.msk.bf16.mxu1 %vm11036_vm15, %v13251_v44 }
0x1940   : > { %10049 = vmatmul.mubr.msk.bf16.vlgmr.msra.gmra.mxu0 %vm1946_vm12, %v13114_v63 }
0x1941   : > { %10052 = vmatprep.mubr.msk.bf16.mxu0 %vm1946_vm12, %v7426_v18 }
0x1948   : > { %10053 = vmatmul.mubr.msk.bf16.gmra.mxu0 %vm1946_vm12, %v8111_v49 }
0x19c0   : > { %v9954_v39 = vpop.f32.mrf.mxu0 }
0x19c1   : > { %v9966_v59 = vpop.f32.mrf.mxu1 }
0x19c2   : > { %v7393_v52 = vadd.f32 %v9966_v59, %v9954_v39  ;;  %v7295_v11 = vpop.f32.mrf.mxu0 }
0x19c3   : > { %v7384_v13 = vpop.f32.mrf.mxu1 }
0x19c4   : > { %v7385_v37 = vadd.f32 %v7384_v13, %v7295_v11  ;;  %v9955_v60 = vpop.f32.mrf.mxu0 }
0x19c5   : > { %v9967_v31 = vpop.f32.mrf.mxu1 }
0x19c6   : > { %v7298_v19 = vpop.f32.mrf.mxu0  ;;  %v7396_v41 = vadd.f32 %v9967_v31, %v9955_v60 }
0x19c7   : > { %v7387_v1 = vpop.f32.mrf.mxu1 }
0x19c8   : > { %v7388_v45 = vadd.f32 %v7387_v1, %v7298_v19  ;;  %v9958_v20 = vpop.f32.mrf.mxu0 }
0x19c9   : > { %v9970_v42 = vpop.f32.mrf.mxu1 }
0x19ca   : > { %v7311_v26 = vpop.f32.mrf.mxu0  ;;  %v7409_v30 = vadd.f32 %v9970_v42, %v9958_v20 }
0x19cb   : > { %v7400_v25 = vpop.f32.mrf.mxu1 }
0x19cc   : > { %v9959_v47 = vpop.f32.mrf.mxu0  ;;  %v7401_v44 = vadd.f32 %v7400_v25, %v7311_v26 }
0x19cd   : > { %v9971_v38 = vpop.f32.mrf.mxu1 }
0x19ce   : > { %v7314_v35 = vpop.f32.mrf.mxu0 }
0x19cf   : > { %v7403_v54 = vpop.f32.mrf.mxu1 }
0x19d0   : > { %v9978_v9 = vpop.f32.mrf.mxu0  ;;  %v7404_v60 = vadd.f32 %v7403_v54, %v7314_v35 }
0x19d1   : > { %v9990_v21 = vpop.f32.mrf.mxu1  ;;  %v7523_v61 = vadd.f32 %v9978_v9, %v7393_v52 }
0x19d2   : > { %v7490_v14 = vpop.f32.mrf.mxu0 }
0x19d3   : > { %v7604_v16 = vpop.f32.mrf.mxu1  ;;  %v7521_v56 = vadd.f32 %v7490_v14, %v7385_v37  ;;  %v7637_v23 = vadd.f32 %v9990_v21, %v7523_v61 }
0x19d4   : > { %v9979_v50 = vpop.f32.mrf.mxu0 }
0x19d5   : > { %v9991_v62 = vpop.f32.mrf.mxu1  ;;  %v7524_v7 = vadd.f32 %v9979_v50, %v7396_v41  ;;  %v7635_v59 = vadd.f32 %v7604_v16, %v7521_v56 }
0x19d6   : > { %v7493_v33 = vpop.f32.mrf.mxu0 }
0x19d7   : > { %v7607_v53 = vpop.f32.mrf.mxu1  ;;  %v7522_v5 = vadd.f32 %v7493_v33, %v7388_v45  ;;  %v7638_v11 = vadd.f32 %v9991_v62, %v7524_v7  ;;  %v7412_v45 = vadd.f32 %v9971_v38, %v9959_v47 }
0x19d8   : > { %v9982_v63 = vpop.f32.mrf.mxu0 }
0x19d9   : > { %v9994_v10 = vpop.f32.mrf.mxu1  ;;  %v7527_v13 = vadd.f32 %v9982_v63, %v7409_v30  ;;  %v7636_v9 = vadd.f32 %v7607_v53, %v7522_v5 }
0x19da   : > { %v7506_v32 = vpop.f32.mrf.mxu0 }
0x19db   : > { %v7620_v15 = vpop.f32.mrf.mxu1  ;;  %v7641_v21 = vadd.f32 %v9994_v10, %v7527_v13  ;;  %v7525_v20 = vadd.f32 %v7506_v32, %v7401_v44 }
0x19dc   : > { %v9983_v34 = vpop.f32.mrf.mxu0 }
0x19dd   : > { %v9995_v43 = vpop.f32.mrf.mxu1  ;;  %v7528_v61 = vadd.f32 %v9983_v34, %v7412_v45  ;;  %v7639_v26 = vadd.f32 %v7620_v15, %v7525_v20 }
0x19de   : > { %v7509_v2 = vpop.f32.mrf.mxu0 }
0x19df   : > { %v7623_v46 = vpop.f32.mrf.mxu1  ;;  %v7526_v42 = vadd.f32 %v7509_v2, %v7404_v60  ;;  %v7642_v47 = vadd.f32 %v9995_v43, %v7528_v61 }
0x19e0   : > { %v10002_v40 = vpop.f32.mrf.mxu0 }
0x19e1   : > { %v10014_v18 = vpop.f32.mrf.mxu1  ;;  %v7751_v39 = vadd.f32 %v10002_v40, %v7637_v23  ;;  %v7640_v25 = vadd.f32 %v7623_v46, %v7526_v42 }
0x19e2   : > { %v7718_v58 = vpop.f32.mrf.mxu0 }
0x19e3   : > { %v7832_v8 = vpop.f32.mrf.mxu1  ;;  %v7749_v37 = vadd.f32 %v7718_v58, %v7635_v59  ;;  %v7865_v14 = vadd.f32 %v10014_v18, %v7751_v39 }
0x19e4   : > { %v10003_v55 = vpop.f32.mrf.mxu0 }
0x19e5   : > { %v10015_v12 = vpop.f32.mrf.mxu1  ;;  %v7752_v33 = vadd.f32 %v10003_v55, %v7638_v11  ;;  %v7863_v16 = vadd.f32 %v7832_v8, %v7749_v37  ;;  %v8999_v55 = vld [vmem:[%s13326_s29] ss:$0 sm:$0xff] }
0x19e6   : > { %v7721_v36 = vpop.f32.mrf.mxu0 }
0x19e7   : > { %v7835_v6 = vpop.f32.mrf.mxu1  ;;  %v7750_v50 = vadd.f32 %v7721_v36, %v7636_v9  ;;  %v7866_v63 = vadd.f32 %v10015_v12, %v7752_v33 }
0x19e8   : > { %v10006_v17 = vpop.f32.mrf.mxu0 }
0x19e9   : > { %v10018_v24 = vpop.f32.mrf.mxu1  ;;  %v7755_v40 = vadd.f32 %v10006_v17, %v7641_v21  ;;  %v7864_v38 = vadd.f32 %v7835_v6, %v7750_v50 }
0x19ea   : > { %v7734_v57 = vpop.f32.mrf.mxu0 }
0x19eb   : > { %v13163_v27 = vpop.f32.mrf.mxu1  ;;  %v7869_v10 = vadd.f32 %v10018_v24, %v7755_v40  ;;  %v7753_v32 = vadd.f32 %v7734_v57, %v7639_v26 }
0x19ec   : > { %v10007_v48 = vpop.f32.mrf.mxu0 }
0x19ed   : > { %v10019_v51 = vpop.f32.mrf.mxu1  ;;  %v7756_v34 = vadd.f32 %v10007_v48, %v7642_v47  ;;  %v7867_v48 = vadd.f32 %v13163_v27, %v7753_v32 }
0x19ee   : > { %v7737_v3 = vpop.f32.mrf.mxu0 }
0x19ef   : > { %v13165_v29 = vpop.f32.mrf.mxu1  ;;  %v7754_v2 = vadd.f32 %v7737_v3, %v7640_v25  ;;  %v7870_v46 = vadd.f32 %v10019_v51, %v7756_v34 }
0x19f0   : > { %v10026_v28 = vpop.f32.mrf.mxu0 }
0x19f1   : > { %v10038_v4 = vpop.f32.mrf.mxu1  ;;  %v7980_v41 = vadd.f32 %v10026_v28, %v7865_v14  ;;  %v7868_v57 = vadd.f32 %v13165_v29, %v7754_v2 }
0x19f2   : > { %v7947_v0 = vpop.f32.mrf.mxu0 }
0x19f3   : > { %v8061_v49 = vpop.f32.mrf.mxu1  ;;  %v7978_v58 = vadd.f32 %v7947_v0, %v7863_v16  ;;  %v8094_v53 = vadd.f32 %v10038_v4, %v7980_v41 }
0x19f4   : > { %v10027_v22 = vpop.f32.mrf.mxu0 }
0x19f5   : > { %v10039_v19 = vpop.f32.mrf.mxu1  ;;  %v7981_v5 = vadd.f32 %v10027_v22, %v7866_v63  ;;  %v8092_v8 = vadd.f32 %v8061_v49, %v7978_v58 }
0x19f6   : > { %v7950_v52 = vpop.f32.mrf.mxu0 }
0x19f7   : > { %v8064_v56 = vpop.f32.mrf.mxu1  ;;  %v7979_v18 = vadd.f32 %v7950_v52, %v7864_v38  ;;  %v8095_v43 = vadd.f32 %v10039_v19, %v7981_v5 }
0x19f8   : > { %v10030_v1 = vpop.f32.mrf.mxu0 }
0x19f9   : > { %v10042_v35 = vpop.f32.mrf.mxu1  ;;  %v7984_v36 = vadd.f32 %v10030_v1, %v7869_v10  ;;  %v8093_v28 = vadd.f32 %v8064_v56, %v7979_v18  ;;  %v8245_v10 = vpop.permute.xlu1 %8244 }
0x19fa   : > { %v7963_v31 = vpop.f32.mrf.mxu0 }
0x19fb   : > { %v8077_v6 = vpop.f32.mrf.mxu1  ;;  %v8098_v0 = vadd.f32 %v10042_v35, %v7984_v36  ;;  %v7982_v30 = vadd.f32 %v7963_v31, %v7867_v48 }
0x19fc   : > { %v10031_v62 = vpop.f32.mrf.mxu0 }
0x19fd   : > { %v7985_v7 = vadd.f32 %v10031_v62, %v7870_v46  ;;  %v10043_v39 = vpop.f32.mrf.mxu1  ;;  %v8096_v60 = vadd.f32 %v8077_v6, %v7982_v30 }
0x19fe   : > { %v7966_v23 = vpop.f32.mrf.mxu0 }
0x19ff   : > { %v7983_v59 = vadd.f32 %v7966_v23, %v7868_v57  ;;  %v8099_v45 = vadd.f32 %v10043_v39, %v7985_v7  ;;  %v8080_v14 = vpop.f32.mrf.mxu1 }
0x1a00   : > { %v10050_v54 = vpop.f32.mrf.mxu0 }
0x1a01   : > { %v8208_v44 = vadd.f32 %v10050_v54, %v8094_v53  ;;  %v8097_v21 = vadd.f32 %v8080_v14, %v7983_v59  ;;  %v13327_v53 = vmov 0.0   ;;  %v8236_v54 = vld [vmem:[%s13328_s21] sm:$0x3] }
0x1a02   : > { %v8175_v12 = vpop.f32.mrf.mxu0 }
0x1a03   : > { %v8206_v17 = vadd.f32 %v8175_v12, %v8092_v8  ;;  %v8222_v4 = vadd.f32 %v8999_v55, %v8208_v44 }
0x1a04   : > { %v10051_v15 = vpop.f32.mrf.mxu0 }
0x1a05   : > { %v8209_v24 = vadd.f32 %v10051_v15, %v8095_v43  ;;  %v8220_v52 = vadd.f32 %v8999_v55, %v8206_v17  ;;  %v8230_v13 = vmax.f32 %v8222_v4, 0.0 }
0x1a06   : > { %v8178_v3 = vpop.f32.mrf.mxu0 }
0x1a07   : > { %v8223_v49 = vadd.f32 %v8999_v55, %v8209_v24  ;;  %v8207_v22 = vadd.f32 %v8178_v3, %v8093_v28  ;;  %v8228_v29 = vmax.f32 %v8220_v52, 0.0 }
0x1a08   : > { %v10054_v11 = vpop.f32.mrf.mxu0 }
0x1a09   : > { %v8231_v37 = vmax.f32 %v8223_v49, 0.0  ;;  %v8221_v51 = vadd.f32 %v8999_v55, %v8207_v22  ;;  %v8212_v19 = vadd.f32 %v10054_v11, %v8098_v0 }
0x1a0a   : > { %v8191_v1 = vpop.f32.mrf.mxu0 }
0x1a0b   : > { %v8229_v9 = vmax.f32 %v8221_v51, 0.0  ;;  %v8238_v27 = vpack.c.bf16 %v8231_v37, %v8230_v13  ;;  %v8226_v61 = vadd.f32 %v8999_v55, %v8212_v19  ;;  %v8210_v20 = vadd.f32 %v8191_v1, %v8096_v60 }
0x1a0c   : > { %v10055_v33 = vpop.f32.mrf.mxu0 }
0x1a0d   : > { %v8213_v50 = vadd.f32 %v10055_v33, %v8099_v45  ;;  %v8237_v41 = vpack.c.bf16 %v8229_v9, %v8228_v29  ;;  %v8234_v56 = vmax.f32 %v8226_v61, 0.0  ;;  %v8224_v40 = vadd.f32 %v8999_v55, %v8210_v20 }
0x1a0e   : > { %v8194_v31 = vpop.f32.mrf.mxu0  ;;  %v8254_v25 = vsel %vm2989_vm13, %v8238_v27, 0 }
0x1a0f   : > { %v8227_v42 = vadd.f32 %v8999_v55, %v8213_v50  ;;  %v8211_v16 = vadd.f32 %v8194_v31, %v8097_v21  ;;  %v8232_v38 = vmax.f32 %v8224_v40, 0.0  ;;  %v8251_v35 = vsel %vm2989_vm13, %v8237_v41, 0 }
0x1a11   : > { %v8235_v62 = vmax.f32 %v8227_v42, 0.0  ;;  %v8225_v63 = vadd.f32 %v8999_v55, %v8211_v16 }
0x1a13   : > { %v8240_v58 = vpack.c.bf16 %v8235_v62, %v8234_v56  ;;  %v8233_v23 = vmax.f32 %v8225_v63, 0.0 }
0x1a15   : > { %v8260_v47 = vsel %vm2989_vm13, %v8240_v58, 0  ;;  %v8239_v5 = vpack.c.bf16 %v8233_v23, %v8232_v38 }
0x1a16   : > { %10057 = vmatpush3.bf16.xpose.msra.mxu1 %v8260_v47 }
0x1a17   : > { %10058 = vmatprep.subr.bf16.mxu1 %v13327_v53  ;;  %v8257_v26 = vsel %vm2989_vm13, %v8239_v5, 0 }
0x1a1e   : > { %10059 = vmatpush3.bf16.xpose.msra.mxu1 %v8257_v26 }
0x1a1f   : > { %10060 = vmatprep.subr.bf16.mxu1 %v13327_v53 }
0x1a26   : > { %10061 = vmatpush3.bf16.xpose.msra.mxu1 %v8254_v25 }
0x1a27   : > { %10062 = vmatprep.subr.bf16.mxu1 %v13327_v53 }
0x1a2e   : > { %10063 = vmatpush3.bf16.xpose.msra.mxu1 %v8251_v35 }
0x1a35   : > { %10065 = vmatmul.mubr.msk.bf16.vlgmr.msra.gmra.mxu1 %vm2989_vm13, %v8236_v54 }
0x1af5   : > { %v8296_v34 = vpop.f32.mrf.mxu1 }
0x1af6   : > { %v8297_v18 = vadd.f32 %v8296_v34, %v8245_v10 }
0x1af7   : > { %v10066_v44 = vpop.f32.mrf.mxu1 }
0x1af8   : > { %8303 = vst.msk [vmem:[%s11419_s23] sm:$0x7] %vm8302_vm0, %v8297_v18 }
0x1af9   : > { %v8299_v32 = vpop.f32.mrf.mxu1 }
0x1afb   : > { %v10067_v2 = vpop.f32.mrf.mxu1 }
0x1afc PF: > { %s13329_s16 = sld [smem:[#allocation34_spill]]  ;;  %s13335_s27 = smov %s10985_s28 }
0x1afd   : > { %s13330_s3 = sld [smem:[#allocation30_spill]]  ;;  %s13337_s30 = smov %s11001_s19 }
0x1afe   : > { %s13331_s29 = sld [smem:[#allocation38_spill]] }
0x1aff   : > { %s13332_s0 = sld [smem:[#allocation33_spill]] }
0x1b00   : > { %s13333_s17 = sld [smem:[#allocation36_spill]] }
0x1b01   : > { %s13334_s1 = sld [smem:[#allocation37_spill]] }
0x1b02   : > { %s40_s20 = sadd.s32 1, %s13329_s16  }
0x1b03   : > { %p37_p5 = scmp.ge.s32.totalorder %s40_s20, 6   ;;  %s13336_s28 = smov %s13330_s3 }
0x1b05   :  { %39 = sbr.rel (!%p37_p5) target bundleno = 26 (0x1a), region = 277 }
0x1b06   : > { %s13338_s19 = smov %s13333_s17 }
0x1b0a   :  { %8323 = vsyncpa [#allocation8], 1 }
0x1b0b   :  { %8325 = vsyncpa [#allocation8 + $0x1], 1 }
0x1b0c   :  { %8326 = vsyncpa [#allocation10], 1 }
0x1b0d   :  { %8328 = vsyncpa [#allocation10 + $0x1], 1 }
0x1b0e   :  { %8329 = vsyncpa [#allocation13], 1 }
0x1b0f   :  { %8331 = vsyncpa [#allocation13 + $0x1], 1 }
0x1b10   :  { %8332 = vsyncpa [#allocation16], 1 }
0x1b11   :  { %8333 = vsyncpa [#allocation19], 1 }
0x1b12   :  { %8334 = vsyncpa [#allocation22], 1 }

</bundles_post_ra>
